<compile_context>
chip_gen: v6e
topology: v6e:2x2x1
jax: 0.10.0
libtpu: 0.0.40
codegen_flags: <defaults>
</compile_context>

<pallas_src>
import functools

import jax
import jax.numpy as jnp
from jax import lax
from jax.experimental import pallas as pl
from jax.experimental.pallas import tpu as pltpu

F32 = jnp.float32
BN_EPS = 1e-5     # nn.BatchNorm1d default
LN_EPS = 1e-6     # nn.LayerNorm(eps=1e-06)


# ----------------------------------------------------------------------------
# helper mirrored from the PyTorch file
# ----------------------------------------------------------------------------
def com_linearsize(linear_size, Con_layer, kernel_size):
    for _ in range(Con_layer):
        linear_size = int(((linear_size + 2 * 1 - kernel_size) / 1 + 1) // 2)
    if Con_layer == 0:
        linear_size = 0
    return linear_size


# ----------------------------------------------------------------------------
# In-kernel helper: zero-filled lane shift.  out[..., l] = v[..., l - s] (0 outside).
# Implemented as an XLU rotate (free slot next to MXU/VPU) + iota mask, so no
# unaligned lane concatenation is ever emitted.
# ----------------------------------------------------------------------------
def _shift(v, s):
    L = v.shape[-1]
    axis = v.ndim - 1
    rolled = pltpu.roll(v, s % L, axis)
    lane = lax.broadcasted_iota(jnp.int32, v.shape, axis)
    if s >= 0:
        return jnp.where(lane >= s, rolled, 0.0)
    return jnp.where(lane < L + s, rolled, 0.0)


# ----------------------------------------------------------------------------
# Fused conv-branch kernel: one sample per grid step, all 3 branches stacked as
# 3*C channel rows, positions on the lane axis (length padded to 128 multiple).
# ----------------------------------------------------------------------------
def _conv_branches_kernel(x_ref, w1_ref, s1_ref, t1_ref, w2_ref, s2_ref, t2_ref,
                          o_ref, *, L_valid):
    x = x_ref[0]                                                     # (3, Lp)

    # layer 1: Conv1d(1->C, k=3, pad=1) for all 3 branches at once (block weights)
    a1 = (jnp.dot(w1_ref[0], _shift(x, 1), preferred_element_type=F32)
          + jnp.dot(w1_ref[1], x, preferred_element_type=F32)
          + jnp.dot(w1_ref[2], _shift(x, -1), preferred_element_type=F32))   # (3C, Lp)
    # fused BatchNorm(eval) + conv bias + ReLU
    a1 = jnp.maximum(a1 * s1_ref[...] + t1_ref[...], 0.0)
    # zero the padded tail so it behaves exactly like the conv's zero padding
    lane = lax.broadcasted_iota(jnp.int32, a1.shape, 1)
    a1 = jnp.where(lane < L_valid, a1, 0.0)

    # MaxPool1d(2) kept virtual: p1[c, j] == m1[c, 2j]
    m1 = jnp.maximum(a1, _shift(a1, -1))

    # layer 2: Conv1d(C->C, k=3, pad=1) on the pooled grid == dilation-2 conv here
    y2 = (jnp.dot(w2_ref[0], _shift(m1, 2), preferred_element_type=F32)
          + jnp.dot(w2_ref[1], m1, preferred_element_type=F32)
          + jnp.dot(w2_ref[2], _shift(m1, -2), preferred_element_type=F32))  # (3C, Lp)
    a2 = jnp.maximum(y2 * s2_ref[...] + t2_ref[...], 0.0)

    # second MaxPool1d(2), still virtual: final feature[c, t] == out[c, 4t]
    o_ref[0] = jnp.maximum(a2, _shift(a2, -2))


def conv_branches(x_all, p):
    """x_all: (N, 3, L0) -> (N, 3*C, L_pad) full-resolution; valid samples at lanes 4t."""
    N, B, L0 = x_all.shape
    L_pad = ((L0 + 127) // 128) * 128
    if L_pad != L0:
        x_all = jnp.pad(x_all, ((0, 0), (0, 0), (0, L_pad - L0)))
    C3 = p["S1"].shape[0]
    K = p["W1"].shape[0]
    return pl.pallas_call(
        functools.partial(_conv_branches_kernel, L_valid=L0),
        out_shape=jax.ShapeDtypeStruct((N, C3, L_pad), F32),
        grid=(N,),
        in_specs=[
            pl.BlockSpec((1, B, L_pad), lambda n: (n, 0, 0)),
            pl.BlockSpec((K, C3, B), lambda n: (0, 0, 0)),
            pl.BlockSpec((C3, 1), lambda n: (0, 0)),
            pl.BlockSpec((C3, 1), lambda n: (0, 0)),
            pl.BlockSpec((K, C3, C3), lambda n: (0, 0, 0)),
            pl.BlockSpec((C3, 1), lambda n: (0, 0)),
            pl.BlockSpec((C3, 1), lambda n: (0, 0)),
        ],
        out_specs=pl.BlockSpec((1, C3, L_pad), lambda n: (n, 0, 0)),
        compiler_params=pltpu.CompilerParams(
            dimension_semantics=("parallel",)),
    )(x_all, p["W1"], p["S1"], p["T1"], p["W2"], p["S2"], p["T2"])


# ----------------------------------------------------------------------------
# Fully fused post-conv head: fc1 -> LN+ReLU -> mid Linear+ReLU -> 3-layer LSTM
#   -> linear3+ReLU -> LN -> fc2, all in one pallas_call.
# ----------------------------------------------------------------------------
def _head_kernel(x_ref, fc1w_ref, fc1b_ref, ln1g_ref, ln1b_ref,
                 midw_ref, midb_ref, wih_ref, whh_ref, blstm_ref,
                 l3w_ref, l3b_ref, ln2g_ref, ln2b_ref, fc2w_ref, fc2b_ref,
                 o_ref, seq_scr, *, T, H, n_mid, n_lstm):
    def layer_norm(v, g, b):
        mu = jnp.mean(v, axis=-1, keepdims=True)
        vc = v - mu
        var = jnp.mean(vc * vc, axis=-1, keepdims=True)      # biased, like PyTorch
        return vc * lax.rsqrt(var + LN_EPS) * g + b

    # fc1 -> layer_1 (LayerNorm) -> dropout(id) -> relu2
    h = jnp.dot(x_ref[...], fc1w_ref[...], preferred_element_type=F32) + fc1b_ref[...]
    h = jnp.maximum(layer_norm(h, ln1g_ref[...], ln1b_ref[...]), 0.0)

    # middle Linear + ReLU (+ dropout id) blocks
    for i in range(n_mid):
        h = jnp.maximum(
            jnp.dot(h, midw_ref[i], preferred_element_type=F32) + midb_ref[i], 0.0)

    # 3-layer LSTM.  nn.LSTM fed a 2-D tensor treats it as an UNBATCHED sequence:
    # the batch dimension of the linear stack is the time axis (faithful to the module).
    seq_scr[...] = h                                          # (T, H)
    for l in range(n_lstm):
        whh_l = whh_ref[l]                                    # (H, 4H)
        # hoisted input-to-hidden matmul: one (T,H)x(H,4H) matmul per layer
        gx = (jnp.dot(seq_scr[...], wih_ref[l], preferred_element_type=F32)
              + blstm_ref[l])                                 # (T, 4H), gate order [i,f,g,o]
        h_t = jnp.zeros((1, H), F32)
        c_t = jnp.zeros((1, H), F32)
        for t in range(T):                                    # static unroll; h/c stay in vregs
            g = gx[t:t + 1, :] + jnp.dot(h_t, whh_l, preferred_element_type=F32)
            i_g = jax.nn.sigmoid(g[:, 0:H])
            f_g = jax.nn.sigmoid(g[:, H:2 * H])
            g_g = jnp.tanh(g[:, 2 * H:3 * H])
            o_g = jax.nn.sigmoid(g[:, 3 * H:4 * H])
            c_t = f_g * c_t + i_g * g_g
            h_t = o_g * jnp.tanh(c_t)
            seq_scr[t:t + 1, :] = h_t                         # layer output (fed to next layer)
        # (gx was computed before seq_scr is overwritten, so the in-place update is safe)

    # linear3 (+ ReLU, dropout id) -> layer_2 (LayerNorm) -> fc2
    h = jnp.maximum(
        jnp.dot(seq_scr[...], l3w_ref[...], preferred_element_type=F32) + l3b_ref[...], 0.0)
    h = layer_norm(h, ln2g_ref[...], ln2b_ref[...])
    o_ref[...] = jnp.dot(h, fc2w_ref[...], preferred_element_type=F32) + fc2b_ref[...]


def head_forward(xflat, p):
    T = xflat.shape[0]
    H = p["fc1_w"].shape[1]
    n_mid = int(p["n_mid"])
    n_lstm = p["wih_t"].shape[0]
    return pl.pallas_call(
        functools.partial(_head_kernel, T=T, H=H, n_mid=n_mid, n_lstm=n_lstm),
        out_shape=jax.ShapeDtypeStruct((T, 5), F32),
        scratch_shapes=[pltpu.VMEM((T, H), F32)],
    )(xflat, p["fc1_w"], p["fc1_b"], p["ln1_g"], p["ln1_b"],
      p["midw"], p["midb"], p["wih_t"], p["whh_t"], p["b_lstm"],
      p["lin3_w"], p["lin3_b"], p["ln2_g"], p["ln2_b"], p["fc2_w"], p["fc2_b"])


# ----------------------------------------------------------------------------
# Parameter construction (deterministic)
# ----------------------------------------------------------------------------
def init_branch_raw(key, n_layers, C_feat, K):
    layers = []
    for i in range(n_layers):
        key, k1, k2, k3, k4, k5, k6 = jax.random.split(key, 7)
        c_in = 1 if i == 0 else C_feat
        layers.append(dict(
            w=0.2 * jax.random.normal(k1, (C_feat, c_in, K), F32),
            b=0.1 * jax.random.normal(k2, (C_feat,), F32),
            gamma=1.0 + 0.1 * jax.random.normal(k3, (C_feat,), F32),
            beta=0.1 * jax.random.normal(k4, (C_feat,), F32),
            mean=0.1 * jax.random.normal(k5, (C_feat,), F32),
            var=1.0 + jax.random.uniform(k6, (C_feat,), F32),
        ))
    return layers


def _bn_fold(conv_d, bn_d):
    # BN(eval) folded onto the conv matmul: y*scale + shift  (shift absorbs the conv bias)
    scale = bn_d["gamma"] / jnp.sqrt(bn_d["var"] + BN_EPS)
    shift = (conv_d["b"] - bn_d["mean"]) * scale + bn_d["beta"]
    return conv_d["w"], scale, shift


def init_params(key, model_para):
    kernel_size, cnn_feature, dp, out_feature, Con_layer, linear_layer = model_para
    # TODO(synk): the fused conv kernel is specialized to the module defaults
    # (kernel_size=3, two conv layers per branch, linear_layer >= 2).
    assert kernel_size == 3 and tuple(Con_layer) == (2, 2, 2) and linear_layer >= 2
    C = cnn_feature
    K = kernel_size

    ls_bop = com_linearsize(2660, Con_layer[0], kernel_size)
    ls_bcp = com_linearsize(2660, Con_layer[1], kernel_size)
    ls_bosp = com_linearsize(2660, Con_layer[2], kernel_size)
    Lf = ls_bop
    fc1_in = C * (ls_bop + ls_bcp + ls_bosp)

    keys = jax.random.split(key, 16)
    bop = init_branch_raw(keys[0], 2, C, K)
    bcp = init_branch_raw(keys[1], 2, C, K)
    bosp = init_branch_raw(keys[2], 2, C, K)

    # Reproduce the original bug: x3's first layer uses conv1_BOP weights + bn1_BOSP stats.
    l1 = [_bn_fold(bop[0], bop[0]), _bn_fold(bcp[0], bcp[0]), _bn_fold(bop[0], bosp[0])]
    l2 = [_bn_fold(bop[1], bop[1]), _bn_fold(bcp[1], bcp[1]), _bn_fold(bosp[1], bosp[1])]

    # Block(-diagonal) weights for the stacked 3*C channel layout.
    W1 = jnp.zeros((K, 3 * C, 3), F32)        # W1[k, b*C+c, b] = conv1_w[b][c, 0, k]
    W2 = jnp.zeros((K, 3 * C, 3 * C), F32)    # W2[k, b*C+co, b*C+ci] = conv2_w[b][co, ci, k]
    for b in range(3):
        w1b = l1[b][0]                                         # (C, 1, K)
        W1 = W1.at[:, b * C:(b + 1) * C, b].set(jnp.transpose(w1b[:, 0, :], (1, 0)))
        w2b = l2[b][0]                                         # (C, C, K)
        W2 = W2.at[:, b * C:(b + 1) * C, b * C:(b + 1) * C].set(jnp.transpose(w2b, (2, 0, 1)))
    S1 = jnp.concatenate([l1[b][1] for b in range(3)]).reshape(3 * C, 1)
    T1 = jnp.concatenate([l1[b][2] for b in range(3)]).reshape(3 * C, 1)
    S2 = jnp.concatenate([l2[b][1] for b in range(3)]).reshape(3 * C, 1)
    T2 = jnp.concatenate([l2[b][2] for b in range(3)]).reshape(3 * C, 1)

    def lin(k, fan_in, fan_out):
        ka, kb = jax.random.split(k)
        s = 1.0 / jnp.sqrt(float(fan_in))
        return (s * jax.random.normal(ka, (fan_in, fan_out), F32),
                s * jax.random.normal(kb, (1, fan_out), F32))

    fc1_w, fc1_b = lin(keys[3], fc1_in, out_feature)
    ln1_g = (1.0 + 0.05 * jax.random.normal(keys[4], (out_feature,), F32)).reshape(1, -1)
    ln1_b = (0.05 * jax.random.normal(keys[5], (out_feature,), F32)).reshape(1, -1)

    n_mid = max(linear_layer - 2, 0)
    midw, midb = [], []
    kmid = keys[6]
    for _ in range(n_mid):
        kmid, kw = jax.random.split(kmid)
        w, b = lin(kw, out_feature, out_feature)
        midw.append(w)
        midb.append(b)
    if n_mid == 0:  # dummy, skipped in-kernel
        midw = [jnp.zeros((out_feature, out_feature), F32)]
        midb = [jnp.zeros((1, out_feature), F32)]
    midw = jnp.stack(midw)
    midb = jnp.stack(midb)

    # LSTM: 3 layers, hidden = input = out_feature, gate order [i, f, g, o].
    H = out_feature
    klstm = jax.random.split(keys[7], 12)
    wih_t, whh_t, b_lstm = [], [], []
    for l in range(3):
        s = 1.0 / jnp.sqrt(float(H))
        w_ih = s * jax.random.normal(klstm[4 * l + 0], (4 * H, H), F32)
        w_hh = s * jax.random.normal(klstm[4 * l + 1], (4 * H, H), F32)
        b_ih = s * jax.random.normal(klstm[4 * l + 2], (4 * H,), F32)
        b_hh = s * jax.random.normal(klstm[4 * l + 3], (4 * H,), F32)
        wih_t.append(w_ih.T)
        whh_t.append(w_hh.T)
        b_lstm.append((b_ih + b_hh).reshape(1, 4 * H))
    wih_t = jnp.stack(wih_t)      # (3, H, 4H)
    whh_t = jnp.stack(whh_t)      # (3, H, 4H)
    b_lstm = jnp.stack(b_lstm)    # (3, 1, 4H)

    lin3_w, lin3_b = lin(keys[8], out_feature, out_feature)
    ln2_g = (1.0 + 0.05 * jax.random.normal(keys[9], (out_feature,), F32)).reshape(1, -1)
    ln2_b = (0.05 * jax.random.normal(keys[10], (out_feature,), F32)).reshape(1, -1)
    fc2_w, fc2_b = lin(keys[11], out_feature, 5)

    return dict(
        W1=W1, S1=S1, T1=T1, W2=W2, S2=S2, T2=T2, Lf=Lf,
        fc1_w=fc1_w, fc1_b=fc1_b, ln1_g=ln1_g, ln1_b=ln1_b,
        midw=midw, midb=midb, n_mid=n_mid,
        wih_t=wih_t, whh_t=whh_t, b_lstm=b_lstm,
        lin3_w=lin3_w, lin3_b=lin3_b, ln2_g=ln2_g, ln2_b=ln2_b,
        fc2_w=fc2_w, fc2_b=fc2_b,
    )


# ----------------------------------------------------------------------------
# Full forward pass (linear_layer > 1 path)
# ----------------------------------------------------------------------------
def forward(params, x1, x2, x3, model_para):
    kernel_size, cnn_feature, dp, out_feature, Con_layer, linear_layer = model_para
    N = x1.shape[0]
    x_all = jnp.concatenate([x1, x2, x3], axis=1)            # (N, 3, 2660), C_in = 1 per branch

    conv_full = conv_branches(x_all, params)                 # (N, 3*C, L_pad), fused conv+BN+ReLU(+virtual pools)
    Lf = params["Lf"]
    feat = conv_full[:, :, 0:4 * Lf:4]                       # composed MaxPool(2)xMaxPool(2) selection -> (N, 3*C, Lf)
    # torch: per-branch x.view(N, C*Lf) then cat(dim=1) == [branch, channel, position] ordering
    xflat = feat.reshape(N, 3 * cnn_feature * Lf)            # (N, 7980)

    return head_forward(xflat, params)                       # (N, 5)


# ----------------------------------------------------------------------------
if __name__ == "__main__":
    # model_para = (kernel_size, cnn_feature, dp, out_feature, Con_layer, linear_layer)
    model_para = (3, 4, 0.1, 32, (2, 2, 2), 3)
    N = 4
    L_INIT = 2660   # hardcoded in the module (linear_size_*_init)

    key = jax.random.PRNGKey(0)
    kp, k1, k2, k3 = jax.random.split(key, 4)
    params = init_params(kp, model_para)

    x1 = jax.random.normal(k1, (N, 1, L_INIT), F32)
    x2 = jax.random.normal(k2, (N, 1, L_INIT), F32)
    x3 = jax.random.normal(k3, (N, 1, L_INIT), F32)

    fwd = jax.jit(lambda a, b, c: forward(params, a, b, c, model_para))
    out = jax.block_until_ready(fwd(x1, x2, x3))
    assert out.shape == (N, 5), out.shape
    assert bool(jnp.all(jnp.isfinite(out)))
    print("KERNEL_OK")
</pallas_src>

<mosaic_0001>
module attributes {stable_mosaic.version = 11 : i64} {
  func.func @_conv_branches_kernel(%arg0: i32, %arg1: memref<1x3x2688xf32, #tpu.memory_space<vmem>>, %arg2: memref<3x12x3xf32, #tpu.memory_space<vmem>>, %arg3: memref<12x1xf32, #tpu.memory_space<vmem>>, %arg4: memref<12x1xf32, #tpu.memory_space<vmem>>, %arg5: memref<3x12x12xf32, #tpu.memory_space<vmem>>, %arg6: memref<12x1xf32, #tpu.memory_space<vmem>>, %arg7: memref<12x1xf32, #tpu.memory_space<vmem>>, %arg8: memref<1x12x2688xf32, #tpu.memory_space<vmem>>) attributes {dimension_semantics = [#tpu.dimension_semantics<parallel>], iteration_bounds = array<i64: 4>, scalar_prefetch = 0 : i64, scratch_operands = 0 : i64, tpu.core_type = #tpu.core_type<tc>, window_params = [{transform_indices = @transform_0, window_bounds = array<i64: 1, 3, 2688>}, {pipeline_mode = #tpu.pipeline_mode<synchronous>, transform_indices = @transform_1, window_bounds = array<i64: 3, 12, 3>}, {pipeline_mode = #tpu.pipeline_mode<synchronous>, transform_indices = @transform_2, window_bounds = array<i64: 12, 1>}, {pipeline_mode = #tpu.pipeline_mode<synchronous>, transform_indices = @transform_3, window_bounds = array<i64: 12, 1>}, {pipeline_mode = #tpu.pipeline_mode<synchronous>, transform_indices = @transform_4, window_bounds = array<i64: 3, 12, 12>}, {pipeline_mode = #tpu.pipeline_mode<synchronous>, transform_indices = @transform_5, window_bounds = array<i64: 12, 1>}, {pipeline_mode = #tpu.pipeline_mode<synchronous>, transform_indices = @transform_6, window_bounds = array<i64: 12, 1>}, {transform_indices = @transform_7, window_bounds = array<i64: 1, 12, 2688>}]} {
    %c0 = arith.constant 0 : index
    %c0_0 = arith.constant 0 : index
    %c0_1 = arith.constant 0 : index
    %0 = vector.load %arg1[%c0, %c0_0, %c0_1] : memref<1x3x2688xf32, #tpu.memory_space<vmem>>, vector<1x3x2688xf32>
    %1 = vector.shape_cast %0 : vector<1x3x2688xf32> to vector<3x2688xf32>
    %c0_2 = arith.constant 0 : index
    %c0_3 = arith.constant 0 : index
    %c0_4 = arith.constant 0 : index
    %2 = vector.load %arg2[%c0_2, %c0_3, %c0_4] : memref<3x12x3xf32, #tpu.memory_space<vmem>>, vector<1x12x3xf32>
    %3 = vector.shape_cast %2 : vector<1x12x3xf32> to vector<12x3xf32>
    %c1_i32 = arith.constant 1 : i32
    %4 = tpu.dynamic_rotate %1 by %c1_i32 dim 1 : vector<3x2688xf32>, i32 -> vector<3x2688xf32>
    %5 = tpu.iota {dimensions = array<i32: 1>} : vector<3x2688xi32>
    %c1_i32_5 = arith.constant 1 : i32
    %6 = vector.broadcast %c1_i32_5 : i32 to vector<3x2688xi32>
    %7 = arith.cmpi sge, %5, %6 : vector<3x2688xi32>
    %cst = arith.constant 0.000000e+00 : f32
    %8 = vector.broadcast %cst : f32 to vector<3x2688xf32>
    %9 = arith.select %7, %4, %8 : vector<3x2688xi1>, vector<3x2688xf32>
    %cst_6 = arith.constant dense<0.000000e+00> : vector<12x2688xf32>
    %10 = tpu.matmul %3, %9, %cst_6 {dimension_numbers = #tpu.dot_dimension_numbers<[1], [0], [0], [1], [0, 0, 1, 1], [], []>} : vector<12x3xf32>, vector<3x2688xf32>, vector<12x2688xf32> -> vector<12x2688xf32>
    %c1 = arith.constant 1 : index
    %c0_7 = arith.constant 0 : index
    %c0_8 = arith.constant 0 : index
    %11 = vector.load %arg2[%c1, %c0_7, %c0_8] : memref<3x12x3xf32, #tpu.memory_space<vmem>>, vector<1x12x3xf32>
    %12 = vector.shape_cast %11 : vector<1x12x3xf32> to vector<12x3xf32>
    %cst_9 = arith.constant dense<0.000000e+00> : vector<12x2688xf32>
    %13 = tpu.matmul %12, %1, %cst_9 {dimension_numbers = #tpu.dot_dimension_numbers<[1], [0], [0], [1], [0, 0, 1, 1], [], []>} : vector<12x3xf32>, vector<3x2688xf32>, vector<12x2688xf32> -> vector<12x2688xf32>
    %14 = arith.addf %10, %13 : vector<12x2688xf32>
    %c2 = arith.constant 2 : index
    %c0_10 = arith.constant 0 : index
    %c0_11 = arith.constant 0 : index
    %15 = vector.load %arg2[%c2, %c0_10, %c0_11] : memref<3x12x3xf32, #tpu.memory_space<vmem>>, vector<1x12x3xf32>
    %16 = vector.shape_cast %15 : vector<1x12x3xf32> to vector<12x3xf32>
    %c2687_i32 = arith.constant 2687 : i32
    %17 = tpu.dynamic_rotate %1 by %c2687_i32 dim 1 : vector<3x2688xf32>, i32 -> vector<3x2688xf32>
    %18 = tpu.iota {dimensions = array<i32: 1>} : vector<3x2688xi32>
    %c2687_i32_12 = arith.constant 2687 : i32
    %19 = vector.broadcast %c2687_i32_12 : i32 to vector<3x2688xi32>
    %20 = arith.cmpi slt, %18, %19 : vector<3x2688xi32>
    %cst_13 = arith.constant 0.000000e+00 : f32
    %21 = vector.broadcast %cst_13 : f32 to vector<3x2688xf32>
    %22 = arith.select %20, %17, %21 : vector<3x2688xi1>, vector<3x2688xf32>
    %cst_14 = arith.constant dense<0.000000e+00> : vector<12x2688xf32>
    %23 = tpu.matmul %16, %22, %cst_14 {dimension_numbers = #tpu.dot_dimension_numbers<[1], [0], [0], [1], [0, 0, 1, 1], [], []>} : vector<12x3xf32>, vector<3x2688xf32>, vector<12x2688xf32> -> vector<12x2688xf32>
    %24 = arith.addf %14, %23 : vector<12x2688xf32>
    %c0_15 = arith.constant 0 : index
    %c0_16 = arith.constant 0 : index
    %25 = vector.load %arg3[%c0_15, %c0_16] : memref<12x1xf32, #tpu.memory_space<vmem>>, vector<12x1xf32>
    %26 = vector.broadcast %25 : vector<12x1xf32> to vector<12x2688xf32>
    %27 = arith.mulf %24, %26 : vector<12x2688xf32>
    %c0_17 = arith.constant 0 : index
    %c0_18 = arith.constant 0 : index
    %28 = vector.load %arg4[%c0_17, %c0_18] : memref<12x1xf32, #tpu.memory_space<vmem>>, vector<12x1xf32>
    %29 = vector.broadcast %28 : vector<12x1xf32> to vector<12x2688xf32>
    %30 = arith.addf %27, %29 : vector<12x2688xf32>
    %cst_19 = arith.constant 0.000000e+00 : f32
    %31 = vector.broadcast %cst_19 : f32 to vector<12x2688xf32>
    %32 = arith.maximumf %30, %31 : vector<12x2688xf32>
    %33 = tpu.iota {dimensions = array<i32: 1>} : vector<12x2688xi32>
    %c2660_i32 = arith.constant 2660 : i32
    %34 = vector.broadcast %c2660_i32 : i32 to vector<12x2688xi32>
    %35 = arith.cmpi slt, %33, %34 : vector<12x2688xi32>
    %cst_20 = arith.constant 0.000000e+00 : f32
    %36 = vector.broadcast %cst_20 : f32 to vector<12x2688xf32>
    %37 = arith.select %35, %32, %36 : vector<12x2688xi1>, vector<12x2688xf32>
    %c2687_i32_21 = arith.constant 2687 : i32
    %38 = tpu.dynamic_rotate %37 by %c2687_i32_21 dim 1 : vector<12x2688xf32>, i32 -> vector<12x2688xf32>
    %39 = tpu.iota {dimensions = array<i32: 1>} : vector<12x2688xi32>
    %c2687_i32_22 = arith.constant 2687 : i32
    %40 = vector.broadcast %c2687_i32_22 : i32 to vector<12x2688xi32>
    %41 = arith.cmpi slt, %39, %40 : vector<12x2688xi32>
    %cst_23 = arith.constant 0.000000e+00 : f32
    %42 = vector.broadcast %cst_23 : f32 to vector<12x2688xf32>
    %43 = arith.select %41, %38, %42 : vector<12x2688xi1>, vector<12x2688xf32>
    %44 = arith.maximumf %37, %43 : vector<12x2688xf32>
    %c0_24 = arith.constant 0 : index
    %c0_25 = arith.constant 0 : index
    %c0_26 = arith.constant 0 : index
    %45 = vector.load %arg5[%c0_24, %c0_25, %c0_26] : memref<3x12x12xf32, #tpu.memory_space<vmem>>, vector<1x12x12xf32>
    %46 = vector.shape_cast %45 : vector<1x12x12xf32> to vector<12x12xf32>
    %c2_i32 = arith.constant 2 : i32
    %47 = tpu.dynamic_rotate %44 by %c2_i32 dim 1 : vector<12x2688xf32>, i32 -> vector<12x2688xf32>
    %48 = tpu.iota {dimensions = array<i32: 1>} : vector<12x2688xi32>
    %c2_i32_27 = arith.constant 2 : i32
    %49 = vector.broadcast %c2_i32_27 : i32 to vector<12x2688xi32>
    %50 = arith.cmpi sge, %48, %49 : vector<12x2688xi32>
    %cst_28 = arith.constant 0.000000e+00 : f32
    %51 = vector.broadcast %cst_28 : f32 to vector<12x2688xf32>
    %52 = arith.select %50, %47, %51 : vector<12x2688xi1>, vector<12x2688xf32>
    %cst_29 = arith.constant dense<0.000000e+00> : vector<12x2688xf32>
    %53 = tpu.matmul %46, %52, %cst_29 {dimension_numbers = #tpu.dot_dimension_numbers<[1], [0], [0], [1], [0, 0, 1, 1], [], []>} : vector<12x12xf32>, vector<12x2688xf32>, vector<12x2688xf32> -> vector<12x2688xf32>
    %c1_30 = arith.constant 1 : index
    %c0_31 = arith.constant 0 : index
    %c0_32 = arith.constant 0 : index
    %54 = vector.load %arg5[%c1_30, %c0_31, %c0_32] : memref<3x12x12xf32, #tpu.memory_space<vmem>>, vector<1x12x12xf32>
    %55 = vector.shape_cast %54 : vector<1x12x12xf32> to vector<12x12xf32>
    %cst_33 = arith.constant dense<0.000000e+00> : vector<12x2688xf32>
    %56 = tpu.matmul %55, %44, %cst_33 {dimension_numbers = #tpu.dot_dimension_numbers<[1], [0], [0], [1], [0, 0, 1, 1], [], []>} : vector<12x12xf32>, vector<12x2688xf32>, vector<12x2688xf32> -> vector<12x2688xf32>
    %57 = arith.addf %53, %56 : vector<12x2688xf32>
    %c2_34 = arith.constant 2 : index
    %c0_35 = arith.constant 0 : index
    %c0_36 = arith.constant 0 : index
    %58 = vector.load %arg5[%c2_34, %c0_35, %c0_36] : memref<3x12x12xf32, #tpu.memory_space<vmem>>, vector<1x12x12xf32>
    %59 = vector.shape_cast %58 : vector<1x12x12xf32> to vector<12x12xf32>
    %c2686_i32 = arith.constant 2686 : i32
    %60 = tpu.dynamic_rotate %44 by %c2686_i32 dim 1 : vector<12x2688xf32>, i32 -> vector<12x2688xf32>
    %61 = tpu.iota {dimensions = array<i32: 1>} : vector<12x2688xi32>
    %c2686_i32_37 = arith.constant 2686 : i32
    %62 = vector.broadcast %c2686_i32_37 : i32 to vector<12x2688xi32>
    %63 = arith.cmpi slt, %61, %62 : vector<12x2688xi32>
    %cst_38 = arith.constant 0.000000e+00 : f32
    %64 = vector.broadcast %cst_38 : f32 to vector<12x2688xf32>
    %65 = arith.select %63, %60, %64 : vector<12x2688xi1>, vector<12x2688xf32>
    %cst_39 = arith.constant dense<0.000000e+00> : vector<12x2688xf32>
    %66 = tpu.matmul %59, %65, %cst_39 {dimension_numbers = #tpu.dot_dimension_numbers<[1], [0], [0], [1], [0, 0, 1, 1], [], []>} : vector<12x12xf32>, vector<12x2688xf32>, vector<12x2688xf32> -> vector<12x2688xf32>
    %67 = arith.addf %57, %66 : vector<12x2688xf32>
    %c0_40 = arith.constant 0 : index
    %c0_41 = arith.constant 0 : index
    %68 = vector.load %arg6[%c0_40, %c0_41] : memref<12x1xf32, #tpu.memory_space<vmem>>, vector<12x1xf32>
    %69 = vector.broadcast %68 : vector<12x1xf32> to vector<12x2688xf32>
    %70 = arith.mulf %67, %69 : vector<12x2688xf32>
    %c0_42 = arith.constant 0 : index
    %c0_43 = arith.constant 0 : index
    %71 = vector.load %arg7[%c0_42, %c0_43] : memref<12x1xf32, #tpu.memory_space<vmem>>, vector<12x1xf32>
    %72 = vector.broadcast %71 : vector<12x1xf32> to vector<12x2688xf32>
    %73 = arith.addf %70, %72 : vector<12x2688xf32>
    %cst_44 = arith.constant 0.000000e+00 : f32
    %74 = vector.broadcast %cst_44 : f32 to vector<12x2688xf32>
    %75 = arith.maximumf %73, %74 : vector<12x2688xf32>
    %c2686_i32_45 = arith.constant 2686 : i32
    %76 = tpu.dynamic_rotate %75 by %c2686_i32_45 dim 1 : vector<12x2688xf32>, i32 -> vector<12x2688xf32>
    %77 = tpu.iota {dimensions = array<i32: 1>} : vector<12x2688xi32>
    %c2686_i32_46 = arith.constant 2686 : i32
    %78 = vector.broadcast %c2686_i32_46 : i32 to vector<12x2688xi32>
    %79 = arith.cmpi slt, %77, %78 : vector<12x2688xi32>
    %cst_47 = arith.constant 0.000000e+00 : f32
    %80 = vector.broadcast %cst_47 : f32 to vector<12x2688xf32>
    %81 = arith.select %79, %76, %80 : vector<12x2688xi1>, vector<12x2688xf32>
    %82 = arith.maximumf %75, %81 : vector<12x2688xf32>
    %c0_48 = arith.constant 0 : index
    %c0_49 = arith.constant 0 : index
    %c0_50 = arith.constant 0 : index
    %83 = vector.load %arg8[%c0_48, %c0_49, %c0_50] : memref<1x12x2688xf32, #tpu.memory_space<vmem>>, vector<1x12x2688xf32>
    %84 = vector.shape_cast %83 : vector<1x12x2688xf32> to vector<12x2688xf32>
    %85 = vector.shape_cast %82 : vector<12x2688xf32> to vector<1x12x2688xf32>
    tpu.vector_store %arg8[%c0_48, %c0_49, %c0_50], %85 {strides = array<i32>} : memref<1x12x2688xf32, #tpu.memory_space<vmem>>, vector<1x12x2688xf32>,
    return
  }
  func.func @transform_0(%arg0: i32) -> (i32, i32, i32) {
    %c0_i32 = arith.constant 0 : i32
    %c0_i32_0 = arith.constant 0 : i32
    %c0_i32_1 = arith.constant 0 : i32
    return %arg0, %c0_i32, %c0_i32_0 : i32, i32, i32
  }
  func.func @transform_1(%arg0: i32) -> (i32, i32, i32) {
    %c0_i32 = arith.constant 0 : i32
    %c0_i32_0 = arith.constant 0 : i32
    %c0_i32_1 = arith.constant 0 : i32
    %c0_i32_2 = arith.constant 0 : i32
    return %c0_i32, %c0_i32_0, %c0_i32_1 : i32, i32, i32
  }
  func.func @transform_2(%arg0: i32) -> (i32, i32) {
    %c0_i32 = arith.constant 0 : i32
    %c0_i32_0 = arith.constant 0 : i32
    %c0_i32_1 = arith.constant 0 : i32
    return %c0_i32, %c0_i32_0 : i32, i32
  }
  func.func @transform_3(%arg0: i32) -> (i32, i32) {
    %c0_i32 = arith.constant 0 : i32
    %c0_i32_0 = arith.constant 0 : i32
    %c0_i32_1 = arith.constant 0 : i32
    return %c0_i32, %c0_i32_0 : i32, i32
  }
  func.func @transform_4(%arg0: i32) -> (i32, i32, i32) {
    %c0_i32 = arith.constant 0 : i32
    %c0_i32_0 = arith.constant 0 : i32
    %c0_i32_1 = arith.constant 0 : i32
    %c0_i32_2 = arith.constant 0 : i32
    return %c0_i32, %c0_i32_0, %c0_i32_1 : i32, i32, i32
  }
  func.func @transform_5(%arg0: i32) -> (i32, i32) {
    %c0_i32 = arith.constant 0 : i32
    %c0_i32_0 = arith.constant 0 : i32
    %c0_i32_1 = arith.constant 0 : i32
    return %c0_i32, %c0_i32_0 : i32, i32
  }
  func.func @transform_6(%arg0: i32) -> (i32, i32) {
    %c0_i32 = arith.constant 0 : i32
    %c0_i32_0 = arith.constant 0 : i32
    %c0_i32_1 = arith.constant 0 : i32
    return %c0_i32, %c0_i32_0 : i32, i32
  }
  func.func @transform_7(%arg0: i32) -> (i32, i32, i32) {
    %c0_i32 = arith.constant 0 : i32
    %c0_i32_0 = arith.constant 0 : i32
    %c0_i32_1 = arith.constant 0 : i32
    return %arg0, %c0_i32, %c0_i32_0 : i32, i32, i32
  }
}

module attributes {stable_mosaic.version = 11 : i64} {
  func.func @_head_kernel(%arg0: memref<4x7980xf32, #tpu.memory_space<vmem>>, %arg1: memref<7980x32xf32, #tpu.memory_space<vmem>>, %arg2: memref<1x32xf32, #tpu.memory_space<vmem>>, %arg3: memref<1x32xf32, #tpu.memory_space<vmem>>, %arg4: memref<1x32xf32, #tpu.memory_space<vmem>>, %arg5: memref<1x32x32xf32, #tpu.memory_space<vmem>>, %arg6: memref<1x1x32xf32, #tpu.memory_space<vmem>>, %arg7: memref<3x32x128xf32, #tpu.memory_space<vmem>>, %arg8: memref<3x32x128xf32, #tpu.memory_space<vmem>>, %arg9: memref<3x1x128xf32, #tpu.memory_space<vmem>>, %arg10: memref<32x32xf32, #tpu.memory_space<vmem>>, %arg11: memref<1x32xf32, #tpu.memory_space<vmem>>, %arg12: memref<1x32xf32, #tpu.memory_space<vmem>>, %arg13: memref<1x32xf32, #tpu.memory_space<vmem>>, %arg14: memref<32x5xf32, #tpu.memory_space<vmem>>, %arg15: memref<1x5xf32, #tpu.memory_space<vmem>>, %arg16: memref<4x5xf32, #tpu.memory_space<vmem>>, %arg17: memref<4x32xf32, #tpu.memory_space<vmem>>) attributes {dimension_semantics = [], scalar_prefetch = 0 : i64, scratch_operands = 1 : i64, tpu.core_type = #tpu.core_type<tc>} {
    %c0 = arith.constant 0 : index
    %c0_0 = arith.constant 0 : index
    %0 = vector.load %arg0[%c0, %c0_0] : memref<4x7980xf32, #tpu.memory_space<vmem>>, vector<4x7980xf32>
    %c0_1 = arith.constant 0 : index
    %c0_2 = arith.constant 0 : index
    %1 = vector.load %arg1[%c0_1, %c0_2] : memref<7980x32xf32, #tpu.memory_space<vmem>>, vector<7980x32xf32>
    %cst = arith.constant dense<0.000000e+00> : vector<4x32xf32>
    %2 = tpu.matmul %0, %1, %cst {dimension_numbers = #tpu.dot_dimension_numbers<[1], [0], [0], [1], [0, 0, 1, 1], [], []>} : vector<4x7980xf32>, vector<7980x32xf32>, vector<4x32xf32> -> vector<4x32xf32>
    %c0_3 = arith.constant 0 : index
    %c0_4 = arith.constant 0 : index
    %3 = vector.load %arg2[%c0_3, %c0_4] : memref<1x32xf32, #tpu.memory_space<vmem>>, vector<1x32xf32>
    %4 = vector.broadcast %3 : vector<1x32xf32> to vector<4x32xf32>
    %5 = arith.addf %2, %4 : vector<4x32xf32>
    %c0_5 = arith.constant 0 : index
    %c0_6 = arith.constant 0 : index
    %6 = vector.load %arg3[%c0_5, %c0_6] : memref<1x32xf32, #tpu.memory_space<vmem>>, vector<1x32xf32>
    %c0_7 = arith.constant 0 : index
    %c0_8 = arith.constant 0 : index
    %7 = vector.load %arg4[%c0_7, %c0_8] : memref<1x32xf32, #tpu.memory_space<vmem>>, vector<1x32xf32>
    %cst_9 = arith.constant dense<0.000000e+00> : vector<4xf32>
    %8 = vector.multi_reduction <add>, %5, %cst_9 [1] : vector<4x32xf32> to vector<4xf32>
    %9 = vector.shape_cast %8 : vector<4xf32> to vector<4x1xf32>
    %cst_10 = arith.constant 3.200000e+01 : f32
    %10 = vector.broadcast %cst_10 : f32 to vector<4x1xf32>
    %11 = arith.divf %9, %10 : vector<4x1xf32>
    %12 = vector.broadcast %11 : vector<4x1xf32> to vector<4x32xf32>
    %13 = arith.subf %5, %12 : vector<4x32xf32>
    %14 = arith.mulf %13, %13 : vector<4x32xf32>
    %cst_11 = arith.constant dense<0.000000e+00> : vector<4xf32>
    %15 = vector.multi_reduction <add>, %14, %cst_11 [1] : vector<4x32xf32> to vector<4xf32>
    %16 = vector.shape_cast %15 : vector<4xf32> to vector<4x1xf32>
    %cst_12 = arith.constant 3.200000e+01 : f32
    %17 = vector.broadcast %cst_12 : f32 to vector<4x1xf32>
    %18 = arith.divf %16, %17 : vector<4x1xf32>
    %cst_13 = arith.constant 9.99999997E-7 : f32
    %19 = vector.broadcast %cst_13 : f32 to vector<4x1xf32>
    %20 = arith.addf %18, %19 : vector<4x1xf32>
    %21 = math.rsqrt %20 : vector<4x1xf32>
    %22 = vector.broadcast %21 : vector<4x1xf32> to vector<4x32xf32>
    %23 = arith.mulf %13, %22 : vector<4x32xf32>
    %24 = vector.broadcast %6 : vector<1x32xf32> to vector<4x32xf32>
    %25 = arith.mulf %23, %24 : vector<4x32xf32>
    %26 = vector.broadcast %7 : vector<1x32xf32> to vector<4x32xf32>
    %27 = arith.addf %25, %26 : vector<4x32xf32>
    %cst_14 = arith.constant 0.000000e+00 : f32
    %28 = vector.broadcast %cst_14 : f32 to vector<4x32xf32>
    %29 = arith.maximumf %27, %28 : vector<4x32xf32>
    %c0_15 = arith.constant 0 : index
    %c0_16 = arith.constant 0 : index
    %c0_17 = arith.constant 0 : index
    %30 = vector.load %arg5[%c0_15, %c0_16, %c0_17] : memref<1x32x32xf32, #tpu.memory_space<vmem>>, vector<1x32x32xf32>
    %31 = vector.shape_cast %30 : vector<1x32x32xf32> to vector<32x32xf32>
    %cst_18 = arith.constant dense<0.000000e+00> : vector<4x32xf32>
    %32 = tpu.matmul %29, %31, %cst_18 {dimension_numbers = #tpu.dot_dimension_numbers<[1], [0], [0], [1], [0, 0, 1, 1], [], []>} : vector<4x32xf32>, vector<32x32xf32>, vector<4x32xf32> -> vector<4x32xf32>
    %c0_19 = arith.constant 0 : index
    %c0_20 = arith.constant 0 : index
    %c0_21 = arith.constant 0 : index
    %33 = vector.load %arg6[%c0_19, %c0_20, %c0_21] : memref<1x1x32xf32, #tpu.memory_space<vmem>>, vector<1x1x32xf32>
    %34 = vector.shape_cast %33 : vector<1x1x32xf32> to vector<1x32xf32>
    %35 = vector.broadcast %34 : vector<1x32xf32> to vector<4x32xf32>
    %36 = arith.addf %32, %35 : vector<4x32xf32>
    %cst_22 = arith.constant 0.000000e+00 : f32
    %37 = vector.broadcast %cst_22 : f32 to vector<4x32xf32>
    %38 = arith.maximumf %36, %37 : vector<4x32xf32>
    %c0_23 = arith.constant 0 : index
    %c0_24 = arith.constant 0 : index
    %39 = vector.load %arg17[%c0_23, %c0_24] : memref<4x32xf32, #tpu.memory_space<vmem>>, vector<4x32xf32>
    tpu.vector_store %arg17[%c0_23, %c0_24], %38 {strides = array<i32>} : memref<4x32xf32, #tpu.memory_space<vmem>>, vector<4x32xf32>,
    %c0_25 = arith.constant 0 : index
    %c0_26 = arith.constant 0 : index
    %c0_27 = arith.constant 0 : index
    %40 = vector.load %arg8[%c0_25, %c0_26, %c0_27] : memref<3x32x128xf32, #tpu.memory_space<vmem>>, vector<1x32x128xf32>
    %41 = vector.shape_cast %40 : vector<1x32x128xf32> to vector<32x128xf32>
    %c0_28 = arith.constant 0 : index
    %c0_29 = arith.constant 0 : index
    %42 = vector.load %arg17[%c0_28, %c0_29] : memref<4x32xf32, #tpu.memory_space<vmem>>, vector<4x32xf32>
    %c0_30 = arith.constant 0 : index
    %c0_31 = arith.constant 0 : index
    %c0_32 = arith.constant 0 : index
    %43 = vector.load %arg7[%c0_30, %c0_31, %c0_32] : memref<3x32x128xf32, #tpu.memory_space<vmem>>, vector<1x32x128xf32>
    %44 = vector.shape_cast %43 : vector<1x32x128xf32> to vector<32x128xf32>
    %cst_33 = arith.constant dense<0.000000e+00> : vector<4x128xf32>
    %45 = tpu.matmul %42, %44, %cst_33 {dimension_numbers = #tpu.dot_dimension_numbers<[1], [0], [0], [1], [0, 0, 1, 1], [], []>} : vector<4x32xf32>, vector<32x128xf32>, vector<4x128xf32> -> vector<4x128xf32>
    %c0_34 = arith.constant 0 : index
    %c0_35 = arith.constant 0 : index
    %c0_36 = arith.constant 0 : index
    %46 = vector.load %arg9[%c0_34, %c0_35, %c0_36] : memref<3x1x128xf32, #tpu.memory_space<vmem>>, vector<1x1x128xf32>
    %47 = vector.shape_cast %46 : vector<1x1x128xf32> to vector<1x128xf32>
    %48 = vector.broadcast %47 : vector<1x128xf32> to vector<4x128xf32>
    %49 = arith.addf %45, %48 : vector<4x128xf32>
    %cst_37 = arith.constant 0.000000e+00 : f32
    %50 = vector.broadcast %cst_37 : f32 to vector<1x32xf32>
    %cst_38 = arith.constant 0.000000e+00 : f32
    %51 = vector.broadcast %cst_38 : f32 to vector<1x32xf32>
    %52 = vector.extract_strided_slice %49 {offsets = [0, 0], sizes = [1, 128], strides = [1, 1]} : vector<4x128xf32> to vector<1x128xf32>
    %cst_39 = arith.constant dense<0.000000e+00> : vector<1x128xf32>
    %53 = tpu.matmul %50, %41, %cst_39 {dimension_numbers = #tpu.dot_dimension_numbers<[1], [0], [0], [1], [0, 0, 1, 1], [], []>} : vector<1x32xf32>, vector<32x128xf32>, vector<1x128xf32> -> vector<1x128xf32>
    %54 = arith.addf %52, %53 : vector<1x128xf32>
    %55 = vector.extract_strided_slice %54 {offsets = [0, 0], sizes = [1, 32], strides = [1, 1]} : vector<1x128xf32> to vector<1x32xf32>
    %56 = arith.negf %55 : vector<1x32xf32>
    %57 = math.exp %56 : vector<1x32xf32>
    %cst_40 = arith.constant 1.000000e+00 : f32
    %58 = vector.broadcast %cst_40 : f32 to vector<1x32xf32>
    %59 = arith.addf %58, %57 : vector<1x32xf32>
    %60 = arith.divf %58, %59 : vector<1x32xf32>
    %61 = vector.extract_strided_slice %54 {offsets = [0, 32], sizes = [1, 32], strides = [1, 1]} : vector<1x128xf32> to vector<1x32xf32>
    %62 = arith.negf %61 : vector<1x32xf32>
    %63 = math.exp %62 : vector<1x32xf32>
    %cst_41 = arith.constant 1.000000e+00 : f32
    %64 = vector.broadcast %cst_41 : f32 to vector<1x32xf32>
    %65 = arith.addf %64, %63 : vector<1x32xf32>
    %66 = arith.divf %64, %65 : vector<1x32xf32>
    %67 = vector.extract_strided_slice %54 {offsets = [0, 64], sizes = [1, 32], strides = [1, 1]} : vector<1x128xf32> to vector<1x32xf32>
    %68 = math.tanh %67 : vector<1x32xf32>
    %69 = vector.extract_strided_slice %54 {offsets = [0, 96], sizes = [1, 32], strides = [1, 1]} : vector<1x128xf32> to vector<1x32xf32>
    %70 = arith.negf %69 : vector<1x32xf32>
    %71 = math.exp %70 : vector<1x32xf32>
    %cst_42 = arith.constant 1.000000e+00 : f32
    %72 = vector.broadcast %cst_42 : f32 to vector<1x32xf32>
    %73 = arith.addf %72, %71 : vector<1x32xf32>
    %74 = arith.divf %72, %73 : vector<1x32xf32>
    %75 = arith.mulf %66, %51 : vector<1x32xf32>
    %76 = arith.mulf %60, %68 : vector<1x32xf32>
    %77 = arith.addf %75, %76 : vector<1x32xf32>
    %78 = math.tanh %77 : vector<1x32xf32>
    %79 = arith.mulf %74, %78 : vector<1x32xf32>
    %c0_43 = arith.constant 0 : index
    %c0_44 = arith.constant 0 : index
    %80 = vector.load %arg17[%c0_43, %c0_44] : memref<4x32xf32, #tpu.memory_space<vmem>>, vector<1x32xf32>
    tpu.vector_store %arg17[%c0_43, %c0_44], %79 {strides = array<i32>} : memref<4x32xf32, #tpu.memory_space<vmem>>, vector<1x32xf32>,
    %81 = vector.extract_strided_slice %49 {offsets = [1, 0], sizes = [1, 128], strides = [1, 1]} : vector<4x128xf32> to vector<1x128xf32>
    %cst_45 = arith.constant dense<0.000000e+00> : vector<1x128xf32>
    %82 = tpu.matmul %79, %41, %cst_45 {dimension_numbers = #tpu.dot_dimension_numbers<[1], [0], [0], [1], [0, 0, 1, 1], [], []>} : vector<1x32xf32>, vector<32x128xf32>, vector<1x128xf32> -> vector<1x128xf32>
    %83 = arith.addf %81, %82 : vector<1x128xf32>
    %84 = vector.extract_strided_slice %83 {offsets = [0, 0], sizes = [1, 32], strides = [1, 1]} : vector<1x128xf32> to vector<1x32xf32>
    %85 = arith.negf %84 : vector<1x32xf32>
    %86 = math.exp %85 : vector<1x32xf32>
    %cst_46 = arith.constant 1.000000e+00 : f32
    %87 = vector.broadcast %cst_46 : f32 to vector<1x32xf32>
    %88 = arith.addf %87, %86 : vector<1x32xf32>
    %89 = arith.divf %87, %88 : vector<1x32xf32>
    %90 = vector.extract_strided_slice %83 {offsets = [0, 32], sizes = [1, 32], strides = [1, 1]} : vector<1x128xf32> to vector<1x32xf32>
    %91 = arith.negf %90 : vector<1x32xf32>
    %92 = math.exp %91 : vector<1x32xf32>
    %cst_47 = arith.constant 1.000000e+00 : f32
    %93 = vector.broadcast %cst_47 : f32 to vector<1x32xf32>
    %94 = arith.addf %93, %92 : vector<1x32xf32>
    %95 = arith.divf %93, %94 : vector<1x32xf32>
    %96 = vector.extract_strided_slice %83 {offsets = [0, 64], sizes = [1, 32], strides = [1, 1]} : vector<1x128xf32> to vector<1x32xf32>
    %97 = math.tanh %96 : vector<1x32xf32>
    %98 = vector.extract_strided_slice %83 {offsets = [0, 96], sizes = [1, 32], strides = [1, 1]} : vector<1x128xf32> to vector<1x32xf32>
    %99 = arith.negf %98 : vector<1x32xf32>
    %100 = math.exp %99 : vector<1x32xf32>
    %cst_48 = arith.constant 1.000000e+00 : f32
    %101 = vector.broadcast %cst_48 : f32 to vector<1x32xf32>
    %102 = arith.addf %101, %100 : vector<1x32xf32>
    %103 = arith.divf %101, %102 : vector<1x32xf32>
    %104 = arith.mulf %95, %77 : vector<1x32xf32>
    %105 = arith.mulf %89, %97 : vector<1x32xf32>
    %106 = arith.addf %104, %105 : vector<1x32xf32>
    %107 = math.tanh %106 : vector<1x32xf32>
    %108 = arith.mulf %103, %107 : vector<1x32xf32>
    %c1 = arith.constant 1 : index
    %c0_49 = arith.constant 0 : index
    %109 = vector.load %arg17[%c1, %c0_49] : memref<4x32xf32, #tpu.memory_space<vmem>>, vector<1x32xf32>
    tpu.vector_store %arg17[%c1, %c0_49], %108 {strides = array<i32>} : memref<4x32xf32, #tpu.memory_space<vmem>>, vector<1x32xf32>,
    %110 = vector.extract_strided_slice %49 {offsets = [2, 0], sizes = [1, 128], strides = [1, 1]} : vector<4x128xf32> to vector<1x128xf32>
    %cst_50 = arith.constant dense<0.000000e+00> : vector<1x128xf32>
    %111 = tpu.matmul %108, %41, %cst_50 {dimension_numbers = #tpu.dot_dimension_numbers<[1], [0], [0], [1], [0, 0, 1, 1], [], []>} : vector<1x32xf32>, vector<32x128xf32>, vector<1x128xf32> -> vector<1x128xf32>
    %112 = arith.addf %110, %111 : vector<1x128xf32>
    %113 = vector.extract_strided_slice %112 {offsets = [0, 0], sizes = [1, 32], strides = [1, 1]} : vector<1x128xf32> to vector<1x32xf32>
    %114 = arith.negf %113 : vector<1x32xf32>
    %115 = math.exp %114 : vector<1x32xf32>
    %cst_51 = arith.constant 1.000000e+00 : f32
    %116 = vector.broadcast %cst_51 : f32 to vector<1x32xf32>
    %117 = arith.addf %116, %115 : vector<1x32xf32>
    %118 = arith.divf %116, %117 : vector<1x32xf32>
    %119 = vector.extract_strided_slice %112 {offsets = [0, 32], sizes = [1, 32], strides = [1, 1]} : vector<1x128xf32> to vector<1x32xf32>
    %120 = arith.negf %119 : vector<1x32xf32>
    %121 = math.exp %120 : vector<1x32xf32>
    %cst_52 = arith.constant 1.000000e+00 : f32
    %122 = vector.broadcast %cst_52 : f32 to vector<1x32xf32>
    %123 = arith.addf %122, %121 : vector<1x32xf32>
    %124 = arith.divf %122, %123 : vector<1x32xf32>
    %125 = vector.extract_strided_slice %112 {offsets = [0, 64], sizes = [1, 32], strides = [1, 1]} : vector<1x128xf32> to vector<1x32xf32>
    %126 = math.tanh %125 : vector<1x32xf32>
    %127 = vector.extract_strided_slice %112 {offsets = [0, 96], sizes = [1, 32], strides = [1, 1]} : vector<1x128xf32> to vector<1x32xf32>
    %128 = arith.negf %127 : vector<1x32xf32>
    %129 = math.exp %128 : vector<1x32xf32>
    %cst_53 = arith.constant 1.000000e+00 : f32
    %130 = vector.broadcast %cst_53 : f32 to vector<1x32xf32>
    %131 = arith.addf %130, %129 : vector<1x32xf32>
    %132 = arith.divf %130, %131 : vector<1x32xf32>
    %133 = arith.mulf %124, %106 : vector<1x32xf32>
    %134 = arith.mulf %118, %126 : vector<1x32xf32>
    %135 = arith.addf %133, %134 : vector<1x32xf32>
    %136 = math.tanh %135 : vector<1x32xf32>
    %137 = arith.mulf %132, %136 : vector<1x32xf32>
    %c2 = arith.constant 2 : index
    %c0_54 = arith.constant 0 : index
    %138 = vector.load %arg17[%c2, %c0_54] : memref<4x32xf32, #tpu.memory_space<vmem>>, vector<1x32xf32>
    tpu.vector_store %arg17[%c2, %c0_54], %137 {strides = array<i32>} : memref<4x32xf32, #tpu.memory_space<vmem>>, vector<1x32xf32>,
    %139 = vector.extract_strided_slice %49 {offsets = [3, 0], sizes = [1, 128], strides = [1, 1]} : vector<4x128xf32> to vector<1x128xf32>
    %cst_55 = arith.constant dense<0.000000e+00> : vector<1x128xf32>
    %140 = tpu.matmul %137, %41, %cst_55 {dimension_numbers = #tpu.dot_dimension_numbers<[1], [0], [0], [1], [0, 0, 1, 1], [], []>} : vector<1x32xf32>, vector<32x128xf32>, vector<1x128xf32> -> vector<1x128xf32>
    %141 = arith.addf %139, %140 : vector<1x128xf32>
    %142 = vector.extract_strided_slice %141 {offsets = [0, 0], sizes = [1, 32], strides = [1, 1]} : vector<1x128xf32> to vector<1x32xf32>
    %143 = arith.negf %142 : vector<1x32xf32>
    %144 = math.exp %143 : vector<1x32xf32>
    %cst_56 = arith.constant 1.000000e+00 : f32
    %145 = vector.broadcast %cst_56 : f32 to vector<1x32xf32>
    %146 = arith.addf %145, %144 : vector<1x32xf32>
    %147 = arith.divf %145, %146 : vector<1x32xf32>
    %148 = vector.extract_strided_slice %141 {offsets = [0, 32], sizes = [1, 32], strides = [1, 1]} : vector<1x128xf32> to vector<1x32xf32>
    %149 = arith.negf %148 : vector<1x32xf32>
    %150 = math.exp %149 : vector<1x32xf32>
    %cst_57 = arith.constant 1.000000e+00 : f32
    %151 = vector.broadcast %cst_57 : f32 to vector<1x32xf32>
    %152 = arith.addf %151, %150 : vector<1x32xf32>
    %153 = arith.divf %151, %152 : vector<1x32xf32>
    %154 = vector.extract_strided_slice %141 {offsets = [0, 64], sizes = [1, 32], strides = [1, 1]} : vector<1x128xf32> to vector<1x32xf32>
    %155 = math.tanh %154 : vector<1x32xf32>
    %156 = vector.extract_strided_slice %141 {offsets = [0, 96], sizes = [1, 32], strides = [1, 1]} : vector<1x128xf32> to vector<1x32xf32>
    %157 = arith.negf %156 : vector<1x32xf32>
    %158 = math.exp %157 : vector<1x32xf32>
    %cst_58 = arith.constant 1.000000e+00 : f32
    %159 = vector.broadcast %cst_58 : f32 to vector<1x32xf32>
    %160 = arith.addf %159, %158 : vector<1x32xf32>
    %161 = arith.divf %159, %160 : vector<1x32xf32>
    %162 = arith.mulf %153, %135 : vector<1x32xf32>
    %163 = arith.mulf %147, %155 : vector<1x32xf32>
    %164 = arith.addf %162, %163 : vector<1x32xf32>
    %165 = math.tanh %164 : vector<1x32xf32>
    %166 = arith.mulf %161, %165 : vector<1x32xf32>
    %c3 = arith.constant 3 : index
    %c0_59 = arith.constant 0 : index
    %167 = vector.load %arg17[%c3, %c0_59] : memref<4x32xf32, #tpu.memory_space<vmem>>, vector<1x32xf32>
    tpu.vector_store %arg17[%c3, %c0_59], %166 {strides = array<i32>} : memref<4x32xf32, #tpu.memory_space<vmem>>, vector<1x32xf32>,
    %c1_60 = arith.constant 1 : index
    %c0_61 = arith.constant 0 : index
    %c0_62 = arith.constant 0 : index
    %168 = vector.load %arg8[%c1_60, %c0_61, %c0_62] : memref<3x32x128xf32, #tpu.memory_space<vmem>>, vector<1x32x128xf32>
    %169 = vector.shape_cast %168 : vector<1x32x128xf32> to vector<32x128xf32>
    %c0_63 = arith.constant 0 : index
    %c0_64 = arith.constant 0 : index
    %170 = vector.load %arg17[%c0_63, %c0_64] : memref<4x32xf32, #tpu.memory_space<vmem>>, vector<4x32xf32>
    %c1_65 = arith.constant 1 : index
    %c0_66 = arith.constant 0 : index
    %c0_67 = arith.constant 0 : index
    %171 = vector.load %arg7[%c1_65, %c0_66, %c0_67] : memref<3x32x128xf32, #tpu.memory_space<vmem>>, vector<1x32x128xf32>
    %172 = vector.shape_cast %171 : vector<1x32x128xf32> to vector<32x128xf32>
    %cst_68 = arith.constant dense<0.000000e+00> : vector<4x128xf32>
    %173 = tpu.matmul %170, %172, %cst_68 {dimension_numbers = #tpu.dot_dimension_numbers<[1], [0], [0], [1], [0, 0, 1, 1], [], []>} : vector<4x32xf32>, vector<32x128xf32>, vector<4x128xf32> -> vector<4x128xf32>
    %c1_69 = arith.constant 1 : index
    %c0_70 = arith.constant 0 : index
    %c0_71 = arith.constant 0 : index
    %174 = vector.load %arg9[%c1_69, %c0_70, %c0_71] : memref<3x1x128xf32, #tpu.memory_space<vmem>>, vector<1x1x128xf32>
    %175 = vector.shape_cast %174 : vector<1x1x128xf32> to vector<1x128xf32>
    %176 = vector.broadcast %175 : vector<1x128xf32> to vector<4x128xf32>
    %177 = arith.addf %173, %176 : vector<4x128xf32>
    %cst_72 = arith.constant 0.000000e+00 : f32
    %178 = vector.broadcast %cst_72 : f32 to vector<1x32xf32>
    %cst_73 = arith.constant 0.000000e+00 : f32
    %179 = vector.broadcast %cst_73 : f32 to vector<1x32xf32>
    %180 = vector.extract_strided_slice %177 {offsets = [0, 0], sizes = [1, 128], strides = [1, 1]} : vector<4x128xf32> to vector<1x128xf32>
    %cst_74 = arith.constant dense<0.000000e+00> : vector<1x128xf32>
    %181 = tpu.matmul %178, %169, %cst_74 {dimension_numbers = #tpu.dot_dimension_numbers<[1], [0], [0], [1], [0, 0, 1, 1], [], []>} : vector<1x32xf32>, vector<32x128xf32>, vector<1x128xf32> -> vector<1x128xf32>
    %182 = arith.addf %180, %181 : vector<1x128xf32>
    %183 = vector.extract_strided_slice %182 {offsets = [0, 0], sizes = [1, 32], strides = [1, 1]} : vector<1x128xf32> to vector<1x32xf32>
    %184 = arith.negf %183 : vector<1x32xf32>
    %185 = math.exp %184 : vector<1x32xf32>
    %cst_75 = arith.constant 1.000000e+00 : f32
    %186 = vector.broadcast %cst_75 : f32 to vector<1x32xf32>
    %187 = arith.addf %186, %185 : vector<1x32xf32>
    %188 = arith.divf %186, %187 : vector<1x32xf32>
    %189 = vector.extract_strided_slice %182 {offsets = [0, 32], sizes = [1, 32], strides = [1, 1]} : vector<1x128xf32> to vector<1x32xf32>
    %190 = arith.negf %189 : vector<1x32xf32>
    %191 = math.exp %190 : vector<1x32xf32>
    %cst_76 = arith.constant 1.000000e+00 : f32
    %192 = vector.broadcast %cst_76 : f32 to vector<1x32xf32>
    %193 = arith.addf %192, %191 : vector<1x32xf32>
    %194 = arith.divf %192, %193 : vector<1x32xf32>
    %195 = vector.extract_strided_slice %182 {offsets = [0, 64], sizes = [1, 32], strides = [1, 1]} : vector<1x128xf32> to vector<1x32xf32>
    %196 = math.tanh %195 : vector<1x32xf32>
    %197 = vector.extract_strided_slice %182 {offsets = [0, 96], sizes = [1, 32], strides = [1, 1]} : vector<1x128xf32> to vector<1x32xf32>
    %198 = arith.negf %197 : vector<1x32xf32>
    %199 = math.exp %198 : vector<1x32xf32>
    %cst_77 = arith.constant 1.000000e+00 : f32
    %200 = vector.broadcast %cst_77 : f32 to vector<1x32xf32>
    %201 = arith.addf %200, %199 : vector<1x32xf32>
    %202 = arith.divf %200, %201 : vector<1x32xf32>
    %203 = arith.mulf %194, %179 : vector<1x32xf32>
    %204 = arith.mulf %188, %196 : vector<1x32xf32>
    %205 = arith.addf %203, %204 : vector<1x32xf32>
    %206 = math.tanh %205 : vector<1x32xf32>
    %207 = arith.mulf %202, %206 : vector<1x32xf32>
    %c0_78 = arith.constant 0 : index
    %c0_79 = arith.constant 0 : index
    %208 = vector.load %arg17[%c0_78, %c0_79] : memref<4x32xf32, #tpu.memory_space<vmem>>, vector<1x32xf32>
    tpu.vector_store %arg17[%c0_78, %c0_79], %207 {strides = array<i32>} : memref<4x32xf32, #tpu.memory_space<vmem>>, vector<1x32xf32>,
    %209 = vector.extract_strided_slice %177 {offsets = [1, 0], sizes = [1, 128], strides = [1, 1]} : vector<4x128xf32> to vector<1x128xf32>
    %cst_80 = arith.constant dense<0.000000e+00> : vector<1x128xf32>
    %210 = tpu.matmul %207, %169, %cst_80 {dimension_numbers = #tpu.dot_dimension_numbers<[1], [0], [0], [1], [0, 0, 1, 1], [], []>} : vector<1x32xf32>, vector<32x128xf32>, vector<1x128xf32> -> vector<1x128xf32>
    %211 = arith.addf %209, %210 : vector<1x128xf32>
    %212 = vector.extract_strided_slice %211 {offsets = [0, 0], sizes = [1, 32], strides = [1, 1]} : vector<1x128xf32> to vector<1x32xf32>
    %213 = arith.negf %212 : vector<1x32xf32>
    %214 = math.exp %213 : vector<1x32xf32>
    %cst_81 = arith.constant 1.000000e+00 : f32
    %215 = vector.broadcast %cst_81 : f32 to vector<1x32xf32>
    %216 = arith.addf %215, %214 : vector<1x32xf32>
    %217 = arith.divf %215, %216 : vector<1x32xf32>
    %218 = vector.extract_strided_slice %211 {offsets = [0, 32], sizes = [1, 32], strides = [1, 1]} : vector<1x128xf32> to vector<1x32xf32>
    %219 = arith.negf %218 : vector<1x32xf32>
    %220 = math.exp %219 : vector<1x32xf32>
    %cst_82 = arith.constant 1.000000e+00 : f32
    %221 = vector.broadcast %cst_82 : f32 to vector<1x32xf32>
    %222 = arith.addf %221, %220 : vector<1x32xf32>
    %223 = arith.divf %221, %222 : vector<1x32xf32>
    %224 = vector.extract_strided_slice %211 {offsets = [0, 64], sizes = [1, 32], strides = [1, 1]} : vector<1x128xf32> to vector<1x32xf32>
    %225 = math.tanh %224 : vector<1x32xf32>
    %226 = vector.extract_strided_slice %211 {offsets = [0, 96], sizes = [1, 32], strides = [1, 1]} : vector<1x128xf32> to vector<1x32xf32>
    %227 = arith.negf %226 : vector<1x32xf32>
    %228 = math.exp %227 : vector<1x32xf32>
    %cst_83 = arith.constant 1.000000e+00 : f32
    %229 = vector.broadcast %cst_83 : f32 to vector<1x32xf32>
    %230 = arith.addf %229, %228 : vector<1x32xf32>
    %231 = arith.divf %229, %230 : vector<1x32xf32>
    %232 = arith.mulf %223, %205 : vector<1x32xf32>
    %233 = arith.mulf %217, %225 : vector<1x32xf32>
    %234 = arith.addf %232, %233 : vector<1x32xf32>
    %235 = math.tanh %234 : vector<1x32xf32>
    %236 = arith.mulf %231, %235 : vector<1x32xf32>
    %c1_84 = arith.constant 1 : index
    %c0_85 = arith.constant 0 : index
    %237 = vector.load %arg17[%c1_84, %c0_85] : memref<4x32xf32, #tpu.memory_space<vmem>>, vector<1x32xf32>
    tpu.vector_store %arg17[%c1_84, %c0_85], %236 {strides = array<i32>} : memref<4x32xf32, #tpu.memory_space<vmem>>, vector<1x32xf32>,
    %238 = vector.extract_strided_slice %177 {offsets = [2, 0], sizes = [1, 128], strides = [1, 1]} : vector<4x128xf32> to vector<1x128xf32>
    %cst_86 = arith.constant dense<0.000000e+00> : vector<1x128xf32>
    %239 = tpu.matmul %236, %169, %cst_86 {dimension_numbers = #tpu.dot_dimension_numbers<[1], [0], [0], [1], [0, 0, 1, 1], [], []>} : vector<1x32xf32>, vector<32x128xf32>, vector<1x128xf32> -> vector<1x128xf32>
    %240 = arith.addf %238, %239 : vector<1x128xf32>
    %241 = vector.extract_strided_slice %240 {offsets = [0, 0], sizes = [1, 32], strides = [1, 1]} : vector<1x128xf32> to vector<1x32xf32>
    %242 = arith.negf %241 : vector<1x32xf32>
    %243 = math.exp %242 : vector<1x32xf32>
    %cst_87 = arith.constant 1.000000e+00 : f32
    %244 = vector.broadcast %cst_87 : f32 to vector<1x32xf32>
    %245 = arith.addf %244, %243 : vector<1x32xf32>
    %246 = arith.divf %244, %245 : vector<1x32xf32>
    %247 = vector.extract_strided_slice %240 {offsets = [0, 32], sizes = [1, 32], strides = [1, 1]} : vector<1x128xf32> to vector<1x32xf32>
    %248 = arith.negf %247 : vector<1x32xf32>
    %249 = math.exp %248 : vector<1x32xf32>
    %cst_88 = arith.constant 1.000000e+00 : f32
    %250 = vector.broadcast %cst_88 : f32 to vector<1x32xf32>
    %251 = arith.addf %250, %249 : vector<1x32xf32>
    %252 = arith.divf %250, %251 : vector<1x32xf32>
    %253 = vector.extract_strided_slice %240 {offsets = [0, 64], sizes = [1, 32], strides = [1, 1]} : vector<1x128xf32> to vector<1x32xf32>
    %254 = math.tanh %253 : vector<1x32xf32>
    %255 = vector.extract_strided_slice %240 {offsets = [0, 96], sizes = [1, 32], strides = [1, 1]} : vector<1x128xf32> to vector<1x32xf32>
    %256 = arith.negf %255 : vector<1x32xf32>
    %257 = math.exp %256 : vector<1x32xf32>
    %cst_89 = arith.constant 1.000000e+00 : f32
    %258 = vector.broadcast %cst_89 : f32 to vector<1x32xf32>
    %259 = arith.addf %258, %257 : vector<1x32xf32>
    %260 = arith.divf %258, %259 : vector<1x32xf32>
    %261 = arith.mulf %252, %234 : vector<1x32xf32>
    %262 = arith.mulf %246, %254 : vector<1x32xf32>
    %263 = arith.addf %261, %262 : vector<1x32xf32>
    %264 = math.tanh %263 : vector<1x32xf32>
    %265 = arith.mulf %260, %264 : vector<1x32xf32>
    %c2_90 = arith.constant 2 : index
    %c0_91 = arith.constant 0 : index
    %266 = vector.load %arg17[%c2_90, %c0_91] : memref<4x32xf32, #tpu.memory_space<vmem>>, vector<1x32xf32>
    tpu.vector_store %arg17[%c2_90, %c0_91], %265 {strides = array<i32>} : memref<4x32xf32, #tpu.memory_space<vmem>>, vector<1x32xf32>,
    %267 = vector.extract_strided_slice %177 {offsets = [3, 0], sizes = [1, 128], strides = [1, 1]} : vector<4x128xf32> to vector<1x128xf32>
    %cst_92 = arith.constant dense<0.000000e+00> : vector<1x128xf32>
    %268 = tpu.matmul %265, %169, %cst_92 {dimension_numbers = #tpu.dot_dimension_numbers<[1], [0], [0], [1], [0, 0, 1, 1], [], []>} : vector<1x32xf32>, vector<32x128xf32>, vector<1x128xf32> -> vector<1x128xf32>
    %269 = arith.addf %267, %268 : vector<1x128xf32>
    %270 = vector.extract_strided_slice %269 {offsets = [0, 0], sizes = [1, 32], strides = [1, 1]} : vector<1x128xf32> to vector<1x32xf32>
    %271 = arith.negf %270 : vector<1x32xf32>
    %272 = math.exp %271 : vector<1x32xf32>
    %cst_93 = arith.constant 1.000000e+00 : f32
    %273 = vector.broadcast %cst_93 : f32 to vector<1x32xf32>
    %274 = arith.addf %273, %272 : vector<1x32xf32>
    %275 = arith.divf %273, %274 : vector<1x32xf32>
    %276 = vector.extract_strided_slice %269 {offsets = [0, 32], sizes = [1, 32], strides = [1, 1]} : vector<1x128xf32> to vector<1x32xf32>
    %277 = arith.negf %276 : vector<1x32xf32>
    %278 = math.exp %277 : vector<1x32xf32>
    %cst_94 = arith.constant 1.000000e+00 : f32
    %279 = vector.broadcast %cst_94 : f32 to vector<1x32xf32>
    %280 = arith.addf %279, %278 : vector<1x32xf32>
    %281 = arith.divf %279, %280 : vector<1x32xf32>
    %282 = vector.extract_strided_slice %269 {offsets = [0, 64], sizes = [1, 32], strides = [1, 1]} : vector<1x128xf32> to vector<1x32xf32>
    %283 = math.tanh %282 : vector<1x32xf32>
    %284 = vector.extract_strided_slice %269 {offsets = [0, 96], sizes = [1, 32], strides = [1, 1]} : vector<1x128xf32> to vector<1x32xf32>
    %285 = arith.negf %284 : vector<1x32xf32>
    %286 = math.exp %285 : vector<1x32xf32>
    %cst_95 = arith.constant 1.000000e+00 : f32
    %287 = vector.broadcast %cst_95 : f32 to vector<1x32xf32>
    %288 = arith.addf %287, %286 : vector<1x32xf32>
    %289 = arith.divf %287, %288 : vector<1x32xf32>
    %290 = arith.mulf %281, %263 : vector<1x32xf32>
    %291 = arith.mulf %275, %283 : vector<1x32xf32>
    %292 = arith.addf %290, %291 : vector<1x32xf32>
    %293 = math.tanh %292 : vector<1x32xf32>
    %294 = arith.mulf %289, %293 : vector<1x32xf32>
    %c3_96 = arith.constant 3 : index
    %c0_97 = arith.constant 0 : index
    %295 = vector.load %arg17[%c3_96, %c0_97] : memref<4x32xf32, #tpu.memory_space<vmem>>, vector<1x32xf32>
    tpu.vector_store %arg17[%c3_96, %c0_97], %294 {strides = array<i32>} : memref<4x32xf32, #tpu.memory_space<vmem>>, vector<1x32xf32>,
    %c2_98 = arith.constant 2 : index
    %c0_99 = arith.constant 0 : index
    %c0_100 = arith.constant 0 : index
    %296 = vector.load %arg8[%c2_98, %c0_99, %c0_100] : memref<3x32x128xf32, #tpu.memory_space<vmem>>, vector<1x32x128xf32>
    %297 = vector.shape_cast %296 : vector<1x32x128xf32> to vector<32x128xf32>
    %c0_101 = arith.constant 0 : index
    %c0_102 = arith.constant 0 : index
    %298 = vector.load %arg17[%c0_101, %c0_102] : memref<4x32xf32, #tpu.memory_space<vmem>>, vector<4x32xf32>
    %c2_103 = arith.constant 2 : index
    %c0_104 = arith.constant 0 : index
    %c0_105 = arith.constant 0 : index
    %299 = vector.load %arg7[%c2_103, %c0_104, %c0_105] : memref<3x32x128xf32, #tpu.memory_space<vmem>>, vector<1x32x128xf32>
    %300 = vector.shape_cast %299 : vector<1x32x128xf32> to vector<32x128xf32>
    %cst_106 = arith.constant dense<0.000000e+00> : vector<4x128xf32>
    %301 = tpu.matmul %298, %300, %cst_106 {dimension_numbers = #tpu.dot_dimension_numbers<[1], [0], [0], [1], [0, 0, 1, 1], [], []>} : vector<4x32xf32>, vector<32x128xf32>, vector<4x128xf32> -> vector<4x128xf32>
    %c2_107 = arith.constant 2 : index
    %c0_108 = arith.constant 0 : index
    %c0_109 = arith.constant 0 : index
    %302 = vector.load %arg9[%c2_107, %c0_108, %c0_109] : memref<3x1x128xf32, #tpu.memory_space<vmem>>, vector<1x1x128xf32>
    %303 = vector.shape_cast %302 : vector<1x1x128xf32> to vector<1x128xf32>
    %304 = vector.broadcast %303 : vector<1x128xf32> to vector<4x128xf32>
    %305 = arith.addf %301, %304 : vector<4x128xf32>
    %cst_110 = arith.constant 0.000000e+00 : f32
    %306 = vector.broadcast %cst_110 : f32 to vector<1x32xf32>
    %cst_111 = arith.constant 0.000000e+00 : f32
    %307 = vector.broadcast %cst_111 : f32 to vector<1x32xf32>
    %308 = vector.extract_strided_slice %305 {offsets = [0, 0], sizes = [1, 128], strides = [1, 1]} : vector<4x128xf32> to vector<1x128xf32>
    %cst_112 = arith.constant dense<0.000000e+00> : vector<1x128xf32>
    %309 = tpu.matmul %306, %297, %cst_112 {dimension_numbers = #tpu.dot_dimension_numbers<[1], [0], [0], [1], [0, 0, 1, 1], [], []>} : vector<1x32xf32>, vector<32x128xf32>, vector<1x128xf32> -> vector<1x128xf32>
    %310 = arith.addf %308, %309 : vector<1x128xf32>
    %311 = vector.extract_strided_slice %310 {offsets = [0, 0], sizes = [1, 32], strides = [1, 1]} : vector<1x128xf32> to vector<1x32xf32>
    %312 = arith.negf %311 : vector<1x32xf32>
    %313 = math.exp %312 : vector<1x32xf32>
    %cst_113 = arith.constant 1.000000e+00 : f32
    %314 = vector.broadcast %cst_113 : f32 to vector<1x32xf32>
    %315 = arith.addf %314, %313 : vector<1x32xf32>
    %316 = arith.divf %314, %315 : vector<1x32xf32>
    %317 = vector.extract_strided_slice %310 {offsets = [0, 32], sizes = [1, 32], strides = [1, 1]} : vector<1x128xf32> to vector<1x32xf32>
    %318 = arith.negf %317 : vector<1x32xf32>
    %319 = math.exp %318 : vector<1x32xf32>
    %cst_114 = arith.constant 1.000000e+00 : f32
    %320 = vector.broadcast %cst_114 : f32 to vector<1x32xf32>
    %321 = arith.addf %320, %319 : vector<1x32xf32>
    %322 = arith.divf %320, %321 : vector<1x32xf32>
    %323 = vector.extract_strided_slice %310 {offsets = [0, 64], sizes = [1, 32], strides = [1, 1]} : vector<1x128xf32> to vector<1x32xf32>
    %324 = math.tanh %323 : vector<1x32xf32>
    %325 = vector.extract_strided_slice %310 {offsets = [0, 96], sizes = [1, 32], strides = [1, 1]} : vector<1x128xf32> to vector<1x32xf32>
    %326 = arith.negf %325 : vector<1x32xf32>
    %327 = math.exp %326 : vector<1x32xf32>
    %cst_115 = arith.constant 1.000000e+00 : f32
    %328 = vector.broadcast %cst_115 : f32 to vector<1x32xf32>
    %329 = arith.addf %328, %327 : vector<1x32xf32>
    %330 = arith.divf %328, %329 : vector<1x32xf32>
    %331 = arith.mulf %322, %307 : vector<1x32xf32>
    %332 = arith.mulf %316, %324 : vector<1x32xf32>
    %333 = arith.addf %331, %332 : vector<1x32xf32>
    %334 = math.tanh %333 : vector<1x32xf32>
    %335 = arith.mulf %330, %334 : vector<1x32xf32>
    %c0_116 = arith.constant 0 : index
    %c0_117 = arith.constant 0 : index
    %336 = vector.load %arg17[%c0_116, %c0_117] : memref<4x32xf32, #tpu.memory_space<vmem>>, vector<1x32xf32>
    tpu.vector_store %arg17[%c0_116, %c0_117], %335 {strides = array<i32>} : memref<4x32xf32, #tpu.memory_space<vmem>>, vector<1x32xf32>,
    %337 = vector.extract_strided_slice %305 {offsets = [1, 0], sizes = [1, 128], strides = [1, 1]} : vector<4x128xf32> to vector<1x128xf32>
    %cst_118 = arith.constant dense<0.000000e+00> : vector<1x128xf32>
    %338 = tpu.matmul %335, %297, %cst_118 {dimension_numbers = #tpu.dot_dimension_numbers<[1], [0], [0], [1], [0, 0, 1, 1], [], []>} : vector<1x32xf32>, vector<32x128xf32>, vector<1x128xf32> -> vector<1x128xf32>
    %339 = arith.addf %337, %338 : vector<1x128xf32>
    %340 = vector.extract_strided_slice %339 {offsets = [0, 0], sizes = [1, 32], strides = [1, 1]} : vector<1x128xf32> to vector<1x32xf32>
    %341 = arith.negf %340 : vector<1x32xf32>
    %342 = math.exp %341 : vector<1x32xf32>
    %cst_119 = arith.constant 1.000000e+00 : f32
    %343 = vector.broadcast %cst_119 : f32 to vector<1x32xf32>
    %344 = arith.addf %343, %342 : vector<1x32xf32>
    %345 = arith.divf %343, %344 : vector<1x32xf32>
    %346 = vector.extract_strided_slice %339 {offsets = [0, 32], sizes = [1, 32], strides = [1, 1]} : vector<1x128xf32> to vector<1x32xf32>
    %347 = arith.negf %346 : vector<1x32xf32>
    %348 = math.exp %347 : vector<1x32xf32>
    %cst_120 = arith.constant 1.000000e+00 : f32
    %349 = vector.broadcast %cst_120 : f32 to vector<1x32xf32>
    %350 = arith.addf %349, %348 : vector<1x32xf32>
    %351 = arith.divf %349, %350 : vector<1x32xf32>
    %352 = vector.extract_strided_slice %339 {offsets = [0, 64], sizes = [1, 32], strides = [1, 1]} : vector<1x128xf32> to vector<1x32xf32>
    %353 = math.tanh %352 : vector<1x32xf32>
    %354 = vector.extract_strided_slice %339 {offsets = [0, 96], sizes = [1, 32], strides = [1, 1]} : vector<1x128xf32> to vector<1x32xf32>
    %355 = arith.negf %354 : vector<1x32xf32>
    %356 = math.exp %355 : vector<1x32xf32>
    %cst_121 = arith.constant 1.000000e+00 : f32
    %357 = vector.broadcast %cst_121 : f32 to vector<1x32xf32>
    %358 = arith.addf %357, %356 : vector<1x32xf32>
    %359 = arith.divf %357, %358 : vector<1x32xf32>
    %360 = arith.mulf %351, %333 : vector<1x32xf32>
    %361 = arith.mulf %345, %353 : vector<1x32xf32>
    %362 = arith.addf %360, %361 : vector<1x32xf32>
    %363 = math.tanh %362 : vector<1x32xf32>
    %364 = arith.mulf %359, %363 : vector<1x32xf32>
    %c1_122 = arith.constant 1 : index
    %c0_123 = arith.constant 0 : index
    %365 = vector.load %arg17[%c1_122, %c0_123] : memref<4x32xf32, #tpu.memory_space<vmem>>, vector<1x32xf32>
    tpu.vector_store %arg17[%c1_122, %c0_123], %364 {strides = array<i32>} : memref<4x32xf32, #tpu.memory_space<vmem>>, vector<1x32xf32>,
    %366 = vector.extract_strided_slice %305 {offsets = [2, 0], sizes = [1, 128], strides = [1, 1]} : vector<4x128xf32> to vector<1x128xf32>
    %cst_124 = arith.constant dense<0.000000e+00> : vector<1x128xf32>
    %367 = tpu.matmul %364, %297, %cst_124 {dimension_numbers = #tpu.dot_dimension_numbers<[1], [0], [0], [1], [0, 0, 1, 1], [], []>} : vector<1x32xf32>, vector<32x128xf32>, vector<1x128xf32> -> vector<1x128xf32>
    %368 = arith.addf %366, %367 : vector<1x128xf32>
    %369 = vector.extract_strided_slice %368 {offsets = [0, 0], sizes = [1, 32], strides = [1, 1]} : vector<1x128xf32> to vector<1x32xf32>
    %370 = arith.negf %369 : vector<1x32xf32>
    %371 = math.exp %370 : vector<1x32xf32>
    %cst_125 = arith.constant 1.000000e+00 : f32
    %372 = vector.broadcast %cst_125 : f32 to vector<1x32xf32>
    %373 = arith.addf %372, %371 : vector<1x32xf32>
    %374 = arith.divf %372, %373 : vector<1x32xf32>
    %375 = vector.extract_strided_slice %368 {offsets = [0, 32], sizes = [1, 32], strides = [1, 1]} : vector<1x128xf32> to vector<1x32xf32>
    %376 = arith.negf %375 : vector<1x32xf32>
    %377 = math.exp %376 : vector<1x32xf32>
    %cst_126 = arith.constant 1.000000e+00 : f32
    %378 = vector.broadcast %cst_126 : f32 to vector<1x32xf32>
    %379 = arith.addf %378, %377 : vector<1x32xf32>
    %380 = arith.divf %378, %379 : vector<1x32xf32>
    %381 = vector.extract_strided_slice %368 {offsets = [0, 64], sizes = [1, 32], strides = [1, 1]} : vector<1x128xf32> to vector<1x32xf32>
    %382 = math.tanh %381 : vector<1x32xf32>
    %383 = vector.extract_strided_slice %368 {offsets = [0, 96], sizes = [1, 32], strides = [1, 1]} : vector<1x128xf32> to vector<1x32xf32>
    %384 = arith.negf %383 : vector<1x32xf32>
    %385 = math.exp %384 : vector<1x32xf32>
    %cst_127 = arith.constant 1.000000e+00 : f32
    %386 = vector.broadcast %cst_127 : f32 to vector<1x32xf32>
    %387 = arith.addf %386, %385 : vector<1x32xf32>
    %388 = arith.divf %386, %387 : vector<1x32xf32>
    %389 = arith.mulf %380, %362 : vector<1x32xf32>
    %390 = arith.mulf %374, %382 : vector<1x32xf32>
    %391 = arith.addf %389, %390 : vector<1x32xf32>
    %392 = math.tanh %391 : vector<1x32xf32>
    %393 = arith.mulf %388, %392 : vector<1x32xf32>
    %c2_128 = arith.constant 2 : index
    %c0_129 = arith.constant 0 : index
    %394 = vector.load %arg17[%c2_128, %c0_129] : memref<4x32xf32, #tpu.memory_space<vmem>>, vector<1x32xf32>
    tpu.vector_store %arg17[%c2_128, %c0_129], %393 {strides = array<i32>} : memref<4x32xf32, #tpu.memory_space<vmem>>, vector<1x32xf32>,
    %395 = vector.extract_strided_slice %305 {offsets = [3, 0], sizes = [1, 128], strides = [1, 1]} : vector<4x128xf32> to vector<1x128xf32>
    %cst_130 = arith.constant dense<0.000000e+00> : vector<1x128xf32>
    %396 = tpu.matmul %393, %297, %cst_130 {dimension_numbers = #tpu.dot_dimension_numbers<[1], [0], [0], [1], [0, 0, 1, 1], [], []>} : vector<1x32xf32>, vector<32x128xf32>, vector<1x128xf32> -> vector<1x128xf32>
    %397 = arith.addf %395, %396 : vector<1x128xf32>
    %398 = vector.extract_strided_slice %397 {offsets = [0, 0], sizes = [1, 32], strides = [1, 1]} : vector<1x128xf32> to vector<1x32xf32>
    %399 = arith.negf %398 : vector<1x32xf32>
    %400 = math.exp %399 : vector<1x32xf32>
    %cst_131 = arith.constant 1.000000e+00 : f32
    %401 = vector.broadcast %cst_131 : f32 to vector<1x32xf32>
    %402 = arith.addf %401, %400 : vector<1x32xf32>
    %403 = arith.divf %401, %402 : vector<1x32xf32>
    %404 = vector.extract_strided_slice %397 {offsets = [0, 32], sizes = [1, 32], strides = [1, 1]} : vector<1x128xf32> to vector<1x32xf32>
    %405 = arith.negf %404 : vector<1x32xf32>
    %406 = math.exp %405 : vector<1x32xf32>
    %cst_132 = arith.constant 1.000000e+00 : f32
    %407 = vector.broadcast %cst_132 : f32 to vector<1x32xf32>
    %408 = arith.addf %407, %406 : vector<1x32xf32>
    %409 = arith.divf %407, %408 : vector<1x32xf32>
    %410 = vector.extract_strided_slice %397 {offsets = [0, 64], sizes = [1, 32], strides = [1, 1]} : vector<1x128xf32> to vector<1x32xf32>
    %411 = math.tanh %410 : vector<1x32xf32>
    %412 = vector.extract_strided_slice %397 {offsets = [0, 96], sizes = [1, 32], strides = [1, 1]} : vector<1x128xf32> to vector<1x32xf32>
    %413 = arith.negf %412 : vector<1x32xf32>
    %414 = math.exp %413 : vector<1x32xf32>
    %cst_133 = arith.constant 1.000000e+00 : f32
    %415 = vector.broadcast %cst_133 : f32 to vector<1x32xf32>
    %416 = arith.addf %415, %414 : vector<1x32xf32>
    %417 = arith.divf %415, %416 : vector<1x32xf32>
    %418 = arith.mulf %409, %391 : vector<1x32xf32>
    %419 = arith.mulf %403, %411 : vector<1x32xf32>
    %420 = arith.addf %418, %419 : vector<1x32xf32>
    %421 = math.tanh %420 : vector<1x32xf32>
    %422 = arith.mulf %417, %421 : vector<1x32xf32>
    %c3_134 = arith.constant 3 : index
    %c0_135 = arith.constant 0 : index
    %423 = vector.load %arg17[%c3_134, %c0_135] : memref<4x32xf32, #tpu.memory_space<vmem>>, vector<1x32xf32>
    tpu.vector_store %arg17[%c3_134, %c0_135], %422 {strides = array<i32>} : memref<4x32xf32, #tpu.memory_space<vmem>>, vector<1x32xf32>,
    %c0_136 = arith.constant 0 : index
    %c0_137 = arith.constant 0 : index
    %424 = vector.load %arg17[%c0_136, %c0_137] : memref<4x32xf32, #tpu.memory_space<vmem>>, vector<4x32xf32>
    %c0_138 = arith.constant 0 : index
    %c0_139 = arith.constant 0 : index
    %425 = vector.load %arg10[%c0_138, %c0_139] : memref<32x32xf32, #tpu.memory_space<vmem>>, vector<32x32xf32>
    %cst_140 = arith.constant dense<0.000000e+00> : vector<4x32xf32>
    %426 = tpu.matmul %424, %425, %cst_140 {dimension_numbers = #tpu.dot_dimension_numbers<[1], [0], [0], [1], [0, 0, 1, 1], [], []>} : vector<4x32xf32>, vector<32x32xf32>, vector<4x32xf32> -> vector<4x32xf32>
    %c0_141 = arith.constant 0 : index
    %c0_142 = arith.constant 0 : index
    %427 = vector.load %arg11[%c0_141, %c0_142] : memref<1x32xf32, #tpu.memory_space<vmem>>, vector<1x32xf32>
    %428 = vector.broadcast %427 : vector<1x32xf32> to vector<4x32xf32>
    %429 = arith.addf %426, %428 : vector<4x32xf32>
    %cst_143 = arith.constant 0.000000e+00 : f32
    %430 = vector.broadcast %cst_143 : f32 to vector<4x32xf32>
    %431 = arith.maximumf %429, %430 : vector<4x32xf32>
    %c0_144 = arith.constant 0 : index
    %c0_145 = arith.constant 0 : index
    %432 = vector.load %arg12[%c0_144, %c0_145] : memref<1x32xf32, #tpu.memory_space<vmem>>, vector<1x32xf32>
    %c0_146 = arith.constant 0 : index
    %c0_147 = arith.constant 0 : index
    %433 = vector.load %arg13[%c0_146, %c0_147] : memref<1x32xf32, #tpu.memory_space<vmem>>, vector<1x32xf32>
    %cst_148 = arith.constant dense<0.000000e+00> : vector<4xf32>
    %434 = vector.multi_reduction <add>, %431, %cst_148 [1] : vector<4x32xf32> to vector<4xf32>
    %435 = vector.shape_cast %434 : vector<4xf32> to vector<4x1xf32>
    %cst_149 = arith.constant 3.200000e+01 : f32
    %436 = vector.broadcast %cst_149 : f32 to vector<4x1xf32>
    %437 = arith.divf %435, %436 : vector<4x1xf32>
    %438 = vector.broadcast %437 : vector<4x1xf32> to vector<4x32xf32>
    %439 = arith.subf %431, %438 : vector<4x32xf32>
    %440 = arith.mulf %439, %439 : vector<4x32xf32>
    %cst_150 = arith.constant dense<0.000000e+00> : vector<4xf32>
    %441 = vector.multi_reduction <add>, %440, %cst_150 [1] : vector<4x32xf32> to vector<4xf32>
    %442 = vector.shape_cast %441 : vector<4xf32> to vector<4x1xf32>
    %cst_151 = arith.constant 3.200000e+01 : f32
    %443 = vector.broadcast %cst_151 : f32 to vector<4x1xf32>
    %444 = arith.divf %442, %443 : vector<4x1xf32>
    %cst_152 = arith.constant 9.99999997E-7 : f32
    %445 = vector.broadcast %cst_152 : f32 to vector<4x1xf32>
    %446 = arith.addf %444, %445 : vector<4x1xf32>
    %447 = math.rsqrt %446 : vector<4x1xf32>
    %448 = vector.broadcast %447 : vector<4x1xf32> to vector<4x32xf32>
    %449 = arith.mulf %439, %448 : vector<4x32xf32>
    %450 = vector.broadcast %432 : vector<1x32xf32> to vector<4x32xf32>
    %451 = arith.mulf %449, %450 : vector<4x32xf32>
    %452 = vector.broadcast %433 : vector<1x32xf32> to vector<4x32xf32>
    %453 = arith.addf %451, %452 : vector<4x32xf32>
    %c0_153 = arith.constant 0 : index
    %c0_154 = arith.constant 0 : index
    %454 = vector.load %arg14[%c0_153, %c0_154] : memref<32x5xf32, #tpu.memory_space<vmem>>, vector<32x5xf32>
    %cst_155 = arith.constant dense<0.000000e+00> : vector<4x5xf32>
    %455 = tpu.matmul %453, %454, %cst_155 {dimension_numbers = #tpu.dot_dimension_numbers<[1], [0], [0], [1], [0, 0, 1, 1], [], []>} : vector<4x32xf32>, vector<32x5xf32>, vector<4x5xf32> -> vector<4x5xf32>
    %c0_156 = arith.constant 0 : index
    %c0_157 = arith.constant 0 : index
    %456 = vector.load %arg15[%c0_156, %c0_157] : memref<1x5xf32, #tpu.memory_space<vmem>>, vector<1x5xf32>
    %457 = vector.broadcast %456 : vector<1x5xf32> to vector<4x5xf32>
    %458 = arith.addf %455, %457 : vector<4x5xf32>
    %c0_158 = arith.constant 0 : index
    %c0_159 = arith.constant 0 : index
    %459 = vector.load %arg16[%c0_158, %c0_159] : memref<4x5xf32, #tpu.memory_space<vmem>>, vector<4x5xf32>
    tpu.vector_store %arg16[%c0_158, %c0_159], %458 {strides = array<i32>} : memref<4x5xf32, #tpu.memory_space<vmem>>, vector<4x5xf32>,
    return
  }
}

</mosaic_0001>

<bundles_post_ra>
// kernel: _lambda_.2
= control target key start
LH: loop header
LB: loop body
LE: loop exit
PB: predicated region body
PF: predicated region fallthrough
CT: control target
= control target key end

     0   :  { %12 = vsyncpa [#allocation3], 0  ;;  %s11465_s0 = inlined_call_operand.vmem [shape: f32[4,3,2688], index: 0, kind: input, shape index: {}]   ;;  %s11466_s1 = inlined_call_operand.hbm [shape: f32[3,12,3], index: 1, kind: input, shape index: {}]   ;;  %s11467_s2 = inlined_call_operand.hbm [shape: f32[12,1], index: 2, kind: input, shape index: {}]   ;;  %s11468_s3 = inlined_call_operand.hbm [shape: f32[12,1], index: 3, kind: input, shape index: {}]   ;;  %s11469_s4 = inlined_call_operand.hbm [shape: f32[3,12,12], index: 4, kind: input, shape index: {}]   ;;  %s11470_s5 = inlined_call_operand.hbm [shape: f32[12,1], index: 5, kind: input, shape index: {}]   ;;  %s11471_s6 = inlined_call_operand.hbm [shape: f32[12,1], index: 6, kind: input, shape index: {}]   ;;  %s11472_s7 = inlined_call_operand.vmem [shape: f32[4,12,2688], index: 7, kind: output, shape index: {}]  }
   0x1   :  { %13 = vsyncpa [#allocation5], 0 }
   0x2   :  { %14 = vsyncpa [#allocation8], 0 }
   0x3   :  { %15 = vsyncpa [#allocation11], 0  ;;  %s8193_s24 = smov 0  }
   0x4 LB: > { %s8199_s25 = sadd.s32 4294967295, %s8137_s24   ;;  %p7532_p0 = scmp.ge.s32.totalorder %s8137_s24, 1  ;;  %s8137_s24 = sphi %s8193_s24, %s21_s24  }
   0x5   : > { %p204_p1 = scmp.lt.s32.totalorder %s8137_s24, 5  ;;  %p7913_p2 = scmp.eq.s32.totalorder %s8199_s25, 0 }
   0x6   : > { %s8139_s27 = smov [#allocation4]   ;;  %s8140_s29 = smov [#allocation7]  }
   0x7   : > { %p8204_p3 = pnand %p7532_p0, %p204_p1  ;;  %s229_s28 = sshll.u32 %s8139_s27, 4  ;;  %s230_s28 = int_to_ptr.vmem [resolvable:$true] %s229_s28 }
   0x8   : > { %s255_s30 = sshll.u32 %s8140_s29, 4  ;;  %s8141_s9 = smov [#allocation2]   ;;  %s8210_s30 = int_to_ptr.vmem [resolvable:$true] %s255_s30 }
   0x9   : > { %p7894_p4 = pneg %p8204_p3  ;;  %s216_s10 = sshll.u32 %s8141_s9, 4  ;;  %s8218_s10 = int_to_ptr.vmem [resolvable:$true] %s216_s10 }
   0xa   : > { %s8142_s11 = smov [#allocation6]   ;;  %s7970_s14 = scalar_lea.vmem %s230_s28, 256 }
   0xb   : > { %p8214_p5 = pnand %p7913_p2, %p7894_p4  ;;  %s8220_s12 = sshll.u32 %s8142_s11, 4  ;;  %s243_s12 = int_to_ptr.vmem [resolvable:$true] %s8220_s12 }
   0xc   : > { %p7971_p7 = scmp.ne.s32.totalorder %s230_s28, %s7970_s14  ;;  %p7978_p10 = scmp.lt.s32.totalorder %s230_s28, %s230_s28 }
   0xd   : > { %p8224_p6 = pneg %p8214_p5  ;;  %p7979_p11 = scmp.lt.s32.totalorder %s7970_s14, %s7970_s14 }
   0xf   : > { %p7973_p8 = pnand %p7971_p7, %p8224_p6  ;;  %p7980_p12 = por %p7979_p11, %p7978_p10 }
  0x11   : > { %p7974_p9 = pneg %p7973_p8 }
  0x13   : > { %p7981_p13 = pnand %p7980_p12, %p7974_p9 }
  0x15   : > { %7984 = shalt.err (!%p7981_p13)
}
  0x16   : > { %s8143_s15 = smov 128   ;;  %s8144_s16 = smov 8  }
  0x17   : > { %7900 = dma.hbm_to_vmem [thread:$0]  (!%p8214_p5), %s11467_s2, 256, %s230_s28, [#allocation5], %s8143_s15, %s8143_s15, %s8144_s16  }
  0x18   : > { %s7996_s19 = scalar_lea.vmem %s8210_s30, 768  ;;  %p8004_p7 = scmp.lt.s32.totalorder %s8210_s30, %s8210_s30 }
  0x19   : > { %p7997_p0 = scmp.ne.s32.totalorder %s8210_s30, %s7996_s19  ;;  %p8005_p8 = scmp.lt.s32.totalorder %s7996_s19, %s7996_s19 }
  0x1b   : > { %p7999_p1 = pnand %p7997_p0, %p8224_p6  ;;  %p8006_p9 = por %p8005_p8, %p8004_p7 }
  0x1d   : > { %p8000_p4 = pneg %p7999_p1 }
  0x1f   : > { %p8007_p10 = pnand %p8006_p9, %p8000_p4 }
  0x21   : > { %8010 = shalt.err (!%p8007_p10)
}
  0x22   : > { %7906 = dma.hbm_to_vmem [thread:$0]  (!%p8214_p5), %s11469_s4, 768, %s8210_s30, [#allocation8], %s8143_s15, %s8143_s15, %s8144_s16  }
  0x23   : > { %s8022_s22 = scalar_lea.vmem %s8218_s10, 768  ;;  %p8030_p0 = scmp.lt.s32.totalorder %s8218_s10, %s8218_s10 }
  0x24   : > { %p8023_p11 = scmp.ne.s32.totalorder %s8218_s10, %s8022_s22  ;;  %p8031_p1 = scmp.lt.s32.totalorder %s8022_s22, %s8022_s22 }
  0x26   : > { %p8025_p12 = pnand %p8023_p11, %p8224_p6  ;;  %p8032_p4 = por %p8031_p1, %p8030_p0 }
  0x28   : > { %p8026_p13 = pneg %p8025_p12 }
  0x2a   : > { %p8033_p7 = pnand %p8032_p4, %p8026_p13 }
  0x2c   : > { %8036 = shalt.err (!%p8033_p7)
}
  0x2d   : > { %7897 = dma.hbm_to_vmem [thread:$0]  (!%p8214_p5), %s11466_s1, 768, %s8218_s10, [#allocation3], %s8143_s15, %s8143_s15, %s8144_s16  }
  0x2e   : > { %s8048_s28 = scalar_lea.vmem %s243_s12, 256  ;;  %p8056_p11 = scmp.lt.s32.totalorder %s243_s12, %s243_s12 }
  0x2f   : > { %p8049_p8 = scmp.ne.s32.totalorder %s243_s12, %s8048_s28  ;;  %p8057_p12 = scmp.lt.s32.totalorder %s8048_s28, %s8048_s28 }
  0x31   : > { %p8051_p9 = pnand %p8049_p8, %p8224_p6  ;;  %p8058_p13 = por %p8057_p12, %p8056_p11 }
  0x33   : > { %p8052_p10 = pneg %p8051_p9 }
  0x35   : > { %p8059_p0 = pnand %p8058_p13, %p8052_p10 }
  0x37   : > { %8062 = shalt.err (!%p8059_p0)
}
  0x38   : > { %7903 = dma.hbm_to_vmem [thread:$0]  (!%p8214_p5), %s11468_s3, 256, %s243_s12, [#allocation5], %s8143_s15, %s8143_s15, %s8144_s16  }
  0x39   : > { %s8145_s9 = smov [#allocation9]   ;;  %s8146_s11 = smov [#allocation10]  }
  0x3a   : > { %s268_s10 = sshll.u32 %s8145_s9, 4  ;;  %s281_s14 = sshll.u32 %s8146_s11, 4  ;;  %s269_s10 = int_to_ptr.vmem [resolvable:$true] %s268_s10  ;;  %s282_s14 = int_to_ptr.vmem [resolvable:$true] %s281_s14 }
  0x3b   : > { %s8074_s17 = scalar_lea.vmem %s269_s10, 256  ;;  %p8082_p8 = scmp.lt.s32.totalorder %s269_s10, %s269_s10 }
  0x3c   : > { %p8075_p1 = scmp.ne.s32.totalorder %s269_s10, %s8074_s17  ;;  %p8083_p9 = scmp.lt.s32.totalorder %s8074_s17, %s8074_s17 }
  0x3e   : > { %p8077_p4 = pnand %p8075_p1, %p8224_p6  ;;  %p8084_p10 = por %p8083_p9, %p8082_p8 }
  0x40   : > { %p8078_p7 = pneg %p8077_p4 }
  0x42   : > { %p8085_p11 = pnand %p8084_p10, %p8078_p7 }
  0x44   : > { %8088 = shalt.err (!%p8085_p11)
}
  0x45   : > { %7909 = dma.hbm_to_vmem [thread:$0]  (!%p8214_p5), %s11470_s5, 256, %s269_s10, [#allocation8], %s8143_s15, %s8143_s15, %s8144_s16  }
  0x46   : > { %s8100_s19 = scalar_lea.vmem %s282_s14, 256  ;;  %p8108_p1 = scmp.lt.s32.totalorder %s282_s14, %s282_s14 }
  0x47   : > { %p8101_p12 = scmp.ne.s32.totalorder %s282_s14, %s8100_s19  ;;  %p8109_p4 = scmp.lt.s32.totalorder %s8100_s19, %s8100_s19 }
  0x49   : > { %p8103_p13 = pnand %p8101_p12, %p8224_p6  ;;  %p8110_p7 = por %p8109_p4, %p8108_p1 }
  0x4b   : > { %p8104_p0 = pneg %p8103_p13 }
  0x4d   : > { %p8111_p8 = pnand %p8110_p7, %p8104_p0 }
  0x4f   : > { %8114 = shalt.err (!%p8111_p8)
}
  0x50   : > { %7912 = dma.hbm_to_vmem [thread:$0]  (!%p8214_p5), %s11471_s6, 256, %s282_s14, [#allocation11], %s8143_s15, %s8143_s15, %s8144_s16  }
  0x51   : > { %305 = sbr.rel (%p8204_p3) target bundleno = 1257 (0x4e9), region = 48 }
  0x56   : > { %8120 = dma.done.wait (%p7913_p2), [#allocation3], 768  }
  0x57   : > { %8122 = vsyncadd (%p7913_p2), [#allocation3], 4294966528 }
  0x58   : > { %8124 = dma.done.wait (%p7913_p2), [#allocation5], 512  }
  0x59   : > { %8126 = vsyncadd (%p7913_p2), [#allocation5], 4294966784 }
  0x5a   : > { %8128 = dma.done.wait (%p7913_p2), [#allocation8], 1024  }
  0x5b   : > { %8130 = vsyncadd (%p7913_p2), [#allocation8], 4294966272 }
  0x5c   : > { %8132 = dma.done.wait (%p7913_p2), [#allocation11], 256  }
  0x5d   : > { %8134 = vsyncadd (%p7913_p2), [#allocation11], 4294967040  ;;  %p357_p3 = scmp.lt.s32.totalorder %s8199_s25, 3  ;;  %v11473_v0 = vmov 0.0   ;;  %vm549_vm0 = vcmask 1042432   ;;  %s8148_s16 = smov 1   ;;  %v453_v29 = vlaneseq }
  0x5e   : > { %656 = vmatprep.mubr.f32.mxu0 %v11473_v0  ;;  %733 = vmatprep.mubr.f32.mxu1 %v11473_v0  ;;  %vm542_vm1 = vcmask 23552   ;;  %v8358_v8 = vld [vmem:[#allocation2 + $0x10] sm:$0xff]  ;;  %v8381_v12 = vld [vmem:[#allocation2 + $0x18] sm:$0xf]  ;;  %s8149_s22 = smov 127   ;;  %v8150_v26 = vmov 0  }
  0x5f   : > { %s11755_s25 = smov (!%p357_p3, %s8199_s25), 3  ;;  %v3471_v24 = vld [vmem:[#allocation6 + $0x8] sm:$0xf]  ;;  %v3417_v25 = vld [vmem:[#allocation4 + $0x8] sm:$0xf]  ;;  %7948 = vset.pattern.permute.xlu1 %v8150_v26  ;;  %7947 = vset.pattern.permute.xlu0 %v8150_v26  ;;  %v3416_v27 = vld [vmem:[#allocation4] sm:$0xff] }
  0x60   : > { %s7868_s26 = smul.u32 84, %s11755_s25  ;;  %v3470_v28 = vld [vmem:[#allocation6] sm:$0xff]  ;;  %v8586_v30 = vand.u32 127, %v453_v29  ;;  %v8605_v40 = vld [vmem:[#allocation2 + $0x8] sm:$0xf]  ;;  %s8151_s23 = smov 2  }
  0x61   : > { %v8591_v35 = vld [vmem:[#allocation2] sm:$0xff]  ;;  %s8152_s27 = smov 126   ;;  %vm4041_vm7 = vcmask 1043456   ;;  %vm4034_vm8 = vcmask 97280   ;;  %s7869_s28 = smul.u32 336, %s11755_s25 }
  0x62   : > { %s8327_s15 = scalar_lea.vmem %s11465_s0, %s7868_s26  ;;  %11562 = vst [vmem:[#allocation16_spill] sm:$0xff] %v8586_v30  ;;  %vm455_vm2 = vcmp.lt.s32.totalorder %v8586_v30, 1  ;;  %vm497_vm3 = vcmp.ge.s32.totalorder %v8586_v30, 1  ;;  %vm2396_vm4 = vcmp.lt.s32.totalorder %v8586_v30, 127 }
  0x63   : > { %v8330_v1 = vld [vmem:[%s8327_s15 + $0x8] sm:$0x77]  ;;  %v8333_v2 = vld [vmem:[%s8327_s15] sm:$0x77]  ;;  %v8346_v5 = vld [vmem:[%s8327_s15 + $0x10] sm:$0x77]  ;;  %s11178_s9 = scalar_lea.vmem %s11472_s7, %s7869_s28 }
  0x64   : > { %415 = vrot.lane.b32.xlu0 %v8330_v1, %s8148_s16  ;;  %v8339_v3 = vcombine.high %v8333_v2, %v8333_v2  ;;  %v8343_v4 = vcombine.high %v8330_v1, %v8330_v1  ;;  %v8349_v6 = vld [vmem:[%s8327_s15 + $0x18] sm:$0x77]  ;;  %v8354_v7 = vld [vmem:[%s8327_s15 + $0x20] sm:$0x77]  ;;  %v8362_v9 = vcombine.high %v8346_v5, %v8346_v5  ;;  %v8390_v13 = vld [vmem:[%s8327_s15 + $0x28] sm:$0x77] }
  0x65   : > { %v8372_v10 = vcombine.high %v8349_v6, %v8349_v6  ;;  %v8378_v11 = vcombine.high %v8354_v7, %v8354_v7  ;;  %v8401_v14 = vld [vmem:[%s8327_s15 + $0x30] sm:$0x77]  ;;  %v8410_v15 = vcombine.high %v8390_v13, %v8390_v13  ;;  %v8424_v17 = vld [vmem:[%s8327_s15 + $0x38] sm:$0x77]  ;;  %v8444_v19 = vld [vmem:[%s8327_s15 + $0x40] sm:$0x77] }
  0x66   : > { %413 = vrot.lane.b32.xlu1 %v8339_v3, %s8148_s16  ;;  %7549 = vmatprep.subr.msk.mxu0 %vm549_vm0, %v8339_v3  ;;  %v8419_v16 = vcombine.high %v8401_v14, %v8401_v14  ;;  %v8439_v18 = vcombine.high %v8424_v17, %v8424_v17  ;;  %v8460_v20 = vcombine.high %v8444_v19, %v8444_v19  ;;  %v8472_v21 = vld [vmem:[%s8327_s15 + $0x50] sm:$0x7]  ;;  %v376_v22 = vld [vmem:[%s8327_s15 + $0x48] sm:$0x77] }
  0x67   : > { %7550 = vmatpush1.msk.msra.mxu0 %vm549_vm0, %v8333_v2  ;;  %7553 = vmatprep.subr.msk.mxu1 %vm549_vm0, %v8343_v4  ;;  %v400_v23 = vcombine.high %v376_v22, %v376_v22 }
  0x68   : > { %417 = vrot.lane.b32.xlu0 %v8343_v4, %s8148_s16  ;;  %7551 = vmatmul.mubr.msk.f32.vlgmr.msra.gmra.mxu0 %vm542_vm1, %v8358_v8 }
  0x69   : > { %662 = vmatprep.mubr.f32.mxu0 %v11473_v0  ;;  %7557 = vmatprep.subr.msk.mxu0 %vm549_vm0, %v8362_v9 }
  0x6a   : > { %423 = vrot.lane.b32.xlu1 %v8349_v6, %s8148_s16  ;;  %7558 = vmatpush1.msk.msra.mxu0 %vm549_vm0, %v8346_v5 }
  0x6b   : > { %7565 = vmatprep.subr.msk.mxu0 %vm549_vm0, %v8378_v11  ;;  %7554 = vmatpush1.msk.msra.mxu1 %vm549_vm0, %v8330_v1 }
  0x6c   : > { %425 = vrot.lane.b32.xlu0 %v8372_v10, %s8148_s16  ;;  %7552 = vmatmul.mubr.msk.f32.gmra.mxu0 %vm542_vm1, %v8381_v12 }
  0x6d   : > { %810 = vmatprep.mubr.f32.mxu0 %v11473_v0  ;;  %7555 = vmatmul.mubr.msk.f32.vlgmr.msra.gmra.mxu1 %vm542_vm1, %v8358_v8 }
  0x6e   : > { %421 = vrot.lane.b32.xlu1 %v8362_v9, %s8148_s16  ;;  %739 = vmatprep.mubr.f32.mxu1 %v11473_v0 }
  0x6f   : > { %7561 = vmatprep.subr.msk.mxu1 %vm549_vm0, %v8372_v10 }
  0x70   : > { %431 = vrot.lane.b32.xlu0 %v8390_v13, %s8148_s16  ;;  %7559 = vmatmul.mubr.msk.f32.vlgmr.msra.gmra.mxu0 %vm542_vm1, %v8358_v8 }
  0x71   : > { %816 = vmatprep.mubr.f32.mxu0 %v11473_v0  ;;  %7566 = vmatpush1.msk.msra.mxu0 %vm549_vm0, %v8354_v7 }
  0x72   : > { %433 = vrot.lane.b32.xlu1 %v8410_v15, %s8148_s16  ;;  %7573 = vmatprep.subr.msk.mxu0 %vm549_vm0, %v8419_v16 }
  0x73   : > { %7556 = vmatmul.mubr.msk.f32.gmra.mxu1 %vm542_vm1, %v8381_v12 }
  0x74   : > { %429 = vrot.lane.b32.xlu0 %v8378_v11, %s8148_s16  ;;  %7560 = vmatmul.mubr.msk.f32.gmra.mxu0 %vm542_vm1, %v8381_v12 }
  0x75   : > { %964 = vmatprep.mubr.f32.mxu0 %v11473_v0  ;;  %7562 = vmatpush1.msk.msra.mxu1 %vm549_vm0, %v8349_v6 }
  0x76   : > { %439 = vrot.lane.b32.xlu1 %v8424_v17, %s8148_s16  ;;  %887 = vmatprep.mubr.f32.mxu1 %v11473_v0 }
  0x77   : > { %7563 = vmatmul.mubr.msk.f32.vlgmr.msra.gmra.mxu1 %vm542_vm1, %v8358_v8  ;;  %7569 = vmatprep.subr.msk.mxu1 %vm549_vm0, %v8410_v15 }
  0x78   : > { %441 = vrot.lane.b32.xlu0 %v8439_v18, %s8148_s16  ;;  %7567 = vmatmul.mubr.msk.f32.vlgmr.msra.gmra.mxu0 %vm542_vm1, %v8358_v8 }
  0x79   : > { %970 = vmatprep.mubr.f32.mxu0 %v11473_v0  ;;  %7574 = vmatpush1.msk.msra.mxu0 %vm549_vm0, %v8401_v14 }
  0x7a   : > { %437 = vrot.lane.b32.xlu1 %v8419_v16, %s8148_s16  ;;  %7581 = vmatprep.subr.msk.mxu0 %vm549_vm0, %v8460_v20 }
  0x7b   : > { %893 = vmatprep.mubr.f32.mxu1 %v11473_v0  ;;  %7570 = vmatpush1.msk.msra.mxu1 %vm549_vm0, %v8390_v13 }
  0x7c   : > { %411 = vrot.lane.b32.xlu0 %v8333_v2, %s8148_s16  ;;  %7568 = vmatmul.mubr.msk.f32.gmra.mxu0 %vm542_vm1, %v8381_v12 }
  0x7d   : > { %1118 = vmatprep.mubr.f32.mxu0 %v11473_v0  ;;  %7564 = vmatmul.mubr.msk.f32.gmra.mxu1 %vm542_vm1, %v8381_v12 }
  0x7e   : > { %451 = vrot.lane.b32.xlu1 %v8472_v21, %s8148_s16  ;;  %1041 = vmatprep.mubr.f32.mxu1 %v11473_v0 }
  0x7f   : > { %7577 = vmatprep.subr.msk.mxu1 %vm549_vm0, %v8439_v18 }
  0x80   : > { %447 = vrot.lane.b32.xlu0 %v376_v22, %s8148_s16  ;;  %7575 = vmatmul.mubr.msk.f32.vlgmr.msra.gmra.mxu0 %vm542_vm1, %v8358_v8 }
  0x81   : > { %1124 = vmatprep.mubr.f32.mxu0 %v11473_v0  ;;  %7582 = vmatpush1.msk.msra.mxu0 %vm549_vm0, %v8444_v19 }
  0x82   : > { %449 = vrot.lane.b32.xlu1 %v400_v23, %s8148_s16  ;;  %7832 = vmatprep.subr.msk.mxu0 %vm549_vm0, %v8472_v21 }
  0x83   : > { %7571 = vmatmul.mubr.msk.f32.vlgmr.msra.gmra.mxu1 %vm542_vm1, %v8358_v8 }
  0x84   : > { %445 = vrot.lane.b32.xlu0 %v8460_v20, %s8148_s16  ;;  %7576 = vmatmul.mubr.msk.f32.gmra.mxu0 %vm542_vm1, %v8381_v12 }
  0x85   : > { %1272 = vmatprep.mubr.f32.mxu0 %v11473_v0  ;;  %1047 = vmatprep.mubr.f32.mxu1 %v11473_v0 }
  0x86   : > { %419 = vrot.lane.b32.xlu1 %v8346_v5, %s8148_s16  ;;  %7578 = vmatpush1.msk.msra.mxu1 %vm549_vm0, %v8424_v17 }
  0x87   : > { %7572 = vmatmul.mubr.msk.f32.gmra.mxu1 %vm542_vm1, %v8381_v12  ;;  %7585 = vmatprep.subr.msk.mxu1 %vm549_vm0, %v400_v23 }
  0x88   : > { %2356 = vrot.lane.b32.xlu0 %v8339_v3, %s8149_s22  ;;  %7583 = vmatmul.mubr.msk.f32.vlgmr.msra.gmra.mxu0 %vm542_vm1, %v8358_v8 }
  0x89   : > { %1278 = vmatprep.mubr.f32.mxu0 %v11473_v0  ;;  %7833 = vmatpush3.msk.msra.mxu0 %vm549_vm0, %v8472_v21 }
  0x8a   : > { %2358 = vrot.lane.b32.xlu1 %v8330_v1, %s8149_s22  ;;  %1195 = vmatprep.mubr.f32.mxu1 %v11473_v0 }
  0x8b   : > { %7579 = vmatmul.mubr.msk.f32.vlgmr.msra.gmra.mxu1 %vm542_vm1, %v8358_v8 }
  0x8c   : > { %2354 = vrot.lane.b32.xlu0 %v8333_v2, %s8149_s22  ;;  %7584 = vmatmul.mubr.msk.f32.gmra.mxu0 %vm542_vm1, %v8381_v12 }
  0x8d   : > { %7834 = vmatprep.mubr.msk.f32.mxu0 %vm542_vm1, %v8358_v8  ;;  %1201 = vmatprep.mubr.f32.mxu1 %v11473_v0 }
  0x8e   : > { %427 = vrot.lane.b32.xlu1 %v8354_v7, %s8148_s16  ;;  %7586 = vmatpush1.msk.msra.mxu1 %vm549_vm0, %v376_v22 }
  0x8f   : > { %7580 = vmatmul.mubr.msk.f32.gmra.mxu1 %vm542_vm1, %v8381_v12 }
  0x90   : > { %2364 = vrot.lane.b32.xlu0 %v8362_v9, %s8149_s22  ;;  %7835 = vmatmul.mubr.msk.f32.vlgmr.msra.gmra.mxu0 %vm542_vm1, %v8381_v12 }
  0x91   : > { %1647 = vmatprep.mubr.f32.mxu0 %v11473_v0  ;;  %1349 = vmatprep.mubr.f32.mxu1 %v11473_v0 }
  0x92   : > { %2366 = vrot.lane.b32.xlu1 %v8349_v6, %s8149_s22 }
  0x93   : > { %7587 = vmatmul.mubr.msk.f32.vlgmr.msra.gmra.mxu1 %vm542_vm1, %v8358_v8 }
  0x94   : > { %2362 = vrot.lane.b32.xlu0 %v8346_v5, %s8149_s22  ;;  %1355 = vmatprep.mubr.f32.mxu1 %v11473_v0 }
  0x96   : > { %435 = vrot.lane.b32.xlu1 %v8401_v14, %s8148_s16 }
  0x97   : > { %7588 = vmatmul.mubr.msk.f32.gmra.mxu1 %vm542_vm1, %v8381_v12  ;;  %v8723_v12 = vld [vmem:[#allocation2 + $0x20] sm:$0xff] }
  0x98   : > { %2372 = vrot.lane.b32.xlu0 %v8378_v11, %s8149_s22  ;;  %1570 = vmatprep.mubr.f32.mxu1 %v11473_v0 }
  0x9a   : > { %2374 = vrot.lane.b32.xlu1 %v8390_v13, %s8149_s22 }
  0x9c   : > { %2370 = vrot.lane.b32.xlu0 %v8354_v7, %s8149_s22 }
  0x9e   : > { %443 = vrot.lane.b32.xlu1 %v8444_v19, %s8148_s16 }
  0xa0   : > { %2380 = vrot.lane.b32.xlu0 %v8419_v16, %s8149_s22 }
  0xa2   : > { %2382 = vrot.lane.b32.xlu1 %v8424_v17, %s8149_s22  ;;  %v8742_v17 = vld [vmem:[#allocation2 + $0x28] sm:$0xf] }
  0xa4   : > { %2378 = vrot.lane.b32.xlu0 %v8401_v14, %s8149_s22 }
  0xa6   : > { %2388 = vrot.lane.b32.xlu1 %v8460_v20, %s8149_s22 }
  0xa8   : > { %2390 = vrot.lane.b32.xlu0 %v376_v22, %s8149_s22 }
  0xaa   : > { %2386 = vrot.lane.b32.xlu1 %v8444_v19, %s8149_s22 }
  0xac   : > { %2360 = vrot.lane.b32.xlu0 %v8343_v4, %s8149_s22 }
  0xae   : > { %2394 = vrot.lane.b32.xlu1 %v8472_v21, %s8149_s22 }
  0xb0   : > { %2368 = vrot.lane.b32.xlu0 %v8372_v10, %s8149_s22 }
  0xb2   : > { %2376 = vrot.lane.b32.xlu1 %v8410_v15, %s8149_s22 }
  0xb4   : > { %2384 = vrot.lane.b32.xlu0 %v8439_v18, %s8149_s22 }
  0xb6   : > { %2392 = vrot.lane.b32.xlu1 %v400_v23, %s8149_s22 }
  0xb8   : > { %3425 = vperm.xlu0 %7947, %v3417_v25  }
  0xba   : > { %3479 = vperm.xlu1 %7948, %v3471_v24  }
  0xbc   : > { %3474 = vperm.xlu0 %7947, %v3470_v28  }
  0xbe   : > { %3420 = vperm.xlu1 %7948, %v3416_v27  }
  0xd6   : > { %v416_v31 = vpop.permute.xlu0 %415 }
  0xd8   : > { %v414_v32 = vpop.permute.xlu1 %413 }
  0xd9   : > { %v474_v36 = vsel %vm455_vm2, %v414_v32, %v416_v31 }
  0xda   : > { %v418_v33 = vpop.permute.xlu0 %417 }
  0xdb   : > { %v473_v34 = vsel %vm455_vm2, %v416_v31, %v418_v33 }
  0xdc   : > { %v424_v37 = vpop.permute.xlu1 %423  ;;  %7596 = vmatprep.subr.msk.mxu0 %vm549_vm0, %v473_v34 }
  0xdd   : > { %7597 = vmatpush1.msk.msra.mxu0 %vm549_vm0, %v474_v36 }
  0xde   : > { %v8597_v38 = vpop.permute.xlu0 %425  ;;  %7598 = vmatmul.mubr.msk.f32.vlgmr.msra.gmra.mxu0 %vm542_vm1, %v8591_v35 }
  0xdf   : > { %v469_v39 = vsel %vm455_vm2, %v424_v37, %v8597_v38  ;;  %1653 = vmatprep.mubr.f32.mxu0 %v11473_v0 }
  0xe0   : > { %v422_v41 = vpop.permute.xlu1 %421  ;;  %7604 = vmatprep.subr.msk.mxu0 %vm549_vm0, %v469_v39 }
  0xe1   : > { %v470_v42 = vsel %vm455_vm2, %v422_v41, %v424_v37 }
  0xe2   : > { %v432_v43 = vpop.permute.xlu0 %431  ;;  %7599 = vmatmul.mubr.msk.f32.gmra.mxu0 %vm542_vm1, %v8605_v40 }
  0xe3   : > { %7605 = vmatpush1.msk.msra.mxu0 %vm549_vm0, %v470_v42  ;;  %1801 = vmatprep.mubr.f32.mxu0 %v11473_v0 }
  0xe4   : > { %v8614_v44 = vpop.permute.xlu1 %433 }
  0xe5   : > { %v465_v45 = vsel %vm455_vm2, %v432_v43, %v8614_v44 }
  0xe6   : > { %v8619_v46 = vpop.permute.xlu0 %429  ;;  %7606 = vmatmul.mubr.msk.f32.vlgmr.msra.gmra.mxu0 %vm542_vm1, %v8591_v35  ;;  %7612 = vmatprep.subr.msk.mxu0 %vm549_vm0, %v465_v45 }
  0xe7   : > { %v466_v47 = vsel %vm455_vm2, %v8619_v46, %v432_v43  ;;  %1807 = vmatprep.mubr.f32.mxu0 %v11473_v0 }
  0xe8   : > { %v440_v48 = vpop.permute.xlu1 %439  ;;  %7613 = vmatpush1.msk.msra.mxu0 %vm549_vm0, %v466_v47 }
  0xea   : > { %v8629_v49 = vpop.permute.xlu0 %441  ;;  %7607 = vmatmul.mubr.msk.f32.gmra.mxu0 %vm542_vm1, %v8605_v40 }
  0xeb   : > { %v461_v50 = vsel %vm455_vm2, %v440_v48, %v8629_v49  ;;  %1955 = vmatprep.mubr.f32.mxu0 %v11473_v0 }
  0xec   : > { %v8637_v51 = vpop.permute.xlu1 %437  ;;  %7620 = vmatprep.subr.msk.mxu0 %vm549_vm0, %v461_v50 }
  0xed   : > { %v462_v52 = vsel %vm455_vm2, %v8637_v51, %v440_v48 }
  0xee   : > { %v412_v53 = vpop.permute.xlu0 %411  ;;  %7614 = vmatmul.mubr.msk.f32.vlgmr.msra.gmra.mxu0 %vm542_vm1, %v8591_v35 }
  0xef   : > { %7621 = vmatpush1.msk.msra.mxu0 %vm549_vm0, %v462_v52  ;;  %v475_v54 = vsel %vm455_vm2, %v412_v53, %v414_v32  ;;  %1961 = vmatprep.mubr.f32.mxu0 %v11473_v0 }
  0xf0   : > { %7592 = vmatprep.subr.msk.mxu1 %vm549_vm0, %v475_v54  ;;  %v8651_v55 = vpop.permute.xlu1 %451 }
  0xf1   : > { %v476_v56 = vsel %vm455_vm2, %v8651_v55, %v412_v53 }
  0xf2   : > { %v518_v57 = vsel %vm497_vm3, %v476_v56, 0.0  ;;  %v448_v58 = vpop.permute.xlu0 %447  ;;  %7615 = vmatmul.mubr.msk.f32.gmra.mxu0 %vm542_vm1, %v8605_v40 }
  0xf3   : > { %7593 = vmatpush1.msk.msra.mxu1 %vm549_vm0, %v518_v57  ;;  %2109 = vmatprep.mubr.f32.mxu0 %v11473_v0 }
  0xf4   : > { %7594 = vmatmul.mubr.msk.f32.vlgmr.msra.gmra.mxu1 %vm542_vm1, %v8591_v35  ;;  %v8662_v59 = vpop.permute.xlu1 %449 }
  0xf5   : > { %v457_v60 = vsel %vm455_vm2, %v448_v58, %v8662_v59  ;;  %1576 = vmatprep.mubr.f32.mxu1 %v11473_v0  ;;  %v456_v31 = vsel %vm455_vm2, %v8662_v59, %v8651_v55 }
  0xf6   : > { %v8668_v61 = vpop.permute.xlu0 %445  ;;  %7622 = vmatmul.mubr.msk.f32.vlgmr.msra.gmra.mxu0 %vm542_vm1, %v8591_v35  ;;  %7628 = vmatprep.subr.msk.mxu0 %vm549_vm0, %v457_v60 }
  0xf7   : > { %v458_v62 = vsel %vm455_vm2, %v8668_v61, %v448_v58  ;;  %2115 = vmatprep.mubr.f32.mxu0 %v11473_v0 }
  0xf8   : > { %7595 = vmatmul.mubr.msk.f32.gmra.mxu1 %vm542_vm1, %v8605_v40  ;;  %v420_v63 = vpop.permute.xlu1 %419  ;;  %7629 = vmatpush1.msk.msra.mxu0 %vm549_vm0, %v458_v62 }
  0xf9   : > { %v472_v1 = vsel %vm455_vm2, %v418_v33, %v420_v63  ;;  %v471_v2 = vsel %vm455_vm2, %v420_v63, %v422_v41  ;;  %1724 = vmatprep.mubr.f32.mxu1 %v11473_v0  ;;  %v8822_v41 = vadd.s32 2560, %v8586_v30 }
  0xfa   : > { %v2357_v3 = vpop.permute.xlu0 %2356  ;;  %7600 = vmatprep.subr.msk.mxu1 %vm549_vm0, %v471_v2  ;;  %7623 = vmatmul.mubr.msk.f32.gmra.mxu0 %vm542_vm1, %v8605_v40 }
  0xfb   : > { %7601 = vmatpush1.msk.msra.mxu1 %vm549_vm0, %v472_v1  ;;  %2263 = vmatprep.mubr.f32.mxu0 %v11473_v0  ;;  %11563 = vst [vmem:[#allocation17_spill] sm:$0xff] %v8822_v41  ;;  %vm2438_vm5 = vcmp.lt.s32.totalorder %v8822_v41, 2687 }
  0xfc   : > { %7602 = vmatmul.mubr.msk.f32.vlgmr.msra.gmra.mxu1 %vm542_vm1, %v8591_v35  ;;  %v8693_v4 = vpop.permute.xlu1 %2358 }
  0xfd   : > { %v2415_v5 = vsel %vm2396_vm4, %v2357_v3, %v8693_v4  ;;  %1730 = vmatprep.mubr.f32.mxu1 %v11473_v0 }
  0xfe   : > { %v8699_v6 = vpop.permute.xlu0 %2354  ;;  %7630 = vmatmul.mubr.msk.f32.vlgmr.msra.gmra.mxu0 %vm542_vm1, %v8591_v35  ;;  %7635 = vmatprep.subr.msk.mxu0 %vm549_vm0, %v2415_v5 }
  0xff   : > { %v2416_v7 = vsel %vm2396_vm4, %v8699_v6, %v2357_v3  ;;  %2269 = vmatprep.mubr.f32.mxu0 %v11473_v0 }
 0x100   : > { %7603 = vmatmul.mubr.msk.f32.gmra.mxu1 %vm542_vm1, %v8605_v40  ;;  %v428_v8 = vpop.permute.xlu1 %427  ;;  %7636 = vmatpush1.msk.msra.mxu0 %vm549_vm0, %v2416_v7 }
 0x101   : > { %v468_v9 = vsel %vm455_vm2, %v8597_v38, %v428_v8  ;;  %v467_v10 = vsel %vm455_vm2, %v428_v8, %v8619_v46  ;;  %1878 = vmatprep.mubr.f32.mxu1 %v11473_v0 }
 0x102   : > { %v2365_v11 = vpop.permute.xlu0 %2364  ;;  %7608 = vmatprep.subr.msk.mxu1 %vm549_vm0, %v467_v10  ;;  %7631 = vmatmul.mubr.msk.f32.gmra.mxu0 %vm542_vm1, %v8605_v40 }
 0x103   : > { %7609 = vmatpush1.msk.msra.mxu1 %vm549_vm0, %v468_v9  ;;  %2593 = vmatprep.mubr.f32.mxu0 %v11473_v0 }
 0x104   : > { %7610 = vmatmul.mubr.msk.f32.vlgmr.msra.gmra.mxu1 %vm542_vm1, %v8591_v35  ;;  %v8727_v13 = vpop.permute.xlu1 %2366 }
 0x105   : > { %v2411_v14 = vsel %vm2396_vm4, %v2365_v11, %v8727_v13  ;;  %1884 = vmatprep.mubr.f32.mxu1 %v11473_v0 }
 0x106   : > { %v8733_v15 = vpop.permute.xlu0 %2362  ;;  %7637 = vmatmul.mubr.msk.f32.vlgmr.msra.gmra.mxu0 %vm542_vm1, %v8723_v12  ;;  %7643 = vmatprep.subr.msk.mxu0 %vm549_vm0, %v2411_v14 }
 0x107   : > { %v2412_v16 = vsel %vm2396_vm4, %v8733_v15, %v2365_v11  ;;  %2599 = vmatprep.mubr.f32.mxu0 %v11473_v0 }
 0x108   : > { %7611 = vmatmul.mubr.msk.f32.gmra.mxu1 %vm542_vm1, %v8605_v40  ;;  %v436_v18 = vpop.permute.xlu1 %435  ;;  %7644 = vmatpush1.msk.msra.mxu0 %vm549_vm0, %v2412_v16 }
 0x109   : > { %v464_v19 = vsel %vm455_vm2, %v8614_v44, %v436_v18  ;;  %v463_v20 = vsel %vm455_vm2, %v436_v18, %v8637_v51  ;;  %2032 = vmatprep.mubr.f32.mxu1 %v11473_v0 }
 0x10a   : > { %v2373_v21 = vpop.permute.xlu0 %2372  ;;  %7616 = vmatprep.subr.msk.mxu1 %vm549_vm0, %v463_v20  ;;  %7638 = vmatmul.mubr.msk.f32.gmra.mxu0 %vm542_vm1, %v8742_v17 }
 0x10b   : > { %7617 = vmatpush1.msk.msra.mxu1 %vm549_vm0, %v464_v19  ;;  %2747 = vmatprep.mubr.f32.mxu0 %v11473_v0 }
 0x10c   : > { %7618 = vmatmul.mubr.msk.f32.vlgmr.msra.gmra.mxu1 %vm542_vm1, %v8591_v35  ;;  %v8761_v22 = vpop.permute.xlu1 %2374 }
 0x10d   : > { %v2407_v23 = vsel %vm2396_vm4, %v2373_v21, %v8761_v22  ;;  %2038 = vmatprep.mubr.f32.mxu1 %v11473_v0 }
 0x10e   : > { %v2371_v24 = vpop.permute.xlu0 %2370  ;;  %7645 = vmatmul.mubr.msk.f32.vlgmr.msra.gmra.mxu0 %vm542_vm1, %v8723_v12  ;;  %7651 = vmatprep.subr.msk.mxu0 %vm549_vm0, %v2407_v23 }
 0x10f   : > { %v2408_v25 = vsel %vm2396_vm4, %v2371_v24, %v2373_v21  ;;  %2753 = vmatprep.mubr.f32.mxu0 %v11473_v0 }
 0x110   : > { %7619 = vmatmul.mubr.msk.f32.gmra.mxu1 %vm542_vm1, %v8605_v40  ;;  %v444_v26 = vpop.permute.xlu1 %443  ;;  %7652 = vmatpush1.msk.msra.mxu0 %vm549_vm0, %v2408_v25 }
 0x111   : > { %v460_v27 = vsel %vm455_vm2, %v8629_v49, %v444_v26  ;;  %v459_v28 = vsel %vm455_vm2, %v444_v26, %v8668_v61  ;;  %2186 = vmatprep.mubr.f32.mxu1 %v11473_v0 }
 0x112   : > { %v2381_v29 = vpop.permute.xlu0 %2380  ;;  %7624 = vmatprep.subr.msk.mxu1 %vm549_vm0, %v459_v28  ;;  %7646 = vmatmul.mubr.msk.f32.gmra.mxu0 %vm542_vm1, %v8742_v17 }
 0x113   : > { %7625 = vmatpush1.msk.msra.mxu1 %vm549_vm0, %v460_v27  ;;  %2901 = vmatprep.mubr.f32.mxu0 %v11473_v0 }
 0x114   : > { %7626 = vmatmul.mubr.msk.f32.vlgmr.msra.gmra.mxu1 %vm542_vm1, %v8591_v35  ;;  %7837 = vmatprep.subr.msk.mxu1 %vm549_vm0, %v456_v31  ;;  %v8795_v32 = vpop.permute.xlu1 %2382 }
 0x115   : > { %7838 = vmatpush3.msk.msra.mxu1 %vm549_vm0, %v456_v31  ;;  %v2403_v33 = vsel %vm2396_vm4, %v2381_v29, %v8795_v32  ;;  %2192 = vmatprep.mubr.f32.mxu1 %v11473_v0 }
 0x116   : > { %v2379_v34 = vpop.permute.xlu0 %2378  ;;  %7653 = vmatmul.mubr.msk.f32.vlgmr.msra.gmra.mxu0 %vm542_vm1, %v8723_v12  ;;  %7659 = vmatprep.subr.msk.mxu0 %vm549_vm0, %v2403_v33 }
 0x117   : > { %v2404_v36 = vsel %vm2396_vm4, %v2379_v34, %v2381_v29  ;;  %2907 = vmatprep.mubr.f32.mxu0 %v11473_v0 }
 0x118   : > { %7627 = vmatmul.mubr.msk.f32.gmra.mxu1 %vm542_vm1, %v8605_v40  ;;  %v2389_v37 = vpop.permute.xlu1 %2388  ;;  %7660 = vmatpush1.msk.msra.mxu0 %vm549_vm0, %v2404_v36 }
 0x119   : > { %7839 = vmatprep.mubr.msk.f32.mxu1 %vm542_vm1, %v8591_v35 }
 0x11a   : > { %v8813_v38 = vpop.permute.xlu0 %2390  ;;  %7654 = vmatmul.mubr.msk.f32.gmra.mxu0 %vm542_vm1, %v8742_v17 }
 0x11b   : > { %3055 = vmatprep.mubr.f32.mxu0 %v11473_v0  ;;  %v2399_v39 = vsel %vm2396_vm4, %v2389_v37, %v8813_v38 }
 0x11c   : > { %7840 = vmatmul.mubr.msk.f32.vlgmr.msra.gmra.mxu1 %vm542_vm1, %v8605_v40  ;;  %v2387_v42 = vpop.permute.xlu1 %2386  ;;  %7667 = vmatprep.subr.msk.mxu0 %vm549_vm0, %v2399_v39 }
 0x11d   : > { %v2400_v35 = vsel %vm2396_vm4, %v2387_v42, %v2389_v37  ;;  %2670 = vmatprep.mubr.f32.mxu1 %v11473_v0 }
 0x11e   : > { %v2361_v43 = vpop.permute.xlu0 %2360  ;;  %7661 = vmatmul.mubr.msk.f32.vlgmr.msra.gmra.mxu0 %vm542_vm1, %v8723_v12 }
 0x11f   : > { %v2414_v44 = vsel %vm2396_vm4, %v8693_v4, %v2361_v43  ;;  %v2413_v40 = vsel %vm2396_vm4, %v2361_v43, %v8733_v15  ;;  %3061 = vmatprep.mubr.f32.mxu0 %v11473_v0  ;;  %7668 = vmatpush1.msk.msra.mxu0 %vm549_vm0, %v2400_v35 }
 0x120   : > { %7639 = vmatprep.subr.msk.mxu1 %vm549_vm0, %v2413_v40  ;;  %v2395_v45 = vpop.permute.xlu1 %2394 }
 0x121   : > { %v2417_v46 = vsel %vm2396_vm4, %v2395_v45, %v8699_v6  ;;  %7640 = vmatpush1.msk.msra.mxu1 %vm549_vm0, %v2414_v44 }
 0x122   : > { %v2369_v47 = vpop.permute.xlu0 %2368  ;;  %7641 = vmatmul.mubr.msk.f32.vlgmr.msra.gmra.mxu1 %vm542_vm1, %v8723_v12  ;;  %7662 = vmatmul.mubr.msk.f32.gmra.mxu0 %vm542_vm1, %v8742_v17  ;;  %v2459_v48 = vsel %vm2438_vm5, %v2417_v46, 0.0 }
 0x123   : > { %v2410_v49 = vsel %vm2396_vm4, %v8727_v13, %v2369_v47  ;;  %7842 = vmatprep.subr.msk.mxu0 %vm549_vm0, %v2459_v48  ;;  %v2409_v50 = vsel %vm2396_vm4, %v2369_v47, %v2371_v24  ;;  %2676 = vmatprep.mubr.f32.mxu1 %v11473_v0 }
 0x124   : > { %7647 = vmatprep.subr.msk.mxu1 %vm549_vm0, %v2409_v50  ;;  %v2377_v51 = vpop.permute.xlu1 %2376  ;;  %3209 = vmatprep.mubr.f32.mxu0 %v11473_v0 }
 0x125   : > { %7648 = vmatpush1.msk.msra.mxu1 %vm549_vm0, %v2410_v49  ;;  %v2405_v52 = vsel %vm2396_vm4, %v2377_v51, %v2379_v34  ;;  %v2406_v54 = vsel %vm2396_vm4, %v8761_v22, %v2377_v51 }
 0x126   : > { %7642 = vmatmul.mubr.msk.f32.gmra.mxu1 %vm542_vm1, %v8742_v17  ;;  %7655 = vmatprep.subr.msk.mxu1 %vm549_vm0, %v2405_v52  ;;  %v2385_v53 = vpop.permute.xlu0 %2384 }
 0x127   : > { %7669 = vmatmul.mubr.msk.f32.vlgmr.msra.gmra.mxu0 %vm542_vm1, %v8723_v12  ;;  %2824 = vmatprep.mubr.f32.mxu1 %v11473_v0  ;;  %v2401_v55 = vsel %vm2396_vm4, %v2385_v53, %v2387_v42  ;;  %v2402_v57 = vsel %vm2396_vm4, %v8795_v32, %v2385_v53 }
 0x128   : > { %7843 = vmatpush3.msk.msra.mxu0 %vm549_vm0, %v2459_v48  ;;  %3215 = vmatprep.mubr.f32.mxu0 %v11473_v0  ;;  %v2393_v56 = vpop.permute.xlu1 %2392  ;;  %v8920_v60 = vpop.f32.mrf.mxu0 }
 0x129   : > { %v2397_v58 = vsel %vm2396_vm4, %v2393_v56, %v2395_v45  ;;  %v2398_v59 = vsel %vm2396_vm4, %v8813_v38, %v2393_v56 }
 0x12a   : > { %7649 = vmatmul.mubr.msk.f32.vlgmr.msra.gmra.mxu1 %vm542_vm1, %v8723_v12  ;;  %v8923_v61 = vpop.f32.mrf.mxu0 }
 0x12b   : > { %7656 = vmatpush1.msk.msra.mxu1 %vm549_vm0, %v2406_v54  ;;  %7670 = vmatmul.mubr.msk.f32.gmra.mxu0 %vm542_vm1, %v8742_v17 }
 0x12c   : > { %2830 = vmatprep.mubr.f32.mxu1 %v11473_v0  ;;  %7844 = vmatprep.mubr.msk.f32.mxu0 %vm542_vm1, %v8723_v12  ;;  %v8925_v62 = vpop.f32.mrf.mxu0 }
 0x12d   : > { %7663 = vmatprep.subr.msk.mxu1 %vm549_vm0, %v2401_v55  ;;  %v8937_v5 = vpop.f32.mrf.mxu1 }
 0x12e   : > { %7650 = vmatmul.mubr.msk.f32.gmra.mxu1 %vm542_vm1, %v8742_v17  ;;  %v8927_v63 = vpop.f32.mrf.mxu0 }
 0x12f   : > { %7845 = vmatmul.mubr.msk.f32.vlgmr.msra.gmra.mxu0 %vm542_vm1, %v8742_v17  ;;  %2978 = vmatprep.mubr.f32.mxu1 %v11473_v0  ;;  %v8941_v7 = vpop.f32.mrf.mxu1 }
 0x130   : > { %4246 = vmatprep.mubr.f32.mxu0 %v11473_v0  ;;  %v8929_v1 = vpop.f32.mrf.mxu0 }
 0x132   : > { %7657 = vmatmul.mubr.msk.f32.vlgmr.msra.gmra.mxu1 %vm542_vm1, %v8723_v12  ;;  %v8931_v2 = vpop.f32.mrf.mxu0 }
 0x133   : > { %7664 = vmatpush1.msk.msra.mxu1 %vm549_vm0, %v2402_v57  ;;  %2984 = vmatprep.mubr.f32.mxu1 %v11473_v0  ;;  %v8945_v9 = vpop.f32.mrf.mxu1 }
 0x134   : > { %7671 = vmatprep.subr.msk.mxu1 %vm549_vm0, %v2397_v58  ;;  %v8933_v3 = vpop.f32.mrf.mxu0 }
 0x135   : > { %v8949_v11 = vpop.f32.mrf.mxu1 }
 0x136   : > { %7658 = vmatmul.mubr.msk.f32.gmra.mxu1 %vm542_vm1, %v8742_v17  ;;  %v8935_v4 = vpop.f32.mrf.mxu0 }
 0x137   : > { %3132 = vmatprep.mubr.f32.mxu1 %v11473_v0  ;;  %v8953_v13 = vpop.f32.mrf.mxu1 }
 0x138   : > { %v8939_v6 = vpop.f32.mrf.mxu0 }
 0x139   : > { %v8957_v15 = vpop.f32.mrf.mxu1 }
 0x13a   : > { %7665 = vmatmul.mubr.msk.f32.vlgmr.msra.gmra.mxu1 %vm542_vm1, %v8723_v12  ;;  %v8943_v8 = vpop.f32.mrf.mxu0 }
 0x13b   : > { %7672 = vmatpush1.msk.msra.mxu1 %vm549_vm0, %v2398_v59  ;;  %3138 = vmatprep.mubr.f32.mxu1 %v11473_v0 }
 0x13c   : > { %v8947_v10 = vpop.f32.mrf.mxu0 }
 0x13e   : > { %7666 = vmatmul.mubr.msk.f32.gmra.mxu1 %vm542_vm1, %v8742_v17 }
 0x13f   : > { %3286 = vmatprep.mubr.f32.mxu1 %v11473_v0 }
 0x142   : > { %7673 = vmatmul.mubr.msk.f32.vlgmr.msra.gmra.mxu1 %vm542_vm1, %v8723_v12  ;;  %v8951_v12 = vpop.f32.mrf.mxu0 }
 0x143   : > { %3292 = vmatprep.mubr.f32.mxu1 %v11473_v0 }
 0x144   : > { %v8955_v14 = vpop.f32.mrf.mxu0 }
 0x146   : > { %7674 = vmatmul.mubr.msk.f32.gmra.mxu1 %vm542_vm1, %v8742_v17  ;;  %v8959_v16 = vpop.f32.mrf.mxu0  ;;  %v8961_v17 = vpop.f32.mrf.mxu1 }
 0x147   : > { %4169 = vmatprep.mubr.f32.mxu1 %v11473_v0  ;;  %11564 = vst [vmem:[#allocation18_spill] sm:$0xff] %v8959_v16 }
 0x148   : > { %v8963_v18 = vpop.f32.mrf.mxu0  ;;  %v8965_v19 = vpop.f32.mrf.mxu1 }
 0x14a   : > { %v8967_v20 = vpop.f32.mrf.mxu0  ;;  %v8969_v21 = vpop.f32.mrf.mxu1 }
 0x14b   : > { %11565 = vst [vmem:[#allocation19_spill] sm:$0xff] %v8967_v20 }
 0x14c   : > { %v8971_v22 = vpop.f32.mrf.mxu0  ;;  %v8973_v23 = vpop.f32.mrf.mxu1 }
 0x14d   : > { %11566 = vst [vmem:[#allocation20_spill] sm:$0xff] %v8971_v22 }
 0x14e   : > { %v8975_v24 = vpop.f32.mrf.mxu0  ;;  %v8977_v25 = vpop.f32.mrf.mxu1 }
 0x14f   : > { %11567 = vst [vmem:[#allocation21_spill] sm:$0xff] %v8975_v24 }
 0x150   : > { %v8979_v26 = vpop.f32.mrf.mxu0  ;;  %v8981_v27 = vpop.f32.mrf.mxu1 }
 0x151   : > { %11568 = vst [vmem:[#allocation22_spill] sm:$0xff] %v8979_v26 }
 0x152   : > { %v8983_v28 = vpop.f32.mrf.mxu0  ;;  %v8985_v29 = vpop.f32.mrf.mxu1 }
 0x153   : > { %11569 = vst [vmem:[#allocation23_spill] sm:$0xff] %v8983_v28  ;;  %11570 = vst [vmem:[#allocation24_spill] sm:$0xff] %v8985_v29 }
 0x154   : > { %v8987_v31 = vpop.f32.mrf.mxu0  ;;  %v8989_v32 = vpop.f32.mrf.mxu1 }
 0x155   : > { %11571 = vst [vmem:[#allocation25_spill] sm:$0xff] %v8987_v31  ;;  %11572 = vst [vmem:[#allocation26_spill] sm:$0xff] %v8989_v32  ;;  %v9039_v31 = vpop.permute.xlu1 %3479 }
 0x156   : > { %v8991_v33 = vpop.f32.mrf.mxu0  ;;  %v8993_v34 = vpop.f32.mrf.mxu1 }
 0x157   : > { %11573 = vst [vmem:[#allocation27_spill] sm:$0xff] %v8991_v33  ;;  %11574 = vst [vmem:[#allocation28_spill] sm:$0xff] %v8993_v34 }
 0x158   : > { %v8999_v38 = vpop.f32.mrf.mxu1 }
 0x159   : > { %11575 = vst [vmem:[#allocation29_spill] sm:$0xff] %v8999_v38 }
 0x15a   : > { %v9005_v35 = vpop.f32.mrf.mxu1 }
 0x15b   : > { %11576 = vst [vmem:[#allocation30_spill] sm:$0xff] %v9005_v35 }
 0x15c   : > { %v9011_v40 = vpop.f32.mrf.mxu1 }
 0x15d   : > { %11577 = vst [vmem:[#allocation31_spill] sm:$0xff] %v9011_v40  ;;  %v9045_v40 = vpop.permute.xlu0 %3425 }
 0x15e   : > { %v9017_v47 = vpop.f32.mrf.mxu1 }
 0x15f   : > { %11578 = vst [vmem:[#allocation32_spill] sm:$0xff] %v9017_v47 }
 0x160   : > { %v1359_v50 = vpop.f32.mrf.mxu1 }
 0x19e   : > { %v8995_v36 = vpop.f32.mrf.mxu0 }
 0x1a0   : > { %v8997_v37 = vpop.f32.mrf.mxu0 }
 0x1a2   : > { %v9001_v39 = vpop.f32.mrf.mxu0 }
 0x1a4   : > { %v9003_v42 = vpop.f32.mrf.mxu0 }
 0x1a6   : > { %v9007_v43 = vpop.f32.mrf.mxu0 }
 0x1a8   : > { %v9009_v44 = vpop.f32.mrf.mxu0 }
 0x1aa   : > { %v9013_v45 = vpop.f32.mrf.mxu0 }
 0x1ac   : > { %v9015_v46 = vpop.f32.mrf.mxu0 }
 0x1ae   : > { %v9019_v48 = vpop.f32.mrf.mxu0 }
 0x1b0   : > { %v9021_v49 = vpop.f32.mrf.mxu0 }
 0x1b2   : > { %v9023_v51 = vpop.f32.mrf.mxu0 }
 0x1b4   : > { %v1572_v52 = vpop.f32.mrf.mxu1  ;;  %v9025_v53 = vpop.f32.mrf.mxu0 }
 0x1b6   : > { %v1574_v54 = vpop.f32.mrf.mxu1  ;;  %v9027_v55 = vpop.f32.mrf.mxu0 }
 0x1b7   : > { %11579 = vst [vmem:[#allocation33_spill] sm:$0xff] %v9027_v55 }
 0x1b8   : > { %v1578_v56 = vpop.f32.mrf.mxu1  ;;  %v9029_v57 = vpop.f32.mrf.mxu0 }
 0x1b9   : > { %11580 = vst [vmem:[#allocation34_spill] sm:$0xff] %v9029_v57  ;;  %v1579_v16 = vadd.f32 %v1578_v56, %v8925_v62 }
 0x1ba   : > { %v1580_v58 = vpop.f32.mrf.mxu1  ;;  %v9031_v59 = vpop.f32.mrf.mxu0 }
 0x1bb   : > { %11581 = vst [vmem:[#allocation35_spill] sm:$0xff] %v9031_v59  ;;  %v9061_v59 = vpop.permute.xlu0 %3474 }
 0x1bc   : > { %v1726_v0 = vpop.f32.mrf.mxu1  ;;  %v9033_v30 = vpop.f32.mrf.mxu0 }
 0x1bd   : > { %11582 = vst [vmem:[#allocation36_spill] sm:$0xff] %v9033_v30  ;;  %v1573_v30 = vadd.f32 %v1572_v52, %v8920_v60  ;;  %v1581_v52 = vadd.f32 %v1580_v58, %v8927_v63 }
 0x1be   : > { %v9035_v41 = vpop.f32.mrf.mxu1  ;;  %v9037_v33 = vpop.f32.mrf.mxu0 }
 0x1bf   : > { %11583 = vst [vmem:[#allocation37_spill] sm:$0xff] %v9037_v33  ;;  %v9056_v33 = vpop.permute.xlu1 %3420 }
 0x1c0   : > { %v9041_v47 = vpop.f32.mrf.mxu1  ;;  %v9043_v35 = vpop.f32.mrf.mxu0 }
 0x1c1   : > { %11584 = vst [vmem:[#allocation38_spill] sm:$0xff] %v9043_v35  ;;  %v1575_v35 = vadd.f32 %v1574_v54, %v8923_v61 }
 0x1c2   : > { %v9047_v24 = vpop.f32.mrf.mxu1  ;;  %v9049_v28 = vpop.f32.mrf.mxu0 }
 0x1c3   : > { %11585 = vst [vmem:[#allocation39_spill] sm:$0xff] %v9049_v28 }
 0x1c4   : > { %v9051_v38 = vpop.f32.mrf.mxu1  ;;  %v2273_v26 = vpop.f32.mrf.mxu0 }
 0x1c5   : > { %v9054_v57 = vadd.f32 %v2273_v26, %v1359_v50 }
 0x1c6   : > { %v9058_v32 = vpop.f32.mrf.mxu1  ;;  %v2595_v22 = vpop.f32.mrf.mxu0 }
 0x1c7   : > { %11586 = vst [vmem:[#allocation40_spill] sm:$0xff] %v9054_v57  ;;  %v3374_v20 = vadd.f32 %v2595_v22, %v1573_v30 }
 0x1c8   : > { %v9063_v34 = vpop.f32.mrf.mxu1  ;;  %v2597_v28 = vpop.f32.mrf.mxu0 }
 0x1c9   : > { %v3375_v55 = vadd.f32 %v2597_v28, %v1575_v35  ;;  %v3428_v60 = vmul.f32 %v9056_v33, %v3374_v20 }
 0x1ca   : > { %v9067_v26 = vpop.f32.mrf.mxu1  ;;  %v2601_v50 = vpop.f32.mrf.mxu0 }
 0x1cb   : > { %v3429_v57 = vmul.f32 %v9056_v33, %v3375_v55  ;;  %v3395_v29 = vadd.f32 %v2601_v50, %v1579_v16  ;;  %v9072_v30 = vadd.f32 %v9061_v59, %v3428_v60 }
 0x1cc   : > { %v9074_v61 = vpop.f32.mrf.mxu1  ;;  %v2603_v22 = vpop.f32.mrf.mxu0 }
 0x1cd   : > { %11587 = vst [vmem:[#allocation41_spill] sm:$0xff] %v9072_v30  ;;  %v3449_v54 = vmul.f32 %v9045_v40, %v3395_v29  ;;  %v3396_v62 = vadd.f32 %v2603_v22, %v1581_v52  ;;  %v11480_v28 = vmax.f32 %v9072_v30, 0.0  ;;  %v9081_v35 = vadd.f32 %v9061_v59, %v3429_v57 }
 0x1ce   : > { %v9078_v20 = vpop.f32.mrf.mxu1 }
 0x1cf   : > { %11588 = vst [vmem:[#allocation42_spill] sm:$0xff] %v9081_v35  ;;  %v3450_v63 = vmul.f32 %v9045_v40, %v3396_v62  ;;  %3629 = vrot.lane.b32.xlu0 %v11480_v28, %s8149_s22  ;;  %v11479_v55 = vmax.f32 %v9081_v35, 0.0  ;;  %v9091_v29 = vadd.f32 %v9039_v31, %v3449_v54  ;;  %v2749_v54 = vpop.f32.mrf.mxu0 }
 0x1d0   : > { %v9087_v16 = vpop.f32.mrf.mxu1 }
 0x1d1   : > { %11589 = vst [vmem:[#allocation43_spill] sm:$0xff] %v9091_v29  ;;  %3633 = vrot.lane.b32.xlu1 %v11479_v55, %s8149_s22  ;;  %v9099_v57 = vadd.f32 %v9039_v31, %v3450_v63  ;;  %v11483_v60 = vmax.f32 %v9091_v29, 0.0  ;;  %v1727_v55 = vadd.f32 %v1726_v0, %v8929_v1  ;;  %v2751_v28 = vpop.f32.mrf.mxu0  ;;  %v1652_v29 = vadd.f32 %v8997_v37, %v8941_v7 }
 0x1d2   : > { %v9096_v56 = vpop.f32.mrf.mxu1  ;;  %v1656_v0 = vadd.f32 %v9001_v39, %v8945_v9  ;;  %v1733_v9 = vadd.f32 %v9041_v47, %v8933_v3 }
 0x1d3   : > { %11590 = vst [vmem:[#allocation44_spill] sm:$0xff] %v9099_v57  ;;  %v11485_v50 = vmax.f32 %v9099_v57, 0.0  ;;  %v3378_v35 = vadd.f32 %v2749_v54, %v1727_v55  ;;  %v2755_v57 = vpop.f32.mrf.mxu0 }
 0x1d4   : > { %v9101_v58 = vpop.f32.mrf.mxu1 }
 0x1d5   : > { %3631 = vrot.lane.b32.xlu1 %v11483_v60, %s8149_s22  ;;  %3635 = vrot.lane.b32.xlu0 %v11485_v50, %s8149_s22  ;;  %v1650_v60 = vadd.f32 %v8995_v36, %v8937_v5  ;;  %v2757_v5 = vpop.f32.mrf.mxu0 }
 0x1d6   : > { %v9111_v52 = vpop.f32.mrf.mxu1 }
 0x1d7   : > { %11591 = vst [vmem:[#allocation45_spill] sm:$0xff] %v9111_v52 }
 0x1d8   : > { %v9113_v22 = vpop.f32.mrf.mxu1 }
 0x1d9   : > { %11592 = vst [vmem:[#allocation46_spill] sm:$0xff] %v9113_v22 }
 0x1da   : > { %v9115_v62 = vpop.f32.mrf.mxu1 }
 0x1db   : > { %11593 = vst [vmem:[#allocation47_spill] sm:$0xff] %v9115_v62  ;;  %v1729_v62 = vadd.f32 %v9035_v41, %v8931_v2  ;;  %v1804_v2 = vadd.f32 %v9007_v43, %v8953_v13 }
 0x1dc   : > { %v9117_v63 = vpop.f32.mrf.mxu1 }
 0x1dd   : > { %11594 = vst [vmem:[#allocation48_spill] sm:$0xff] %v9117_v63  ;;  %v3432_v63 = vmul.f32 %v9056_v33, %v3378_v35  ;;  %v3379_v54 = vadd.f32 %v2751_v28, %v1729_v62 }
 0x1de   : > { %v9120_v30 = vpop.f32.mrf.mxu1 }
 0x1df   : > { %11595 = vst [vmem:[#allocation49_spill] sm:$0xff] %v9120_v30  ;;  %v1658_v30 = vadd.f32 %v9003_v42, %v8949_v11  ;;  %v9143_v28 = vadd.f32 %v9061_v59, %v3432_v63 }
 0x1e2   : > { %v2672_v50 = vpop.f32.mrf.mxu1 }
 0x1e3   : > { %v3376_v52 = vadd.f32 %v2672_v50, %v1650_v60  ;;  %v3433_v60 = vmul.f32 %v9056_v33, %v3379_v54  ;;  %v3399_v50 = vadd.f32 %v2755_v57, %v1733_v9  ;;  %v1735_v57 = vadd.f32 %v9047_v24, %v8935_v4 }
 0x1e4   : > { %v2674_v22 = vpop.f32.mrf.mxu1 }
 0x1e5   : > { %v3430_v1 = vmul.f32 %v9056_v33, %v3376_v52  ;;  %v3377_v55 = vadd.f32 %v2674_v22, %v1652_v29  ;;  %v2903_v52 = vpop.f32.mrf.mxu0  ;;  %v1810_v22 = vadd.f32 %v9013_v45, %v8961_v17  ;;  %v3453_v17 = vmul.f32 %v9045_v40, %v3399_v50 }
 0x1e6   : > { %v2678_v36 = vpop.f32.mrf.mxu1 }
 0x1e7   : > { %v3431_v7 = vmul.f32 %v9056_v33, %v3377_v55  ;;  %v3397_v37 = vadd.f32 %v2678_v36, %v1656_v0  ;;  %v9136_v41 = vadd.f32 %v9061_v59, %v3430_v1  ;;  %v11515_v0 = vmax.f32 %v9143_v28, 0.0  ;;  %v2905_v45 = vpop.f32.mrf.mxu0 }
 0x1e8   : > { %v2680_v39 = vpop.f32.mrf.mxu1  ;;  %v1881_v55 = vadd.f32 %v9051_v38, %v8939_v6  ;;  %v3400_v36 = vadd.f32 %v2757_v5, %v1735_v57  ;;  %v9199_v50 = vadd.f32 %v9039_v31, %v3453_v17 }
 0x1e9   : > { %v3451_v35 = vmul.f32 %v9045_v40, %v3397_v37  ;;  %v3398_v29 = vadd.f32 %v2680_v39, %v1658_v30  ;;  %v3526_v11 = vmax.f32 %v9136_v41, 0.0  ;;  %v9148_v42 = vadd.f32 %v9061_v59, %v3431_v7 }
 0x1ea   : > { %v2826_v13 = vpop.f32.mrf.mxu1  ;;  %v9179_v7 = vadd.f32 %v9061_v59, %v3433_v60  ;;  %v1806_v37 = vadd.f32 %v9009_v44, %v8957_v15  ;;  %v3382_v6 = vadd.f32 %v2903_v52, %v1881_v55  ;;  %v1887_v39 = vadd.f32 %v9063_v34, %v8947_v10 }
 0x1eb   : > { %v3452_v43 = vmul.f32 %v9045_v40, %v3398_v29  ;;  %v3380_v3 = vadd.f32 %v2826_v13, %v1804_v2  ;;  %3637 = vrot.lane.b32.xlu1 %v3526_v11, %s8149_s22  ;;  %v3527_v47 = vmax.f32 %v9148_v42, 0.0  ;;  %v9157_v30 = vadd.f32 %v9039_v31, %v3451_v35  ;;  %v2909_v35 = vpop.f32.mrf.mxu0 }
 0x1ec   : > { %v2828_v62 = vpop.f32.mrf.mxu1  ;;  %v3454_v15 = vmul.f32 %v9045_v40, %v3400_v36  ;;  %v11516_v60 = vmax.f32 %v9179_v7, 0.0  ;;  %v1812_v52 = vadd.f32 %v9015_v46, %v8965_v19  ;;  %v3436_v13 = vmul.f32 %v9056_v33, %v3382_v6 }
 0x1ed   : > { %v3434_v63 = vmul.f32 %v9056_v33, %v3380_v3  ;;  %3641 = vrot.lane.b32.xlu0 %v3527_v47, %s8149_s22  ;;  %v9169_v1 = vadd.f32 %v9039_v31, %v3452_v43  ;;  %v3547_v24 = vmax.f32 %v9157_v30, 0.0  ;;  %v3381_v44 = vadd.f32 %v2828_v62, %v1806_v37 }
 0x1ee   : > { %v2832_v54 = vpop.f32.mrf.mxu1  ;;  %v3403_v10 = vadd.f32 %v2909_v35, %v1887_v39  ;;  %v1958_v3 = vadd.f32 %v9019_v48, %v8969_v21  ;;  %v3549_v46 = vmax.f32 %v9199_v50, 0.0  ;;  %v1883_v55 = vadd.f32 %v9058_v32, %v8943_v8 }
 0x1ef   : > { %v3401_v4 = vadd.f32 %v2832_v54, %v1810_v22  ;;  %3645 = vrot.lane.b32.xlu1 %v11515_v0, %s8149_s22  ;;  %v3548_v5 = vmax.f32 %v9169_v1, 0.0  ;;  %v9189_v9 = vadd.f32 %v9061_v59, %v3434_v63  ;;  %v2911_v22 = vpop.f32.mrf.mxu0  ;;  %v3435_v57 = vmul.f32 %v9056_v33, %v3381_v44 }
 0x1f0   : > { %v2834_v2 = vpop.f32.mrf.mxu1  ;;  %v9219_v63 = vadd.f32 %v9039_v31, %v3454_v15  ;;  %v3457_v17 = vmul.f32 %v9045_v40, %v3403_v10  ;;  %v9229_v54 = vadd.f32 %v9061_v59, %v3436_v13  ;;  %v1964_v36 = vadd.f32 %v9023_v51, %v8977_v25 }
 0x1f1   : > { %v3455_v38 = vmul.f32 %v9045_v40, %v3401_v4  ;;  %3639 = vrot.lane.b32.xlu0 %v3547_v24, %s8149_s22  ;;  %v11499_v34 = vmax.f32 %v9189_v9, 0.0  ;;  %v3402_v19 = vadd.f32 %v2834_v2, %v1812_v52  ;;  %v3057_v4 = vpop.f32.mrf.mxu0  ;;  %v3383_v2 = vadd.f32 %v2905_v45, %v1883_v55 }
 0x1f2   : > { %v2980_v29 = vpop.f32.mrf.mxu1  ;;  %v11517_v32 = vmax.f32 %v9219_v63, 0.0  ;;  %v9239_v6 = vadd.f32 %v9061_v59, %v3435_v57  ;;  %v11491_v51 = vmax.f32 %v9229_v54, 0.0  ;;  %v9249_v45 = vadd.f32 %v9039_v31, %v3457_v17 }
 0x1f3   : > { %3643 = vrot.lane.b32.xlu1 %v3548_v5, %s8149_s22  ;;  %v9209_v43 = vadd.f32 %v9039_v31, %v3455_v38  ;;  %v3384_v21 = vadd.f32 %v2980_v29, %v1958_v3  ;;  %v3456_v8 = vmul.f32 %v9045_v40, %v3402_v19  ;;  %v1889_v38 = vadd.f32 %v9067_v26, %v8951_v12  ;;  %v3059_v29 = vpop.f32.mrf.mxu0 }
 0x1f4   : > { %v2982_v62 = vpop.f32.mrf.mxu1  ;;  %v2035_v35 = vadd.f32 %v9074_v61, %v8955_v14  ;;  %v3437_v44 = vmul.f32 %v9056_v33, %v3383_v2  ;;  %v11502_v26 = vmax.f32 %v9239_v6, 0.0  ;;  %v1960_v13 = vadd.f32 %v9021_v49, %v8973_v23 }
 0x1f5   : > { %3649 = vrot.lane.b32.xlu0 %v11516_v60, %s8149_s22  ;;  %v11505_v48 = vmax.f32 %v9209_v43, 0.0  ;;  %v3438_v39 = vmul.f32 %v9056_v33, %v3384_v21  ;;  %v3404_v12 = vadd.f32 %v2911_v22, %v1889_v38  ;;  %v9259_v52 = vadd.f32 %v9039_v31, %v3456_v8  ;;  %v3063_v57 = vpop.f32.mrf.mxu0 }
 0x1f6   : > { %v2986_v37 = vpop.f32.mrf.mxu1  ;;  %v3386_v10 = vadd.f32 %v3057_v4, %v2035_v35  ;;  %v11497_v61 = vmax.f32 %v9249_v45, 0.0  ;;  %v2041_v22 = vadd.f32 %v9087_v16, %v8963_v18  ;;  %v3385_v23 = vadd.f32 %v2982_v62, %v1960_v13  ;;  %v11596_v4 = vld [vmem:[#allocation24_spill] sm:$0xff]  ;;  %v11598_v35 = vld [vmem:[#allocation18_spill] sm:$0xff] }
 0x1f7   : > { %3653 = vrot.lane.b32.xlu1 %v11499_v34, %s8149_s22  ;;  %v3405_v25 = vadd.f32 %v2986_v37, %v1964_v36  ;;  %v9269_v3 = vadd.f32 %v9061_v59, %v3438_v39  ;;  %v3458_v55 = vmul.f32 %v9045_v40, %v3404_v12  ;;  %v11503_v49 = vmax.f32 %v9259_v52, 0.0  ;;  %v11597_v37 = vld [vmem:[#allocation33_spill] sm:$0xff]  ;;  %v3065_v8 = vpop.f32.mrf.mxu0 }
 0x1f8   : > { %v2988_v15 = vpop.f32.mrf.mxu1  ;;  %v9279_v17 = vadd.f32 %v9061_v59, %v3437_v44  ;;  %v1966_v21 = vadd.f32 %v9025_v53, %v8981_v27  ;;  %v3440_v36 = vmul.f32 %v9056_v33, %v3386_v10  ;;  %v3407_v18 = vadd.f32 %v3063_v57, %v2041_v22  ;;  %v11600_v22 = vld [vmem:[#allocation35_spill] sm:$0xff] }
 0x1f9   : > { %3647 = vrot.lane.b32.xlu0 %v3549_v46, %s8149_s22  ;;  %v3459_v14 = vmul.f32 %v9045_v40, %v3405_v25  ;;  %v11487_v16 = vmax.f32 %v9269_v3, 0.0  ;;  %v2112_v2 = vadd.f32 %v11597_v37, %v11596_v4  ;;  %v3439_v39 = vmul.f32 %v9056_v33, %v3385_v23  ;;  %v11601_v4 = vld [vmem:[#allocation19_spill] sm:$0xff] }
 0x1fa   : > { %v3134_v19 = vpop.f32.mrf.mxu1  ;;  %v3406_v27 = vadd.f32 %v2988_v15, %v1966_v21  ;;  %v11493_v53 = vmax.f32 %v9279_v17, 0.0  ;;  %v9299_v25 = vadd.f32 %v9039_v31, %v3458_v55  ;;  %v2037_v44 = vadd.f32 %v9078_v20, %v11598_v35  ;;  %v3211_v55 = vpop.f32.mrf.mxu0  ;;  %v11602_v35 = vld [vmem:[#allocation20_spill] sm:$0xff] }
 0x1fb   : > { %3655 = vrot.lane.b32.xlu1 %v11505_v48, %s8149_s22  ;;  %v9289_v62 = vadd.f32 %v9039_v31, %v3459_v14  ;;  %v3461_v12 = vmul.f32 %v9045_v40, %v3407_v18  ;;  %v3388_v13 = vadd.f32 %v3134_v19, %v2112_v2  ;;  %v9309_v10 = vadd.f32 %v9061_v59, %v3440_v36  ;;  %v11599_v14 = vld [vmem:[#allocation28_spill] sm:$0xff] }
 0x1fc   : > { %v3136_v38 = vpop.f32.mrf.mxu1  ;;  %v2118_v57 = vadd.f32 %v11600_v22, %v11599_v14  ;;  %v3387_v21 = vadd.f32 %v3059_v29, %v2037_v44  ;;  %v3460_v20 = vmul.f32 %v9045_v40, %v3406_v27  ;;  %v11495_v19 = vmax.f32 %v9299_v25, 0.0 }
 0x1fd   : > { %3651 = vrot.lane.b32.xlu0 %v11517_v32, %s8149_s22  ;;  %v11489_v15 = vmax.f32 %v9289_v62, 0.0  ;;  %v9319_v18 = vadd.f32 %v9061_v59, %v3439_v39  ;;  %v2043_v36 = vadd.f32 %v9096_v56, %v11601_v4  ;;  %v3442_v37 = vmul.f32 %v9056_v33, %v3388_v13  ;;  %v3213_v39 = vpop.f32.mrf.mxu0 }
 0x1fe   : > { %v3140_v23 = vpop.f32.mrf.mxu1  ;;  %v11488_v29 = vmax.f32 %v9309_v10, 0.0  ;;  %v9329_v27 = vadd.f32 %v9039_v31, %v3461_v12  ;;  %v2189_v44 = vadd.f32 %v9101_v58, %v11602_v35  ;;  %v3441_v14 = vmul.f32 %v9056_v33, %v3387_v21  ;;  %v11606_v35 = vld [vmem:[#allocation46_spill] sm:$0xff] }
 0x1ff   : > { %3661 = vrot.lane.b32.xlu1 %v11491_v51, %s8149_s22  ;;  %v3409_v2 = vadd.f32 %v3140_v23, %v2118_v57  ;;  %v3408_v22 = vadd.f32 %v3065_v8, %v2043_v36  ;;  %v11490_v56 = vmax.f32 %v9319_v18, 0.0  ;;  %v9339_v13 = vadd.f32 %v9039_v31, %v3460_v20  ;;  %v11603_v57 = vld [vmem:[#allocation26_spill] sm:$0xff] }
 0x200   : > { %v11604_v23 = vld [vmem:[#allocation34_spill] sm:$0xff]  ;;  %v3142_v4 = vpop.f32.mrf.mxu1  ;;  %v11492_v8 = vmax.f32 %v9329_v27, 0.0  ;;  %v9349_v21 = vadd.f32 %v9061_v59, %v3442_v37 }
 0x201   : > { %3657 = vrot.lane.b32.xlu0 %v11502_v26, %s8149_s22  ;;  %v2114_v12 = vadd.f32 %v11604_v23, %v11603_v57  ;;  %v3463_v58 = vmul.f32 %v9045_v40, %v3409_v2  ;;  %v11605_v36 = vld [vmem:[#allocation22_spill] sm:$0xff]  ;;  %v9359_v2 = vadd.f32 %v9061_v59, %v3441_v14  ;;  %v11608_v23 = vld [vmem:[#allocation36_spill] sm:$0xff] }
 0x202   : > { %v2195_v20 = vadd.f32 %v11606_v35, %v11605_v36  ;;  %v11610_v35 = vld [vmem:[#allocation47_spill] sm:$0xff] }
 0x203   : > { %3663 = vrot.lane.b32.xlu1 %v11497_v61, %s8149_s22  ;;  %v3389_v57 = vadd.f32 %v3136_v38, %v2114_v12  ;;  %v11496_v38 = vmax.f32 %v9349_v21, 0.0  ;;  %v11609_v12 = vld [vmem:[#allocation23_spill] sm:$0xff] }
 0x204   : > { %v2197_v14 = vadd.f32 %v11610_v35, %v11609_v12  ;;  %v11614_v35 = vld [vmem:[#allocation38_spill] sm:$0xff] }
 0x205   : > { %3659 = vrot.lane.b32.xlu0 %v11503_v49, %s8149_s22 }
 0x207   : > { %3669 = vrot.lane.b32.xlu1 %v11487_v16, %s8149_s22  ;;  %v3390_v16 = vadd.f32 %v3211_v55, %v2189_v44  ;;  %v11494_v55 = vmax.f32 %v9339_v13, 0.0  ;;  %v11607_v44 = vld [vmem:[#allocation29_spill] sm:$0xff] }
 0x208   : > { %v2120_v37 = vadd.f32 %v11608_v23, %v11607_v44  ;;  %v11612_v23 = vld [vmem:[#allocation45_spill] sm:$0xff] }
 0x209   : > { %3665 = vrot.lane.b32.xlu0 %v11493_v53, %s8149_s22  ;;  %v3444_v51 = vmul.f32 %v9056_v33, %v3390_v16  ;;  %v3443_v53 = vmul.f32 %v9056_v33, %v3389_v57  ;;  %v11498_v16 = vmax.f32 %v9359_v2, 0.0 }
 0x20a   : > { %v3410_v44 = vadd.f32 %v3142_v4, %v2120_v37  ;;  %v11613_v37 = vld [vmem:[#allocation31_spill] sm:$0xff] }
 0x20b   : > { %3671 = vrot.lane.b32.xlu1 %v11489_v15, %s8149_s22  ;;  %v3462_v15 = vmul.f32 %v9045_v40, %v3408_v22  ;;  %v9369_v22 = vadd.f32 %v9039_v31, %v3463_v58  ;;  %v9389_v57 = vadd.f32 %v9061_v59, %v3444_v51 }
 0x20c   : > { %v3464_v61 = vmul.f32 %v9045_v40, %v3410_v44 }
 0x20d   : > { %3667 = vrot.lane.b32.xlu0 %v11495_v19, %s8149_s22  ;;  %v11500_v4 = vmax.f32 %v9369_v22, 0.0 }
 0x20f   : > { %3677 = vrot.lane.b32.xlu1 %v11488_v29, %s8149_s22  ;;  %v3217_v29 = vpop.f32.mrf.mxu0 }
 0x210   : > { %v3411_v36 = vadd.f32 %v3217_v29, %v2195_v20  ;;  %v9379_v29 = vadd.f32 %v9039_v31, %v3462_v15  ;;  %v11611_v20 = vld [vmem:[#allocation21_spill] sm:$0xff]  ;;  %v2268_v15 = vadd.f32 %v11614_v35, %v11613_v37 }
 0x211   : > { %3673 = vrot.lane.b32.xlu0 %v11490_v56, %s8149_s22  ;;  %v3288_v56 = vpop.f32.mrf.mxu1  ;;  %v2191_v58 = vadd.f32 %v11612_v23, %v11611_v20  ;;  %v11616_v20 = vld [vmem:[#allocation37_spill] sm:$0xff] }
 0x212   : > { %v3465_v19 = vmul.f32 %v9045_v40, %v3411_v36  ;;  %v9399_v36 = vadd.f32 %v9061_v59, %v3443_v53  ;;  %v11618_v53 = vld [vmem:[#allocation39_spill] sm:$0xff] }
 0x213   : > { %3679 = vrot.lane.b32.xlu1 %v11492_v8, %s8149_s22  ;;  %v3219_v8 = vpop.f32.mrf.mxu0 }
 0x214   : > { %v3412_v12 = vadd.f32 %v3219_v8, %v2197_v14  ;;  %v11501_v8 = vmax.f32 %v9379_v29, 0.0  ;;  %v11615_v14 = vld [vmem:[#allocation30_spill] sm:$0xff]  ;;  %v9409_v44 = vadd.f32 %v9039_v31, %v3465_v19 }
 0x215   : > { %3675 = vrot.lane.b32.xlu0 %v11494_v55, %s8149_s22  ;;  %v3290_v55 = vpop.f32.mrf.mxu1  ;;  %v2266_v23 = vadd.f32 %v11616_v20, %v11615_v14  ;;  %v7846_v34 = vpop.f32.mrf.mxu0  ;;  %v11620_v20 = vld [vmem:[#allocation48_spill] sm:$0xff] }
 0x216   : > { %v3393_v37 = vadd.f32 %v3290_v55, %v2268_v15  ;;  %v11513_v55 = vmax.f32 %v9399_v36, 0.0  ;;  %v11619_v15 = vld [vmem:[#allocation25_spill] sm:$0xff] }
 0x217   : > { %3685 = vrot.lane.b32.xlu1 %v11496_v38, %s8149_s22  ;;  %v3391_v38 = vadd.f32 %v3213_v39, %v2191_v58  ;;  %v3294_v51 = vpop.f32.mrf.mxu1  ;;  %v11504_v39 = vmax.f32 %v9389_v57, 0.0  ;;  %v11617_v58 = vld [vmem:[#allocation32_spill] sm:$0xff]  ;;  %v3392_v14 = vadd.f32 %v3288_v56, %v2266_v23  ;;  %v3365_v26 = vpop.f32.mrf.mxu0  ;;  %v11511_v56 = vmax.f32 %v9409_v44, 0.0  ;;  %v11621_v23 = vld [vmem:[#allocation27_spill] sm:$0xff] }
 0x218   : > { %v2272_v35 = vadd.f32 %v11618_v53, %v11617_v58  ;;  %v3447_v49 = vmul.f32 %v9056_v33, %v3393_v37 }
 0x219   : > { %3681 = vrot.lane.b32.xlu0 %v11498_v16, %s8149_s22  ;;  %v3466_v16 = vmul.f32 %v9045_v40, %v3412_v12  ;;  %v9419_v12 = vadd.f32 %v9039_v31, %v3464_v61  ;;  %v3296_v19 = vpop.f32.mrf.mxu1  ;;  %v11622_v61 = vld [vmem:[#allocation49_spill] sm:$0xff] }
 0x21a   : > { %v3413_v58 = vadd.f32 %v3294_v51, %v2272_v35  ;;  %v2343_v53 = vadd.f32 %v11622_v61, %v11621_v23 }
 0x21b   : > { %3687 = vrot.lane.b32.xlu1 %v11500_v4, %s8149_s22  ;;  %v3445_v4 = vmul.f32 %v9056_v33, %v3391_v38  ;;  %v9429_v38 = vadd.f32 %v9039_v31, %v3466_v16  ;;  %v11514_v51 = vmax.f32 %v9419_v12, 0.0 }
 0x21c   : > { %v3394_v35 = vadd.f32 %v3365_v26, %v2343_v53  ;;  %v3467_v16 = vmul.f32 %v9045_v40, %v3413_v58 }
 0x21d   : > { %3683 = vrot.lane.b32.xlu0 %v11501_v8, %s8149_s22  ;;  %v2348_v8 = vadd.f32 %v11620_v20, %v11619_v15  ;;  %v3446_v15 = vmul.f32 %v9056_v33, %v3392_v14  ;;  %v11623_v20 = vld [vmem:[#allocation40_spill] sm:$0xff]  ;;  %v9440_v37 = vadd.f32 %v9061_v59, %v3445_v4 }
 0x21e   : > { %v3414_v48 = vadd.f32 %v3296_v19, %v11623_v20  ;;  %v3448_v58 = vmul.f32 %v9056_v33, %v3394_v35  ;;  %v11624_v20 = vld [vmem:[#allocation17_spill] sm:$0xff] }
 0x21f   : > { %3693 = vrot.lane.b32.xlu1 %v11504_v39, %s8149_s22  ;;  %v3415_v39 = vadd.f32 %v7846_v34, %v2348_v8  ;;  %v11512_v34 = vmax.f32 %v9429_v38, 0.0  ;;  %v9448_v8 = vadd.f32 %v9061_v59, %v3447_v49  ;;  %v11510_v26 = vmax.f32 %v9440_v37, 0.0 }
 0x220   : > { %v3468_v19 = vmul.f32 %v9045_v40, %v3414_v48  ;;  %v9457_v4 = vadd.f32 %v9061_v59, %v3446_v15  ;;  %v3502_v33 = vadd.f32 %v9061_v59, %v3448_v58  ;;  %vm3586_vm6 = vcmp.lt.s32.totalorder %v11624_v20, 2660 }
 0x221   : > { %3689 = vrot.lane.b32.xlu0 %v11513_v55, %s8149_s22  ;;  %v3469_v14 = vmul.f32 %v9045_v40, %v3415_v39  ;;  %v11507_v49 = vmax.f32 %v9448_v8, 0.0  ;;  %v9465_v39 = vadd.f32 %v9039_v31, %v3467_v16  ;;  %vm6014_vm12 = vcmp.lt.s32.totalorder %v11624_v20, 2686 }
 0x222   : > { %v11506_v48 = vmax.f32 %v9457_v4, 0.0  ;;  %v9473_v23 = vadd.f32 %v9039_v31, %v3468_v19  ;;  %v3544_v35 = vmax.f32 %v3502_v33, 0.0  ;;  %v11625_v19 = vld [vmem:[#allocation16_spill] sm:$0xff] }
 0x223   : > { %3695 = vrot.lane.b32.xlu1 %v11511_v56, %s8149_s22  ;;  %v3523_v40 = vadd.f32 %v9039_v31, %v3469_v14  ;;  %v11508_v61 = vmax.f32 %v9465_v39, 0.0  ;;  %vm3925_vm9 = vcmp.lt.s32.totalorder %v11625_v19, 2  ;;  %vm3968_vm10 = vcmp.ge.s32.totalorder %v11625_v19, 2 }
 0x224   : > { %v11509_v15 = vmax.f32 %v9473_v23, 0.0  ;;  %v9492_v59 = vsel %vm3586_vm6, %v3544_v35, 0.0  ;;  %vm5951_vm11 = vcmp.lt.s32.totalorder %v11625_v19, 126 }
 0x225   : > { %3691 = vrot.lane.b32.xlu0 %v11514_v51, %s8149_s22  ;;  %v3565_v53 = vmax.f32 %v3523_v40, 0.0  ;;  %v11626_v40 = vld [vmem:[#allocation41_spill] sm:$0xff]  ;;  %v11630_v51 = vld [vmem:[#allocation43_spill] sm:$0xff] }
 0x226   : > { %v11627_v33 = vmax.f32 %v11626_v40, 0.0 }
 0x227   : > { %3699 = vrot.lane.b32.xlu1 %v11512_v34, %s8149_s22  ;;  %v9488_v31 = vsel %vm3586_vm6, %v3565_v53, 0.0 }
 0x229   : > { %3697 = vrot.lane.b32.xlu0 %v11510_v26, %s8149_s22  ;;  %v11628_v26 = vld [vmem:[#allocation42_spill] sm:$0xff] }
 0x22a   : > { %v11629_v56 = vmax.f32 %v11628_v26, 0.0 }
 0x22b   : > { %3705 = vrot.lane.b32.xlu1 %v11507_v49, %s8149_s22 }
 0x22d   : > { %3701 = vrot.lane.b32.xlu0 %v11506_v48, %s8149_s22 }
 0x22f   : > { %3703 = vrot.lane.b32.xlu1 %v11508_v61, %s8149_s22 }
 0x231   : > { %3707 = vrot.lane.b32.xlu0 %v11509_v15, %s8149_s22 }
 0x233   : > { %3711 = vrot.lane.b32.xlu1 %v9488_v31, %s8149_s22 }
 0x235   : > { %3709 = vrot.lane.b32.xlu0 %v9492_v59, %s8149_s22 }
 0x241   : > { %v9496_v16 = vpop.permute.xlu0 %3629 }
 0x243   : > { %v3634_v14 = vpop.permute.xlu1 %3633 }
 0x244   : > { %v3751_v58 = vsel %vm2396_vm4, %v9496_v16, %v3634_v14 }
 0x245   : > { %v9503_v48 = vmax.f32 %v11627_v33, %v3751_v58 }
 0x247   : > { %3841 = vrot.lane.b32.xlu0 %v9503_v48, %s8151_s23  ;;  %v9507_v53 = vpop.permute.xlu1 %3631  ;;  %v3636_v35 = vpop.permute.xlu0 %3635 }
 0x248   : > { %v3752_v58 = vsel %vm2396_vm4, %v9507_v53, %v3636_v35 }
 0x25d   : > { %v3638_v49 = vpop.permute.xlu1 %3637 }
 0x25e   : > { %v3749_v61 = vsel %vm2396_vm4, %v3634_v14, %v3638_v49  ;;  %v11631_v14 = vmax.f32 %v11630_v51, 0.0 }
 0x25f   : > { %v3642_v15 = vpop.permute.xlu0 %3641  ;;  %v3798_v34 = vmax.f32 %v11629_v56, %v3749_v61  ;;  %v11632_v61 = vld [vmem:[#allocation44_spill] sm:$0xff] }
 0x260   : > { %v3747_v40 = vsel %vm2396_vm4, %v3638_v49, %v3642_v15  ;;  %v3818_v0 = vmax.f32 %v11631_v14, %v3752_v58  ;;  %v11633_v49 = vmax.f32 %v11632_v61, 0.0  ;;  %v11635_v61 = vmax.f32 %v9219_v63, 0.0 }
 0x261   : > { %5871 = vrot.lane.b32.xlu0 %v3798_v34, %s8152_s27  ;;  %3845 = vrot.lane.b32.xlu1 %v3798_v34, %s8151_s23  ;;  %v3646_v33 = vpop.permute.xlu1 %3645  ;;  %v9524_v56 = vmax.f32 %v3526_v11, %v3747_v40  ;;  %v9537_v11 = vld [vmem:[#allocation7 + $0x10] sm:$0xff] }
 0x262   : > { %v3745_v41 = vsel %vm2396_vm4, %v3642_v15, %v3646_v33 }
 0x263   : > { %v3640_v55 = vpop.permute.xlu0 %3639  ;;  %v9546_v15 = vmax.f32 %v3527_v47, %v3745_v41 }
 0x264   : > { %v3750_v26 = vsel %vm2396_vm4, %v3636_v35, %v3640_v55 }
 0x265   : > { %v3819_v60 = vmax.f32 %v11633_v49, %v3750_v26  ;;  %3843 = vrot.lane.b32.xlu1 %v3818_v0, %s8151_s23  ;;  %3849 = vrot.lane.b32.xlu0 %v9524_v56, %s8151_s23  ;;  %v3644_v32 = vpop.permute.xlu1 %3643 }
 0x266   : > { %v3748_v35 = vsel %vm2396_vm4, %v3640_v55, %v3644_v32  ;;  %v11634_v55 = vmov 0.0  }
 0x267   : > { %7678 = vmatprep.subr.msk.mxu1 %vm4041_vm7, %v3819_v60  ;;  %v3650_v51 = vpop.permute.xlu0 %3649 }
 0x268   : > { %7679 = vmatpush1.msk.msra.mxu1 %vm4041_vm7, %v3818_v0 }
 0x269   : > { %5869 = vrot.lane.b32.xlu1 %v3818_v0, %s8152_s27  ;;  %4135 = vmatprep.subr.mxu1 %v3798_v34  ;;  %v3654_v58 = vpop.permute.xlu1 %3653  ;;  %v3820_v0 = vmax.f32 %v3547_v24, %v3748_v35  ;;  %v9555_v34 = vld [vmem:[#allocation7 + $0x18] sm:$0xf] }
 0x26a   : > { %3847 = vrot.lane.b32.xlu0 %v3819_v60, %s8151_s23  ;;  %4136 = vmatpush1.msra.mxu1 %v9503_v48  ;;  %v3741_v30 = vsel %vm2396_vm4, %v3650_v51, %v3654_v58 }
 0x26b   : > { %v3648_v40 = vpop.permute.xlu0 %3647  ;;  %7680 = vmatmul.mubr.msk.f32.vlgmr.msra.gmra.mxu1 %vm4034_vm8, %v9537_v11 }
 0x26c   : > { %v3746_v14 = vsel %vm2396_vm4, %v3644_v32, %v3648_v40  ;;  %4175 = vmatprep.mubr.f32.mxu1 %v11634_v55 }
 0x26d   : > { %v9559_v26 = vmax.f32 %v3548_v5, %v3746_v14  ;;  %3853 = vrot.lane.b32.xlu1 %v9546_v15, %s8151_s23  ;;  %v3656_v42 = vpop.permute.xlu1 %3655  ;;  %v3743_v5 = vsel %vm2396_vm4, %v3646_v33, %v3650_v51  ;;  %v11636_v33 = vmax.f32 %v9179_v7, 0.0 }
 0x26e   : > { %5877 = vrot.lane.b32.xlu0 %v3820_v0, %s8152_s27 }
 0x26f   : > { %v3652_v47 = vpop.permute.xlu0 %3651  ;;  %7682 = vmatprep.subr.msk.mxu0 %vm4041_vm7, %v9559_v26  ;;  %7681 = vmatmul.mubr.msk.f32.gmra.mxu1 %vm4034_vm8, %v9555_v34  ;;  %v9593_v51 = vmax.f32 %v11636_v33, %v3741_v30  ;;  %v11639_v30 = vmax.f32 %v9259_v52, 0.0 }
 0x270   : > { %v3742_v1 = vsel %vm2396_vm4, %v3652_v47, %v3656_v42  ;;  %v3744_v24 = vsel %vm2396_vm4, %v3648_v40, %v3652_v47  ;;  %7683 = vmatpush1.msk.msra.mxu0 %vm4041_vm7, %v3820_v0  ;;  %4323 = vmatprep.mubr.f32.mxu1 %v11634_v55 }
 0x271   : > { %v9580_v32 = vmax.f32 %v3549_v46, %v3744_v24  ;;  %v9584_v49 = vmax.f32 %v11635_v61, %v3742_v1  ;;  %5873 = vrot.lane.b32.xlu1 %v3819_v60, %s8152_s27  ;;  %4212 = vmatprep.subr.mxu0 %v9546_v15  ;;  %v3662_v41 = vpop.permute.xlu1 %3661  ;;  %v11637_v60 = vmax.f32 %v9143_v28, 0.0 }
 0x272   : > { %3855 = vrot.lane.b32.xlu0 %v9559_v26, %s8151_s23  ;;  %4213 = vmatpush1.msra.mxu0 %v9524_v56 }
 0x273   : > { %v3658_v50 = vpop.permute.xlu0 %3657  ;;  %7686 = vmatprep.subr.msk.mxu1 %vm4041_vm7, %v9584_v49  ;;  %7684 = vmatmul.mubr.msk.f32.vlgmr.msra.gmra.mxu0 %vm4034_vm8, %v9537_v11  ;;  %v9601_v46 = vmax.f32 %v11637_v60, %v3743_v5 }
 0x274   : > { %7687 = vmatpush1.msk.msra.mxu1 %vm4041_vm7, %v9580_v32  ;;  %4252 = vmatprep.mubr.f32.mxu0 %v11634_v55  ;;  %v3737_v28 = vsel %vm2396_vm4, %v3658_v50, %v3662_v41  ;;  %v3739_v14 = vsel %vm2396_vm4, %v3654_v58, %v3658_v50 }
 0x275   : > { %3851 = vrot.lane.b32.xlu1 %v3820_v0, %s8151_s23  ;;  %4289 = vmatprep.subr.mxu1 %v9593_v51  ;;  %v3664_v7 = vpop.permute.xlu1 %3663  ;;  %v11638_v0 = vmax.f32 %v9209_v43, 0.0  ;;  %v11641_v43 = vmax.f32 %v9189_v9, 0.0 }
 0x276   : > { %3861 = vrot.lane.b32.xlu0 %v9593_v51, %s8151_s23  ;;  %4290 = vmatpush1.msra.mxu1 %v9601_v46 }
 0x277   : > { %v3660_v63 = vpop.permute.xlu0 %3659  ;;  %7688 = vmatmul.mubr.msk.f32.vlgmr.msra.gmra.mxu1 %vm4034_vm8, %v9537_v11  ;;  %7685 = vmatmul.mubr.msk.f32.gmra.mxu0 %vm4034_vm8, %v9555_v34  ;;  %v9647_v52 = vmax.f32 %v11641_v43, %v3739_v14 }
 0x278   : > { %v3738_v35 = vsel %vm2396_vm4, %v3660_v63, %v3664_v7  ;;  %v3740_v40 = vsel %vm2396_vm4, %v3656_v42, %v3660_v63  ;;  %4400 = vmatprep.mubr.f32.mxu0 %v11634_v55  ;;  %4329 = vmatprep.mubr.f32.mxu1 %v11634_v55  ;;  %v11640_v42 = vmax.f32 %v9239_v6, 0.0  ;;  %v11642_v63 = vmax.f32 %v9249_v45, 0.0 }
 0x279   : > { %v9627_v47 = vmax.f32 %v11638_v0, %v3740_v40  ;;  %v9631_v1 = vmax.f32 %v11639_v30, %v3738_v35  ;;  %3857 = vrot.lane.b32.xlu1 %v9601_v46, %s8151_s23  ;;  %v3670_v24 = vpop.permute.xlu1 %3669  ;;  %v11643_v35 = vmax.f32 %v9299_v25, 0.0  ;;  %v11645_v45 = vmax.f32 %v9229_v54, 0.0 }
 0x27a   : > { %3863 = vrot.lane.b32.xlu0 %v9584_v49, %s8151_s23  ;;  %v9639_v5 = vmax.f32 %v11640_v42, %v3737_v28 }
 0x27b   : > { %v3666_v58 = vpop.permute.xlu0 %3665  ;;  %7690 = vmatprep.subr.msk.mxu0 %vm4041_vm7, %v9631_v1  ;;  %7689 = vmatmul.mubr.msk.f32.gmra.mxu1 %vm4034_vm8, %v9555_v34 }
 0x27c   : > { %7691 = vmatpush1.msk.msra.mxu0 %vm4041_vm7, %v9627_v47  ;;  %4477 = vmatprep.mubr.f32.mxu1 %v11634_v55  ;;  %v3733_v9 = vsel %vm2396_vm4, %v3666_v58, %v3670_v24  ;;  %v3735_v60 = vsel %vm2396_vm4, %v3662_v41, %v3666_v58 }
 0x27d   : > { %3859 = vrot.lane.b32.xlu1 %v9580_v32, %s8151_s23  ;;  %4366 = vmatprep.subr.mxu0 %v9639_v5  ;;  %v3672_v6 = vpop.permute.xlu1 %3671  ;;  %v9691_v25 = vmax.f32 %v11645_v45, %v3735_v60 }
 0x27e   : > { %3869 = vrot.lane.b32.xlu0 %v9639_v5, %s8151_s23  ;;  %4367 = vmatpush1.msra.mxu0 %v9647_v52 }
 0x27f   : > { %v3668_v61 = vpop.permute.xlu0 %3667  ;;  %7692 = vmatmul.mubr.msk.f32.vlgmr.msra.gmra.mxu0 %vm4034_vm8, %v9537_v11 }
 0x280   : > { %v3734_v33 = vsel %vm2396_vm4, %v3668_v61, %v3672_v6  ;;  %v3736_v50 = vsel %vm2396_vm4, %v3664_v7, %v3668_v61  ;;  %4406 = vmatprep.mubr.f32.mxu0 %v11634_v55  ;;  %v11644_v7 = vmax.f32 %v9279_v17, 0.0  ;;  %v11646_v61 = vmax.f32 %v9289_v62, 0.0 }
 0x281   : > { %v9671_v28 = vmax.f32 %v11642_v63, %v3736_v50  ;;  %v9675_v40 = vmax.f32 %v11643_v35, %v3734_v33  ;;  %3865 = vrot.lane.b32.xlu1 %v9647_v52, %s8151_s23  ;;  %v3678_v14 = vpop.permute.xlu1 %3677  ;;  %v11647_v33 = vmax.f32 %v9339_v13, 0.0  ;;  %v11649_v62 = vmax.f32 %v9269_v3, 0.0 }
 0x282   : > { %3871 = vrot.lane.b32.xlu0 %v9631_v1, %s8151_s23  ;;  %v9683_v0 = vmax.f32 %v11644_v7, %v3733_v9 }
 0x283   : > { %v3674_v41 = vpop.permute.xlu0 %3673  ;;  %7694 = vmatprep.subr.msk.mxu1 %vm4041_vm7, %v9675_v40  ;;  %7693 = vmatmul.mubr.msk.f32.gmra.mxu0 %vm4034_vm8, %v9555_v34 }
 0x284   : > { %7695 = vmatpush1.msk.msra.mxu1 %vm4041_vm7, %v9671_v28  ;;  %4554 = vmatprep.mubr.f32.mxu0 %v11634_v55  ;;  %v3729_v54 = vsel %vm2396_vm4, %v3674_v41, %v3678_v14  ;;  %v3731_v43 = vsel %vm2396_vm4, %v3670_v24, %v3674_v41 }
 0x285   : > { %3867 = vrot.lane.b32.xlu1 %v9627_v47, %s8151_s23  ;;  %4443 = vmatprep.subr.mxu1 %v9683_v0  ;;  %v3680_v17 = vpop.permute.xlu1 %3679  ;;  %v9735_v13 = vmax.f32 %v11649_v62, %v3731_v43 }
 0x286   : > { %3877 = vrot.lane.b32.xlu0 %v9683_v0, %s8151_s23  ;;  %4444 = vmatpush1.msra.mxu1 %v9691_v25 }
 0x287   : > { %v3676_v30 = vpop.permute.xlu0 %3675  ;;  %7696 = vmatmul.mubr.msk.f32.vlgmr.msra.gmra.mxu1 %vm4034_vm8, %v9537_v11 }
 0x288   : > { %v3730_v42 = vsel %vm2396_vm4, %v3676_v30, %v3680_v17  ;;  %v3732_v58 = vsel %vm2396_vm4, %v3672_v6, %v3676_v30  ;;  %4483 = vmatprep.mubr.f32.mxu1 %v11634_v55  ;;  %v11648_v6 = vmax.f32 %v9319_v18, 0.0  ;;  %v11650_v30 = vmax.f32 %v9329_v27, 0.0 }
 0x289   : > { %v9715_v9 = vmax.f32 %v11646_v61, %v3732_v58  ;;  %v9719_v50 = vmax.f32 %v11647_v33, %v3730_v42  ;;  %3873 = vrot.lane.b32.xlu1 %v9691_v25, %s8151_s23  ;;  %v3686_v60 = vpop.permute.xlu1 %3685  ;;  %v11651_v42 = vmax.f32 %v9379_v29, 0.0  ;;  %v11653_v27 = vmax.f32 %v9309_v10, 0.0 }
 0x28a   : > { %3879 = vrot.lane.b32.xlu0 %v9675_v40, %s8151_s23  ;;  %v9727_v63 = vmax.f32 %v11648_v6, %v3729_v54 }
 0x28b   : > { %v3682_v24 = vpop.permute.xlu0 %3681  ;;  %7698 = vmatprep.subr.msk.mxu0 %vm4041_vm7, %v9719_v50  ;;  %7697 = vmatmul.mubr.msk.f32.gmra.mxu1 %vm4034_vm8, %v9555_v34 }
 0x28c   : > { %7699 = vmatpush1.msk.msra.mxu0 %vm4041_vm7, %v9715_v9  ;;  %4631 = vmatprep.mubr.f32.mxu1 %v11634_v55  ;;  %v3725_v3 = vsel %vm2396_vm4, %v3682_v24, %v3686_v60  ;;  %v3727_v45 = vsel %vm2396_vm4, %v3678_v14, %v3682_v24 }
 0x28d   : > { %3875 = vrot.lane.b32.xlu1 %v9671_v28, %s8151_s23  ;;  %4520 = vmatprep.subr.mxu0 %v9727_v63  ;;  %v3688_v18 = vpop.permute.xlu1 %3687  ;;  %v9779_v29 = vmax.f32 %v11653_v27, %v3727_v45 }
 0x28e   : > { %3885 = vrot.lane.b32.xlu0 %v9727_v63, %s8151_s23  ;;  %4521 = vmatpush1.msra.mxu0 %v9735_v13 }
 0x28f   : > { %v3684_v35 = vpop.permute.xlu0 %3683  ;;  %7700 = vmatmul.mubr.msk.f32.vlgmr.msra.gmra.mxu0 %vm4034_vm8, %v9537_v11 }
 0x290   : > { %v3726_v7 = vsel %vm2396_vm4, %v3684_v35, %v3688_v18  ;;  %v3728_v41 = vsel %vm2396_vm4, %v3680_v17, %v3684_v35  ;;  %4560 = vmatprep.mubr.f32.mxu0 %v11634_v55  ;;  %v11652_v17 = vmax.f32 %v9359_v2, 0.0  ;;  %v11654_v35 = vmax.f32 %v9369_v22, 0.0 }
 0x291   : > { %v9759_v54 = vmax.f32 %v11650_v30, %v3728_v41  ;;  %v9763_v58 = vmax.f32 %v11651_v42, %v3726_v7  ;;  %3881 = vrot.lane.b32.xlu1 %v9735_v13, %s8151_s23  ;;  %v3694_v43 = vpop.permute.xlu1 %3693  ;;  %v11655_v7 = vmax.f32 %v9419_v12, 0.0  ;;  %v11657_v22 = vmax.f32 %v9349_v21, 0.0 }
 0x292   : > { %3887 = vrot.lane.b32.xlu0 %v9719_v50, %s8151_s23  ;;  %v9771_v61 = vmax.f32 %v11652_v17, %v3725_v3 }
 0x293   : > { %v3690_v14 = vpop.permute.xlu0 %3689  ;;  %7702 = vmatprep.subr.msk.mxu1 %vm4041_vm7, %v9763_v58  ;;  %7701 = vmatmul.mubr.msk.f32.gmra.mxu0 %vm4034_vm8, %v9555_v34 }
 0x294   : > { %7703 = vmatpush1.msk.msra.mxu1 %vm4041_vm7, %v9759_v54  ;;  %4708 = vmatprep.mubr.f32.mxu0 %v11634_v55  ;;  %v3721_v10 = vsel %vm2396_vm4, %v3690_v14, %v3694_v43  ;;  %v3723_v62 = vsel %vm2396_vm4, %v3686_v60, %v3690_v14 }
 0x295   : > { %3883 = vrot.lane.b32.xlu1 %v9715_v9, %s8151_s23  ;;  %4597 = vmatprep.subr.mxu1 %v9771_v61  ;;  %v3696_v2 = vpop.permute.xlu1 %3695  ;;  %v9823_v12 = vmax.f32 %v11657_v22, %v3723_v62  ;;  %v11662_v22 = vmax.f32 %v9473_v23, 0.0 }
 0x296   : > { %3893 = vrot.lane.b32.xlu0 %v9771_v61, %s8151_s23  ;;  %4598 = vmatpush1.msra.mxu1 %v9779_v29 }
 0x297   : > { %v3692_v33 = vpop.permute.xlu0 %3691  ;;  %7704 = vmatmul.mubr.msk.f32.vlgmr.msra.gmra.mxu1 %vm4034_vm8, %v9537_v11 }
 0x298   : > { %v3722_v6 = vsel %vm2396_vm4, %v3692_v33, %v3696_v2  ;;  %v3724_v24 = vsel %vm2396_vm4, %v3688_v18, %v3692_v33  ;;  %4637 = vmatprep.mubr.f32.mxu1 %v11634_v55  ;;  %v11656_v18 = vmax.f32 %v9399_v36, 0.0 }
 0x299   : > { %v9803_v3 = vmax.f32 %v11654_v35, %v3724_v24  ;;  %v9807_v41 = vmax.f32 %v11655_v7, %v3722_v6  ;;  %3889 = vrot.lane.b32.xlu1 %v9779_v29, %s8151_s23  ;;  %v3700_v45 = vpop.permute.xlu1 %3699  ;;  %v11659_v24 = vmax.f32 %v9409_v44, 0.0  ;;  %v11660_v35 = vmax.f32 %v9440_v37, 0.0 }
 0x29a   : > { %3895 = vrot.lane.b32.xlu0 %v9763_v58, %s8151_s23  ;;  %v9815_v30 = vmax.f32 %v11656_v18, %v3721_v10  ;;  %v3720_v21 = vsel %vm2396_vm4, %v3696_v2, %v3700_v45  ;;  %v11658_v10 = vmax.f32 %v9429_v38, 0.0  ;;  %v11661_v44 = vmax.f32 %v9389_v57, 0.0 }
 0x29b   : > { %v3698_v60 = vpop.permute.xlu0 %3697  ;;  %7706 = vmatprep.subr.msk.mxu0 %vm4041_vm7, %v9807_v41  ;;  %7705 = vmatmul.mubr.msk.f32.gmra.mxu1 %vm4034_vm8, %v9555_v34  ;;  %v9857_v62 = vmax.f32 %v11659_v24, %v3720_v21 }
 0x29c   : > { %7707 = vmatpush1.msk.msra.mxu0 %vm4041_vm7, %v9803_v3  ;;  %4785 = vmatprep.mubr.f32.mxu1 %v11634_v55  ;;  %v3719_v33 = vsel %vm2396_vm4, %v3694_v43, %v3698_v60 }
 0x29d   : > { %3891 = vrot.lane.b32.xlu1 %v9759_v54, %s8151_s23  ;;  %4674 = vmatprep.subr.mxu0 %v9815_v30  ;;  %v3706_v36 = vpop.permute.xlu1 %3705 }
 0x29e   : > { %3901 = vrot.lane.b32.xlu0 %v9815_v30, %s8151_s23  ;;  %4675 = vmatpush1.msra.mxu0 %v9823_v12 }
 0x29f   : > { %v3702_v42 = vpop.permute.xlu0 %3701  ;;  %7708 = vmatmul.mubr.msk.f32.vlgmr.msra.gmra.mxu0 %vm4034_vm8, %v9537_v11 }
 0x2a0   : > { %4714 = vmatprep.mubr.f32.mxu0 %v11634_v55  ;;  %v3717_v17 = vsel %vm2396_vm4, %v3698_v60, %v3702_v42  ;;  %v3715_v60 = vsel %vm2396_vm4, %v3702_v42, %v3706_v36 }
 0x2a1   : > { %3897 = vrot.lane.b32.xlu1 %v9823_v12, %s8151_s23  ;;  %v3704_v14 = vpop.permute.xlu1 %3703  ;;  %v9861_v7 = vmax.f32 %v11660_v35, %v3717_v17 }
 0x2a2   : > { %3903 = vrot.lane.b32.xlu0 %v9807_v41, %s8151_s23  ;;  %v3718_v27 = vsel %vm2396_vm4, %v3700_v45, %v3704_v14  ;;  %v9872_v45 = vmax.f32 %v11661_v44, %v3719_v33 }
 0x2a3   : > { %v9851_v6 = vmax.f32 %v11658_v10, %v3718_v27  ;;  %v3708_v2 = vpop.permute.xlu0 %3707  ;;  %7709 = vmatmul.mubr.msk.f32.gmra.mxu0 %vm4034_vm8, %v9555_v34 }
 0x2a4   : > { %4862 = vmatprep.mubr.f32.mxu0 %v11634_v55  ;;  %v3716_v43 = vsel %vm2396_vm4, %v3704_v14, %v3708_v2  ;;  %v11663_v14 = vmax.f32 %v9465_v39, 0.0  ;;  %v11664_v39 = vmax.f32 %v9448_v8, 0.0 }
 0x2a5   : > { %3899 = vrot.lane.b32.xlu1 %v9803_v3, %s8151_s23  ;;  %7710 = vmatprep.subr.msk.mxu1 %vm4041_vm7, %v9851_v6  ;;  %v3712_v38 = vpop.permute.xlu1 %3711 }
 0x2a6   : > { %3909 = vrot.lane.b32.xlu0 %v9861_v7, %s8151_s23  ;;  %v3714_v37 = vsel %vm2396_vm4, %v3708_v2, %v3712_v38  ;;  %v3754_v18 = vsel %vm2396_vm4, %v3712_v38, %v9507_v53  ;;  %7711 = vmatpush1.msk.msra.mxu1 %vm4041_vm7, %v9857_v62  ;;  %v9894_v27 = vmax.f32 %v11663_v14, %v3716_v43  ;;  %v7013_v38 = vld [vmem:[#allocation9] sm:$0xff] }
 0x2a7   : > { %v3796_v57 = vsel %vm2438_vm5, %v3754_v18, 0.0  ;;  %v9889_v21 = vmax.f32 %v11662_v22, %v3714_v37  ;;  %v3710_v17 = vpop.permute.xlu0 %3709  ;;  %4751 = vmatprep.subr.mxu1 %v9861_v7  ;;  %v7068_v37 = vld [vmem:[#allocation10 + $0x8] sm:$0xf] }
 0x2a8   : > { %v9897_v53 = vmax.f32 %v9488_v31, %v3796_v57  ;;  %v3713_v42 = vsel %vm2396_vm4, %v3706_v36, %v3710_v17  ;;  %v3753_v33 = vsel %vm2396_vm4, %v3710_v17, %v9496_v16  ;;  %4752 = vmatpush1.msra.mxu1 %v9872_v45  ;;  %v11665_v16 = vmax.f32 %v9457_v4, 0.0 }
 0x2a9   : > { %v3775_v23 = vsel %vm2438_vm5, %v3753_v33, 0.0  ;;  %3905 = vrot.lane.b32.xlu1 %v9872_v45, %s8151_s23  ;;  %7714 = vmatprep.subr.msk.mxu0 %vm4041_vm7, %v9889_v21  ;;  %v9913_v31 = vmax.f32 %v11664_v39, %v3713_v42 }
 0x2aa   : > { %v9916_v36 = vmax.f32 %v9492_v59, %v3775_v23  ;;  %3911 = vrot.lane.b32.xlu0 %v9851_v6, %s8151_s23  ;;  %7715 = vmatpush1.msk.msra.mxu0 %vm4041_vm7, %v9894_v27  ;;  %v9924_v10 = vmax.f32 %v11665_v16, %v3715_v60 }
 0x2ab   : > { %7847 = vmatprep.subr.msk.mxu1 %vm4041_vm7, %v9897_v53  ;;  %7712 = vmatmul.mubr.msk.f32.vlgmr.msra.gmra.mxu1 %vm4034_vm8, %v9537_v11 }
 0x2ac   : > { %4828 = vmatprep.subr.mxu0 %v9913_v31  ;;  %7848 = vmatpush3.msk.msra.mxu1 %vm4041_vm7, %v9897_v53 }
 0x2ad   : > { %4829 = vmatpush1.msra.mxu0 %v9924_v10  ;;  %7849 = vmatprep.subr.mxu1 %v9916_v36 }
 0x2ae   : > { %3907 = vrot.lane.b32.xlu1 %v9857_v62, %s8151_s23  ;;  %7850 = vmatpush3.msra.mxu1 %v9916_v36 }
 0x2af   : > { %3919 = vrot.lane.b32.xlu0 %v9889_v21, %s8151_s23  ;;  %4791 = vmatprep.mubr.f32.mxu1 %v11634_v55 }
 0x2b0   : > { %7713 = vmatmul.mubr.msk.f32.gmra.mxu1 %vm4034_vm8, %v9555_v34  ;;  %7716 = vmatmul.mubr.msk.f32.vlgmr.msra.gmra.mxu0 %vm4034_vm8, %v9537_v11 }
 0x2b1   : > { %7851 = vmatprep.mubr.msk.f32.mxu1 %vm4034_vm8, %v9537_v11  ;;  %4868 = vmatprep.mubr.f32.mxu0 %v11634_v55 }
 0x2b2   : > { %3913 = vrot.lane.b32.xlu1 %v9924_v10, %s8151_s23 }
 0x2b3   : > { %3917 = vrot.lane.b32.xlu0 %v9913_v31, %s8151_s23 }
 0x2b4   : > { %7852 = vmatmul.mubr.msk.f32.vlgmr.msra.gmra.mxu1 %vm4034_vm8, %v9555_v34  ;;  %7717 = vmatmul.mubr.msk.f32.gmra.mxu0 %vm4034_vm8, %v9555_v34 }
 0x2b5   : > { %5160 = vmatprep.mubr.f32.mxu1 %v11634_v55  ;;  %5083 = vmatprep.mubr.f32.mxu0 %v11634_v55 }
 0x2b6   : > { %3923 = vrot.lane.b32.xlu1 %v9897_v53, %s8151_s23 }
 0x2b7   : > { %3921 = vrot.lane.b32.xlu0 %v9916_v36, %s8151_s23 }
 0x2b9   : > { %v9984_v8 = vpop.permute.xlu0 %3841 }
 0x2ba   : > { %5875 = vrot.lane.b32.xlu1 %v9524_v56, %s8152_s27 }
 0x2bb   : > { %5867 = vrot.lane.b32.xlu0 %v9503_v48, %s8152_s27 }
 0x2be   : > { %3915 = vrot.lane.b32.xlu1 %v9894_v27, %s8151_s23 }
 0x2bf   : > { %5885 = vrot.lane.b32.xlu0 %v9580_v32, %s8152_s27 }
 0x2c2   : > { %5881 = vrot.lane.b32.xlu1 %v9559_v26, %s8152_s27 }
 0x2c3   : > { %5883 = vrot.lane.b32.xlu0 %v9601_v46, %s8152_s27 }
 0x2c6   : > { %5879 = vrot.lane.b32.xlu1 %v9546_v15, %s8152_s27 }
 0x2c7   : > { %5893 = vrot.lane.b32.xlu0 %v9627_v47, %s8152_s27 }
 0x2ca   : > { %5889 = vrot.lane.b32.xlu1 %v9584_v49, %s8152_s27 }
 0x2cb   : > { %5891 = vrot.lane.b32.xlu0 %v9647_v52, %s8152_s27 }
 0x2ce   : > { %5887 = vrot.lane.b32.xlu1 %v9593_v51, %s8152_s27 }
 0x2cf   : > { %5901 = vrot.lane.b32.xlu0 %v9671_v28, %s8152_s27  ;;  %v10047_v28 = vld [vmem:[#allocation7] sm:$0xff] }
 0x2d2   : > { %5897 = vrot.lane.b32.xlu1 %v9631_v1, %s8152_s27 }
 0x2d3   : > { %5899 = vrot.lane.b32.xlu0 %v9691_v25, %s8152_s27  ;;  %v9992_v4 = vpop.permute.xlu0 %5871  ;;  %v9994_v48 = vpop.permute.xlu1 %3845 }
 0x2d6   : > { %5895 = vrot.lane.b32.xlu1 %v9639_v5, %s8152_s27 }
 0x2d7   : > { %5909 = vrot.lane.b32.xlu0 %v9715_v9, %s8152_s27  ;;  %v3850_v59 = vpop.permute.xlu0 %3849  ;;  %v10000_v56 = vpop.permute.xlu1 %3843  ;;  %v10063_v9 = vld [vmem:[#allocation7 + $0x8] sm:$0xf] }
 0x2da   : > { %5905 = vrot.lane.b32.xlu1 %v9675_v40, %s8152_s27 }
 0x2db   : > { %5907 = vrot.lane.b32.xlu0 %v9735_v13, %s8152_s27  ;;  %v10006_v11 = vpop.permute.xlu1 %5869 }
 0x2dc   : > { %v3848_v15 = vpop.permute.xlu0 %3847 }
 0x2dd   : > { %v3965_v34 = vsel %vm3925_vm9, %v10000_v56, %v3848_v15 }
 0x2de   : > { %5903 = vrot.lane.b32.xlu1 %v9683_v0, %s8152_s27  ;;  %7721 = vmatprep.subr.msk.mxu0 %vm4041_vm7, %v3965_v34  ;;  %v3962_v0 = vsel %vm3925_vm9, %v9994_v48, %v3850_v59 }
 0x2df   : > { %5917 = vrot.lane.b32.xlu0 %v9759_v54, %s8152_s27  ;;  %v10017_v26 = vpop.permute.xlu1 %3853 }
 0x2e0   : > { %v10019_v32 = vpop.permute.xlu0 %5877  ;;  %v3960_v52 = vsel %vm3925_vm9, %v3850_v59, %v10017_v26 }
 0x2e2   : > { %5913 = vrot.lane.b32.xlu1 %v9719_v50, %s8152_s27 }
 0x2e3   : > { %5915 = vrot.lane.b32.xlu0 %v9779_v29, %s8152_s27  ;;  %v10025_v49 = vpop.permute.xlu1 %5873 }
 0x2e4   : > { %v10027_v51 = vpop.permute.xlu0 %3855 }
 0x2e6   : > { %5911 = vrot.lane.b32.xlu1 %v9727_v63, %s8152_s27 }
 0x2e7   : > { %5925 = vrot.lane.b32.xlu0 %v9803_v3, %s8152_s27  ;;  %v3852_v46 = vpop.permute.xlu1 %3851 }
 0x2e8   : > { %v10033_v47 = vpop.permute.xlu0 %3861  ;;  %v3963_v1 = vsel %vm3925_vm9, %v3848_v15, %v3852_v46  ;;  %v3961_v5 = vsel %vm3925_vm9, %v3852_v46, %v10027_v51 }
 0x2e9   : > { %7726 = vmatprep.subr.msk.mxu1 %vm4041_vm7, %v3961_v5 }
 0x2ea   : > { %5921 = vrot.lane.b32.xlu1 %v9763_v58, %s8152_s27  ;;  %7727 = vmatpush1.msk.msra.mxu1 %vm4041_vm7, %v3963_v1 }
 0x2eb   : > { %5923 = vrot.lane.b32.xlu0 %v9823_v12, %s8152_s27  ;;  %5126 = vmatprep.subr.mxu1 %v3960_v52  ;;  %v10051_v40 = vpop.permute.xlu1 %3857 }
 0x2ec   : > { %v10056_v25 = vpop.permute.xlu0 %3863  ;;  %5127 = vmatpush1.msra.mxu1 %v3962_v0 }
 0x2ed   : > { %7728 = vmatmul.mubr.msk.f32.vlgmr.msra.gmra.mxu1 %vm4034_vm8, %v10047_v28 }
 0x2ee   : > { %5919 = vrot.lane.b32.xlu1 %v9771_v61, %s8152_s27  ;;  %5166 = vmatprep.mubr.f32.mxu1 %v11634_v55 }
 0x2ef   : > { %5933 = vrot.lane.b32.xlu0 %v9857_v62, %s8152_s27  ;;  %v10067_v50 = vpop.permute.xlu1 %3859 }
 0x2f0   : > { %v10069_v63 = vpop.permute.xlu0 %3869 }
 0x2f1   : > { %7729 = vmatmul.mubr.msk.f32.gmra.mxu1 %vm4034_vm8, %v10063_v9 }
 0x2f2   : > { %5929 = vrot.lane.b32.xlu1 %v9807_v41, %s8152_s27  ;;  %5314 = vmatprep.mubr.f32.mxu1 %v11634_v55 }
 0x2f3   : > { %5931 = vrot.lane.b32.xlu0 %v9872_v45, %s8152_s27  ;;  %v3866_v13 = vpop.permute.xlu1 %3865 }
 0x2f4   : > { %v10078_v54 = vpop.permute.xlu0 %3871  ;;  %v3952_v41 = vsel %vm3925_vm9, %v3866_v13, %v10069_v63  ;;  %v3954_v12 = vsel %vm3925_vm9, %v10033_v47, %v3866_v13 }
 0x2f6   : > { %5927 = vrot.lane.b32.xlu1 %v9815_v30, %s8152_s27 }
 0x2f7   : > { %5941 = vrot.lane.b32.xlu0 %v9894_v27, %s8152_s27  ;;  %v3868_v58 = vpop.permute.xlu1 %3867 }
 0x2f8   : > { %v10084_v61 = vpop.permute.xlu0 %3877  ;;  %v3955_v29 = vsel %vm3925_vm9, %v10056_v25, %v3868_v58  ;;  %v3953_v3 = vsel %vm3925_vm9, %v3868_v58, %v10078_v54  ;;  %v3964_v58 = vsel %vm3925_vm9, %v9984_v8, %v9994_v48  ;;  %v3959_v48 = vsel %vm3925_vm9, %v10027_v51, %v10067_v50 }
 0x2f9   : > { %7734 = vmatprep.subr.msk.mxu1 %vm4041_vm7, %v3953_v3  ;;  %v3958_v51 = vsel %vm3925_vm9, %v10017_v26, %v10051_v40 }
 0x2fa   : > { %5937 = vrot.lane.b32.xlu1 %v9851_v6, %s8152_s27  ;;  %7735 = vmatpush1.msk.msra.mxu1 %vm4041_vm7, %v3955_v29 }
 0x2fb   : > { %5939 = vrot.lane.b32.xlu0 %v9924_v10, %s8152_s27  ;;  %5280 = vmatprep.subr.mxu1 %v3952_v41  ;;  %v10101_v30 = vpop.permute.xlu1 %3873 }
 0x2fc   : > { %v10106_v2 = vpop.permute.xlu0 %3879  ;;  %5281 = vmatpush1.msra.mxu1 %v3954_v12 }
 0x2fd   : > { %7736 = vmatmul.mubr.msk.f32.vlgmr.msra.gmra.mxu1 %vm4034_vm8, %v10047_v28 }
 0x2fe   : > { %5935 = vrot.lane.b32.xlu1 %v9861_v7, %s8152_s27  ;;  %5320 = vmatprep.mubr.f32.mxu1 %v11634_v55  ;;  %v7014_v7 = vld [vmem:[#allocation9 + $0x8] sm:$0xf] }
 0x2ff   : > { %5949 = vrot.lane.b32.xlu0 %v9897_v53, %s8152_s27  ;;  %v10115_v6 = vpop.permute.xlu1 %3875 }
 0x300   : > { %v10117_v24 = vpop.permute.xlu0 %3885 }
 0x301   : > { %7737 = vmatmul.mubr.msk.f32.gmra.mxu1 %vm4034_vm8, %v10063_v9 }
 0x302   : > { %5945 = vrot.lane.b32.xlu1 %v9889_v21, %s8152_s27  ;;  %5468 = vmatprep.mubr.f32.mxu1 %v11634_v55  ;;  %v7067_v21 = vld [vmem:[#allocation10] sm:$0xff] }
 0x303   : > { %5947 = vrot.lane.b32.xlu0 %v9916_v36, %s8152_s27  ;;  %v3882_v62 = vpop.permute.xlu1 %3881 }
 0x304   : > { %v10126_v35 = vpop.permute.xlu0 %3887  ;;  %v3944_v60 = vsel %vm3925_vm9, %v3882_v62, %v10117_v24  ;;  %v3946_v22 = vsel %vm3925_vm9, %v10084_v61, %v3882_v62 }
 0x306   : > { %5943 = vrot.lane.b32.xlu1 %v9913_v31, %s8152_s27 }
 0x307   : > { %7022 = vperm.xlu0 %7947, %v7014_v7   ;;  %v3884_v43 = vpop.permute.xlu1 %3883 }
 0x308   : > { %v10130_v44 = vpop.permute.xlu0 %3893  ;;  %v3947_v45 = vsel %vm3925_vm9, %v10106_v2, %v3884_v43  ;;  %v3945_v18 = vsel %vm3925_vm9, %v3884_v43, %v10126_v35  ;;  %v3951_v43 = vsel %vm3925_vm9, %v10078_v54, %v10115_v6  ;;  %v5991_v54 = vsel %vm5951_vm11, %v10006_v11, %v10025_v49 }
 0x309   : > { %7742 = vmatprep.subr.msk.mxu1 %vm4041_vm7, %v3945_v18 }
 0x30a   : > { %7017 = vperm.xlu1 %7948, %v7013_v38   ;;  %7743 = vmatpush1.msk.msra.mxu1 %vm4041_vm7, %v3947_v45  ;;  %v5989_v38 = vsel %vm5951_vm11, %v10025_v49, %v10019_v32  ;;  %v3948_v45 = vsel %vm3925_vm9, %v10101_v30, %v10084_v61 }
 0x30b   : > { %7076 = vperm.xlu0 %7947, %v7068_v37   ;;  %5434 = vmatprep.subr.mxu1 %v3944_v60  ;;  %v10143_v57 = vpop.permute.xlu1 %3889 }
 0x30c   : > { %v10148_v17 = vpop.permute.xlu0 %3895  ;;  %5435 = vmatpush1.msra.mxu1 %v3946_v22 }
 0x30d   : > { %7744 = vmatmul.mubr.msk.f32.vlgmr.msra.gmra.mxu1 %vm4034_vm8, %v10047_v28 }
 0x30e   : > { %7071 = vperm.xlu1 %7948, %v7067_v21   ;;  %5474 = vmatprep.mubr.f32.mxu1 %v11634_v55 }
 0x30f   : > { %v10153_v14 = vpop.permute.xlu1 %3891 }
 0x310   : > { %v10155_v27 = vpop.permute.xlu0 %3901 }
 0x311   : > { %7745 = vmatmul.mubr.msk.f32.gmra.mxu1 %vm4034_vm8, %v10063_v9 }
 0x312   : > { %5622 = vmatprep.mubr.f32.mxu1 %v11634_v55 }
 0x313   : > { %v3898_v53 = vpop.permute.xlu1 %3897 }
 0x314   : > { %v10160_v42 = vpop.permute.xlu0 %3903  ;;  %v3936_v36 = vsel %vm3925_vm9, %v3898_v53, %v10155_v27  ;;  %v3938_v16 = vsel %vm3925_vm9, %v10130_v44, %v3898_v53 }
 0x317   : > { %v3900_v33 = vpop.permute.xlu1 %3899 }
 0x318   : > { %v10162_v23 = vpop.permute.xlu0 %3909  ;;  %v3937_v39 = vsel %vm3925_vm9, %v3900_v33, %v10160_v42  ;;  %v3939_v31 = vsel %vm3925_vm9, %v10148_v17, %v3900_v33  ;;  %v3940_v33 = vsel %vm3925_vm9, %v10143_v57, %v10130_v44 }
 0x319   : > { %7750 = vmatprep.subr.msk.mxu1 %vm4041_vm7, %v3937_v39 }
 0x31a   : > { %7751 = vmatpush1.msk.msra.mxu1 %vm4041_vm7, %v3939_v31 }
 0x31b   : > { %5588 = vmatprep.subr.mxu1 %v3936_v36  ;;  %v10178_v10 = vpop.permute.xlu1 %3905 }
 0x31c   : > { %v10180_v59 = vpop.permute.xlu0 %3911  ;;  %5589 = vmatpush1.msra.mxu1 %v3938_v16 }
 0x31d   : > { %7752 = vmatmul.mubr.msk.f32.vlgmr.msra.gmra.mxu1 %vm4034_vm8, %v10047_v28 }
 0x31e   : > { %5628 = vmatprep.mubr.f32.mxu1 %v11634_v55 }
 0x320   : > { %v10185_v15 = vpop.permute.xlu1 %3907 }
 0x321   : > { %v10187_v34 = vpop.permute.xlu0 %3919  ;;  %7753 = vmatmul.mubr.msk.f32.gmra.mxu1 %vm4034_vm8, %v10063_v9  ;;  %v3933_v31 = vsel %vm3925_vm9, %v10185_v15, %v10180_v59 }
 0x322   : > { %5776 = vmatprep.mubr.f32.mxu1 %v11634_v55 }
 0x324   : > { %v3914_v46 = vpop.permute.xlu1 %3913 }
 0x325   : > { %v10192_v1 = vpop.permute.xlu0 %3917 }
 0x326   : > { %v3928_v26 = vsel %vm3925_vm9, %v3914_v46, %v10192_v1 }
 0x328   : > { %v10195_v5 = vpop.permute.xlu1 %3923 }
 0x329   : > { %v10197_v52 = vpop.permute.xlu0 %3921  ;;  %v3967_v0 = vsel %vm3925_vm9, %v10195_v5, %v10000_v56  ;;  %v3957_v56 = vsel %vm3925_vm9, %v10067_v50, %v10056_v25 }
 0x32a   : > { %v4010_v13 = vsel %vm3968_vm10, %v3967_v0, 0.0  ;;  %v3966_v29 = vsel %vm3925_vm9, %v10197_v52, %v9984_v8  ;;  %v3956_v8 = vsel %vm3925_vm9, %v10051_v40, %v10033_v47  ;;  %v3949_v47 = vsel %vm3925_vm9, %v10115_v6, %v10106_v2 }
 0x32b   : > { %7722 = vmatpush1.msk.msra.mxu0 %vm4041_vm7, %v4010_v13  ;;  %v3930_v2 = vsel %vm3925_vm9, %v10162_v23, %v3914_v46  ;;  %v3950_v6 = vsel %vm3925_vm9, %v10069_v63, %v10101_v30  ;;  %v3941_v63 = vsel %vm3925_vm9, %v10153_v14, %v10148_v17  ;;  %v3943_v17 = vsel %vm3925_vm9, %v10126_v35, %v10153_v14  ;;  %v10349_v14 = vld [vmem:[#allocation7 + $0x28] sm:$0xf] }
 0x32c   : > { %5049 = vmatprep.subr.mxu0 %v3964_v58  ;;  %v10212_v3 = vpop.permute.xlu1 %5875  ;;  %v3942_v35 = vsel %vm3925_vm9, %v10117_v24, %v10143_v57  ;;  %v3932_v0 = vsel %vm3925_vm9, %v10178_v10, %v10162_v23 }
 0x32d   : > { %v10214_v41 = vpop.permute.xlu0 %5867  ;;  %7723 = vmatpush1.msk.msra.mxu0 %vm3968_vm10, %v3966_v29  ;;  %v5988_v49 = vsel %vm5951_vm11, %v9992_v4, %v10212_v3 }
 0x32e   : > { %7724 = vmatmul.mubr.msk.f32.vlgmr.msra.gmra.mxu0 %vm4034_vm8, %v10047_v28  ;;  %7730 = vmatprep.subr.msk.mxu0 %vm4041_vm7, %v3957_v56  ;;  %v5990_v61 = vsel %vm5951_vm11, %v10214_v41, %v9992_v4  ;;  %v10323_v4 = vld [vmem:[#allocation7 + $0x20] sm:$0xff]  ;;  %v3926_v56 = vsel %vm3925_vm9, %v10192_v1, %v10197_v52 }
 0x32f   : > { %7731 = vmatpush1.msk.msra.mxu0 %vm4041_vm7, %v3959_v48  ;;  %5089 = vmatprep.mubr.f32.mxu0 %v11634_v55 }
 0x330   : > { %5203 = vmatprep.subr.mxu0 %v3956_v8  ;;  %v3916_v25 = vpop.permute.xlu1 %3915 }
 0x331   : > { %v10237_v50 = vpop.permute.xlu0 %5885  ;;  %v3929_v12 = vsel %vm3925_vm9, %v3916_v25, %v10187_v34  ;;  %v3931_v62 = vsel %vm3925_vm9, %v10180_v59, %v3916_v25  ;;  %5204 = vmatpush1.msra.mxu0 %v3958_v51  ;;  %v3935_v59 = vsel %vm3925_vm9, %v10160_v42, %v10185_v15  ;;  %v3934_v42 = vsel %vm3925_vm9, %v10155_v27, %v10178_v10 }
 0x332   : > { %7725 = vmatmul.mubr.msk.f32.gmra.mxu0 %vm4034_vm8, %v10063_v9  ;;  %7738 = vmatprep.subr.msk.mxu0 %vm4041_vm7, %v3949_v47  ;;  %v3927_v15 = vsel %vm3925_vm9, %v10187_v34, %v10195_v5 }
 0x333   : > { %7758 = vmatprep.subr.msk.mxu1 %vm4041_vm7, %v3929_v12  ;;  %5237 = vmatprep.mubr.f32.mxu0 %v11634_v55 }
 0x334   : > { %7759 = vmatpush1.msk.msra.mxu1 %vm4041_vm7, %v3931_v62  ;;  %v10259_v40 = vpop.permute.xlu1 %5881 }
 0x335   : > { %v10264_v7 = vpop.permute.xlu0 %5883  ;;  %5742 = vmatprep.subr.mxu1 %v3928_v26  ;;  %v5985_v48 = vsel %vm5951_vm11, %v10259_v40, %v10237_v50  ;;  %v5987_v52 = vsel %vm5951_vm11, %v10019_v32, %v10259_v40 }
 0x336   : > { %5743 = vmatpush1.msra.mxu1 %v3930_v2  ;;  %7732 = vmatmul.mubr.msk.f32.vlgmr.msra.gmra.mxu0 %vm4034_vm8, %v10047_v28  ;;  %v10489_v2 = vpop.f32.mrf.mxu1 }
 0x337   : > { %7739 = vmatpush1.msk.msra.mxu0 %vm4041_vm7, %v3951_v43  ;;  %7760 = vmatmul.mubr.msk.f32.vlgmr.msra.gmra.mxu1 %vm4034_vm8, %v10047_v28 }
 0x338   : > { %7765 = vmatprep.subr.msk.mxu1 %vm4041_vm7, %v5989_v38  ;;  %5357 = vmatprep.subr.mxu0 %v3948_v45  ;;  %v10292_v37 = vpop.permute.xlu1 %5879 }
 0x339   : > { %7766 = vmatpush1.msk.msra.mxu1 %vm4041_vm7, %v5991_v54  ;;  %v10295_v18 = vpop.permute.xlu0 %5893  ;;  %5358 = vmatpush1.msra.mxu0 %v3950_v6  ;;  %v10502_v6 = vpop.f32.mrf.mxu1 }
 0x33a   : > { %6156 = vmatprep.subr.mxu1 %v5988_v49  ;;  %5243 = vmatprep.mubr.f32.mxu0 %v11634_v55 }
 0x33b   : > { %7746 = vmatprep.subr.msk.mxu0 %vm4041_vm7, %v3941_v63  ;;  %5782 = vmatprep.mubr.f32.mxu1 %v11634_v55 }
 0x33c   : > { %6157 = vmatpush1.msra.mxu1 %v5990_v61  ;;  %7733 = vmatmul.mubr.msk.f32.gmra.mxu0 %vm4034_vm8, %v10063_v9  ;;  %v5890_v30 = vpop.permute.xlu1 %5889 }
 0x33d   : > { %7761 = vmatmul.mubr.msk.f32.gmra.mxu1 %vm4034_vm8, %v10063_v9  ;;  %v10316_v60 = vpop.permute.xlu0 %5891  ;;  %v5981_v22 = vsel %vm5951_vm11, %v5890_v30, %v10295_v18  ;;  %5391 = vmatprep.mubr.f32.mxu0 %v11634_v55  ;;  %v5983_v21 = vsel %vm5951_vm11, %v10237_v50, %v5890_v30  ;;  %v5984_v50 = vsel %vm5951_vm11, %v10292_v37, %v10264_v7 }
 0x33e   : > { %6190 = vmatprep.mubr.f32.mxu1 %v11634_v55  ;;  %7773 = vmatprep.subr.msk.mxu1 %vm4041_vm7, %v5981_v22 }
 0x340   : > { %7740 = vmatmul.mubr.msk.f32.vlgmr.msra.gmra.mxu0 %vm4034_vm8, %v10047_v28  ;;  %v5888_v53 = vpop.permute.xlu1 %5887 }
 0x341   : > { %7747 = vmatpush1.msk.msra.mxu0 %vm4041_vm7, %v3943_v17  ;;  %7767 = vmatmul.mubr.msk.f32.vlgmr.msra.gmra.mxu1 %vm4034_vm8, %v10323_v4  ;;  %v10342_v39 = vpop.permute.xlu0 %5901  ;;  %v5980_v44 = vsel %vm5951_vm11, %v5888_v53, %v10316_v60  ;;  %v5982_v36 = vsel %vm5951_vm11, %v10264_v7, %v5888_v53 }
 0x342   : > { %5511 = vmatprep.subr.mxu0 %v3940_v33  ;;  %7774 = vmatpush1.msk.msra.mxu1 %vm4041_vm7, %v5983_v21 }
 0x343   : > { %5512 = vmatpush1.msra.mxu0 %v3942_v35  ;;  %5397 = vmatprep.mubr.f32.mxu0 %v11634_v55 }
 0x344   : > { %7754 = vmatprep.subr.msk.mxu0 %vm4041_vm7, %v3933_v31  ;;  %6196 = vmatprep.mubr.f32.mxu1 %v11634_v55  ;;  %v10364_v24 = vpop.permute.xlu1 %5897 }
 0x345   : > { %7741 = vmatmul.mubr.msk.f32.gmra.mxu0 %vm4034_vm8, %v10063_v9  ;;  %7768 = vmatmul.mubr.msk.f32.gmra.mxu1 %vm4034_vm8, %v10349_v14  ;;  %v10370_v57 = vpop.permute.xlu0 %5899  ;;  %v5977_v32 = vsel %vm5951_vm11, %v10364_v24, %v10342_v39  ;;  %v5979_v12 = vsel %vm5951_vm11, %v10295_v18, %v10364_v24 }
 0x346   : > { %6310 = vmatprep.subr.mxu1 %v5980_v44  ;;  %5545 = vmatprep.mubr.f32.mxu0 %v11634_v55 }
 0x347   : > { %6311 = vmatpush1.msra.mxu1 %v5982_v36  ;;  %6344 = vmatprep.mubr.f32.mxu1 %v11634_v55 }
 0x348   : > { %v10374_v16 = vpop.permute.xlu1 %5895 }
 0x349   : > { %7748 = vmatmul.mubr.msk.f32.vlgmr.msra.gmra.mxu0 %vm4034_vm8, %v10047_v28  ;;  %7775 = vmatmul.mubr.msk.f32.vlgmr.msra.gmra.mxu1 %vm4034_vm8, %v10323_v4  ;;  %v10384_v46 = vpop.permute.xlu0 %5909  ;;  %v5976_v26 = vsel %vm5951_vm11, %v10374_v16, %v10370_v57  ;;  %v5978_v40 = vsel %vm5951_vm11, %v10316_v60, %v10374_v16  ;;  %v10521_v60 = vpop.f32.mrf.mxu1 }
 0x34a   : > { %7755 = vmatpush1.msk.msra.mxu0 %vm4041_vm7, %v3935_v59  ;;  %5551 = vmatprep.mubr.f32.mxu0 %v11634_v55 }
 0x34b   : > { %5665 = vmatprep.subr.mxu0 %v3932_v0  ;;  %6350 = vmatprep.mubr.f32.mxu1 %v11634_v55  ;;  %v10530_v17 = vpop.f32.mrf.mxu1 }
 0x34c   : > { %5666 = vmatpush1.msra.mxu0 %v3934_v42  ;;  %v5906_v13 = vpop.permute.xlu1 %5905 }
 0x34d   : > { %7854 = vmatprep.subr.msk.mxu0 %vm4041_vm7, %v3927_v15  ;;  %7749 = vmatmul.mubr.msk.f32.gmra.mxu0 %vm4034_vm8, %v10063_v9  ;;  %v10404_v23 = vpop.permute.xlu0 %5907  ;;  %v5973_v27 = vsel %vm5951_vm11, %v5906_v13, %v10384_v46  ;;  %v5975_v10 = vsel %vm5951_vm11, %v10342_v39, %v5906_v13  ;;  %v10547_v24 = vpop.f32.mrf.mxu1 }
 0x34e   : > { %7776 = vmatmul.mubr.msk.f32.gmra.mxu1 %vm4034_vm8, %v10349_v14  ;;  %5699 = vmatprep.mubr.f32.mxu0 %v11634_v55 }
 0x34f   : > { %7781 = vmatprep.subr.msk.mxu1 %vm4041_vm7, %v5973_v27  ;;  %6498 = vmatprep.mubr.f32.mxu1 %v11634_v55 }
 0x350   : > { %7782 = vmatpush1.msk.msra.mxu1 %vm4041_vm7, %v5975_v10  ;;  %v5904_v34 = vpop.permute.xlu1 %5903 }
 0x351   : > { %7756 = vmatmul.mubr.msk.f32.vlgmr.msra.gmra.mxu0 %vm4034_vm8, %v10047_v28  ;;  %v5918_v5 = vpop.permute.xlu0 %5917  ;;  %v5974_v58 = vsel %vm5951_vm11, %v10370_v57, %v5904_v34  ;;  %v5972_v29 = vsel %vm5951_vm11, %v5904_v34, %v10404_v23 }
 0x352   : > { %7855 = vmatpush3.msk.msra.mxu0 %vm4041_vm7, %v3927_v15  ;;  %5705 = vmatprep.mubr.f32.mxu0 %v11634_v55  ;;  %v10563_v15 = vpop.f32.mrf.mxu1 }
 0x353   : > { %7856 = vmatprep.subr.mxu0 %v3926_v56  ;;  %6464 = vmatprep.subr.mxu1 %v5972_v29 }
 0x354   : > { %7857 = vmatpush3.msra.mxu0 %v3926_v56  ;;  %6465 = vmatpush1.msra.mxu1 %v5974_v58  ;;  %v5914_v8 = vpop.permute.xlu1 %5913  ;;  %v10583_v34 = vpop.f32.mrf.mxu1 }
 0x355   : > { %7769 = vmatprep.subr.msk.mxu0 %vm4041_vm7, %v5985_v48  ;;  %7757 = vmatmul.mubr.msk.f32.gmra.mxu0 %vm4034_vm8, %v10063_v9  ;;  %v5916_v25 = vpop.permute.xlu0 %5915  ;;  %v5969_v7 = vsel %vm5951_vm11, %v5914_v8, %v5918_v5  ;;  %v5971_v18 = vsel %vm5951_vm11, %v10384_v46, %v5914_v8 }
 0x356   : > { %7783 = vmatmul.mubr.msk.f32.vlgmr.msra.gmra.mxu1 %vm4034_vm8, %v10323_v4  ;;  %7858 = vmatprep.mubr.msk.f32.mxu0 %vm4034_vm8, %v10047_v28  ;;  %v5986_v28 = vsel %vm5951_vm11, %v10212_v3, %v10292_v37  ;;  %v10599_v29 = vpop.f32.mrf.mxu1 }
 0x357   : > { %6504 = vmatprep.mubr.f32.mxu1 %v11634_v55 }
 0x358   : > { %v5912_v1 = vpop.permute.xlu1 %5911  ;;  %v10606_v56 = vpop.f32.mrf.mxu1 }
 0x359   : > { %7859 = vmatmul.mubr.msk.f32.vlgmr.msra.gmra.mxu0 %vm4034_vm8, %v10063_v9  ;;  %v5926_v51 = vpop.permute.xlu0 %5925  ;;  %v5968_v63 = vsel %vm5951_vm11, %v5912_v1, %v5916_v25  ;;  %v5970_v30 = vsel %vm5951_vm11, %v10404_v23, %v5912_v1 }
 0x35a   : > { %7770 = vmatpush1.msk.msra.mxu0 %vm4041_vm7, %v5987_v52  ;;  %7784 = vmatmul.mubr.msk.f32.gmra.mxu1 %vm4034_vm8, %v10349_v14  ;;  %v10610_v48 = vpop.f32.mrf.mxu1 }
 0x35b   : > { %6233 = vmatprep.subr.mxu0 %v5984_v50  ;;  %6267 = vmatprep.mubr.f32.mxu0 %v11634_v55 }
 0x35c   : > { %6234 = vmatpush1.msra.mxu0 %v5986_v28  ;;  %v5922_v9 = vpop.permute.xlu1 %5921  ;;  %6652 = vmatprep.mubr.f32.mxu1 %v11634_v55  ;;  %v10612_v8 = vpop.f32.mrf.mxu1 }
 0x35d   : > { %7777 = vmatprep.subr.msk.mxu0 %vm4041_vm7, %v5977_v32  ;;  %7771 = vmatmul.mubr.msk.f32.vlgmr.msra.gmra.mxu0 %vm4034_vm8, %v10323_v4  ;;  %v5924_v3 = vpop.permute.xlu0 %5923  ;;  %v5965_v62 = vsel %vm5951_vm11, %v5922_v9, %v5926_v51  ;;  %v5967_v47 = vsel %vm5951_vm11, %v5918_v5, %v5922_v9 }
 0x35e   : > { %7778 = vmatpush1.msk.msra.mxu0 %vm4041_vm7, %v5979_v12  ;;  %6273 = vmatprep.mubr.f32.mxu0 %v11634_v55 }
 0x35f   : > { %6387 = vmatprep.subr.mxu0 %v5976_v26  ;;  %7789 = vmatprep.subr.msk.mxu1 %vm4041_vm7, %v5965_v62 }
 0x360   : > { %6388 = vmatpush1.msra.mxu0 %v5978_v40  ;;  %7790 = vmatpush1.msk.msra.mxu1 %vm4041_vm7, %v5967_v47  ;;  %v5920_v43 = vpop.permute.xlu1 %5919 }
 0x361   : > { %7785 = vmatprep.subr.msk.mxu0 %vm4041_vm7, %v5969_v7  ;;  %7772 = vmatmul.mubr.msk.f32.gmra.mxu0 %vm4034_vm8, %v10349_v14  ;;  %v5934_v38 = vpop.permute.xlu0 %5933  ;;  %v5966_v45 = vsel %vm5951_vm11, %v5916_v25, %v5920_v43  ;;  %v5964_v54 = vsel %vm5951_vm11, %v5920_v43, %v5924_v3  ;;  %v10614_v25 = vpop.f32.mrf.mxu1 }
 0x362   : > { %6421 = vmatprep.mubr.f32.mxu0 %v11634_v55  ;;  %6618 = vmatprep.subr.mxu1 %v5964_v54 }
 0x363   : > { %6619 = vmatpush1.msra.mxu1 %v5966_v45  ;;  %v10616_v1 = vpop.f32.mrf.mxu1 }
 0x364   : > { %7791 = vmatmul.mubr.msk.f32.vlgmr.msra.gmra.mxu1 %vm4034_vm8, %v10323_v4  ;;  %v5930_v37 = vpop.permute.xlu1 %5929 }
 0x365   : > { %7779 = vmatmul.mubr.msk.f32.vlgmr.msra.gmra.mxu0 %vm4034_vm8, %v10323_v4  ;;  %v5932_v49 = vpop.permute.xlu0 %5931  ;;  %6658 = vmatprep.mubr.f32.mxu1 %v11634_v55  ;;  %v5961_v61 = vsel %vm5951_vm11, %v5930_v37, %v5934_v38  ;;  %v5963_v39 = vsel %vm5951_vm11, %v5926_v51, %v5930_v37  ;;  %v10618_v52 = vpop.f32.mrf.mxu1 }
 0x366   : > { %7786 = vmatpush1.msk.msra.mxu0 %vm4041_vm7, %v5971_v18  ;;  %6427 = vmatprep.mubr.f32.mxu0 %v11634_v55 }
 0x367   : > { %6541 = vmatprep.subr.mxu0 %v5968_v63 }
 0x368   : > { %6542 = vmatpush1.msra.mxu0 %v5970_v30  ;;  %7792 = vmatmul.mubr.msk.f32.gmra.mxu1 %vm4034_vm8, %v10349_v14  ;;  %v5928_v22 = vpop.permute.xlu1 %5927 }
 0x369   : > { %7780 = vmatmul.mubr.msk.f32.gmra.mxu0 %vm4034_vm8, %v10349_v14  ;;  %7793 = vmatprep.subr.msk.mxu0 %vm4041_vm7, %v5961_v61  ;;  %v5942_v21 = vpop.permute.xlu0 %5941  ;;  %v5960_v53 = vsel %vm5951_vm11, %v5928_v22, %v5932_v49  ;;  %v5962_v36 = vsel %vm5951_vm11, %v5924_v3, %v5928_v22 }
 0x36a   : > { %6575 = vmatprep.mubr.f32.mxu0 %v11634_v55  ;;  %6806 = vmatprep.mubr.f32.mxu1 %v11634_v55 }
 0x36c   : > { %v5938_v33 = vpop.permute.xlu1 %5937 }
 0x36d   : > { %7787 = vmatmul.mubr.msk.f32.vlgmr.msra.gmra.mxu0 %vm4034_vm8, %v10323_v4  ;;  %v5940_v35 = vpop.permute.xlu0 %5939  ;;  %v5957_v31 = vsel %vm5951_vm11, %v5938_v33, %v5942_v21  ;;  %v5959_v44 = vsel %vm5951_vm11, %v5934_v38, %v5938_v33 }
 0x36e   : > { %7794 = vmatpush1.msk.msra.mxu0 %vm4041_vm7, %v5963_v39  ;;  %6581 = vmatprep.mubr.f32.mxu0 %v11634_v55 }
 0x36f   : > { %6695 = vmatprep.subr.mxu0 %v5960_v53  ;;  %7797 = vmatprep.subr.msk.mxu1 %vm4041_vm7, %v5957_v31 }
 0x370   : > { %6696 = vmatpush1.msra.mxu0 %v5962_v36  ;;  %7798 = vmatpush1.msk.msra.mxu1 %vm4041_vm7, %v5959_v44  ;;  %v5936_v57 = vpop.permute.xlu1 %5935 }
 0x371   : > { %7788 = vmatmul.mubr.msk.f32.gmra.mxu0 %vm4034_vm8, %v10349_v14  ;;  %v5950_v16 = vpop.permute.xlu0 %5949  ;;  %v5958_v59 = vsel %vm5951_vm11, %v5932_v49, %v5936_v57  ;;  %v5956_v46 = vsel %vm5951_vm11, %v5936_v57, %v5940_v35 }
 0x372   : > { %v5993_v0 = vsel %vm5951_vm11, %v5950_v16, %v10006_v11  ;;  %6729 = vmatprep.mubr.f32.mxu0 %v11634_v55  ;;  %6772 = vmatprep.subr.mxu1 %v5956_v46 }
 0x373   : > { %v6056_v42 = vsel %vm6014_vm12, %v5993_v0, 0.0  ;;  %6773 = vmatpush1.msra.mxu1 %v5958_v59 }
 0x374   : > { %7799 = vmatmul.mubr.msk.f32.vlgmr.msra.gmra.mxu1 %vm4034_vm8, %v10323_v4  ;;  %7861 = vmatprep.subr.msk.mxu1 %vm4041_vm7, %v6056_v42  ;;  %v5946_v13 = vpop.permute.xlu1 %5945 }
 0x375   : > { %7795 = vmatmul.mubr.msk.f32.vlgmr.msra.gmra.mxu0 %vm4034_vm8, %v10323_v4  ;;  %v5948_v23 = vpop.permute.xlu0 %5947  ;;  %v5953_v11 = vsel %vm5951_vm11, %v5946_v13, %v5950_v16  ;;  %v5955_v27 = vsel %vm5951_vm11, %v5942_v21, %v5946_v13  ;;  %7862 = vmatpush3.msk.msra.mxu1 %vm4041_vm7, %v6056_v42 }
 0x376   : > { %v5992_v10 = vsel %vm5951_vm11, %v5948_v23, %v10214_v41  ;;  %6735 = vmatprep.mubr.f32.mxu0 %v11634_v55  ;;  %7801 = vmatprep.subr.msk.mxu0 %vm4041_vm7, %v5953_v11 }
 0x377   : > { %7863 = vmatprep.subr.msk.mxu1 %vm6014_vm12, %v5992_v10  ;;  %6812 = vmatprep.mubr.f32.mxu1 %v11634_v55 }
 0x378   : > { %7802 = vmatpush1.msk.msra.mxu0 %vm4041_vm7, %v5955_v27  ;;  %7864 = vmatpush3.msk.msra.mxu1 %vm6014_vm12, %v5992_v10  ;;  %v5944_v5 = vpop.permute.xlu1 %5943 }
 0x379   : > { %7796 = vmatmul.mubr.msk.f32.gmra.mxu0 %vm4034_vm8, %v10349_v14  ;;  %7800 = vmatmul.mubr.msk.f32.gmra.mxu1 %vm4034_vm8, %v10349_v14  ;;  %v5954_v41 = vsel %vm5951_vm11, %v5940_v35, %v5944_v5  ;;  %v5952_v58 = vsel %vm5951_vm11, %v5944_v5, %v5948_v23 }
 0x37a   : > { %6849 = vmatprep.subr.mxu0 %v5952_v58  ;;  %6883 = vmatprep.mubr.f32.mxu0 %v11634_v55 }
 0x37b   : > { %6850 = vmatpush1.msra.mxu0 %v5954_v41  ;;  %7865 = vmatprep.mubr.msk.f32.mxu1 %vm4034_vm8, %v10323_v4 }
 0x37d   : > { %7803 = vmatmul.mubr.msk.f32.vlgmr.msra.gmra.mxu0 %vm4034_vm8, %v10323_v4  ;;  %7866 = vmatmul.mubr.msk.f32.vlgmr.msra.gmra.mxu1 %vm4034_vm8, %v10349_v14  ;;  %v10620_v4 = vpop.f32.mrf.mxu1 }
 0x37e   : > { %6889 = vmatprep.mubr.f32.mxu0 %v11634_v55  ;;  %v10624_v55 = vpop.f32.mrf.mxu0 }
 0x37f   : > { %v10622_v51 = vpop.f32.mrf.mxu1 }
 0x380   : > { %v10628_v28 = vpop.f32.mrf.mxu0 }
 0x381   : > { %7804 = vmatmul.mubr.msk.f32.gmra.mxu0 %vm4034_vm8, %v10349_v14  ;;  %v10626_v50 = vpop.f32.mrf.mxu1 }
 0x382   : > { %v10632_v32 = vpop.f32.mrf.mxu0 }
 0x383   : > { %v10630_v14 = vpop.f32.mrf.mxu1 }
 0x384   : > { %v10636_v12 = vpop.f32.mrf.mxu0 }
 0x385   : > { %v10634_v9 = vpop.f32.mrf.mxu1 }
 0x386   : > { %v10640_v62 = vpop.f32.mrf.mxu0 }
 0x387   : > { %v10638_v3 = vpop.f32.mrf.mxu1 }
 0x388   : > { %v10644_v26 = vpop.f32.mrf.mxu0 }
 0x389   : > { %v10642_v47 = vpop.f32.mrf.mxu1 }
 0x38a   : > { %v10648_v7 = vpop.f32.mrf.mxu0 }
 0x38b   : > { %v10646_v40 = vpop.f32.mrf.mxu1 }
 0x38c   : > { %v10652_v38 = vpop.f32.mrf.mxu0 }
 0x38e   : > { %v10656_v54 = vpop.f32.mrf.mxu0 }
 0x390   : > { %v10660_v18 = vpop.f32.mrf.mxu0 }
 0x391   : > { %11666 = vst [vmem:[#allocation24_spill] sm:$0xff] %v10660_v18 }
 0x392   : > { %v10664_v63 = vpop.f32.mrf.mxu0 }
 0x393   : > { %11667 = vst [vmem:[#allocation33_spill] sm:$0xff] %v10664_v63 }
 0x394   : > { %v10668_v30 = vpop.f32.mrf.mxu0 }
 0x395   : > { %11668 = vst [vmem:[#allocation18_spill] sm:$0xff] %v10668_v30 }
 0x396   : > { %v10672_v21 = vpop.f32.mrf.mxu0 }
 0x397   : > { %11669 = vst [vmem:[#allocation28_spill] sm:$0xff] %v10672_v21 }
 0x398   : > { %v10676_v33 = vpop.f32.mrf.mxu0 }
 0x399   : > { %11670 = vst [vmem:[#allocation35_spill] sm:$0xff] %v10676_v33 }
 0x39a   : > { %v10680_v35 = vpop.f32.mrf.mxu0 }
 0x39b   : > { %11672 = vst [vmem:[#allocation20_spill] sm:$0xff] %v10680_v35  ;;  %v10712_v35 = vpop.permute.xlu1 %7017 }
 0x39c   : > { %v10684_v44 = vpop.f32.mrf.mxu0 }
 0x39d   : > { %11673 = vst [vmem:[#allocation26_spill] sm:$0xff] %v10684_v44 }
 0x39e   : > { %v10688_v57 = vpop.f32.mrf.mxu0 }
 0x39f   : > { %11675 = vst [vmem:[#allocation22_spill] sm:$0xff] %v10688_v57  ;;  %v10722_v63 = vpop.permute.xlu1 %7071 }
 0x3a0   : > { %v10692_v59 = vpop.f32.mrf.mxu0 }
 0x3a1   : > { %11677 = vst [vmem:[#allocation29_spill] sm:$0xff] %v10692_v59 }
 0x3a2   : > { %v10696_v0 = vpop.f32.mrf.mxu0 }
 0x3a3   : > { %11679 = vst [vmem:[#allocation23_spill] sm:$0xff] %v10696_v0 }
 0x3a4   : > { %v4872_v13 = vpop.f32.mrf.mxu0 }
 0x3ad   : > { %v10650_v43 = vpop.f32.mrf.mxu1 }
 0x3af   : > { %v10654_v45 = vpop.f32.mrf.mxu1 }
 0x3b1   : > { %v10658_v37 = vpop.f32.mrf.mxu1 }
 0x3b3   : > { %v10662_v49 = vpop.f32.mrf.mxu1 }
 0x3bd   : > { %v10666_v61 = vpop.f32.mrf.mxu1 }
 0x3bf   : > { %v10670_v22 = vpop.f32.mrf.mxu1 }
 0x3c1   : > { %v10674_v53 = vpop.f32.mrf.mxu1 }
 0x3c3   : > { %v10678_v39 = vpop.f32.mrf.mxu1 }
 0x3c4   : > { %11671 = vst [vmem:[#allocation19_spill] sm:$0xff] %v10678_v39 }
 0x3cd   : > { %v10682_v31 = vpop.f32.mrf.mxu1 }
 0x3cf   : > { %v10686_v36 = vpop.f32.mrf.mxu1 }
 0x3d0   : > { %11674 = vst [vmem:[#allocation34_spill] sm:$0xff] %v10686_v36 }
 0x3d1   : > { %v10690_v16 = vpop.f32.mrf.mxu1 }
 0x3d2   : > { %11676 = vst [vmem:[#allocation46_spill] sm:$0xff] %v10690_v16 }
 0x3d3   : > { %v10694_v46 = vpop.f32.mrf.mxu1 }
 0x3d4   : > { %11678 = vst [vmem:[#allocation36_spill] sm:$0xff] %v10694_v46 }
 0x3dd   : > { %v10698_v42 = vpop.f32.mrf.mxu1 }
 0x3de   : > { %11680 = vst [vmem:[#allocation47_spill] sm:$0xff] %v10698_v42  ;;  %v10717_v42 = vpop.permute.xlu0 %7022 }
 0x3df   : > { %v10700_v23 = vpop.f32.mrf.mxu1 }
 0x3e0   : > { %11681 = vst [vmem:[#allocation21_spill] sm:$0xff] %v10700_v23 }
 0x3e1   : > { %v10702_v27 = vpop.f32.mrf.mxu1 }
 0x3e2   : > { %11682 = vst [vmem:[#allocation45_spill] sm:$0xff] %v10702_v27 }
 0x3e3   : > { %v10704_v41 = vpop.f32.mrf.mxu1 }
 0x3e4   : > { %11683 = vst [vmem:[#allocation31_spill] sm:$0xff] %v10704_v41 }
 0x3ee   : > { %v5085_v11 = vpop.f32.mrf.mxu0 }
 0x3ef   : > { %v5086_v27 = vadd.f32 %v5085_v11, %v10489_v2 }
 0x3f0   : > { %v5087_v10 = vpop.f32.mrf.mxu0 }
 0x3f2   : > { %v5091_v5 = vpop.f32.mrf.mxu0 }
 0x3f4   : > { %v5093_v58 = vpop.f32.mrf.mxu0 }
 0x3f6   : > { %v5239_v20 = vpop.f32.mrf.mxu0 }
 0x3f7   : > { %v10706_v19 = vpop.f32.mrf.mxu1  ;;  %v5240_v39 = vadd.f32 %v5239_v20, %v10547_v24 }
 0x3f8   : > { %11684 = vst [vmem:[#allocation38_spill] sm:$0xff] %v10706_v19  ;;  %v5241_v59 = vpop.f32.mrf.mxu0  ;;  %v5088_v19 = vadd.f32 %v5087_v10, %v10502_v6  ;;  %v5094_v6 = vadd.f32 %v5093_v58, %v10530_v17 }
 0x3f9   : > { %v10708_v44 = vpop.f32.mrf.mxu1 }
 0x3fa   : > { %11685 = vst [vmem:[#allocation30_spill] sm:$0xff] %v10708_v44 }
 0x3fc   : > { %v5245_v0 = vpop.f32.mrf.mxu0 }
 0x3fd   : > { %v10710_v57 = vpop.f32.mrf.mxu1 }
 0x3fe   : > { %11686 = vst [vmem:[#allocation37_spill] sm:$0xff] %v10710_v57  ;;  %v5247_v23 = vpop.f32.mrf.mxu0  ;;  %v5092_v57 = vadd.f32 %v5091_v5, %v10521_v60 }
 0x3ff   : > { %v5786_v33 = vpop.f32.mrf.mxu1 }
 0x400   : > { %v10715_v46 = vadd.f32 %v5786_v33, %v4872_v13  ;;  %v5393_v30 = vpop.f32.mrf.mxu0 }
 0x401   : > { %v6192_v41 = vpop.f32.mrf.mxu1 }
 0x402   : > { %11687 = vst [vmem:[#allocation32_spill] sm:$0xff] %v10715_v46  ;;  %v6971_v21 = vadd.f32 %v6192_v41, %v5086_v27  ;;  %v10720_v16 = vpop.f32.mrf.mxu0  ;;  %v10731_v41 = vpop.permute.xlu0 %7076 }
 0x403   : > { %v6194_v44 = vpop.f32.mrf.mxu1 }
 0x404   : > { %v7025_v36 = vmul.f32 %v10712_v35, %v6971_v21  ;;  %v6972_v18 = vadd.f32 %v6194_v44, %v5088_v19 }
 0x405   : > { %v5399_v2 = vpop.f32.mrf.mxu0  ;;  %v6198_v33 = vpop.f32.mrf.mxu1 }
 0x406   : > { %v10727_v13 = vadd.f32 %v10722_v63, %v7025_v36  ;;  %v7026_v11 = vmul.f32 %v10712_v35, %v6972_v18  ;;  %v6992_v46 = vadd.f32 %v6198_v33, %v5092_v57  ;;  %v5242_v57 = vadd.f32 %v5241_v59, %v10563_v15 }
 0x407   : > { %v5401_v27 = vpop.f32.mrf.mxu0  ;;  %v6200_v10 = vpop.f32.mrf.mxu1  ;;  %v5246_v59 = vadd.f32 %v5245_v0, %v10583_v34  ;;  %v5248_v34 = vadd.f32 %v5247_v23, %v10599_v29 }
 0x408   : > { %v11524_v60 = vmax.f32 %v10727_v13, 0.0  ;;  %v10736_v19 = vadd.f32 %v10722_v63, %v7026_v11  ;;  %v7046_v21 = vmul.f32 %v10717_v42, %v6992_v46  ;;  %v6993_v44 = vadd.f32 %v6200_v10, %v5094_v6 }
 0x409   : > { %v10739_v36 = vpop.f32.mrf.mxu0  ;;  %v6346_v18 = vpop.f32.mrf.mxu1 }
 0x40a   : > { %v10743_v17 = vadd.f32 %v10731_v41, %v7046_v21  ;;  %v6975_v5 = vadd.f32 %v6346_v18, %v5240_v39  ;;  %7163 = vrot.lane.b32.xlu1 %v11524_v60, %s8152_s27  ;;  %v7047_v20 = vmul.f32 %v10717_v42, %v6993_v44  ;;  %v11522_v46 = vmax.f32 %v10736_v19, 0.0 }
 0x40b   : > { %v10749_v24 = vpop.f32.mrf.mxu0  ;;  %v6348_v58 = vpop.f32.mrf.mxu1 }
 0x40c   : > { %v11520_v33 = vmax.f32 %v10743_v17, 0.0  ;;  %v7029_v11 = vmul.f32 %v10712_v35, %v6975_v5  ;;  %v6976_v15 = vadd.f32 %v6348_v58, %v5242_v57  ;;  %v10756_v39 = vadd.f32 %v10731_v41, %v7047_v20 }
 0x40d   : > { %v10758_v6 = vpop.f32.mrf.mxu0 }
 0x40e   : > { %v10761_v10 = vadd.f32 %v10722_v63, %v7029_v11  ;;  %v7030_v21 = vmul.f32 %v10712_v35, %v6976_v15  ;;  %v6352_v44 = vpop.f32.mrf.mxu1  ;;  %7165 = vrot.lane.b32.xlu0 %v11520_v33, %s8152_s27  ;;  %7167 = vrot.lane.b32.xlu1 %v11522_v46, %s8152_s27  ;;  %v11521_v57 = vmax.f32 %v10756_v39, 0.0 }
 0x40f   : > { %v6996_v0 = vadd.f32 %v6352_v44, %v5246_v59  ;;  %v10771_v18 = vpop.f32.mrf.mxu0  ;;  %v5394_v44 = vadd.f32 %v5393_v30, %v10606_v56 }
 0x410   : > { %v11523_v5 = vmax.f32 %v10761_v10, 0.0  ;;  %v10776_v20 = vadd.f32 %v10722_v63, %v7030_v21  ;;  %v6354_v58 = vpop.f32.mrf.mxu1 }
 0x411   : > { %v7050_v11 = vmul.f32 %v10717_v42, %v6996_v0  ;;  %v6997_v15 = vadd.f32 %v6354_v58, %v5248_v34  ;;  %v10779_v33 = vpop.f32.mrf.mxu0 }
 0x412   : > { %11688 = vst [vmem:[#allocation39_spill] sm:$0xff] %v10776_v20  ;;  %7169 = vrot.lane.b32.xlu0 %v11521_v57, %s8152_s27  ;;  %7179 = vrot.lane.b32.xlu1 %v11523_v5, %s8152_s27  ;;  %v11525_v21 = vmax.f32 %v10776_v20, 0.0 }
 0x413   : > { %v10788_v29 = vadd.f32 %v10731_v41, %v7050_v11  ;;  %v7051_v23 = vmul.f32 %v10717_v42, %v6997_v15  ;;  %v10791_v59 = vpop.f32.mrf.mxu0  ;;  %v5396_v15 = vadd.f32 %v10720_v16, %v10610_v48  ;;  %v5402_v48 = vadd.f32 %v5401_v27, %v10614_v25 }
 0x415   : > { %v11527_v34 = vmax.f32 %v10788_v29, 0.0  ;;  %v10797_v0 = vadd.f32 %v10731_v41, %v7051_v23  ;;  %v10799_v58 = vpop.f32.mrf.mxu0  ;;  %v5400_v23 = vadd.f32 %v5399_v2, %v10612_v8 }
 0x416   : > { %7183 = vrot.lane.b32.xlu1 %v11525_v21, %s8152_s27  ;;  %v6500_v11 = vpop.f32.mrf.mxu1 }
 0x417   : > { %7181 = vrot.lane.b32.xlu0 %v11527_v34, %s8152_s27  ;;  %v10809_v56 = vpop.f32.mrf.mxu0  ;;  %v6979_v30 = vadd.f32 %v6500_v11, %v5394_v44  ;;  %v11528_v46 = vmax.f32 %v10797_v0, 0.0 }
 0x418   : > { %v6502_v57 = vpop.f32.mrf.mxu1 }
 0x419   : > { %v7033_v5 = vmul.f32 %v10712_v35, %v6979_v30  ;;  %v10814_v60 = vpop.f32.mrf.mxu0  ;;  %v6980_v21 = vadd.f32 %v6502_v57, %v5396_v15 }
 0x41a   : > { %v6506_v20 = vpop.f32.mrf.mxu1 }
 0x41b   : > { %v10818_v16 = vadd.f32 %v10722_v63, %v7033_v5  ;;  %v7034_v34 = vmul.f32 %v10712_v35, %v6980_v21  ;;  %7185 = vrot.lane.b32.xlu0 %v11528_v46, %s8152_s27  ;;  %v10824_v8 = vpop.f32.mrf.mxu0  ;;  %v7000_v2 = vadd.f32 %v6506_v20, %v5400_v23 }
 0x41c   : > { %v6508_v44 = vpop.f32.mrf.mxu1 }
 0x41d   : > { %v11529_v11 = vmax.f32 %v10818_v16, 0.0  ;;  %v10828_v57 = vadd.f32 %v10722_v63, %v7034_v34  ;;  %v7054_v25 = vmul.f32 %v10717_v42, %v7000_v2  ;;  %v6269_v27 = vpop.f32.mrf.mxu0  ;;  %v7001_v5 = vadd.f32 %v6508_v44, %v5402_v48 }
 0x41e   : > { %v5548_v48 = vadd.f32 %v10739_v36, %v10616_v1  ;;  %v5554_v1 = vadd.f32 %v10758_v6, %v10620_v4 }
 0x41f   : > { %11689 = vst [vmem:[#allocation25_spill] sm:$0xff] %v10828_v57  ;;  %v10832_v15 = vadd.f32 %v10731_v41, %v7054_v25  ;;  %v7055_v21 = vmul.f32 %v10717_v42, %v7001_v5  ;;  %v6271_v30 = vpop.f32.mrf.mxu0  ;;  %7195 = vrot.lane.b32.xlu1 %v11529_v11, %s8152_s27  ;;  %v11530_v20 = vmax.f32 %v10828_v57, 0.0  ;;  %v5550_v5 = vadd.f32 %v10749_v24, %v10618_v52 }
 0x420   : > { %v5556_v52 = vadd.f32 %v10771_v18, %v10622_v51 }
 0x421   : > { %v11531_v23 = vmax.f32 %v10832_v15, 0.0  ;;  %v10841_v34 = vadd.f32 %v10731_v41, %v7055_v21  ;;  %v6275_v2 = vpop.f32.mrf.mxu0 }
 0x423   : > { %11690 = vst [vmem:[#allocation48_spill] sm:$0xff] %v10841_v34  ;;  %7197 = vrot.lane.b32.xlu0 %v11531_v23, %s8152_s27  ;;  %7199 = vrot.lane.b32.xlu1 %v11530_v20, %s8152_s27  ;;  %v10851_v44 = vpop.f32.mrf.mxu0  ;;  %v11533_v21 = vmax.f32 %v10841_v34, 0.0 }
 0x424   : > { %v6654_v25 = vpop.f32.mrf.mxu1 }
 0x425   : > { %v6983_v46 = vadd.f32 %v6654_v25, %v5548_v48  ;;  %v10862_v23 = vpop.f32.mrf.mxu0 }
 0x426   : > { %v6656_v11 = vpop.f32.mrf.mxu1 }
 0x427   : > { %v7037_v36 = vmul.f32 %v10712_v35, %v6983_v46  ;;  %7201 = vrot.lane.b32.xlu0 %v11533_v21, %s8152_s27  ;;  %v6984_v20 = vadd.f32 %v6656_v11, %v5550_v5  ;;  %v10875_v21 = vpop.f32.mrf.mxu0 }
 0x428   : > { %v6660_v57 = vpop.f32.mrf.mxu1 }
 0x429   : > { %v10867_v24 = vadd.f32 %v10722_v63, %v7037_v36  ;;  %v7038_v48 = vmul.f32 %v10712_v35, %v6984_v20  ;;  %v7004_v25 = vadd.f32 %v6660_v57, %v5554_v1  ;;  %v10889_v1 = vpop.f32.mrf.mxu0  ;;  %v5163_v36 = vadd.f32 %v10650_v43, %v10624_v55 }
 0x42a   : > { %v6662_v4 = vpop.f32.mrf.mxu1  ;;  %v5704_v55 = vadd.f32 %v10791_v59, %v10630_v14  ;;  %v5708_v14 = vadd.f32 %v10799_v58, %v10634_v9  ;;  %v5861_v9 = vadd.f32 %v10814_v60, %v10642_v47 }
 0x42b   : > { %v7133_v46 = vmax.f32 %v10867_v24, 0.0  ;;  %v10872_v6 = vadd.f32 %v10722_v63, %v7038_v48  ;;  %v7058_v11 = vmul.f32 %v10717_v42, %v7004_v25  ;;  %v7005_v5 = vadd.f32 %v6662_v4, %v5556_v52  ;;  %v10902_v4 = vpop.f32.mrf.mxu0 }
 0x42c   : > { %v5702_v52 = vadd.f32 %v10779_v33, %v10626_v50  ;;  %v6973_v48 = vadd.f32 %v6269_v27, %v5163_v36  ;;  %v5165_v36 = vadd.f32 %v10654_v45, %v10628_v28 }
 0x42d   : > { %v10878_v34 = vadd.f32 %v10731_v41, %v7058_v11  ;;  %v7059_v51 = vmul.f32 %v10717_v42, %v7005_v5  ;;  %7211 = vrot.lane.b32.xlu1 %v7133_v46, %s8152_s27  ;;  %v11535_v18 = vmax.f32 %v10872_v6, 0.0 }
 0x42e   : > { %v7027_v50 = vmul.f32 %v10712_v35, %v6973_v48 }
 0x42f   : > { %v7154_v57 = vmax.f32 %v10878_v34, 0.0  ;;  %v10887_v20 = vadd.f32 %v10731_v41, %v7059_v51  ;;  %v5169_v51 = vadd.f32 %v10658_v37, %v10632_v32  ;;  %v5710_v32 = vadd.f32 %v10809_v56, %v10638_v3 }
 0x430   : > { %v6974_v37 = vadd.f32 %v6271_v30, %v5165_v36  ;;  %v10923_v48 = vadd.f32 %v10722_v63, %v7027_v50  ;;  %v5171_v30 = vadd.f32 %v10662_v49, %v10636_v12 }
 0x431   : > { %7213 = vrot.lane.b32.xlu0 %v7154_v57, %s8152_s27  ;;  %7215 = vrot.lane.b32.xlu1 %v11535_v18, %s8152_s27  ;;  %v11538_v25 = vmax.f32 %v10887_v20, 0.0  ;;  %v6577_v18 = vpop.f32.mrf.mxu0  ;;  %v6994_v59 = vadd.f32 %v6275_v2, %v5169_v51 }
 0x432   : > { %v7028_v51 = vmul.f32 %v10712_v35, %v6974_v37  ;;  %v7123_v50 = vmax.f32 %v10923_v48, 0.0  ;;  %v6995_v12 = vadd.f32 %v10851_v44, %v5171_v30 }
 0x433   : > { %v7048_v58 = vmul.f32 %v10717_v42, %v6994_v59 }
 0x434   : > { %v6808_v11 = vpop.f32.mrf.mxu1 }
 0x435   : > { %v6987_v43 = vadd.f32 %v6808_v11, %v5702_v52  ;;  %7217 = vrot.lane.b32.xlu0 %v11538_v25, %s8152_s27 }
 0x436   : > { %v6810_v5 = vpop.f32.mrf.mxu1 }
 0x437   : > { %v7041_v33 = vmul.f32 %v10712_v35, %v6987_v43  ;;  %v6988_v27 = vadd.f32 %v6810_v5, %v5704_v55  ;;  %v10927_v5 = vpop.f32.mrf.mxu0 }
 0x439   : > { %v10918_v52 = vadd.f32 %v10722_v63, %v7041_v33  ;;  %v6814_v11 = vpop.f32.mrf.mxu1  ;;  %v7042_v28 = vmul.f32 %v10712_v35, %v6988_v27  ;;  %v5317_v27 = vadd.f32 %v10666_v61, %v10640_v62  ;;  %v6583_v36 = vpop.f32.mrf.mxu0  ;;  %v10960_v62 = vadd.f32 %v10722_v63, %v7028_v51  ;;  %v11691_v51 = vld [vmem:[#allocation19_spill] sm:$0xff] }
 0x43a   : > { %v7008_v45 = vadd.f32 %v6814_v11, %v5708_v14  ;;  %v10949_v14 = vadd.f32 %v10731_v41, %v7048_v58  ;;  %v5856_v11 = vadd.f32 %v10824_v8, %v10646_v40  ;;  %v7049_v8 = vmul.f32 %v10717_v42, %v6995_v12 }
 0x43b   : > { %v7137_v55 = vmax.f32 %v10918_v52, 0.0  ;;  %v6816_v43 = vpop.f32.mrf.mxu1  ;;  %v10941_v33 = vadd.f32 %v10722_v63, %v7042_v28  ;;  %v6977_v61 = vadd.f32 %v10862_v23, %v5317_v27  ;;  %v5319_v28 = vadd.f32 %v10670_v22, %v10644_v26 }
 0x43c   : > { %v7062_v2 = vmul.f32 %v10717_v42, %v7008_v45  ;;  %v7009_v3 = vadd.f32 %v6816_v43, %v5710_v32  ;;  %v6585_v45 = vpop.f32.mrf.mxu0  ;;  %v11557_v40 = vmax.f32 %v10949_v14, 0.0  ;;  %v7124_v58 = vmax.f32 %v10960_v62, 0.0 }
 0x43d   : > { %v7867_v56 = vpop.f32.mrf.mxu1  ;;  %7227 = vrot.lane.b32.xlu1 %v7137_v55, %s8152_s27  ;;  %v11537_v37 = vmax.f32 %v10941_v33, 0.0  ;;  %v7031_v26 = vmul.f32 %v10712_v35, %v6977_v61  ;;  %v6978_v22 = vadd.f32 %v10875_v21, %v5319_v28  ;;  %v10992_v30 = vadd.f32 %v10731_v41, %v7049_v8  ;;  %v11695_v8 = vld [vmem:[#allocation46_spill] sm:$0xff] }
 0x43e   : > { %v10944_v47 = vadd.f32 %v10731_v41, %v7062_v2  ;;  %v7012_v60 = vadd.f32 %v7867_v56, %v5861_v9  ;;  %v7063_v59 = vmul.f32 %v10717_v42, %v7009_v3  ;;  %v5323_v9 = vadd.f32 %v10674_v53, %v10648_v7  ;;  %v6731_v56 = vpop.f32.mrf.mxu0 }
 0x43f   : > { %v6962_v32 = vpop.f32.mrf.mxu1  ;;  %v5471_v3 = vadd.f32 %v10682_v31, %v10656_v54  ;;  %v11003_v27 = vadd.f32 %v10722_v63, %v7031_v26  ;;  %v7032_v54 = vmul.f32 %v10712_v35, %v6978_v22  ;;  %v11556_v61 = vmax.f32 %v10992_v30, 0.0 }
 0x440   : > { %v7158_v49 = vmax.f32 %v10944_v47, 0.0  ;;  %v7066_v44 = vmul.f32 %v10717_v42, %v7012_v60  ;;  %v10973_v43 = vadd.f32 %v10731_v41, %v7063_v59  ;;  %v6991_v23 = vadd.f32 %v6962_v32, %v5856_v11  ;;  %v11693_v59 = vld [vmem:[#allocation34_spill] sm:$0xff]  ;;  %v6733_v32 = vpop.f32.mrf.mxu0 }
 0x441   : > { %7171 = vrot.lane.b32.xlu1 %v7123_v50, %s8152_s27  ;;  %v6998_v7 = vadd.f32 %v10889_v1, %v5323_v9  ;;  %v5325_v60 = vadd.f32 %v11691_v51, %v10652_v38  ;;  %v6981_v31 = vadd.f32 %v6577_v18, %v5471_v3  ;;  %v11692_v1 = vld [vmem:[#allocation24_spill] sm:$0xff]  ;;  %v11694_v18 = vld [vmem:[#allocation33_spill] sm:$0xff]  ;;  %v11540_v9 = vmax.f32 %v11003_v27, 0.0 }
 0x442   : > { %7229 = vrot.lane.b32.xlu0 %v7158_v49, %s8152_s27  ;;  %v10984_v2 = vadd.f32 %v10731_v41, %v7066_v44  ;;  %v11536_v53 = vmax.f32 %v10973_v43, 0.0  ;;  %v7045_v21 = vmul.f32 %v10712_v35, %v6991_v23  ;;  %v5473_v11 = vadd.f32 %v11693_v59, %v11692_v1  ;;  %v6737_v51 = vpop.f32.mrf.mxu0 }
 0x443   : > { %v7052_v38 = vmul.f32 %v10717_v42, %v6998_v7  ;;  %v6999_v44 = vadd.f32 %v10902_v4, %v5325_v60  ;;  %v5477_v23 = vadd.f32 %v11695_v8, %v11694_v18  ;;  %v11025_v26 = vadd.f32 %v10722_v63, %v7032_v54  ;;  %v11696_v4 = vld [vmem:[#allocation28_spill] sm:$0xff]  ;;  %v11697_v7 = vld [vmem:[#allocation47_spill] sm:$0xff] }
 0x444   : > { %v11558_v12 = vmax.f32 %v10984_v2, 0.0  ;;  %v11016_v28 = vadd.f32 %v10722_v63, %v7045_v21  ;;  %v7035_v22 = vmul.f32 %v10712_v35, %v6981_v31  ;;  %v6982_v3 = vadd.f32 %v10927_v5, %v5473_v11  ;;  %v11698_v5 = vld [vmem:[#allocation18_spill] sm:$0xff]  ;;  %v11699_v31 = vld [vmem:[#allocation36_spill] sm:$0xff] }
 0x445   : > { %7231 = vrot.lane.b32.xlu1 %v11537_v37, %s8152_s27  ;;  %v5625_v21 = vadd.f32 %v11697_v7, %v11696_v4  ;;  %v11035_v60 = vadd.f32 %v10731_v41, %v7052_v38  ;;  %v7053_v1 = vmul.f32 %v10717_v42, %v6999_v44  ;;  %v7002_v59 = vadd.f32 %v6583_v36, %v5477_v23  ;;  %v11700_v36 = vld [vmem:[#allocation35_spill] sm:$0xff]  ;;  %v11701_v44 = vld [vmem:[#allocation21_spill] sm:$0xff]  ;;  %v6739_v7 = vpop.f32.mrf.mxu0 }
 0x446   : > { %7173 = vrot.lane.b32.xlu0 %v11557_v40, %s8152_s27  ;;  %v11543_v54 = vmax.f32 %v11016_v28, 0.0  ;;  %v5479_v11 = vadd.f32 %v11699_v31, %v11698_v5  ;;  %v11539_v18 = vmax.f32 %v11025_v26, 0.0  ;;  %v11046_v8 = vadd.f32 %v10722_v63, %v7035_v22 }
 0x447   : > { %v7036_v38 = vmul.f32 %v10712_v35, %v6982_v3  ;;  %v6985_v4 = vadd.f32 %v6731_v56, %v5625_v21  ;;  %v5627_v23 = vadd.f32 %v11701_v44, %v11700_v36  ;;  %v11056_v5 = vadd.f32 %v10731_v41, %v7053_v1  ;;  %v11702_v56 = vld [vmem:[#allocation20_spill] sm:$0xff]  ;;  %v11703_v3 = vld [vmem:[#allocation45_spill] sm:$0xff]  ;;  %v6885_v37 = vpop.f32.mrf.mxu0 }
 0x448   : > { %v7056_v31 = vmul.f32 %v10717_v42, %v7002_v59  ;;  %v7003_v22 = vadd.f32 %v6585_v45, %v5479_v11  ;;  %v5631_v21 = vadd.f32 %v11703_v3, %v11702_v56  ;;  %v11542_v25 = vmax.f32 %v11046_v8, 0.0  ;;  %v11704_v45 = vld [vmem:[#allocation22_spill] sm:$0xff] }
 0x449   : > { %7175 = vrot.lane.b32.xlu1 %v7124_v58, %s8152_s27  ;;  %v11066_v36 = vadd.f32 %v10722_v63, %v7036_v38  ;;  %v7039_v44 = vmul.f32 %v10712_v35, %v6985_v4  ;;  %v6986_v1 = vadd.f32 %v6733_v32, %v5627_v23  ;;  %v11705_v59 = vld [vmem:[#allocation38_spill] sm:$0xff]  ;;  %v11707_v38 = vld [vmem:[#allocation31_spill] sm:$0xff]  ;;  %v6887_v23 = vpop.f32.mrf.mxu0 }
 0x44a   : > { %7233 = vrot.lane.b32.xlu0 %v11536_v53, %s8152_s27  ;;  %v11541_v53 = vmax.f32 %v11035_v60, 0.0  ;;  %v5779_v11 = vadd.f32 %v11705_v59, %v11704_v45  ;;  %v11076_v56 = vadd.f32 %v10731_v41, %v7056_v31  ;;  %v7057_v3 = vmul.f32 %v10717_v42, %v7003_v22  ;;  %v11706_v32 = vld [vmem:[#allocation26_spill] sm:$0xff] }
 0x44b   : > { %v5633_v4 = vadd.f32 %v11707_v38, %v11706_v32  ;;  %v11086_v45 = vadd.f32 %v10722_v63, %v7039_v44  ;;  %v7040_v59 = vmul.f32 %v10712_v35, %v6986_v1  ;;  %v11709_v22 = vld [vmem:[#allocation30_spill] sm:$0xff]  ;;  %v11711_v44 = vld [vmem:[#allocation37_spill] sm:$0xff] }
 0x44c   : > { %v6989_v31 = vadd.f32 %v6885_v37, %v5779_v11  ;;  %v11096_v32 = vadd.f32 %v10731_v41, %v7057_v3  ;;  %v11710_v37 = vld [vmem:[#allocation23_spill] sm:$0xff]  ;;  %v6891_v11 = vpop.f32.mrf.mxu0 }
 0x44d   : > { %7245 = vrot.lane.b32.xlu1 %v11558_v12, %s8152_s27  ;;  %v5785_v1 = vadd.f32 %v11711_v44, %v11710_v37 }
 0x44e   : > { %7177 = vrot.lane.b32.xlu0 %v11556_v61, %s8152_s27 }
 0x44f   : > { %v7010_v37 = vadd.f32 %v6891_v11, %v5785_v1  ;;  %v11712_v1 = vld [vmem:[#allocation32_spill] sm:$0xff] }
 0x451   : > { %7187 = vrot.lane.b32.xlu1 %v11540_v9, %s8152_s27  ;;  %v7006_v9 = vadd.f32 %v6737_v51, %v5631_v21  ;;  %v11708_v51 = vld [vmem:[#allocation29_spill] sm:$0xff]  ;;  %v7064_v44 = vmul.f32 %v10717_v42, %v7010_v37 }
 0x452   : > { %7243 = vrot.lane.b32.xlu0 %v11543_v54, %s8152_s27  ;;  %v5781_v21 = vadd.f32 %v11709_v22, %v11708_v51  ;;  %v7007_v54 = vadd.f32 %v6739_v7, %v5633_v4  ;;  %v11106_v51 = vadd.f32 %v10722_v63, %v7040_v59  ;;  %v7043_v22 = vmul.f32 %v10712_v35, %v6989_v31  ;;  %v6893_v59 = vpop.f32.mrf.mxu0 }
 0x453   : > { %v7060_v38 = vmul.f32 %v10717_v42, %v7006_v9  ;;  %v11553_v9 = vmax.f32 %v11096_v32, 0.0  ;;  %v7011_v11 = vadd.f32 %v6893_v59, %v11712_v1 }
 0x454   : > { %v6990_v3 = vadd.f32 %v6887_v23, %v5781_v21  ;;  %v7061_v4 = vmul.f32 %v10717_v42, %v7007_v54  ;;  %v11551_v31 = vmax.f32 %v11106_v51, 0.0  ;;  %v11122_v23 = vadd.f32 %v10722_v63, %v7043_v22 }
 0x455   : > { %7191 = vrot.lane.b32.xlu1 %v11539_v18, %s8152_s27  ;;  %v11544_v18 = vmax.f32 %v11056_v5, 0.0  ;;  %v11114_v7 = vadd.f32 %v10731_v41, %v7060_v38  ;;  %v7065_v37 = vmul.f32 %v10717_v42, %v7011_v11 }
 0x456   : > { %7189 = vrot.lane.b32.xlu0 %v11541_v53, %s8152_s27  ;;  %v11555_v53 = vmax.f32 %v11066_v36, 0.0  ;;  %v7044_v21 = vmul.f32 %v10712_v35, %v6990_v3  ;;  %v11130_v54 = vadd.f32 %v10731_v41, %v7061_v4  ;;  %v11548_v22 = vmax.f32 %v11122_v23, 0.0 }
 0x457   : > { %v11550_v38 = vmax.f32 %v11114_v7, 0.0  ;;  %v11146_v4 = vadd.f32 %v10731_v41, %v7064_v44 }
 0x458   : > { %v11139_v35 = vadd.f32 %v10722_v63, %v7044_v21  ;;  %v11549_v3 = vmax.f32 %v11130_v54, 0.0  ;;  %v11158_v21 = vadd.f32 %v10731_v41, %v7065_v37 }
 0x459   : > { %7203 = vrot.lane.b32.xlu1 %v11542_v25, %s8152_s27  ;;  %v11554_v25 = vmax.f32 %v11076_v56, 0.0  ;;  %v11546_v63 = vmax.f32 %v11146_v4, 0.0 }
 0x45a   : > { %7193 = vrot.lane.b32.xlu0 %v11544_v18, %s8152_s27  ;;  %v11552_v18 = vmax.f32 %v11086_v45, 0.0  ;;  %v11547_v59 = vmax.f32 %v11139_v35, 0.0  ;;  %v11545_v42 = vmax.f32 %v11158_v21, 0.0 }
 0x45d   : > { %7207 = vrot.lane.b32.xlu1 %v11555_v53, %s8152_s27 }
 0x45e   : > { %7205 = vrot.lane.b32.xlu0 %v11554_v25, %s8152_s27 }
 0x461   : > { %7219 = vrot.lane.b32.xlu1 %v11552_v18, %s8152_s27 }
 0x462   : > { %7209 = vrot.lane.b32.xlu0 %v11553_v9, %s8152_s27 }
 0x465   : > { %7223 = vrot.lane.b32.xlu1 %v11551_v31, %s8152_s27 }
 0x466   : > { %7221 = vrot.lane.b32.xlu0 %v11550_v38, %s8152_s27  ;;  %v11715_v38 = vmax.f32 %v10743_v17, 0.0 }
 0x469   : > { %7235 = vrot.lane.b32.xlu1 %v11548_v22, %s8152_s27 }
 0x46a   : > { %7225 = vrot.lane.b32.xlu0 %v11549_v3, %s8152_s27 }
 0x46d   : > { %7239 = vrot.lane.b32.xlu1 %v11547_v59, %s8152_s27 }
 0x46e   : > { %7237 = vrot.lane.b32.xlu0 %v11546_v63, %s8152_s27 }
 0x472   : > { %7241 = vrot.lane.b32.xlu0 %v11545_v42, %s8152_s27  ;;  %v11714_v42 = vmax.f32 %v10727_v13, 0.0 }
 0x47c   : > { %v11170_v44 = vpop.permute.xlu1 %7163 }
 0x480   : > { %v11173_v1 = vpop.permute.xlu0 %7165  ;;  %v7168_v41 = vpop.permute.xlu1 %7167 }
 0x481   : > { %v7285_v37 = vsel %vm5951_vm11, %v11170_v44, %v7168_v41 }
 0x482   : > { %v7331_v63 = vmax.f32 %v11714_v42, %v7285_v37 }
 0x484   : > { %7373 = vst [vmem:[%s11178_s9] sm:$0xff] %v7331_v63  ;;  %v7170_v59 = vpop.permute.xlu0 %7169  ;;  %v7180_v22 = vpop.permute.xlu1 %7179  ;;  %v11716_v63 = vmax.f32 %v10761_v10, 0.0 }
 0x485   : > { %v7286_v3 = vsel %vm5951_vm11, %v11173_v1, %v7170_v59 }
 0x486   : > { %v7352_v31 = vmax.f32 %v11715_v38, %v7286_v3 }
 0x488   : > { %7394 = vst [vmem:[%s11178_s9 + $0xa8] sm:$0xf] %v7352_v31  ;;  %v11192_v18 = vpop.permute.xlu1 %7183  ;;  %v11717_v31 = vmax.f32 %v10788_v29, 0.0 }
 0x489   : > { %v7182_v9 = vpop.permute.xlu0 %7181  ;;  %v7277_v13 = vsel %vm5951_vm11, %v7180_v22, %v11192_v18 }
 0x48a   : > { %v7335_v42 = vmax.f32 %v11716_v63, %v7277_v13  ;;  %v11718_v13 = vmax.f32 %v10818_v16, 0.0 }
 0x48c   : > { %7377 = vst [vmem:[%s11178_s9 + $0x20] sm:$0xff] %v7335_v42 }
 0x48d   : > { %v11200_v37 = vpop.permute.xlu0 %7185 }
 0x48e   : > { %v7278_v17 = vsel %vm5951_vm11, %v7182_v9, %v11200_v37 }
 0x48f   : > { %v7356_v38 = vmax.f32 %v11717_v31, %v7278_v17  ;;  %v11719_v17 = vmax.f32 %v10832_v15, 0.0 }
 0x491   : > { %7398 = vst [vmem:[%s11178_s9 + $0xc8] sm:$0xf] %v7356_v38  ;;  %v11208_v3 = vpop.permute.xlu1 %7195 }
 0x495   : > { %v11210_v25 = vpop.permute.xlu0 %7197  ;;  %v11212_v53 = vpop.permute.xlu1 %7199 }
 0x496   : > { %v7269_v10 = vsel %vm5951_vm11, %v11208_v3, %v11212_v53 }
 0x497   : > { %v7339_v63 = vmax.f32 %v11718_v13, %v7269_v10 }
 0x499   : > { %7381 = vst [vmem:[%s11178_s9 + $0x40] sm:$0xff] %v7339_v63  ;;  %v11221_v29 = vpop.permute.xlu0 %7201 }
 0x49a   : > { %v7270_v42 = vsel %vm5951_vm11, %v11210_v25, %v11221_v29 }
 0x49b   : > { %v7360_v31 = vmax.f32 %v11719_v17, %v7270_v42 }
 0x49d   : > { %7402 = vst [vmem:[%s11178_s9 + $0xe8] sm:$0xf] %v7360_v31 }
 0x49f   : > { %v11230_v38 = vpop.permute.xlu1 %7211 }
 0x4a3   : > { %v11232_v61 = vpop.permute.xlu0 %7213  ;;  %v11234_v16 = vpop.permute.xlu1 %7215 }
 0x4a4   : > { %v7261_v10 = vsel %vm5951_vm11, %v11230_v38, %v11234_v16 }
 0x4a5   : > { %v7343_v13 = vmax.f32 %v7133_v46, %v7261_v10  ;;  %v11720_v10 = vmax.f32 %v10736_v19, 0.0  ;;  %v11721_v19 = vmax.f32 %v10756_v39, 0.0 }
 0x4a7   : > { %7385 = vst [vmem:[%s11178_s9 + $0x60] sm:$0xff] %v7343_v13  ;;  %v11243_v63 = vpop.permute.xlu0 %7217 }
 0x4a8   : > { %v7262_v15 = vsel %vm5951_vm11, %v11232_v61, %v11243_v63 }
 0x4a9   : > { %v7364_v42 = vmax.f32 %v7154_v57, %v7262_v15 }
 0x4ab   : > { %7406 = vst [vmem:[%s11178_s9 + $0x108] sm:$0xf] %v7364_v42 }
 0x4af   : > { %v11252_v17 = vpop.permute.xlu1 %7227 }
 0x4b3   : > { %v7172_v31 = vpop.permute.xlu1 %7171 }
 0x4b4   : > { %v7283_v24 = vsel %vm5951_vm11, %v7168_v41, %v7172_v31  ;;  %v11256_v46 = vpop.permute.xlu0 %7229 }
 0x4b5   : > { %v7332_v13 = vmax.f32 %v11720_v10, %v7283_v24 }
 0x4b7   : > { %7374 = vst [vmem:[%s11178_s9 + $0x8] sm:$0xff] %v7332_v13  ;;  %v11261_v40 = vpop.permute.xlu1 %7231 }
 0x4b8   : > { %v7253_v34 = vsel %vm5951_vm11, %v11252_v17, %v11261_v40  ;;  %v7174_v57 = vpop.permute.xlu0 %7173 }
 0x4b9   : > { %v7347_v15 = vmax.f32 %v7137_v55, %v7253_v34  ;;  %v7284_v41 = vsel %vm5951_vm11, %v7170_v59, %v7174_v57 }
 0x4ba   : > { %v7353_v42 = vmax.f32 %v11721_v19, %v7284_v41 }
 0x4bb   : > { %7389 = vst [vmem:[%s11178_s9 + $0x80] sm:$0xff] %v7347_v15  ;;  %v7176_v24 = vpop.permute.xlu1 %7175  ;;  %v11724_v15 = vmax.f32 %v10949_v14, 0.0 }
 0x4bc   : > { %v7279_v10 = vsel %vm5951_vm11, %v7176_v24, %v7180_v22  ;;  %v7281_v13 = vsel %vm5951_vm11, %v7172_v31, %v7176_v24  ;;  %7395 = vst [vmem:[%s11178_s9 + $0xb0] sm:$0xf] %v7353_v42  ;;  %v11279_v12 = vpop.permute.xlu0 %7233  ;;  %v11723_v31 = vmax.f32 %v10984_v2, 0.0  ;;  %v11726_v2 = vld [vmem:[#allocation39_spill] sm:$0xff] }
 0x4bd   : > { %v7333_v52 = vmax.f32 %v7123_v50, %v7281_v13  ;;  %v7334_v55 = vmax.f32 %v7124_v58, %v7279_v10  ;;  %v7254_v39 = vsel %vm5951_vm11, %v11256_v46, %v11279_v12  ;;  %v11728_v13 = vmax.f32 %v11016_v28, 0.0 }
 0x4be   : > { %v7368_v22 = vmax.f32 %v7158_v49, %v7254_v39 }
 0x4bf   : > { %7375 = vst [vmem:[%s11178_s9 + $0x10] sm:$0xff] %v7333_v52  ;;  %7376 = vst [vmem:[%s11178_s9 + $0x18] sm:$0xff] %v7334_v55  ;;  %v11293_v59 = vpop.permute.xlu1 %7245 }
 0x4c0   : > { %v7288_v48 = vsel %vm5951_vm11, %v11293_v59, %v11173_v1  ;;  %7410 = vst [vmem:[%s11178_s9 + $0x128] sm:$0xf] %v7368_v22  ;;  %v7178_v50 = vpop.permute.xlu0 %7177  ;;  %v11725_v1 = vmax.f32 %v10992_v30, 0.0 }
 0x4c1   : > { %v7330_v58 = vsel %vm6014_vm12, %v7288_v48, 0.0  ;;  %v7280_v47 = vsel %vm5951_vm11, %v7178_v50, %v7182_v9  ;;  %v7282_v49 = vsel %vm5951_vm11, %v7174_v57, %v7178_v50  ;;  %v11727_v57 = vmax.f32 %v11726_v2, 0.0 }
 0x4c2   : > { %v7372_v34 = vmax.f32 %v11723_v31, %v7330_v58  ;;  %v7354_v41 = vmax.f32 %v11724_v15, %v7282_v49  ;;  %v7355_v19 = vmax.f32 %v11725_v1, %v7280_v47  ;;  %v11729_v48 = vmax.f32 %v11003_v27, 0.0  ;;  %v11732_v49 = vld [vmem:[#allocation25_spill] sm:$0xff] }
 0x4c3   : > { %v7188_v42 = vpop.permute.xlu1 %7187  ;;  %v11730_v50 = vmax.f32 %v11025_v26, 0.0  ;;  %v11731_v58 = vmax.f32 %v10797_v0, 0.0  ;;  %v11733_v31 = vmax.f32 %v11732_v49, 0.0  ;;  %v11734_v15 = vmax.f32 %v11035_v60, 0.0 }
 0x4c4   : > { %7414 = vst [vmem:[%s11178_s9 + $0x148] sm:$0xf] %v7372_v34  ;;  %v7275_v24 = vsel %vm5951_vm11, %v11192_v18, %v7188_v42  ;;  %7396 = vst [vmem:[%s11178_s9 + $0xb8] sm:$0xf] %v7354_v41  ;;  %v11318_v9 = vpop.permute.xlu0 %7243  ;;  %v11735_v1 = vmax.f32 %v11056_v5, 0.0  ;;  %v11736_v2 = vmax.f32 %v11046_v8, 0.0 }
 0x4c5   : > { %7397 = vst [vmem:[%s11178_s9 + $0xc0] sm:$0xf] %v7355_v19  ;;  %v7336_v14 = vmax.f32 %v11727_v57, %v7275_v24  ;;  %v7287_v30 = vsel %vm5951_vm11, %v11318_v9, %v11170_v44  ;;  %v11737_v5 = vmax.f32 %v11066_v36, 0.0  ;;  %v11740_v36 = vmax.f32 %v10872_v6, 0.0 }
 0x4c6   : > { %v7309_v10 = vsel %vm6014_vm12, %v7287_v30, 0.0  ;;  %v11738_v30 = vld [vmem:[#allocation48_spill] sm:$0xff]  ;;  %v11747_v49 = vmax.f32 %v11114_v7, 0.0  ;;  %v11749_v7 = vmax.f32 %v11122_v23, 0.0 }
 0x4c7   : > { %7378 = vst [vmem:[%s11178_s9 + $0x28] sm:$0xff] %v7336_v14  ;;  %v7192_v18 = vpop.permute.xlu1 %7191  ;;  %v7351_v52 = vmax.f32 %v11728_v13, %v7309_v10  ;;  %v11739_v10 = vmax.f32 %v11738_v30, 0.0 }
 0x4c8   : > { %v7271_v55 = vsel %vm5951_vm11, %v7192_v18, %v11208_v3  ;;  %v7273_v39 = vsel %vm5951_vm11, %v7188_v42, %v7192_v18  ;;  %v7190_v22 = vpop.permute.xlu0 %7189 }
 0x4c9   : > { %v7337_v44 = vmax.f32 %v11729_v48, %v7273_v39  ;;  %v7338_v62 = vmax.f32 %v11730_v50, %v7271_v55  ;;  %7393 = vst [vmem:[%s11178_s9 + $0xa0] sm:$0xff] %v7351_v52  ;;  %v7276_v28 = vsel %vm5951_vm11, %v11200_v37, %v7190_v22  ;;  %v11741_v39 = vmax.f32 %v11076_v56, 0.0 }
 0x4ca   : > { %v7357_v47 = vmax.f32 %v11731_v58, %v7276_v28  ;;  %v11742_v48 = vmax.f32 %v11096_v32, 0.0  ;;  %v11744_v32 = vmax.f32 %v11106_v51, 0.0  ;;  %v11746_v51 = vmax.f32 %v10941_v33, 0.0 }
 0x4cb   : > { %7379 = vst [vmem:[%s11178_s9 + $0x30] sm:$0xff] %v7337_v44  ;;  %7380 = vst [vmem:[%s11178_s9 + $0x38] sm:$0xff] %v7338_v62  ;;  %v7204_v3 = vpop.permute.xlu1 %7203  ;;  %v11743_v62 = vmax.f32 %v11086_v45, 0.0 }
 0x4cc   : > { %v7267_v27 = vsel %vm5951_vm11, %v11212_v53, %v7204_v3  ;;  %7399 = vst [vmem:[%s11178_s9 + $0xd0] sm:$0xf] %v7357_v47  ;;  %v7194_v26 = vpop.permute.xlu0 %7193  ;;  %v11745_v47 = vmax.f32 %v10887_v20, 0.0 }
 0x4cd   : > { %v7340_v34 = vmax.f32 %v11733_v31, %v7267_v27  ;;  %v7272_v0 = vsel %vm5951_vm11, %v7194_v26, %v11210_v25  ;;  %v7274_v37 = vsel %vm5951_vm11, %v7190_v22, %v7194_v26 }
 0x4ce   : > { %v7358_v41 = vmax.f32 %v11734_v15, %v7274_v37  ;;  %v7359_v53 = vmax.f32 %v11735_v1, %v7272_v0 }
 0x4cf   : > { %7382 = vst [vmem:[%s11178_s9 + $0x48] sm:$0xff] %v7340_v34  ;;  %v7208_v19 = vpop.permute.xlu1 %7207 }
 0x4d0   : > { %v7263_v42 = vsel %vm5951_vm11, %v7208_v19, %v11230_v38  ;;  %v7265_v25 = vsel %vm5951_vm11, %v7204_v3, %v7208_v19  ;;  %7400 = vst [vmem:[%s11178_s9 + $0xd8] sm:$0xf] %v7358_v41  ;;  %7401 = vst [vmem:[%s11178_s9 + $0xe0] sm:$0xf] %v7359_v53  ;;  %v7206_v24 = vpop.permute.xlu0 %7205 }
 0x4d1   : > { %v7341_v60 = vmax.f32 %v11736_v2, %v7265_v25  ;;  %v7342_v57 = vmax.f32 %v11737_v5, %v7263_v42  ;;  %v7268_v14 = vsel %vm5951_vm11, %v11221_v29, %v7206_v24 }
 0x4d2   : > { %v7361_v38 = vmax.f32 %v11739_v10, %v7268_v14 }
 0x4d3   : > { %7383 = vst [vmem:[%s11178_s9 + $0x50] sm:$0xff] %v7341_v60  ;;  %7384 = vst [vmem:[%s11178_s9 + $0x58] sm:$0xff] %v7342_v57  ;;  %v7220_v18 = vpop.permute.xlu1 %7219 }
 0x4d4   : > { %v7259_v8 = vsel %vm5951_vm11, %v11234_v16, %v7220_v18  ;;  %7403 = vst [vmem:[%s11178_s9 + $0xf0] sm:$0xf] %v7361_v38  ;;  %v7210_v13 = vpop.permute.xlu0 %7209 }
 0x4d5   : > { %v7344_v52 = vmax.f32 %v11740_v36, %v7259_v8  ;;  %v7264_v29 = vsel %vm5951_vm11, %v7210_v13, %v11232_v61  ;;  %v7266_v55 = vsel %vm5951_vm11, %v7206_v24, %v7210_v13  ;;  %v11753_v24 = vmax.f32 %v11158_v21, 0.0 }
 0x4d6   : > { %v7362_v22 = vmax.f32 %v11741_v39, %v7266_v55  ;;  %v7363_v16 = vmax.f32 %v11742_v48, %v7264_v29 }
 0x4d7   : > { %7386 = vst [vmem:[%s11178_s9 + $0x68] sm:$0xff] %v7344_v52  ;;  %v7224_v44 = vpop.permute.xlu1 %7223 }
 0x4d8   : > { %v7255_v6 = vsel %vm5951_vm11, %v7224_v44, %v11252_v17  ;;  %v7257_v61 = vsel %vm5951_vm11, %v7220_v18, %v7224_v44  ;;  %7404 = vst [vmem:[%s11178_s9 + $0xf8] sm:$0xf] %v7362_v22  ;;  %7405 = vst [vmem:[%s11178_s9 + $0x100] sm:$0xf] %v7363_v16  ;;  %v7222_v50 = vpop.permute.xlu0 %7221 }
 0x4d9   : > { %v7345_v56 = vmax.f32 %v11743_v62, %v7257_v61  ;;  %v7346_v28 = vmax.f32 %v11744_v32, %v7255_v6  ;;  %v7260_v58 = vsel %vm5951_vm11, %v11243_v63, %v7222_v50 }
 0x4da   : > { %v7365_v17 = vmax.f32 %v11745_v47, %v7260_v58 }
 0x4db   : > { %7387 = vst [vmem:[%s11178_s9 + $0x70] sm:$0xff] %v7345_v56  ;;  %7388 = vst [vmem:[%s11178_s9 + $0x78] sm:$0xff] %v7346_v28  ;;  %v7236_v3 = vpop.permute.xlu1 %7235 }
 0x4dc   : > { %v7251_v45 = vsel %vm5951_vm11, %v11261_v40, %v7236_v3  ;;  %7407 = vst [vmem:[%s11178_s9 + $0x110] sm:$0xf] %v7365_v17  ;;  %v7226_v27 = vpop.permute.xlu0 %7225  ;;  %v11748_v40 = vmax.f32 %v11130_v54, 0.0  ;;  %v11750_v54 = vmax.f32 %v11139_v35, 0.0  ;;  %v11752_v35 = vmax.f32 %v11146_v4, 0.0 }
 0x4dd   : > { %v7348_v26 = vmax.f32 %v11746_v51, %v7251_v45  ;;  %v7256_v20 = vsel %vm5951_vm11, %v7226_v27, %v11256_v46  ;;  %v7258_v63 = vsel %vm5951_vm11, %v7222_v50, %v7226_v27 }
 0x4de   : > { %v7366_v31 = vmax.f32 %v11747_v49, %v7258_v63  ;;  %v7367_v34 = vmax.f32 %v11748_v40, %v7256_v20 }
 0x4df   : > { %7390 = vst [vmem:[%s11178_s9 + $0x88] sm:$0xff] %v7348_v26  ;;  %v7240_v0 = vpop.permute.xlu1 %7239 }
 0x4e0   : > { %v7247_v33 = vsel %vm5951_vm11, %v7240_v0, %v11318_v9  ;;  %v7249_v46 = vsel %vm5951_vm11, %v7236_v3, %v7240_v0  ;;  %7408 = vst [vmem:[%s11178_s9 + $0x118] sm:$0xf] %v7366_v31  ;;  %7409 = vst [vmem:[%s11178_s9 + $0x120] sm:$0xf] %v7367_v34  ;;  %v7238_v37 = vpop.permute.xlu0 %7237  ;;  %v11751_v9 = vmax.f32 %v10973_v43, 0.0 }
 0x4e1   : > { %v7349_v15 = vmax.f32 %v11749_v7, %v7249_v46  ;;  %v7350_v41 = vmax.f32 %v11750_v54, %v7247_v33  ;;  %v7252_v1 = vsel %vm5951_vm11, %v11279_v12, %v7238_v37 }
 0x4e2   : > { %v7369_v53 = vmax.f32 %v11751_v9, %v7252_v1 }
 0x4e3   : > { %7391 = vst [vmem:[%s11178_s9 + $0x90] sm:$0xff] %v7349_v15  ;;  %7392 = vst [vmem:[%s11178_s9 + $0x98] sm:$0xff] %v7350_v41 }
 0x4e4   : > { %7411 = vst [vmem:[%s11178_s9 + $0x130] sm:$0xf] %v7369_v53  ;;  %v7242_v19 = vpop.permute.xlu0 %7241 }
 0x4e5   : > { %v7248_v42 = vsel %vm5951_vm11, %v7242_v19, %v11293_v59  ;;  %v7250_v23 = vsel %vm5951_vm11, %v7238_v37, %v7242_v19 }
 0x4e6   : > { %v7370_v25 = vmax.f32 %v11752_v35, %v7250_v23  ;;  %v7371_v12 = vmax.f32 %v11753_v24, %v7248_v42 }
 0x4e8   : > { %7412 = vst [vmem:[%s11178_s9 + $0x138] sm:$0xf] %v7370_v25  ;;  %7413 = vst [vmem:[%s11178_s9 + $0x140] sm:$0xf] %v7371_v12 }
 0x4e9 PF: > { %s21_s24 = sadd.s32 1, %s8137_s24  }
 0x4ea   : > { %p18_p2 = scmp.ge.s32.totalorder %s21_s24, 6  }
 0x4ec   :  { %20 = sbr.rel (!%p18_p2) target bundleno = 4 (0x4), region = 107 }
 0x4f1   :  { %7436 = vsyncpa [#allocation3], 1 }
 0x4f2   :  { %7438 = vsyncpa [#allocation3 + $0x1], 1 }
 0x4f3   :  { %7439 = vsyncpa [#allocation5], 1 }
 0x4f4   :  { %7440 = vsyncpa [#allocation8], 1 }
 0x4f5   :  { %7441 = vsyncpa [#allocation11], 1 }

// kernel: _lambda_.3
= control target key start
LH: loop header
LB: loop body
LE: loop exit
PB: predicated region body
PF: predicated region fallthrough
CT: control target
= control target key end

     0   :  { %s8030_s0 = inlined_call_operand.vmem [shape: f32[4,7980], index: 0, kind: input, shape index: {}]   ;;  %s8031_s1 = inlined_call_operand.hbm [shape: f32[7980,32], index: 1, kind: input, shape index: {}]   ;;  %s8032_s2 = inlined_call_operand.hbm [shape: f32[1,32], index: 2, kind: input, shape index: {}]   ;;  %s8033_s3 = inlined_call_operand.hbm [shape: f32[1,32], index: 3, kind: input, shape index: {}]   ;;  %s8034_s4 = inlined_call_operand.hbm [shape: f32[1,32], index: 4, kind: input, shape index: {}]   ;;  %s8035_s5 = inlined_call_operand.hbm [shape: f32[1,32,32], index: 5, kind: input, shape index: {}]   ;;  %s8036_s6 = inlined_call_operand.hbm [shape: f32[1,1,32], index: 6, kind: input, shape index: {}]   ;;  %s8037_s7 = inlined_call_operand.hbm [shape: f32[3,32,128], index: 7, kind: input, shape index: {}]   ;;  %s8038_s8 = inlined_call_operand.hbm [shape: f32[3,32,128], index: 8, kind: input, shape index: {}]   ;;  %s8039_s9 = inlined_call_operand.hbm [shape: f32[3,1,128], index: 9, kind: input, shape index: {}]   ;;  %s8040_s10 = inlined_call_operand.hbm [shape: f32[32,32], index: 10, kind: input, shape index: {}]   ;;  %s8041_s11 = inlined_call_operand.hbm [shape: f32[1,32], index: 11, kind: input, shape index: {}]   ;;  %s8042_s12 = inlined_call_operand.hbm [shape: f32[1,32], index: 12, kind: input, shape index: {}]   ;;  %s8043_s13 = inlined_call_operand.hbm [shape: f32[1,32], index: 13, kind: input, shape index: {}]   ;;  %s8044_s14 = inlined_call_operand.hbm [shape: f32[32,5], index: 14, kind: input, shape index: {}]   ;;  %s8045_s15 = inlined_call_operand.hbm [shape: f32[1,5], index: 15, kind: input, shape index: {}]   ;;  %s8046_s16 = inlined_call_operand.hbm [shape: f32[4,5], index: 16, kind: output, shape index: {}]  }
   0x1   :  { %8048 = sst [smem:[#allocation37_spill]] %s8030_s0 }
   0x2   :  { %21 = vsyncpa [#allocation4], 0 }
   0x3   :  { %22 = vsyncpa [#allocation7], 0 }
   0x4   :  { %23 = vsyncpa [#allocation10], 0 }
   0x5   :  { %24 = vsyncpa [#allocation13], 0 }
   0x6   :  { %25 = vsyncpa [#allocation16], 0 }
   0x7   :  { %26 = vsyncpa [#allocation19], 0 }
   0x8   :  { %27 = vsyncpa [#allocation22], 0 }
   0x9   :  { %28 = vsyncpa [#allocation25], 0 }
   0xa   :  { %29 = vsyncpa [#allocation5], 0  ;;  %s7459_s21 = smov [#allocation6]   ;;  %s7460_s23 = smov [#allocation9]  }
   0xb   :  { %s50_s22 = sshll.u32 %s7459_s21, 4  ;;  %s70_s24 = sshll.u32 %s7460_s23, 4  ;;  %s51_s22 = int_to_ptr.vmem [resolvable:$true] %s50_s22  ;;  %s71_s24 = int_to_ptr.vmem [resolvable:$true] %s70_s24 }
   0xc   :  { %s7129_s25 = scalar_lea.vmem %s51_s22, 16  ;;  %s7133_s26 = scalar_lea.vmem %s51_s22, 32 }
   0xd   :  { %p7130_p0 = scmp.ne.s32.totalorder %s51_s22, %s7129_s25  ;;  %p7134_p1 = scmp.lt.s32.totalorder %s51_s22, %s51_s22 }
   0xe   :  { %p7135_p2 = scmp.lt.s32.totalorder %s7133_s26, %s7129_s25 }
  0x10   :  { %p7136_p3 = por %p7135_p2, %p7134_p1 }
  0x12   :  { %p7137_p4 = pnand %p7136_p3, %p7130_p0 }
  0x14   :  { %7140 = shalt.err (!%p7137_p4)
}
  0x15   :  { %53 = dma.hbm_to_vmem [thread:$0]  %s8032_s2, 16, %s51_s22, [#allocation7]  }
  0x16   :  { %s7149_s29 = scalar_lea.vmem %s71_s24, 16  ;;  %s7153_s30 = scalar_lea.vmem %s71_s24, 32 }
  0x17   :  { %p7150_p5 = scmp.ne.s32.totalorder %s71_s24, %s7149_s29  ;;  %p7154_p6 = scmp.lt.s32.totalorder %s71_s24, %s71_s24 }
  0x18   :  { %p7155_p7 = scmp.lt.s32.totalorder %s7153_s30, %s7149_s29 }
  0x1a   :  { %p7156_p8 = por %p7155_p7, %p7154_p6 }
  0x1c   :  { %p7157_p9 = pnand %p7156_p8, %p7150_p5 }
  0x1e   :  { %7160 = shalt.err (!%p7157_p9)
}
  0x1f   :  { %73 = dma.hbm_to_vmem [thread:$0]  %s8034_s4, 16, %s71_s24, [#allocation10]  }
  0x20   :  { %s7461_s18 = smov [#allocation12]  }
  0x21   :  { %s92_s19 = sshll.u32 %s7461_s18, 4  ;;  %s93_s19 = int_to_ptr.vmem [resolvable:$true] %s92_s19 }
  0x22   :  { %s7169_s20 = scalar_lea.vmem %s93_s19, 16  ;;  %s7173_s21 = scalar_lea.vmem %s93_s19, 32 }
  0x23   :  { %p7170_p10 = scmp.ne.s32.totalorder %s93_s19, %s7169_s20  ;;  %p7174_p11 = scmp.lt.s32.totalorder %s93_s19, %s93_s19 }
  0x24   :  { %p7175_p12 = scmp.lt.s32.totalorder %s7173_s21, %s7169_s20 }
  0x26   :  { %p7176_p13 = por %p7175_p12, %p7174_p11 }
  0x28   :  { %p7177_p0 = pnand %p7176_p13, %p7170_p10 }
  0x2a   :  { %7180 = shalt.err (!%p7177_p0)
}
  0x2b   :  { %95 = dma.hbm_to_vmem [thread:$0]  %s8036_s6, 16, %s93_s19, [#allocation13]  }
  0x2c   :  { %s7462_s23 = smov [#allocation15]   ;;  %s7463_s26 = smov [#allocation18]  }
  0x2d   :  { %s113_s25 = sshll.u32 %s7462_s23, 4  ;;  %s137_s4 = sshll.u32 %s7463_s26, 4  ;;  %s114_s25 = int_to_ptr.vmem [resolvable:$true] %s113_s25  ;;  %s138_s4 = int_to_ptr.vmem [resolvable:$true] %s137_s4 }
  0x2e   :  { %s7189_s24 = scalar_lea.vmem %s114_s25, 1536  ;;  %p7194_p2 = scmp.lt.s32.totalorder %s114_s25, %s114_s25 }
  0x2f   :  { %p7190_p1 = scmp.ne.s32.totalorder %s114_s25, %s7189_s24  ;;  %p7195_p3 = scmp.lt.s32.totalorder %s7189_s24, %s7189_s24 }
  0x31   :  { %p7196_p4 = por %p7195_p3, %p7194_p2 }
  0x33   :  { %p7197_p5 = pnand %p7196_p4, %p7190_p1 }
  0x35   :  { %7200 = shalt.err (!%p7197_p5)
}
  0x36   :  { %s7464_s27 = smov 128   ;;  %s7465_s28 = smov 8  }
  0x37   :  { %119 = dma.hbm_to_vmem [thread:$0]  %s8038_s8, 1536, %s114_s25, [#allocation16], %s7464_s27, %s7464_s27, %s7465_s28  }
  0x38   :  { %s7209_s6 = scalar_lea.vmem %s138_s4, 512  ;;  %p7214_p7 = scmp.lt.s32.totalorder %s138_s4, %s138_s4 }
  0x39   :  { %p7210_p6 = scmp.ne.s32.totalorder %s138_s4, %s7209_s6  ;;  %p7215_p8 = scmp.lt.s32.totalorder %s7209_s6, %s7209_s6 }
  0x3b   :  { %p7216_p9 = por %p7215_p8, %p7214_p7 }
  0x3d   :  { %p7217_p10 = pnand %p7216_p9, %p7210_p6 }
  0x3f   :  { %7220 = shalt.err (!%p7217_p10)
}
  0x40   :  { %143 = dma.hbm_to_vmem [thread:$0]  %s8040_s10, 512, %s138_s4, [#allocation19], %s7464_s27, %s7464_s27, %s7465_s28  }
  0x41   :  { %s7466_s18 = smov [#allocation21]   ;;  %s7467_s20 = smov [#allocation24]  }
  0x42   :  { %s160_s19 = sshll.u32 %s7466_s18, 4  ;;  %s179_s8 = sshll.u32 %s7467_s20, 4  ;;  %s161_s19 = int_to_ptr.vmem [resolvable:$true] %s160_s19  ;;  %s180_s8 = int_to_ptr.vmem [resolvable:$true] %s179_s8 }
  0x43   :  { %s7229_s21 = scalar_lea.vmem %s161_s19, 16  ;;  %s7233_s2 = scalar_lea.vmem %s161_s19, 32 }
  0x44   :  { %p7230_p11 = scmp.ne.s32.totalorder %s161_s19, %s7229_s21  ;;  %p7234_p12 = scmp.lt.s32.totalorder %s161_s19, %s161_s19 }
  0x45   :  { %p7235_p13 = scmp.lt.s32.totalorder %s7233_s2, %s7229_s21 }
  0x47   :  { %p7236_p0 = por %p7235_p13, %p7234_p12 }
  0x49   :  { %p7237_p1 = pnand %p7236_p0, %p7230_p11 }
  0x4b   :  { %7240 = shalt.err (!%p7237_p1)
}
  0x4c   :  { %163 = dma.hbm_to_vmem [thread:$0]  %s8042_s12, 16, %s161_s19, [#allocation22]  }
  0x4d   :  { %s7249_s25 = scalar_lea.vmem %s180_s8, 512  ;;  %p7254_p3 = scmp.lt.s32.totalorder %s180_s8, %s180_s8 }
  0x4e   :  { %p7250_p2 = scmp.ne.s32.totalorder %s180_s8, %s7249_s25  ;;  %p7255_p4 = scmp.lt.s32.totalorder %s7249_s25, %s7249_s25 }
  0x50   :  { %p7256_p5 = por %p7255_p4, %p7254_p3 }
  0x52   :  { %p7257_p6 = pnand %p7256_p5, %p7250_p2 }
  0x54   :  { %7260 = shalt.err (!%p7257_p6)
}
  0x55   :  { %185 = dma.hbm_to_vmem [thread:$0]  %s8044_s14, 512, %s180_s8, [#allocation25], %s7464_s27, %s7464_s27, %s7465_s28  }
  0x56   :  { %s7468_s4 = smov [#allocation3]   ;;  %s7469_s29 = smov [#allocation8]  }
  0x57   :  { %s37_s24 = sshll.u32 %s7468_s4, 4  ;;  %s60_s12 = sshll.u32 %s7469_s29, 4  ;;  %s38_s24 = int_to_ptr.vmem [resolvable:$true] %s37_s24  ;;  %s61_s12 = int_to_ptr.vmem [resolvable:$true] %s60_s12 }
  0x58   :  { %s7269_s30 = scalar_lea.vmem %s38_s24, 127744  ;;  %p7274_p8 = scmp.lt.s32.totalorder %s38_s24, %s38_s24 }
  0x59   :  { %p7270_p7 = scmp.ne.s32.totalorder %s38_s24, %s7269_s30  ;;  %p7275_p9 = scmp.lt.s32.totalorder %s7269_s30, %s7269_s30 }
  0x5b   :  { %p7276_p10 = por %p7275_p9, %p7274_p8 }
  0x5d   :  { %p7277_p11 = pnand %p7276_p10, %p7270_p7 }
  0x5f   :  { %7280 = shalt.err (!%p7277_p11)
}
  0x60   :  { %43 = dma.hbm_to_vmem [thread:$0]  %s8031_s1, 127744, %s38_s24, [#allocation4], %s7464_s27, %s7464_s27, %s7465_s28  }
  0x61   :  { %s7289_s14 = scalar_lea.vmem %s61_s12, 16  ;;  %s7293_s17 = scalar_lea.vmem %s61_s12, 32 }
  0x62   :  { %p7290_p12 = scmp.ne.s32.totalorder %s61_s12, %s7289_s14  ;;  %p7294_p13 = scmp.lt.s32.totalorder %s61_s12, %s61_s12 }
  0x63   :  { %p7295_p0 = scmp.lt.s32.totalorder %s7293_s17, %s7289_s14 }
  0x65   :  { %p7296_p1 = por %p7295_p0, %p7294_p13 }
  0x67   :  { %p7297_p2 = pnand %p7296_p1, %p7290_p12 }
  0x69   :  { %7300 = shalt.err (!%p7297_p2)
}
  0x6a   :  { %63 = dma.hbm_to_vmem [thread:$0]  %s8033_s3, 16, %s61_s12, [#allocation7]  }
  0x6b   :  { %s7470_s20 = smov [#allocation11]   ;;  %s7471_s21 = smov [#allocation14]  }
  0x6c   :  { %s79_s8 = sshll.u32 %s7470_s20, 4  ;;  %s101_s2 = sshll.u32 %s7471_s21, 4  ;;  %s80_s8 = int_to_ptr.vmem [resolvable:$true] %s79_s8  ;;  %s102_s2 = int_to_ptr.vmem [resolvable:$true] %s101_s2 }
  0x6d   :  { %s7309_s22 = scalar_lea.vmem %s80_s8, 512  ;;  %p7314_p4 = scmp.lt.s32.totalorder %s80_s8, %s80_s8 }
  0x6e   :  { %p7310_p3 = scmp.ne.s32.totalorder %s80_s8, %s7309_s22  ;;  %p7315_p5 = scmp.lt.s32.totalorder %s7309_s22, %s7309_s22 }
  0x70   :  { %p7316_p6 = por %p7315_p5, %p7314_p4 }
  0x72   :  { %p7317_p7 = pnand %p7316_p6, %p7310_p3 }
  0x74   :  { %7320 = shalt.err (!%p7317_p7)
}
  0x75   :  { %85 = dma.hbm_to_vmem [thread:$0]  %s8035_s5, 512, %s80_s8, [#allocation10], %s7464_s27, %s7464_s27, %s7465_s28  }
  0x76   :  { %s7329_s3 = scalar_lea.vmem %s102_s2, 1536  ;;  %p7334_p9 = scmp.lt.s32.totalorder %s102_s2, %s102_s2 }
  0x77   :  { %p7330_p8 = scmp.ne.s32.totalorder %s102_s2, %s7329_s3  ;;  %p7335_p10 = scmp.lt.s32.totalorder %s7329_s3, %s7329_s3 }
  0x79   :  { %p7336_p11 = por %p7335_p10, %p7334_p9 }
  0x7b   :  { %p7337_p12 = pnand %p7336_p11, %p7330_p8 }
  0x7d   :  { %7340 = shalt.err (!%p7337_p12)
}
  0x7e   :  { %107 = dma.hbm_to_vmem [thread:$0]  %s8037_s7, 1536, %s102_s2, [#allocation13], %s7464_s27, %s7464_s27, %s7465_s28  }
  0x7f   :  { %s7472_s26 = smov [#allocation17]  }
  0x80   :  { %s125_s4 = sshll.u32 %s7472_s26, 4  ;;  %s126_s4 = int_to_ptr.vmem [resolvable:$true] %s125_s4 }
  0x81   :  { %s7349_s24 = scalar_lea.vmem %s126_s4, 48  ;;  %s7353_s5 = scalar_lea.vmem %s126_s4, 64 }
  0x82   :  { %p7350_p13 = scmp.ne.s32.totalorder %s126_s4, %s7349_s24  ;;  %p7354_p0 = scmp.lt.s32.totalorder %s126_s4, %s126_s4 }
  0x83   :  { %p7355_p1 = scmp.lt.s32.totalorder %s7353_s5, %s7349_s24 }
  0x85   :  { %p7356_p2 = por %p7355_p1, %p7354_p0 }
  0x87   :  { %p7357_p3 = pnand %p7356_p2, %p7350_p13 }
  0x89   :  { %7360 = shalt.err (!%p7357_p3)
}
  0x8a   :  { %s7473_s29 = smov 16   ;;  %s7474_s12 = smov 1  }
  0x8b   :  { %131 = dma.hbm_to_vmem [thread:$0]  %s8039_s9, 48, %s126_s4, [#allocation16], %s7473_s29, %s7473_s29, %s7474_s12  }
  0x8c   :  { %s7475_s0 = smov [#allocation20]   ;;  %s7476_s7 = smov [#allocation23]  }
  0x8d   :  { %s150_s14 = sshll.u32 %s7475_s0, 4  ;;  %s170_s27 = sshll.u32 %s7476_s7, 4  ;;  %s151_s14 = int_to_ptr.vmem [resolvable:$true] %s150_s14  ;;  %s171_s27 = int_to_ptr.vmem [resolvable:$true] %s170_s27 }
  0x8e   :  { %s7369_s28 = scalar_lea.vmem %s151_s14, 16  ;;  %s7373_s17 = scalar_lea.vmem %s151_s14, 32 }
  0x8f   :  { %p7370_p4 = scmp.ne.s32.totalorder %s151_s14, %s7369_s28  ;;  %p7374_p5 = scmp.lt.s32.totalorder %s151_s14, %s151_s14 }
  0x90   :  { %p7375_p6 = scmp.lt.s32.totalorder %s7373_s17, %s7369_s28 }
  0x92   :  { %p7376_p7 = por %p7375_p6, %p7374_p5 }
  0x94   :  { %p7377_p8 = pnand %p7376_p7, %p7370_p4 }
  0x96   :  { %7380 = shalt.err (!%p7377_p8)
}
  0x97   :  { %153 = dma.hbm_to_vmem [thread:$0]  %s8041_s11, 16, %s151_s14, [#allocation19]  }
  0x98   :  { %s7389_s20 = scalar_lea.vmem %s171_s27, 16  ;;  %s7393_s9 = scalar_lea.vmem %s171_s27, 32 }
  0x99   :  { %p7390_p9 = scmp.ne.s32.totalorder %s171_s27, %s7389_s20  ;;  %p7394_p10 = scmp.lt.s32.totalorder %s171_s27, %s171_s27 }
  0x9a   :  { %p7395_p11 = scmp.lt.s32.totalorder %s7393_s9, %s7389_s20 }
  0x9c   :  { %p7396_p12 = por %p7395_p11, %p7394_p10 }
  0x9e   :  { %p7397_p13 = pnand %p7396_p12, %p7390_p9 }
  0xa0   :  { %7400 = shalt.err (!%p7397_p13)
}
  0xa1   :  { %173 = dma.hbm_to_vmem [thread:$0]  %s8043_s13, 16, %s171_s27, [#allocation22]  }
  0xa2   :  { %s7477_s2 = smov [#allocation26]  }
  0xa3   :  { %s192_s22 = sshll.u32 %s7477_s2, 4  ;;  %s193_s22 = int_to_ptr.vmem [resolvable:$true] %s192_s22 }
  0xa4   :  { %s7409_s1 = scalar_lea.vmem %s193_s22, 16  ;;  %s7413_s23 = scalar_lea.vmem %s193_s22, 32 }
  0xa5   :  { %p7410_p0 = scmp.ne.s32.totalorder %s193_s22, %s7409_s1  ;;  %p7414_p1 = scmp.lt.s32.totalorder %s193_s22, %s193_s22 }
  0xa6   :  { %p7415_p2 = scmp.lt.s32.totalorder %s7413_s23, %s7409_s1 }
  0xa8   :  { %p7416_p3 = por %p7415_p2, %p7414_p1 }
  0xaa   :  { %p7417_p4 = pnand %p7416_p3, %p7410_p0 }
  0xac   :  { %7420 = shalt.err (!%p7417_p4)
}
  0xad   :  { %195 = dma.hbm_to_vmem [thread:$0]  %s8045_s15, 16, %s193_s22, [#allocation25]  }
  0xae   :  { %7441 = dma.done.wait [#allocation4], 127744  }
  0xaf   :  { %7442 = vsyncadd [#allocation4], 4294839552 }
  0xb0   :  { %7443 = dma.done.wait [#allocation7], 32  }
  0xb1   :  { %7444 = vsyncadd [#allocation7], 4294967264 }
  0xb2   :  { %7445 = dma.done.wait [#allocation10], 528  }
  0xb3   :  { %7446 = vsyncadd [#allocation10], 4294966768 }
  0xb4   :  { %7447 = dma.done.wait [#allocation13], 1552  }
  0xb5   :  { %7448 = vsyncadd [#allocation13], 4294965744 }
  0xb6   :  { %7449 = dma.done.wait [#allocation16], 1584  }
  0xb7   :  { %7450 = vsyncadd [#allocation16], 4294965712 }
  0xb8   :  { %7451 = dma.done.wait [#allocation19], 528  }
  0xb9   :  { %7452 = vsyncadd [#allocation19], 4294966768 }
  0xba   :  { %7453 = dma.done.wait [#allocation22], 32  }
  0xbb   :  { %7454 = vsyncadd [#allocation22], 4294967264 }
  0xbc   :  { %7455 = dma.done.wait [#allocation25], 528  }
  0xbd   :  { %7456 = vsyncadd [#allocation25], 4294966768  ;;  %v304_v0 = vld [vmem:[#allocation3 + $0xf8] sm:$0xff]  ;;  %v303_v2 = vld [vmem:[#allocation3 + $0xf0] sm:$0xff]  ;;  %s8049_s25 = sld [smem:[#allocation37_spill]]  ;;  %vm1375_vm0 = vcmask 1043456  }
  0xbe   :  { %v288_v1 = vld [vmem:[#allocation3 + $0x78] sm:$0xff]  ;;  %5571 = vmatprep.subr.mxu0 %v304_v0  ;;  %v287_v4 = vld [vmem:[#allocation3 + $0x70] sm:$0xff]  ;;  %v302_v6 = vld [vmem:[#allocation3 + $0xe8] sm:$0xff]  ;;  %vm1372_vm1 = vcmask 359424   ;;  %vm7479_vm2 = vmmov 0   ;;  %vm3621_vm3 = vcmask 257024  }
  0xbf   :  { %v336_v3 = vld [vmem:[#allocation3 + $0x1f8] sm:$0xff]  ;;  %5572 = vmatpush3.msra.mxu0 %v288_v1  ;;  %v335_v7 = vld [vmem:[#allocation3 + $0x1f0] sm:$0xff]  ;;  %v286_v8 = vld [vmem:[#allocation3 + $0x68] sm:$0xff]  ;;  %vm3662_vm4 = vcmask 261120   ;;  %s7481_s5 = smov 32   ;;  %vm3929_vm5 = vcmask 253952  }
  0xc0   :  { %v320_v5 = vld [vmem:[#allocation3 + $0x178] sm:$0xff]  ;;  %5606 = vmatprep.subr.mxu1 %v336_v3  ;;  %5573 = vmatprep.subr.mxu0 %v303_v2  ;;  %v319_v9 = vld [vmem:[#allocation3 + $0x170] sm:$0xff]  ;;  %v334_v10 = vld [vmem:[#allocation3 + $0x1e8] sm:$0xff]  ;;  %vm4038_vm6 = vcmask 254977   ;;  %vm4150_vm7 = vcmask 256002   ;;  %vm4262_vm8 = vcmask 257027  }
  0xc1   :  { %5607 = vmatpush3.msra.mxu1 %v320_v5  ;;  %5574 = vmatpush3.msra.mxu0 %v287_v4  ;;  %v301_v11 = vld [vmem:[#allocation3 + $0xe0] sm:$0xff]  ;;  %v318_v12 = vld [vmem:[#allocation3 + $0x168] sm:$0xff]  ;;  %v300_v15 = vld [vmem:[#allocation3 + $0xd8] sm:$0xff]  ;;  %s7482_s29 = smov [#allocation27]   ;;  %vm5507_vm9 = vcmask 35840  }
  0xc2   :  { %5608 = vmatprep.subr.mxu1 %v335_v7  ;;  %5575 = vmatprep.subr.mxu0 %v302_v6  ;;  %v285_v13 = vld [vmem:[#allocation3 + $0x60] sm:$0xff]  ;;  %v284_v17 = vld [vmem:[#allocation3 + $0x58] sm:$0xff]  ;;  %v299_v19 = vld [vmem:[#allocation3 + $0xd0] sm:$0xff]  ;;  %s5515_s12 = sshll.u32 %s7482_s29, 4  ;;  %s5516_s12 = int_to_ptr.vmem [resolvable:$true] %s5515_s12 }
  0xc3   :  { %5609 = vmatpush3.msra.mxu1 %v319_v9  ;;  %v333_v14 = vld [vmem:[#allocation3 + $0x1e0] sm:$0xff]  ;;  %5576 = vmatpush3.msra.mxu0 %v286_v8  ;;  %v332_v18 = vld [vmem:[#allocation3 + $0x1d8] sm:$0xff]  ;;  %v283_v21 = vld [vmem:[#allocation3 + $0x50] sm:$0xff]  ;;  %s7421_s30 = scalar_lea.vmem %s5516_s12, 64  ;;  %p7426_p6 = scmp.lt.s32.totalorder %s5516_s12, %s5516_s12 }
  0xc4   :  { %5610 = vmatprep.subr.mxu1 %v334_v10  ;;  %v317_v16 = vld [vmem:[#allocation3 + $0x160] sm:$0xff]  ;;  %5577 = vmatprep.subr.mxu0 %v301_v11  ;;  %v316_v20 = vld [vmem:[#allocation3 + $0x158] sm:$0xff]  ;;  %v331_v22 = vld [vmem:[#allocation3 + $0x1d0] sm:$0xff]  ;;  %p7422_p5 = scmp.ne.s32.totalorder %s5516_s12, %s7421_s30  ;;  %p7427_p7 = scmp.lt.s32.totalorder %s7421_s30, %s7421_s30 }
  0xc5   :  { %5611 = vmatpush3.msra.mxu1 %v318_v12  ;;  %5578 = vmatpush3.msra.mxu0 %v285_v13  ;;  %v298_v23 = vld [vmem:[#allocation3 + $0xc8] sm:$0xff]  ;;  %v315_v24 = vld [vmem:[#allocation3 + $0x150] sm:$0xff]  ;;  %v297_v27 = vld [vmem:[#allocation3 + $0xc0] sm:$0xff] }
  0xc6   :  { %5612 = vmatprep.subr.mxu1 %v333_v14  ;;  %5579 = vmatprep.subr.mxu0 %v300_v15  ;;  %v282_v25 = vld [vmem:[#allocation3 + $0x48] sm:$0xff]  ;;  %v281_v29 = vld [vmem:[#allocation3 + $0x40] sm:$0xff]  ;;  %v296_v31 = vld [vmem:[#allocation3 + $0xb8] sm:$0xff]  ;;  %p7428_p8 = por %p7427_p7, %p7426_p6 }
  0xc7   :  { %5613 = vmatpush3.msra.mxu1 %v317_v16  ;;  %5580 = vmatpush3.msra.mxu0 %v284_v17  ;;  %v330_v26 = vld [vmem:[#allocation3 + $0x1c8] sm:$0xff]  ;;  %v329_v30 = vld [vmem:[#allocation3 + $0x1c0] sm:$0xff]  ;;  %v280_v33 = vld [vmem:[#allocation3 + $0x38] sm:$0xff] }
  0xc8   :  { %5614 = vmatprep.subr.mxu1 %v332_v18  ;;  %5581 = vmatprep.subr.mxu0 %v299_v19  ;;  %v314_v28 = vld [vmem:[#allocation3 + $0x148] sm:$0xff]  ;;  %v313_v32 = vld [vmem:[#allocation3 + $0x140] sm:$0xff]  ;;  %v328_v34 = vld [vmem:[#allocation3 + $0x1b8] sm:$0xff]  ;;  %p7429_p9 = pnand %p7428_p8, %p7422_p5 }
  0xc9   :  { %5615 = vmatpush3.msra.mxu1 %v316_v20  ;;  %5582 = vmatpush3.msra.mxu0 %v283_v21  ;;  %v295_v35 = vld [vmem:[#allocation3 + $0xb0] sm:$0xff]  ;;  %v312_v36 = vld [vmem:[#allocation3 + $0x138] sm:$0xff]  ;;  %v294_v39 = vld [vmem:[#allocation3 + $0xa8] sm:$0xff] }
  0xca   :  { %5616 = vmatprep.subr.mxu1 %v331_v22  ;;  %5583 = vmatprep.subr.mxu0 %v298_v23  ;;  %v279_v37 = vld [vmem:[#allocation3 + $0x30] sm:$0xff]  ;;  %v278_v41 = vld [vmem:[#allocation3 + $0x28] sm:$0xff]  ;;  %v293_v43 = vld [vmem:[#allocation3 + $0xa0] sm:$0xff] }
  0xcb   :  { %5617 = vmatpush3.msra.mxu1 %v315_v24  ;;  %5584 = vmatpush3.msra.mxu0 %v282_v25  ;;  %v327_v38 = vld [vmem:[#allocation3 + $0x1b0] sm:$0xff]  ;;  %v326_v42 = vld [vmem:[#allocation3 + $0x1a8] sm:$0xff]  ;;  %v277_v45 = vld [vmem:[#allocation3 + $0x20] sm:$0xff] }
  0xcc   :  { %5618 = vmatprep.subr.mxu1 %v330_v26  ;;  %5585 = vmatprep.subr.mxu0 %v297_v27  ;;  %v311_v40 = vld [vmem:[#allocation3 + $0x130] sm:$0xff]  ;;  %v310_v44 = vld [vmem:[#allocation3 + $0x128] sm:$0xff]  ;;  %v325_v46 = vld [vmem:[#allocation3 + $0x1a0] sm:$0xff] }
  0xcd   :  { %5619 = vmatpush3.msra.mxu1 %v314_v28  ;;  %5586 = vmatpush3.msra.mxu0 %v281_v29  ;;  %v292_v47 = vld [vmem:[#allocation3 + $0x98] sm:$0xff]  ;;  %v309_v48 = vld [vmem:[#allocation3 + $0x120] sm:$0xff]  ;;  %v291_v51 = vld [vmem:[#allocation3 + $0x90] sm:$0xff] }
  0xce   :  { %5620 = vmatprep.subr.mxu1 %v329_v30  ;;  %5587 = vmatprep.subr.mxu0 %v296_v31  ;;  %v276_v49 = vld [vmem:[#allocation3 + $0x18] sm:$0xff]  ;;  %v275_v54 = vld [vmem:[#allocation3 + $0x10] sm:$0xff]  ;;  %v290_v56 = vld [vmem:[#allocation3 + $0x88] sm:$0xff] }
  0xcf   :  { %5621 = vmatpush3.msra.mxu1 %v313_v32  ;;  %5588 = vmatpush3.msra.mxu0 %v280_v33  ;;  %v324_v50 = vld [vmem:[#allocation3 + $0x198] sm:$0xff]  ;;  %v323_v55 = vld [vmem:[#allocation3 + $0x190] sm:$0xff]  ;;  %v274_v58 = vld [vmem:[#allocation3 + $0x8] sm:$0xff] }
  0xd0   :  { %5622 = vmatprep.subr.mxu1 %v328_v34  ;;  %5589 = vmatprep.subr.mxu0 %v295_v35  ;;  %v308_v52 = vld [vmem:[#allocation3 + $0x118] sm:$0xff]  ;;  %v307_v57 = vld [vmem:[#allocation3 + $0x110] sm:$0xff]  ;;  %v322_v59 = vld [vmem:[#allocation3 + $0x188] sm:$0xff] }
  0xd1   :  { %5623 = vmatpush3.msra.mxu1 %v312_v36  ;;  %5590 = vmatpush3.msra.mxu0 %v279_v37  ;;  %v241_v53 = vld [vmem:[%s8049_s25] sm:$0xff]  ;;  %v242_v62 = vld [vmem:[%s8049_s25 + $0x8] sm:$0xff]  ;;  %v367_v6 = vld [vmem:[#allocation3 + $0x2f0] sm:$0xff] }
  0xd2   :  { %5624 = vmatprep.subr.mxu1 %v327_v38  ;;  %5591 = vmatprep.subr.mxu0 %v294_v39  ;;  %v1310_v60 = vcombine.high %v241_v53, %v241_v53  ;;  %v289_v61 = vld [vmem:[#allocation3 + $0x80] sm:$0xff]  ;;  %v306_v0 = vld [vmem:[#allocation3 + $0x108] sm:$0xff]  ;;  %v368_v2 = vld [vmem:[#allocation3 + $0x2f8] sm:$0xff]  ;;  %v1311_v4 = vcombine.high %v242_v62, %v242_v62 }
  0xd3   :  { %5625 = vmatpush3.msra.mxu1 %v311_v40  ;;  %5592 = vmatpush3.msra.mxu0 %v278_v41  ;;  %v273_v63 = vld [vmem:[#allocation3] sm:$0xff]  ;;  %v352_v5 = vld [vmem:[#allocation3 + $0x278] sm:$0xff]  ;;  %v351_v8 = vld [vmem:[#allocation3 + $0x270] sm:$0xff] }
  0xd4   :  { %5626 = vmatprep.subr.mxu1 %v326_v42  ;;  %5593 = vmatprep.subr.mxu0 %v293_v43  ;;  %v321_v1 = vld [vmem:[#allocation3 + $0x180] sm:$0xff]  ;;  %v400_v7 = vld [vmem:[#allocation3 + $0x3f8] sm:$0xff]  ;;  %v366_v10 = vld [vmem:[#allocation3 + $0x2e8] sm:$0xff] }
  0xd5   :  { %5627 = vmatpush3.msra.mxu1 %v310_v44  ;;  %5594 = vmatpush3.msra.mxu0 %v277_v45  ;;  %v305_v3 = vld [vmem:[#allocation3 + $0x100] sm:$0xff]  ;;  %v384_v9 = vld [vmem:[#allocation3 + $0x378] sm:$0xff]  ;;  %v399_v11 = vld [vmem:[#allocation3 + $0x3f0] sm:$0xff] }
  0xd6   :  { %5628 = vmatprep.subr.mxu1 %v325_v46  ;;  %5595 = vmatprep.subr.mxu0 %v292_v47  ;;  %v350_v12 = vld [vmem:[#allocation3 + $0x268] sm:$0xff]  ;;  %v383_v13 = vld [vmem:[#allocation3 + $0x370] sm:$0xff]  ;;  %v365_v14 = vld [vmem:[#allocation3 + $0x2e0] sm:$0xff] }
  0xd7   :  { %5629 = vmatpush3.msra.mxu1 %v309_v48  ;;  %5596 = vmatpush3.msra.mxu0 %v276_v49  ;;  %v398_v15 = vld [vmem:[#allocation3 + $0x3e8] sm:$0xff]  ;;  %v349_v16 = vld [vmem:[#allocation3 + $0x260] sm:$0xff]  ;;  %v364_v18 = vld [vmem:[#allocation3 + $0x2d8] sm:$0xff] }
  0xd8   :  { %5630 = vmatprep.subr.mxu1 %v324_v50  ;;  %5597 = vmatprep.subr.mxu0 %v291_v51  ;;  %v382_v17 = vld [vmem:[#allocation3 + $0x368] sm:$0xff]  ;;  %v397_v19 = vld [vmem:[#allocation3 + $0x3e0] sm:$0xff]  ;;  %v348_v20 = vld [vmem:[#allocation3 + $0x258] sm:$0xff] }
  0xd9   :  { %5631 = vmatpush3.msra.mxu1 %v308_v52  ;;  %5598 = vmatpush3.msra.mxu0 %v275_v54  ;;  %v381_v21 = vld [vmem:[#allocation3 + $0x360] sm:$0xff]  ;;  %v363_v22 = vld [vmem:[#allocation3 + $0x2d0] sm:$0xff]  ;;  %v396_v23 = vld [vmem:[#allocation3 + $0x3d8] sm:$0xff] }
  0xda   :  { %5632 = vmatprep.subr.mxu1 %v323_v55  ;;  %5599 = vmatprep.subr.mxu0 %v290_v56  ;;  %v347_v24 = vld [vmem:[#allocation3 + $0x250] sm:$0xff]  ;;  %v380_v25 = vld [vmem:[#allocation3 + $0x358] sm:$0xff]  ;;  %v362_v26 = vld [vmem:[#allocation3 + $0x2c8] sm:$0xff] }
  0xdb   :  { %5633 = vmatpush3.msra.mxu1 %v307_v57  ;;  %5600 = vmatpush3.msra.mxu0 %v274_v58  ;;  %v395_v27 = vld [vmem:[#allocation3 + $0x3d0] sm:$0xff]  ;;  %v346_v28 = vld [vmem:[#allocation3 + $0x248] sm:$0xff]  ;;  %v361_v30 = vld [vmem:[#allocation3 + $0x2c0] sm:$0xff] }
  0xdc   :  { %5634 = vmatprep.subr.mxu1 %v322_v59  ;;  %5601 = vmatprep.subr.mxu0 %v289_v61  ;;  %v379_v29 = vld [vmem:[#allocation3 + $0x350] sm:$0xff]  ;;  %v394_v31 = vld [vmem:[#allocation3 + $0x3c8] sm:$0xff]  ;;  %v345_v32 = vld [vmem:[#allocation3 + $0x240] sm:$0xff] }
  0xdd   :  { %1443 = vmatprep.mubr.f32.mxu0 %v1310_v60  ;;  %5602 = vmatpush3.msra.mxu0 %v273_v63  ;;  %v378_v33 = vld [vmem:[#allocation3 + $0x348] sm:$0xff]  ;;  %v360_v34 = vld [vmem:[#allocation3 + $0x2b8] sm:$0xff]  ;;  %v393_v35 = vld [vmem:[#allocation3 + $0x3c0] sm:$0xff] }
  0xde   :  { %5635 = vmatpush3.msra.mxu1 %v306_v0  ;;  %1444 = vmatmul.mubr.f32.vlgmr.msra.gmra.mxu0 %v241_v53  ;;  %v344_v36 = vld [vmem:[#allocation3 + $0x238] sm:$0xff]  ;;  %v377_v37 = vld [vmem:[#allocation3 + $0x340] sm:$0xff]  ;;  %v359_v38 = vld [vmem:[#allocation3 + $0x2b0] sm:$0xff] }
  0xdf   :  { %5636 = vmatprep.subr.mxu1 %v321_v1  ;;  %5641 = vmatprep.subr.mxu0 %v368_v2  ;;  %v392_v39 = vld [vmem:[#allocation3 + $0x3b8] sm:$0xff]  ;;  %v343_v40 = vld [vmem:[#allocation3 + $0x230] sm:$0xff]  ;;  %v358_v42 = vld [vmem:[#allocation3 + $0x2a8] sm:$0xff] }
  0xe0   :  { %5637 = vmatpush3.msra.mxu1 %v305_v3  ;;  %1513 = vmatprep.mubr.f32.mxu1 %v1311_v4  ;;  %v376_v41 = vld [vmem:[#allocation3 + $0x338] sm:$0xff]  ;;  %v391_v43 = vld [vmem:[#allocation3 + $0x3b0] sm:$0xff]  ;;  %v342_v44 = vld [vmem:[#allocation3 + $0x228] sm:$0xff] }
  0xe1   :  { %5642 = vmatpush3.msra.mxu0 %v352_v5  ;;  %1514 = vmatmul.mubr.f32.vlgmr.msra.gmra.mxu1 %v242_v62  ;;  %v375_v45 = vld [vmem:[#allocation3 + $0x330] sm:$0xff]  ;;  %v357_v46 = vld [vmem:[#allocation3 + $0x2a0] sm:$0xff]  ;;  %v390_v47 = vld [vmem:[#allocation3 + $0x3a8] sm:$0xff] }
  0xe2   :  { %5643 = vmatprep.subr.mxu0 %v367_v6  ;;  %5676 = vmatprep.subr.mxu1 %v400_v7  ;;  %v341_v48 = vld [vmem:[#allocation3 + $0x220] sm:$0xff]  ;;  %v374_v49 = vld [vmem:[#allocation3 + $0x328] sm:$0xff]  ;;  %v356_v50 = vld [vmem:[#allocation3 + $0x298] sm:$0xff] }
  0xe3   :  { %5644 = vmatpush3.msra.mxu0 %v351_v8  ;;  %5677 = vmatpush3.msra.mxu1 %v384_v9  ;;  %v389_v51 = vld [vmem:[#allocation3 + $0x3a0] sm:$0xff]  ;;  %v340_v52 = vld [vmem:[#allocation3 + $0x218] sm:$0xff]  ;;  %v355_v54 = vld [vmem:[#allocation3 + $0x290] sm:$0xff] }
  0xe4   :  { %5645 = vmatprep.subr.mxu0 %v366_v10  ;;  %5678 = vmatprep.subr.mxu1 %v399_v11  ;;  %v373_v53 = vld [vmem:[#allocation3 + $0x320] sm:$0xff]  ;;  %v388_v55 = vld [vmem:[#allocation3 + $0x398] sm:$0xff]  ;;  %v339_v56 = vld [vmem:[#allocation3 + $0x210] sm:$0xff] }
  0xe5   :  { %5646 = vmatpush3.msra.mxu0 %v350_v12  ;;  %5679 = vmatpush3.msra.mxu1 %v383_v13  ;;  %v372_v57 = vld [vmem:[#allocation3 + $0x318] sm:$0xff]  ;;  %v354_v58 = vld [vmem:[#allocation3 + $0x288] sm:$0xff]  ;;  %v387_v60 = vld [vmem:[#allocation3 + $0x390] sm:$0xff] }
  0xe6   :  { %5647 = vmatprep.subr.mxu0 %v365_v14  ;;  %5680 = vmatprep.subr.mxu1 %v398_v15  ;;  %v243_v59 = vld [vmem:[%s8049_s25 + $0x10] sm:$0xff]  ;;  %v353_v63 = vld [vmem:[#allocation3 + $0x280] sm:$0xff]  ;;  %v244_v3 = vld [vmem:[%s8049_s25 + $0x18] sm:$0xff] }
  0xe7   :  { %5648 = vmatpush3.msra.mxu0 %v349_v16  ;;  %5681 = vmatpush3.msra.mxu1 %v382_v17  ;;  %v338_v61 = vld [vmem:[#allocation3 + $0x208] sm:$0xff]  ;;  %v371_v62 = vld [vmem:[#allocation3 + $0x310] sm:$0xff]  ;;  %v337_v1 = vld [vmem:[#allocation3 + $0x200] sm:$0xff]  ;;  %v1312_v2 = vcombine.high %v243_v59, %v243_v59  ;;  %v1313_v8 = vcombine.high %v244_v3, %v244_v3 }
  0xe8   :  { %5649 = vmatprep.subr.mxu0 %v364_v18  ;;  %5682 = vmatprep.subr.mxu1 %v397_v19  ;;  %v386_v0 = vld [vmem:[#allocation3 + $0x388] sm:$0xff]  ;;  %v385_v5 = vld [vmem:[#allocation3 + $0x380] sm:$0xff]  ;;  %v432_v6 = vld [vmem:[#allocation3 + $0x4f8] sm:$0xff] }
  0xe9   :  { %5650 = vmatpush3.msra.mxu0 %v348_v20  ;;  %5683 = vmatpush3.msra.mxu1 %v381_v21  ;;  %v370_v4 = vld [vmem:[#allocation3 + $0x308] sm:$0xff]  ;;  %v369_v7 = vld [vmem:[#allocation3 + $0x300] sm:$0xff]  ;;  %v416_v9 = vld [vmem:[#allocation3 + $0x478] sm:$0xff] }
  0xea   :  { %5651 = vmatprep.subr.mxu0 %v363_v22  ;;  %5684 = vmatprep.subr.mxu1 %v396_v23  ;;  %v431_v10 = vld [vmem:[#allocation3 + $0x4f0] sm:$0xff]  ;;  %v464_v11 = vld [vmem:[#allocation3 + $0x5f8] sm:$0xff]  ;;  %v430_v14 = vld [vmem:[#allocation3 + $0x4e8] sm:$0xff] }
  0xeb   :  { %5652 = vmatpush3.msra.mxu0 %v347_v24  ;;  %5685 = vmatpush3.msra.mxu1 %v380_v25  ;;  %v415_v12 = vld [vmem:[#allocation3 + $0x470] sm:$0xff]  ;;  %v448_v13 = vld [vmem:[#allocation3 + $0x578] sm:$0xff]  ;;  %v414_v16 = vld [vmem:[#allocation3 + $0x468] sm:$0xff] }
  0xec   :  { %5653 = vmatprep.subr.mxu0 %v362_v26  ;;  %5686 = vmatprep.subr.mxu1 %v395_v27  ;;  %v463_v15 = vld [vmem:[#allocation3 + $0x5f0] sm:$0xff]  ;;  %v429_v18 = vld [vmem:[#allocation3 + $0x4e0] sm:$0xff]  ;;  %v462_v19 = vld [vmem:[#allocation3 + $0x5e8] sm:$0xff] }
  0xed   :  { %5654 = vmatpush3.msra.mxu0 %v346_v28  ;;  %5687 = vmatpush3.msra.mxu1 %v379_v29  ;;  %v447_v17 = vld [vmem:[#allocation3 + $0x570] sm:$0xff]  ;;  %v413_v20 = vld [vmem:[#allocation3 + $0x460] sm:$0xff]  ;;  %v446_v21 = vld [vmem:[#allocation3 + $0x568] sm:$0xff] }
  0xee   :  { %5655 = vmatprep.subr.mxu0 %v361_v30  ;;  %5688 = vmatprep.subr.mxu1 %v394_v31  ;;  %v428_v22 = vld [vmem:[#allocation3 + $0x4d8] sm:$0xff]  ;;  %v461_v23 = vld [vmem:[#allocation3 + $0x5e0] sm:$0xff]  ;;  %v427_v26 = vld [vmem:[#allocation3 + $0x4d0] sm:$0xff] }
  0xef   :  { %5656 = vmatpush3.msra.mxu0 %v345_v32  ;;  %5689 = vmatpush3.msra.mxu1 %v378_v33  ;;  %v412_v24 = vld [vmem:[#allocation3 + $0x458] sm:$0xff]  ;;  %v445_v25 = vld [vmem:[#allocation3 + $0x560] sm:$0xff]  ;;  %v411_v28 = vld [vmem:[#allocation3 + $0x450] sm:$0xff] }
  0xf0   :  { %5657 = vmatprep.subr.mxu0 %v360_v34  ;;  %5690 = vmatprep.subr.mxu1 %v393_v35  ;;  %v460_v27 = vld [vmem:[#allocation3 + $0x5d8] sm:$0xff]  ;;  %v426_v30 = vld [vmem:[#allocation3 + $0x4c8] sm:$0xff]  ;;  %v459_v31 = vld [vmem:[#allocation3 + $0x5d0] sm:$0xff] }
  0xf1   :  { %5658 = vmatpush3.msra.mxu0 %v344_v36  ;;  %5691 = vmatpush3.msra.mxu1 %v377_v37  ;;  %v444_v29 = vld [vmem:[#allocation3 + $0x558] sm:$0xff]  ;;  %v410_v32 = vld [vmem:[#allocation3 + $0x448] sm:$0xff]  ;;  %v443_v33 = vld [vmem:[#allocation3 + $0x550] sm:$0xff] }
  0xf2   :  { %5659 = vmatprep.subr.mxu0 %v359_v38  ;;  %5692 = vmatprep.subr.mxu1 %v392_v39  ;;  %v425_v34 = vld [vmem:[#allocation3 + $0x4c0] sm:$0xff]  ;;  %v458_v35 = vld [vmem:[#allocation3 + $0x5c8] sm:$0xff]  ;;  %v424_v38 = vld [vmem:[#allocation3 + $0x4b8] sm:$0xff] }
  0xf3   :  { %5660 = vmatpush3.msra.mxu0 %v343_v40  ;;  %5693 = vmatpush3.msra.mxu1 %v376_v41  ;;  %v409_v36 = vld [vmem:[#allocation3 + $0x440] sm:$0xff]  ;;  %v442_v37 = vld [vmem:[#allocation3 + $0x548] sm:$0xff]  ;;  %v408_v40 = vld [vmem:[#allocation3 + $0x438] sm:$0xff] }
  0xf4   :  { %5661 = vmatprep.subr.mxu0 %v358_v42  ;;  %5694 = vmatprep.subr.mxu1 %v391_v43  ;;  %v457_v39 = vld [vmem:[#allocation3 + $0x5c0] sm:$0xff]  ;;  %v423_v42 = vld [vmem:[#allocation3 + $0x4b0] sm:$0xff]  ;;  %v456_v43 = vld [vmem:[#allocation3 + $0x5b8] sm:$0xff] }
  0xf5   :  { %5662 = vmatpush3.msra.mxu0 %v342_v44  ;;  %5695 = vmatpush3.msra.mxu1 %v375_v45  ;;  %v441_v41 = vld [vmem:[#allocation3 + $0x540] sm:$0xff]  ;;  %v407_v44 = vld [vmem:[#allocation3 + $0x430] sm:$0xff]  ;;  %v440_v45 = vld [vmem:[#allocation3 + $0x538] sm:$0xff] }
  0xf6   :  { %5663 = vmatprep.subr.mxu0 %v357_v46  ;;  %5696 = vmatprep.subr.mxu1 %v390_v47  ;;  %v422_v46 = vld [vmem:[#allocation3 + $0x4a8] sm:$0xff]  ;;  %v455_v47 = vld [vmem:[#allocation3 + $0x5b0] sm:$0xff] }
  0xf7   :  { %5664 = vmatpush3.msra.mxu0 %v341_v48  ;;  %5697 = vmatpush3.msra.mxu1 %v374_v49  ;;  %v406_v48 = vld [vmem:[#allocation3 + $0x428] sm:$0xff]  ;;  %v439_v49 = vld [vmem:[#allocation3 + $0x530] sm:$0xff] }
  0xf8   :  { %5665 = vmatprep.subr.mxu0 %v356_v50  ;;  %5698 = vmatprep.subr.mxu1 %v389_v51  ;;  %v421_v50 = vld [vmem:[#allocation3 + $0x4a0] sm:$0xff]  ;;  %v454_v51 = vld [vmem:[#allocation3 + $0x5a8] sm:$0xff] }
  0xf9   :  { %5666 = vmatpush3.msra.mxu0 %v340_v52  ;;  %5699 = vmatpush3.msra.mxu1 %v373_v53  ;;  %v405_v52 = vld [vmem:[#allocation3 + $0x420] sm:$0xff]  ;;  %v438_v53 = vld [vmem:[#allocation3 + $0x528] sm:$0xff] }
  0xfa   :  { %5667 = vmatprep.subr.mxu0 %v355_v54  ;;  %5700 = vmatprep.subr.mxu1 %v388_v55  ;;  %v420_v54 = vld [vmem:[#allocation3 + $0x498] sm:$0xff]  ;;  %v453_v55 = vld [vmem:[#allocation3 + $0x5a0] sm:$0xff] }
  0xfb   :  { %5668 = vmatpush3.msra.mxu0 %v339_v56  ;;  %5701 = vmatpush3.msra.mxu1 %v372_v57  ;;  %v404_v56 = vld [vmem:[#allocation3 + $0x418] sm:$0xff]  ;;  %v437_v57 = vld [vmem:[#allocation3 + $0x520] sm:$0xff] }
  0xfc   :  { %5669 = vmatprep.subr.mxu0 %v354_v58  ;;  %5702 = vmatprep.subr.mxu1 %v387_v60  ;;  %v419_v58 = vld [vmem:[#allocation3 + $0x490] sm:$0xff] }
  0xfd   :  { %5670 = vmatpush3.msra.mxu0 %v338_v61  ;;  %5703 = vmatpush3.msra.mxu1 %v371_v62  ;;  %v403_v60 = vld [vmem:[#allocation3 + $0x410] sm:$0xff]  ;;  %v436_v61 = vld [vmem:[#allocation3 + $0x518] sm:$0xff]  ;;  %v418_v62 = vld [vmem:[#allocation3 + $0x488] sm:$0xff] }
  0xfe   :  { %5671 = vmatprep.subr.mxu0 %v353_v63  ;;  %5704 = vmatprep.subr.mxu1 %v386_v0  ;;  %v245_v63 = vld [vmem:[%s8049_s25 + $0x20] sm:$0xff]  ;;  %v451_v0 = vld [vmem:[#allocation3 + $0x590] sm:$0xff] }
  0xff   :  { %5672 = vmatpush3.msra.mxu0 %v337_v1  ;;  %1583 = vmatprep.mubr.f32.mxu0 %v1312_v2  ;;  %v402_v1 = vld [vmem:[#allocation3 + $0x408] sm:$0xff]  ;;  %v435_v2 = vld [vmem:[#allocation3 + $0x510] sm:$0xff] }
 0x100   :  { %5705 = vmatpush3.msra.mxu1 %v370_v4  ;;  %1584 = vmatmul.mubr.f32.vlgmr.msra.gmra.mxu0 %v243_v59  ;;  %v452_v59 = vld [vmem:[#allocation3 + $0x598] sm:$0xff]  ;;  %v450_v4 = vld [vmem:[#allocation3 + $0x588] sm:$0xff] }
 0x101   :  { %5706 = vmatprep.subr.mxu1 %v385_v5  ;;  %5711 = vmatprep.subr.mxu0 %v432_v6  ;;  %v401_v5 = vld [vmem:[#allocation3 + $0x400] sm:$0xff]  ;;  %v1314_v6 = vcombine.high %v245_v63, %v245_v63 }
 0x102   :  { %5707 = vmatpush3.msra.mxu1 %v369_v7  ;;  %1653 = vmatprep.mubr.f32.mxu1 %v1313_v8  ;;  %v246_v7 = vld [vmem:[%s8049_s25 + $0x28] sm:$0xff] }
 0x103   :  { %5712 = vmatpush3.msra.mxu0 %v416_v9  ;;  %1654 = vmatmul.mubr.f32.vlgmr.msra.gmra.mxu1 %v244_v3  ;;  %v417_v3 = vld [vmem:[#allocation3 + $0x480] sm:$0xff]  ;;  %v434_v8 = vld [vmem:[#allocation3 + $0x508] sm:$0xff] }
 0x104   :  { %5713 = vmatprep.subr.mxu0 %v431_v10  ;;  %5746 = vmatprep.subr.mxu1 %v464_v11  ;;  %v449_v9 = vld [vmem:[#allocation3 + $0x580] sm:$0xff]  ;;  %v496_v10 = vld [vmem:[#allocation3 + $0x6f8] sm:$0xff] }
 0x105   :  { %5714 = vmatpush3.msra.mxu0 %v415_v12  ;;  %5747 = vmatpush3.msra.mxu1 %v448_v13  ;;  %v433_v11 = vld [vmem:[#allocation3 + $0x500] sm:$0xff]  ;;  %v1315_v12 = vcombine.high %v246_v7, %v246_v7  ;;  %v480_v13 = vld [vmem:[#allocation3 + $0x678] sm:$0xff] }
 0x106   :  { %5715 = vmatprep.subr.mxu0 %v430_v14  ;;  %5748 = vmatprep.subr.mxu1 %v463_v15  ;;  %v495_v14 = vld [vmem:[#allocation3 + $0x6f0] sm:$0xff]  ;;  %v528_v15 = vld [vmem:[#allocation3 + $0x7f8] sm:$0xff] }
 0x107   :  { %5716 = vmatpush3.msra.mxu0 %v414_v16  ;;  %5749 = vmatpush3.msra.mxu1 %v447_v17  ;;  %v479_v16 = vld [vmem:[#allocation3 + $0x670] sm:$0xff]  ;;  %v512_v17 = vld [vmem:[#allocation3 + $0x778] sm:$0xff] }
 0x108   :  { %5717 = vmatprep.subr.mxu0 %v429_v18  ;;  %5750 = vmatprep.subr.mxu1 %v462_v19  ;;  %v494_v18 = vld [vmem:[#allocation3 + $0x6e8] sm:$0xff]  ;;  %v527_v19 = vld [vmem:[#allocation3 + $0x7f0] sm:$0xff] }
 0x109   :  { %5718 = vmatpush3.msra.mxu0 %v413_v20  ;;  %5751 = vmatpush3.msra.mxu1 %v446_v21  ;;  %v478_v20 = vld [vmem:[#allocation3 + $0x668] sm:$0xff]  ;;  %v511_v21 = vld [vmem:[#allocation3 + $0x770] sm:$0xff] }
 0x10a   :  { %5719 = vmatprep.subr.mxu0 %v428_v22  ;;  %5752 = vmatprep.subr.mxu1 %v461_v23  ;;  %v493_v22 = vld [vmem:[#allocation3 + $0x6e0] sm:$0xff]  ;;  %v526_v23 = vld [vmem:[#allocation3 + $0x7e8] sm:$0xff] }
 0x10b   :  { %5720 = vmatpush3.msra.mxu0 %v412_v24  ;;  %5753 = vmatpush3.msra.mxu1 %v445_v25  ;;  %v477_v24 = vld [vmem:[#allocation3 + $0x660] sm:$0xff]  ;;  %v510_v25 = vld [vmem:[#allocation3 + $0x768] sm:$0xff] }
 0x10c   :  { %5721 = vmatprep.subr.mxu0 %v427_v26  ;;  %5754 = vmatprep.subr.mxu1 %v460_v27  ;;  %v492_v26 = vld [vmem:[#allocation3 + $0x6d8] sm:$0xff]  ;;  %v525_v27 = vld [vmem:[#allocation3 + $0x7e0] sm:$0xff] }
 0x10d   :  { %5722 = vmatpush3.msra.mxu0 %v411_v28  ;;  %5755 = vmatpush3.msra.mxu1 %v444_v29  ;;  %v476_v28 = vld [vmem:[#allocation3 + $0x658] sm:$0xff]  ;;  %v509_v29 = vld [vmem:[#allocation3 + $0x760] sm:$0xff] }
 0x10e   :  { %5723 = vmatprep.subr.mxu0 %v426_v30  ;;  %5756 = vmatprep.subr.mxu1 %v459_v31  ;;  %v491_v30 = vld [vmem:[#allocation3 + $0x6d0] sm:$0xff]  ;;  %v524_v31 = vld [vmem:[#allocation3 + $0x7d8] sm:$0xff] }
 0x10f   :  { %5724 = vmatpush3.msra.mxu0 %v410_v32  ;;  %5757 = vmatpush3.msra.mxu1 %v443_v33  ;;  %v475_v32 = vld [vmem:[#allocation3 + $0x650] sm:$0xff]  ;;  %v508_v33 = vld [vmem:[#allocation3 + $0x758] sm:$0xff] }
 0x110   :  { %5725 = vmatprep.subr.mxu0 %v425_v34  ;;  %5758 = vmatprep.subr.mxu1 %v458_v35  ;;  %v490_v34 = vld [vmem:[#allocation3 + $0x6c8] sm:$0xff]  ;;  %v523_v35 = vld [vmem:[#allocation3 + $0x7d0] sm:$0xff] }
 0x111   :  { %5726 = vmatpush3.msra.mxu0 %v409_v36  ;;  %5759 = vmatpush3.msra.mxu1 %v442_v37  ;;  %v474_v36 = vld [vmem:[#allocation3 + $0x648] sm:$0xff]  ;;  %v507_v37 = vld [vmem:[#allocation3 + $0x750] sm:$0xff] }
 0x112   :  { %5727 = vmatprep.subr.mxu0 %v424_v38  ;;  %5760 = vmatprep.subr.mxu1 %v457_v39  ;;  %v489_v38 = vld [vmem:[#allocation3 + $0x6c0] sm:$0xff]  ;;  %v522_v39 = vld [vmem:[#allocation3 + $0x7c8] sm:$0xff] }
 0x113   :  { %5728 = vmatpush3.msra.mxu0 %v408_v40  ;;  %5761 = vmatpush3.msra.mxu1 %v441_v41  ;;  %v473_v40 = vld [vmem:[#allocation3 + $0x640] sm:$0xff]  ;;  %v506_v41 = vld [vmem:[#allocation3 + $0x748] sm:$0xff] }
 0x114   :  { %5729 = vmatprep.subr.mxu0 %v423_v42  ;;  %5762 = vmatprep.subr.mxu1 %v456_v43  ;;  %v488_v42 = vld [vmem:[#allocation3 + $0x6b8] sm:$0xff]  ;;  %v521_v43 = vld [vmem:[#allocation3 + $0x7c0] sm:$0xff] }
 0x115   :  { %5730 = vmatpush3.msra.mxu0 %v407_v44  ;;  %5763 = vmatpush3.msra.mxu1 %v440_v45  ;;  %v472_v44 = vld [vmem:[#allocation3 + $0x638] sm:$0xff]  ;;  %v505_v45 = vld [vmem:[#allocation3 + $0x740] sm:$0xff] }
 0x116   :  { %5731 = vmatprep.subr.mxu0 %v422_v46  ;;  %5764 = vmatprep.subr.mxu1 %v455_v47  ;;  %v487_v46 = vld [vmem:[#allocation3 + $0x6b0] sm:$0xff]  ;;  %v520_v47 = vld [vmem:[#allocation3 + $0x7b8] sm:$0xff] }
 0x117   :  { %5732 = vmatpush3.msra.mxu0 %v406_v48  ;;  %5765 = vmatpush3.msra.mxu1 %v439_v49  ;;  %v471_v48 = vld [vmem:[#allocation3 + $0x630] sm:$0xff]  ;;  %v504_v49 = vld [vmem:[#allocation3 + $0x738] sm:$0xff] }
 0x118   :  { %5733 = vmatprep.subr.mxu0 %v421_v50  ;;  %5766 = vmatprep.subr.mxu1 %v454_v51  ;;  %v486_v50 = vld [vmem:[#allocation3 + $0x6a8] sm:$0xff]  ;;  %v519_v51 = vld [vmem:[#allocation3 + $0x7b0] sm:$0xff] }
 0x119   :  { %5734 = vmatpush3.msra.mxu0 %v405_v52  ;;  %5767 = vmatpush3.msra.mxu1 %v438_v53  ;;  %v470_v52 = vld [vmem:[#allocation3 + $0x628] sm:$0xff]  ;;  %v503_v53 = vld [vmem:[#allocation3 + $0x730] sm:$0xff] }
 0x11a   :  { %5735 = vmatprep.subr.mxu0 %v420_v54  ;;  %5768 = vmatprep.subr.mxu1 %v453_v55  ;;  %v485_v54 = vld [vmem:[#allocation3 + $0x6a0] sm:$0xff]  ;;  %v518_v55 = vld [vmem:[#allocation3 + $0x7a8] sm:$0xff] }
 0x11b   :  { %5736 = vmatpush3.msra.mxu0 %v404_v56  ;;  %5769 = vmatpush3.msra.mxu1 %v437_v57  ;;  %v469_v56 = vld [vmem:[#allocation3 + $0x620] sm:$0xff]  ;;  %v502_v57 = vld [vmem:[#allocation3 + $0x728] sm:$0xff] }
 0x11c   :  { %5737 = vmatprep.subr.mxu0 %v419_v58  ;;  %5770 = vmatprep.subr.mxu1 %v452_v59  ;;  %v484_v58 = vld [vmem:[#allocation3 + $0x698] sm:$0xff]  ;;  %v517_v59 = vld [vmem:[#allocation3 + $0x7a0] sm:$0xff] }
 0x11d   :  { %5738 = vmatpush3.msra.mxu0 %v403_v60  ;;  %5771 = vmatpush3.msra.mxu1 %v436_v61  ;;  %v468_v60 = vld [vmem:[#allocation3 + $0x618] sm:$0xff]  ;;  %v501_v61 = vld [vmem:[#allocation3 + $0x720] sm:$0xff] }
 0x11e   :  { %5739 = vmatprep.subr.mxu0 %v418_v62  ;;  %5772 = vmatprep.subr.mxu1 %v451_v0  ;;  %v483_v62 = vld [vmem:[#allocation3 + $0x690] sm:$0xff] }
 0x11f   :  { %5740 = vmatpush3.msra.mxu0 %v402_v1  ;;  %5773 = vmatpush3.msra.mxu1 %v435_v2  ;;  %v467_v0 = vld [vmem:[#allocation3 + $0x610] sm:$0xff]  ;;  %v500_v1 = vld [vmem:[#allocation3 + $0x718] sm:$0xff]  ;;  %v482_v2 = vld [vmem:[#allocation3 + $0x688] sm:$0xff] }
 0x120   :  { %5741 = vmatprep.subr.mxu0 %v417_v3  ;;  %5774 = vmatprep.subr.mxu1 %v450_v4  ;;  %v247_v3 = vld [vmem:[%s8049_s25 + $0x30] sm:$0xff] }
 0x121   :  { %5742 = vmatpush3.msra.mxu0 %v401_v5  ;;  %1723 = vmatprep.mubr.f32.mxu0 %v1314_v6  ;;  %v515_v4 = vld [vmem:[#allocation3 + $0x790] sm:$0xff]  ;;  %v466_v5 = vld [vmem:[#allocation3 + $0x608] sm:$0xff] }
 0x122   :  { %5775 = vmatpush3.msra.mxu1 %v434_v8  ;;  %1724 = vmatmul.mubr.f32.vlgmr.msra.gmra.mxu0 %v245_v63  ;;  %v516_v63 = vld [vmem:[#allocation3 + $0x798] sm:$0xff]  ;;  %v499_v6 = vld [vmem:[#allocation3 + $0x710] sm:$0xff]  ;;  %v514_v8 = vld [vmem:[#allocation3 + $0x788] sm:$0xff] }
 0x123   :  { %5776 = vmatprep.subr.mxu1 %v449_v9  ;;  %5781 = vmatprep.subr.mxu0 %v496_v10  ;;  %v465_v9 = vld [vmem:[#allocation3 + $0x600] sm:$0xff]  ;;  %v1316_v10 = vcombine.high %v247_v3, %v247_v3 }
 0x124   :  { %5777 = vmatpush3.msra.mxu1 %v433_v11  ;;  %1793 = vmatprep.mubr.f32.mxu1 %v1315_v12  ;;  %v248_v11 = vld [vmem:[%s8049_s25 + $0x38] sm:$0xff]  ;;  %v498_v12 = vld [vmem:[#allocation3 + $0x708] sm:$0xff] }
 0x125   :  { %5782 = vmatpush3.msra.mxu0 %v480_v13  ;;  %1794 = vmatmul.mubr.f32.vlgmr.msra.gmra.mxu1 %v246_v7  ;;  %v481_v7 = vld [vmem:[#allocation3 + $0x680] sm:$0xff] }
 0x126   :  { %5783 = vmatprep.subr.mxu0 %v495_v14  ;;  %5816 = vmatprep.subr.mxu1 %v528_v15  ;;  %v513_v13 = vld [vmem:[#allocation3 + $0x780] sm:$0xff]  ;;  %v560_v14 = vld [vmem:[#allocation3 + $0x8f8] sm:$0xff] }
 0x127   :  { %5784 = vmatpush3.msra.mxu0 %v479_v16  ;;  %5817 = vmatpush3.msra.mxu1 %v512_v17  ;;  %v497_v15 = vld [vmem:[#allocation3 + $0x700] sm:$0xff]  ;;  %v1317_v16 = vcombine.high %v248_v11, %v248_v11  ;;  %v544_v17 = vld [vmem:[#allocation3 + $0x878] sm:$0xff] }
 0x128   :  { %5785 = vmatprep.subr.mxu0 %v494_v18  ;;  %5818 = vmatprep.subr.mxu1 %v527_v19  ;;  %v559_v18 = vld [vmem:[#allocation3 + $0x8f0] sm:$0xff]  ;;  %v592_v19 = vld [vmem:[#allocation3 + $0x9f8] sm:$0xff] }
 0x129   :  { %5786 = vmatpush3.msra.mxu0 %v478_v20  ;;  %5819 = vmatpush3.msra.mxu1 %v511_v21  ;;  %v543_v20 = vld [vmem:[#allocation3 + $0x870] sm:$0xff]  ;;  %v576_v21 = vld [vmem:[#allocation3 + $0x978] sm:$0xff] }
 0x12a   :  { %5787 = vmatprep.subr.mxu0 %v493_v22  ;;  %5820 = vmatprep.subr.mxu1 %v526_v23  ;;  %v558_v22 = vld [vmem:[#allocation3 + $0x8e8] sm:$0xff]  ;;  %v591_v23 = vld [vmem:[#allocation3 + $0x9f0] sm:$0xff] }
 0x12b   :  { %5788 = vmatpush3.msra.mxu0 %v477_v24  ;;  %5821 = vmatpush3.msra.mxu1 %v510_v25  ;;  %v542_v24 = vld [vmem:[#allocation3 + $0x868] sm:$0xff]  ;;  %v575_v25 = vld [vmem:[#allocation3 + $0x970] sm:$0xff] }
 0x12c   :  { %5789 = vmatprep.subr.mxu0 %v492_v26  ;;  %5822 = vmatprep.subr.mxu1 %v525_v27  ;;  %v557_v26 = vld [vmem:[#allocation3 + $0x8e0] sm:$0xff]  ;;  %v590_v27 = vld [vmem:[#allocation3 + $0x9e8] sm:$0xff] }
 0x12d   :  { %5790 = vmatpush3.msra.mxu0 %v476_v28  ;;  %5823 = vmatpush3.msra.mxu1 %v509_v29  ;;  %v541_v28 = vld [vmem:[#allocation3 + $0x860] sm:$0xff]  ;;  %v574_v29 = vld [vmem:[#allocation3 + $0x968] sm:$0xff] }
 0x12e   :  { %5791 = vmatprep.subr.mxu0 %v491_v30  ;;  %5824 = vmatprep.subr.mxu1 %v524_v31  ;;  %v556_v30 = vld [vmem:[#allocation3 + $0x8d8] sm:$0xff]  ;;  %v589_v31 = vld [vmem:[#allocation3 + $0x9e0] sm:$0xff] }
 0x12f   :  { %5792 = vmatpush3.msra.mxu0 %v475_v32  ;;  %5825 = vmatpush3.msra.mxu1 %v508_v33  ;;  %v540_v32 = vld [vmem:[#allocation3 + $0x858] sm:$0xff]  ;;  %v573_v33 = vld [vmem:[#allocation3 + $0x960] sm:$0xff] }
 0x130   :  { %5793 = vmatprep.subr.mxu0 %v490_v34  ;;  %5826 = vmatprep.subr.mxu1 %v523_v35  ;;  %v555_v34 = vld [vmem:[#allocation3 + $0x8d0] sm:$0xff]  ;;  %v588_v35 = vld [vmem:[#allocation3 + $0x9d8] sm:$0xff] }
 0x131   :  { %5794 = vmatpush3.msra.mxu0 %v474_v36  ;;  %5827 = vmatpush3.msra.mxu1 %v507_v37  ;;  %v539_v36 = vld [vmem:[#allocation3 + $0x850] sm:$0xff]  ;;  %v572_v37 = vld [vmem:[#allocation3 + $0x958] sm:$0xff] }
 0x132   :  { %5795 = vmatprep.subr.mxu0 %v489_v38  ;;  %5828 = vmatprep.subr.mxu1 %v522_v39  ;;  %v554_v38 = vld [vmem:[#allocation3 + $0x8c8] sm:$0xff]  ;;  %v587_v39 = vld [vmem:[#allocation3 + $0x9d0] sm:$0xff] }
 0x133   :  { %5796 = vmatpush3.msra.mxu0 %v473_v40  ;;  %5829 = vmatpush3.msra.mxu1 %v506_v41  ;;  %v538_v40 = vld [vmem:[#allocation3 + $0x848] sm:$0xff]  ;;  %v571_v41 = vld [vmem:[#allocation3 + $0x950] sm:$0xff] }
 0x134   :  { %5797 = vmatprep.subr.mxu0 %v488_v42  ;;  %5830 = vmatprep.subr.mxu1 %v521_v43  ;;  %v553_v42 = vld [vmem:[#allocation3 + $0x8c0] sm:$0xff]  ;;  %v586_v43 = vld [vmem:[#allocation3 + $0x9c8] sm:$0xff] }
 0x135   :  { %5798 = vmatpush3.msra.mxu0 %v472_v44  ;;  %5831 = vmatpush3.msra.mxu1 %v505_v45  ;;  %v537_v44 = vld [vmem:[#allocation3 + $0x840] sm:$0xff]  ;;  %v570_v45 = vld [vmem:[#allocation3 + $0x948] sm:$0xff] }
 0x136   :  { %5799 = vmatprep.subr.mxu0 %v487_v46  ;;  %5832 = vmatprep.subr.mxu1 %v520_v47  ;;  %v552_v46 = vld [vmem:[#allocation3 + $0x8b8] sm:$0xff]  ;;  %v585_v47 = vld [vmem:[#allocation3 + $0x9c0] sm:$0xff] }
 0x137   :  { %5800 = vmatpush3.msra.mxu0 %v471_v48  ;;  %5833 = vmatpush3.msra.mxu1 %v504_v49  ;;  %v536_v48 = vld [vmem:[#allocation3 + $0x838] sm:$0xff]  ;;  %v569_v49 = vld [vmem:[#allocation3 + $0x940] sm:$0xff] }
 0x138   :  { %5801 = vmatprep.subr.mxu0 %v486_v50  ;;  %5834 = vmatprep.subr.mxu1 %v519_v51  ;;  %v551_v50 = vld [vmem:[#allocation3 + $0x8b0] sm:$0xff]  ;;  %v584_v51 = vld [vmem:[#allocation3 + $0x9b8] sm:$0xff] }
 0x139   :  { %5802 = vmatpush3.msra.mxu0 %v470_v52  ;;  %5835 = vmatpush3.msra.mxu1 %v503_v53  ;;  %v535_v52 = vld [vmem:[#allocation3 + $0x830] sm:$0xff]  ;;  %v568_v53 = vld [vmem:[#allocation3 + $0x938] sm:$0xff] }
 0x13a   :  { %5803 = vmatprep.subr.mxu0 %v485_v54  ;;  %5836 = vmatprep.subr.mxu1 %v518_v55  ;;  %v550_v54 = vld [vmem:[#allocation3 + $0x8a8] sm:$0xff]  ;;  %v583_v55 = vld [vmem:[#allocation3 + $0x9b0] sm:$0xff] }
 0x13b   :  { %5804 = vmatpush3.msra.mxu0 %v469_v56  ;;  %5837 = vmatpush3.msra.mxu1 %v502_v57  ;;  %v534_v56 = vld [vmem:[#allocation3 + $0x828] sm:$0xff]  ;;  %v567_v57 = vld [vmem:[#allocation3 + $0x930] sm:$0xff] }
 0x13c   :  { %5805 = vmatprep.subr.mxu0 %v484_v58  ;;  %5838 = vmatprep.subr.mxu1 %v517_v59  ;;  %v549_v58 = vld [vmem:[#allocation3 + $0x8a0] sm:$0xff]  ;;  %v582_v59 = vld [vmem:[#allocation3 + $0x9a8] sm:$0xff] }
 0x13d   :  { %5806 = vmatpush3.msra.mxu0 %v468_v60  ;;  %5839 = vmatpush3.msra.mxu1 %v501_v61  ;;  %v533_v60 = vld [vmem:[#allocation3 + $0x820] sm:$0xff]  ;;  %v566_v61 = vld [vmem:[#allocation3 + $0x928] sm:$0xff] }
 0x13e   :  { %5807 = vmatprep.subr.mxu0 %v483_v62  ;;  %5840 = vmatprep.subr.mxu1 %v516_v63  ;;  %v548_v62 = vld [vmem:[#allocation3 + $0x898] sm:$0xff]  ;;  %v581_v63 = vld [vmem:[#allocation3 + $0x9a0] sm:$0xff] }
 0x13f   :  { %5808 = vmatpush3.msra.mxu0 %v467_v0  ;;  %5841 = vmatpush3.msra.mxu1 %v500_v1  ;;  %v532_v0 = vld [vmem:[#allocation3 + $0x818] sm:$0xff]  ;;  %v565_v1 = vld [vmem:[#allocation3 + $0x920] sm:$0xff] }
 0x140   :  { %5809 = vmatprep.subr.mxu0 %v482_v2  ;;  %5842 = vmatprep.subr.mxu1 %v515_v4  ;;  %v547_v2 = vld [vmem:[#allocation3 + $0x890] sm:$0xff] }
 0x141   :  { %5810 = vmatpush3.msra.mxu0 %v466_v5  ;;  %5843 = vmatpush3.msra.mxu1 %v499_v6  ;;  %v531_v4 = vld [vmem:[#allocation3 + $0x810] sm:$0xff]  ;;  %v564_v5 = vld [vmem:[#allocation3 + $0x918] sm:$0xff]  ;;  %v546_v6 = vld [vmem:[#allocation3 + $0x888] sm:$0xff] }
 0x142   :  { %5811 = vmatprep.subr.mxu0 %v481_v7  ;;  %5844 = vmatprep.subr.mxu1 %v514_v8  ;;  %v249_v7 = vld [vmem:[%s8049_s25 + $0x40] sm:$0xff]  ;;  %v579_v8 = vld [vmem:[#allocation3 + $0x990] sm:$0xff] }
 0x143   :  { %5812 = vmatpush3.msra.mxu0 %v465_v9  ;;  %1863 = vmatprep.mubr.f32.mxu0 %v1316_v10  ;;  %v530_v9 = vld [vmem:[#allocation3 + $0x808] sm:$0xff]  ;;  %v563_v10 = vld [vmem:[#allocation3 + $0x910] sm:$0xff] }
 0x144   :  { %5845 = vmatpush3.msra.mxu1 %v498_v12  ;;  %1864 = vmatmul.mubr.f32.vlgmr.msra.gmra.mxu0 %v247_v3  ;;  %v580_v3 = vld [vmem:[#allocation3 + $0x998] sm:$0xff]  ;;  %v578_v12 = vld [vmem:[#allocation3 + $0x988] sm:$0xff] }
 0x145   :  { %5846 = vmatprep.subr.mxu1 %v513_v13  ;;  %5851 = vmatprep.subr.mxu0 %v560_v14  ;;  %v529_v13 = vld [vmem:[#allocation3 + $0x800] sm:$0xff]  ;;  %v1318_v14 = vcombine.high %v249_v7, %v249_v7 }
 0x146   :  { %5847 = vmatpush3.msra.mxu1 %v497_v15  ;;  %1933 = vmatprep.mubr.f32.mxu1 %v1317_v16  ;;  %v250_v15 = vld [vmem:[%s8049_s25 + $0x48] sm:$0xff] }
 0x147   :  { %5852 = vmatpush3.msra.mxu0 %v544_v17  ;;  %1934 = vmatmul.mubr.f32.vlgmr.msra.gmra.mxu1 %v248_v11  ;;  %v545_v11 = vld [vmem:[#allocation3 + $0x880] sm:$0xff]  ;;  %v562_v16 = vld [vmem:[#allocation3 + $0x908] sm:$0xff] }
 0x148   :  { %5853 = vmatprep.subr.mxu0 %v559_v18  ;;  %5886 = vmatprep.subr.mxu1 %v592_v19  ;;  %v577_v17 = vld [vmem:[#allocation3 + $0x980] sm:$0xff]  ;;  %v624_v18 = vld [vmem:[#allocation3 + $0xaf8] sm:$0xff] }
 0x149   :  { %5854 = vmatpush3.msra.mxu0 %v543_v20  ;;  %5887 = vmatpush3.msra.mxu1 %v576_v21  ;;  %v561_v19 = vld [vmem:[#allocation3 + $0x900] sm:$0xff]  ;;  %v1319_v20 = vcombine.high %v250_v15, %v250_v15  ;;  %v608_v21 = vld [vmem:[#allocation3 + $0xa78] sm:$0xff] }
 0x14a   :  { %5855 = vmatprep.subr.mxu0 %v558_v22  ;;  %5888 = vmatprep.subr.mxu1 %v591_v23  ;;  %v623_v22 = vld [vmem:[#allocation3 + $0xaf0] sm:$0xff]  ;;  %v656_v23 = vld [vmem:[#allocation3 + $0xbf8] sm:$0xff] }
 0x14b   :  { %5856 = vmatpush3.msra.mxu0 %v542_v24  ;;  %5889 = vmatpush3.msra.mxu1 %v575_v25  ;;  %v607_v24 = vld [vmem:[#allocation3 + $0xa70] sm:$0xff]  ;;  %v640_v25 = vld [vmem:[#allocation3 + $0xb78] sm:$0xff] }
 0x14c   :  { %5857 = vmatprep.subr.mxu0 %v557_v26  ;;  %5890 = vmatprep.subr.mxu1 %v590_v27  ;;  %v622_v26 = vld [vmem:[#allocation3 + $0xae8] sm:$0xff]  ;;  %v655_v27 = vld [vmem:[#allocation3 + $0xbf0] sm:$0xff] }
 0x14d   :  { %5858 = vmatpush3.msra.mxu0 %v541_v28  ;;  %5891 = vmatpush3.msra.mxu1 %v574_v29  ;;  %v606_v28 = vld [vmem:[#allocation3 + $0xa68] sm:$0xff]  ;;  %v639_v29 = vld [vmem:[#allocation3 + $0xb70] sm:$0xff] }
 0x14e   :  { %5859 = vmatprep.subr.mxu0 %v556_v30  ;;  %5892 = vmatprep.subr.mxu1 %v589_v31  ;;  %v621_v30 = vld [vmem:[#allocation3 + $0xae0] sm:$0xff]  ;;  %v654_v31 = vld [vmem:[#allocation3 + $0xbe8] sm:$0xff] }
 0x14f   :  { %5860 = vmatpush3.msra.mxu0 %v540_v32  ;;  %5893 = vmatpush3.msra.mxu1 %v573_v33  ;;  %v605_v32 = vld [vmem:[#allocation3 + $0xa60] sm:$0xff]  ;;  %v638_v33 = vld [vmem:[#allocation3 + $0xb68] sm:$0xff] }
 0x150   :  { %5861 = vmatprep.subr.mxu0 %v555_v34  ;;  %5894 = vmatprep.subr.mxu1 %v588_v35  ;;  %v620_v34 = vld [vmem:[#allocation3 + $0xad8] sm:$0xff]  ;;  %v653_v35 = vld [vmem:[#allocation3 + $0xbe0] sm:$0xff] }
 0x151   :  { %5862 = vmatpush3.msra.mxu0 %v539_v36  ;;  %5895 = vmatpush3.msra.mxu1 %v572_v37  ;;  %v604_v36 = vld [vmem:[#allocation3 + $0xa58] sm:$0xff]  ;;  %v637_v37 = vld [vmem:[#allocation3 + $0xb60] sm:$0xff] }
 0x152   :  { %5863 = vmatprep.subr.mxu0 %v554_v38  ;;  %5896 = vmatprep.subr.mxu1 %v587_v39  ;;  %v619_v38 = vld [vmem:[#allocation3 + $0xad0] sm:$0xff]  ;;  %v652_v39 = vld [vmem:[#allocation3 + $0xbd8] sm:$0xff] }
 0x153   :  { %5864 = vmatpush3.msra.mxu0 %v538_v40  ;;  %5897 = vmatpush3.msra.mxu1 %v571_v41  ;;  %v603_v40 = vld [vmem:[#allocation3 + $0xa50] sm:$0xff]  ;;  %v636_v41 = vld [vmem:[#allocation3 + $0xb58] sm:$0xff] }
 0x154   :  { %5865 = vmatprep.subr.mxu0 %v553_v42  ;;  %5898 = vmatprep.subr.mxu1 %v586_v43  ;;  %v618_v42 = vld [vmem:[#allocation3 + $0xac8] sm:$0xff]  ;;  %v651_v43 = vld [vmem:[#allocation3 + $0xbd0] sm:$0xff] }
 0x155   :  { %5866 = vmatpush3.msra.mxu0 %v537_v44  ;;  %5899 = vmatpush3.msra.mxu1 %v570_v45  ;;  %v602_v44 = vld [vmem:[#allocation3 + $0xa48] sm:$0xff]  ;;  %v635_v45 = vld [vmem:[#allocation3 + $0xb50] sm:$0xff] }
 0x156   :  { %5867 = vmatprep.subr.mxu0 %v552_v46  ;;  %5900 = vmatprep.subr.mxu1 %v585_v47  ;;  %v617_v46 = vld [vmem:[#allocation3 + $0xac0] sm:$0xff]  ;;  %v650_v47 = vld [vmem:[#allocation3 + $0xbc8] sm:$0xff] }
 0x157   :  { %5868 = vmatpush3.msra.mxu0 %v536_v48  ;;  %5901 = vmatpush3.msra.mxu1 %v569_v49  ;;  %v601_v48 = vld [vmem:[#allocation3 + $0xa40] sm:$0xff]  ;;  %v634_v49 = vld [vmem:[#allocation3 + $0xb48] sm:$0xff] }
 0x158   :  { %5869 = vmatprep.subr.mxu0 %v551_v50  ;;  %5902 = vmatprep.subr.mxu1 %v584_v51  ;;  %v616_v50 = vld [vmem:[#allocation3 + $0xab8] sm:$0xff]  ;;  %v649_v51 = vld [vmem:[#allocation3 + $0xbc0] sm:$0xff] }
 0x159   :  { %5870 = vmatpush3.msra.mxu0 %v535_v52  ;;  %5903 = vmatpush3.msra.mxu1 %v568_v53  ;;  %v600_v52 = vld [vmem:[#allocation3 + $0xa38] sm:$0xff]  ;;  %v633_v53 = vld [vmem:[#allocation3 + $0xb40] sm:$0xff] }
 0x15a   :  { %5871 = vmatprep.subr.mxu0 %v550_v54  ;;  %5904 = vmatprep.subr.mxu1 %v583_v55  ;;  %v615_v54 = vld [vmem:[#allocation3 + $0xab0] sm:$0xff]  ;;  %v648_v55 = vld [vmem:[#allocation3 + $0xbb8] sm:$0xff] }
 0x15b   :  { %5872 = vmatpush3.msra.mxu0 %v534_v56  ;;  %5905 = vmatpush3.msra.mxu1 %v567_v57  ;;  %v599_v56 = vld [vmem:[#allocation3 + $0xa30] sm:$0xff]  ;;  %v632_v57 = vld [vmem:[#allocation3 + $0xb38] sm:$0xff] }
 0x15c   :  { %5873 = vmatprep.subr.mxu0 %v549_v58  ;;  %5906 = vmatprep.subr.mxu1 %v582_v59  ;;  %v614_v58 = vld [vmem:[#allocation3 + $0xaa8] sm:$0xff]  ;;  %v647_v59 = vld [vmem:[#allocation3 + $0xbb0] sm:$0xff] }
 0x15d   :  { %5874 = vmatpush3.msra.mxu0 %v533_v60  ;;  %5907 = vmatpush3.msra.mxu1 %v566_v61  ;;  %v598_v60 = vld [vmem:[#allocation3 + $0xa28] sm:$0xff]  ;;  %v631_v61 = vld [vmem:[#allocation3 + $0xb30] sm:$0xff] }
 0x15e   :  { %5875 = vmatprep.subr.mxu0 %v548_v62  ;;  %5908 = vmatprep.subr.mxu1 %v581_v63  ;;  %v613_v62 = vld [vmem:[#allocation3 + $0xaa0] sm:$0xff]  ;;  %v646_v63 = vld [vmem:[#allocation3 + $0xba8] sm:$0xff] }
 0x15f   :  { %5876 = vmatpush3.msra.mxu0 %v532_v0  ;;  %5909 = vmatpush3.msra.mxu1 %v565_v1  ;;  %v597_v0 = vld [vmem:[#allocation3 + $0xa20] sm:$0xff]  ;;  %v630_v1 = vld [vmem:[#allocation3 + $0xb28] sm:$0xff] }
 0x160   :  { %5877 = vmatprep.subr.mxu0 %v547_v2  ;;  %5910 = vmatprep.subr.mxu1 %v580_v3  ;;  %v612_v2 = vld [vmem:[#allocation3 + $0xa98] sm:$0xff]  ;;  %v645_v3 = vld [vmem:[#allocation3 + $0xba0] sm:$0xff] }
 0x161   :  { %5878 = vmatpush3.msra.mxu0 %v531_v4  ;;  %5911 = vmatpush3.msra.mxu1 %v564_v5  ;;  %v596_v4 = vld [vmem:[#allocation3 + $0xa18] sm:$0xff]  ;;  %v629_v5 = vld [vmem:[#allocation3 + $0xb20] sm:$0xff] }
 0x162   :  { %5879 = vmatprep.subr.mxu0 %v546_v6  ;;  %5912 = vmatprep.subr.mxu1 %v579_v8  ;;  %v611_v6 = vld [vmem:[#allocation3 + $0xa90] sm:$0xff] }
 0x163   :  { %5880 = vmatpush3.msra.mxu0 %v530_v9  ;;  %5913 = vmatpush3.msra.mxu1 %v563_v10  ;;  %v595_v8 = vld [vmem:[#allocation3 + $0xa10] sm:$0xff]  ;;  %v628_v9 = vld [vmem:[#allocation3 + $0xb18] sm:$0xff]  ;;  %v610_v10 = vld [vmem:[#allocation3 + $0xa88] sm:$0xff] }
 0x164   :  { %5881 = vmatprep.subr.mxu0 %v545_v11  ;;  %5914 = vmatprep.subr.mxu1 %v578_v12  ;;  %v251_v11 = vld [vmem:[%s8049_s25 + $0x50] sm:$0xff] }
 0x165   :  { %5882 = vmatpush3.msra.mxu0 %v529_v13  ;;  %2003 = vmatprep.mubr.f32.mxu0 %v1318_v14  ;;  %v643_v12 = vld [vmem:[#allocation3 + $0xb90] sm:$0xff]  ;;  %v594_v13 = vld [vmem:[#allocation3 + $0xa08] sm:$0xff] }
 0x166   :  { %5915 = vmatpush3.msra.mxu1 %v562_v16  ;;  %2004 = vmatmul.mubr.f32.vlgmr.msra.gmra.mxu0 %v249_v7  ;;  %v644_v7 = vld [vmem:[#allocation3 + $0xb98] sm:$0xff]  ;;  %v627_v14 = vld [vmem:[#allocation3 + $0xb10] sm:$0xff]  ;;  %v642_v16 = vld [vmem:[#allocation3 + $0xb88] sm:$0xff] }
 0x167   :  { %5916 = vmatprep.subr.mxu1 %v577_v17  ;;  %5921 = vmatprep.subr.mxu0 %v624_v18  ;;  %v593_v17 = vld [vmem:[#allocation3 + $0xa00] sm:$0xff]  ;;  %v1320_v18 = vcombine.high %v251_v11, %v251_v11 }
 0x168   :  { %5917 = vmatpush3.msra.mxu1 %v561_v19  ;;  %2073 = vmatprep.mubr.f32.mxu1 %v1319_v20  ;;  %v252_v19 = vld [vmem:[%s8049_s25 + $0x58] sm:$0xff]  ;;  %v626_v20 = vld [vmem:[#allocation3 + $0xb08] sm:$0xff] }
 0x169   :  { %5922 = vmatpush3.msra.mxu0 %v608_v21  ;;  %2074 = vmatmul.mubr.f32.vlgmr.msra.gmra.mxu1 %v250_v15  ;;  %v609_v15 = vld [vmem:[#allocation3 + $0xa80] sm:$0xff] }
 0x16a   :  { %5923 = vmatprep.subr.mxu0 %v623_v22  ;;  %5956 = vmatprep.subr.mxu1 %v656_v23  ;;  %v641_v21 = vld [vmem:[#allocation3 + $0xb80] sm:$0xff]  ;;  %v688_v22 = vld [vmem:[#allocation3 + $0xcf8] sm:$0xff] }
 0x16b   :  { %5924 = vmatpush3.msra.mxu0 %v607_v24  ;;  %5957 = vmatpush3.msra.mxu1 %v640_v25  ;;  %v625_v23 = vld [vmem:[#allocation3 + $0xb00] sm:$0xff]  ;;  %v1321_v24 = vcombine.high %v252_v19, %v252_v19  ;;  %v672_v25 = vld [vmem:[#allocation3 + $0xc78] sm:$0xff] }
 0x16c   :  { %5925 = vmatprep.subr.mxu0 %v622_v26  ;;  %5958 = vmatprep.subr.mxu1 %v655_v27  ;;  %v687_v26 = vld [vmem:[#allocation3 + $0xcf0] sm:$0xff]  ;;  %v720_v27 = vld [vmem:[#allocation3 + $0xdf8] sm:$0xff] }
 0x16d   :  { %5926 = vmatpush3.msra.mxu0 %v606_v28  ;;  %5959 = vmatpush3.msra.mxu1 %v639_v29  ;;  %v671_v28 = vld [vmem:[#allocation3 + $0xc70] sm:$0xff]  ;;  %v704_v29 = vld [vmem:[#allocation3 + $0xd78] sm:$0xff] }
 0x16e   :  { %5927 = vmatprep.subr.mxu0 %v621_v30  ;;  %5960 = vmatprep.subr.mxu1 %v654_v31  ;;  %v686_v30 = vld [vmem:[#allocation3 + $0xce8] sm:$0xff]  ;;  %v719_v31 = vld [vmem:[#allocation3 + $0xdf0] sm:$0xff] }
 0x16f   :  { %5928 = vmatpush3.msra.mxu0 %v605_v32  ;;  %5961 = vmatpush3.msra.mxu1 %v638_v33  ;;  %v670_v32 = vld [vmem:[#allocation3 + $0xc68] sm:$0xff]  ;;  %v703_v33 = vld [vmem:[#allocation3 + $0xd70] sm:$0xff] }
 0x170   :  { %5929 = vmatprep.subr.mxu0 %v620_v34  ;;  %5962 = vmatprep.subr.mxu1 %v653_v35  ;;  %v685_v34 = vld [vmem:[#allocation3 + $0xce0] sm:$0xff]  ;;  %v718_v35 = vld [vmem:[#allocation3 + $0xde8] sm:$0xff] }
 0x171   :  { %5930 = vmatpush3.msra.mxu0 %v604_v36  ;;  %5963 = vmatpush3.msra.mxu1 %v637_v37  ;;  %v669_v36 = vld [vmem:[#allocation3 + $0xc60] sm:$0xff]  ;;  %v702_v37 = vld [vmem:[#allocation3 + $0xd68] sm:$0xff] }
 0x172   :  { %5931 = vmatprep.subr.mxu0 %v619_v38  ;;  %5964 = vmatprep.subr.mxu1 %v652_v39  ;;  %v684_v38 = vld [vmem:[#allocation3 + $0xcd8] sm:$0xff]  ;;  %v717_v39 = vld [vmem:[#allocation3 + $0xde0] sm:$0xff] }
 0x173   :  { %5932 = vmatpush3.msra.mxu0 %v603_v40  ;;  %5965 = vmatpush3.msra.mxu1 %v636_v41  ;;  %v668_v40 = vld [vmem:[#allocation3 + $0xc58] sm:$0xff]  ;;  %v701_v41 = vld [vmem:[#allocation3 + $0xd60] sm:$0xff] }
 0x174   :  { %5933 = vmatprep.subr.mxu0 %v618_v42  ;;  %5966 = vmatprep.subr.mxu1 %v651_v43  ;;  %v683_v42 = vld [vmem:[#allocation3 + $0xcd0] sm:$0xff]  ;;  %v716_v43 = vld [vmem:[#allocation3 + $0xdd8] sm:$0xff] }
 0x175   :  { %5934 = vmatpush3.msra.mxu0 %v602_v44  ;;  %5967 = vmatpush3.msra.mxu1 %v635_v45  ;;  %v667_v44 = vld [vmem:[#allocation3 + $0xc50] sm:$0xff]  ;;  %v700_v45 = vld [vmem:[#allocation3 + $0xd58] sm:$0xff] }
 0x176   :  { %5935 = vmatprep.subr.mxu0 %v617_v46  ;;  %5968 = vmatprep.subr.mxu1 %v650_v47  ;;  %v682_v46 = vld [vmem:[#allocation3 + $0xcc8] sm:$0xff]  ;;  %v715_v47 = vld [vmem:[#allocation3 + $0xdd0] sm:$0xff] }
 0x177   :  { %5936 = vmatpush3.msra.mxu0 %v601_v48  ;;  %5969 = vmatpush3.msra.mxu1 %v634_v49  ;;  %v666_v48 = vld [vmem:[#allocation3 + $0xc48] sm:$0xff]  ;;  %v699_v49 = vld [vmem:[#allocation3 + $0xd50] sm:$0xff] }
 0x178   :  { %5937 = vmatprep.subr.mxu0 %v616_v50  ;;  %5970 = vmatprep.subr.mxu1 %v649_v51  ;;  %v681_v50 = vld [vmem:[#allocation3 + $0xcc0] sm:$0xff]  ;;  %v714_v51 = vld [vmem:[#allocation3 + $0xdc8] sm:$0xff] }
 0x179   :  { %5938 = vmatpush3.msra.mxu0 %v600_v52  ;;  %5971 = vmatpush3.msra.mxu1 %v633_v53  ;;  %v665_v52 = vld [vmem:[#allocation3 + $0xc40] sm:$0xff]  ;;  %v698_v53 = vld [vmem:[#allocation3 + $0xd48] sm:$0xff] }
 0x17a   :  { %5939 = vmatprep.subr.mxu0 %v615_v54  ;;  %5972 = vmatprep.subr.mxu1 %v648_v55  ;;  %v680_v54 = vld [vmem:[#allocation3 + $0xcb8] sm:$0xff]  ;;  %v713_v55 = vld [vmem:[#allocation3 + $0xdc0] sm:$0xff] }
 0x17b   :  { %5940 = vmatpush3.msra.mxu0 %v599_v56  ;;  %5973 = vmatpush3.msra.mxu1 %v632_v57  ;;  %v664_v56 = vld [vmem:[#allocation3 + $0xc38] sm:$0xff]  ;;  %v697_v57 = vld [vmem:[#allocation3 + $0xd40] sm:$0xff] }
 0x17c   :  { %5941 = vmatprep.subr.mxu0 %v614_v58  ;;  %5974 = vmatprep.subr.mxu1 %v647_v59  ;;  %v679_v58 = vld [vmem:[#allocation3 + $0xcb0] sm:$0xff]  ;;  %v712_v59 = vld [vmem:[#allocation3 + $0xdb8] sm:$0xff] }
 0x17d   :  { %5942 = vmatpush3.msra.mxu0 %v598_v60  ;;  %5975 = vmatpush3.msra.mxu1 %v631_v61  ;;  %v663_v60 = vld [vmem:[#allocation3 + $0xc30] sm:$0xff]  ;;  %v696_v61 = vld [vmem:[#allocation3 + $0xd38] sm:$0xff] }
 0x17e   :  { %5943 = vmatprep.subr.mxu0 %v613_v62  ;;  %5976 = vmatprep.subr.mxu1 %v646_v63  ;;  %v678_v62 = vld [vmem:[#allocation3 + $0xca8] sm:$0xff]  ;;  %v711_v63 = vld [vmem:[#allocation3 + $0xdb0] sm:$0xff] }
 0x17f   :  { %5944 = vmatpush3.msra.mxu0 %v597_v0  ;;  %5977 = vmatpush3.msra.mxu1 %v630_v1  ;;  %v662_v0 = vld [vmem:[#allocation3 + $0xc28] sm:$0xff]  ;;  %v695_v1 = vld [vmem:[#allocation3 + $0xd30] sm:$0xff] }
 0x180   :  { %5945 = vmatprep.subr.mxu0 %v612_v2  ;;  %5978 = vmatprep.subr.mxu1 %v645_v3  ;;  %v677_v2 = vld [vmem:[#allocation3 + $0xca0] sm:$0xff]  ;;  %v710_v3 = vld [vmem:[#allocation3 + $0xda8] sm:$0xff] }
 0x181   :  { %5946 = vmatpush3.msra.mxu0 %v596_v4  ;;  %5979 = vmatpush3.msra.mxu1 %v629_v5  ;;  %v661_v4 = vld [vmem:[#allocation3 + $0xc20] sm:$0xff]  ;;  %v694_v5 = vld [vmem:[#allocation3 + $0xd28] sm:$0xff] }
 0x182   :  { %5947 = vmatprep.subr.mxu0 %v611_v6  ;;  %5980 = vmatprep.subr.mxu1 %v644_v7  ;;  %v676_v6 = vld [vmem:[#allocation3 + $0xc98] sm:$0xff]  ;;  %v709_v7 = vld [vmem:[#allocation3 + $0xda0] sm:$0xff] }
 0x183   :  { %5948 = vmatpush3.msra.mxu0 %v595_v8  ;;  %5981 = vmatpush3.msra.mxu1 %v628_v9  ;;  %v660_v8 = vld [vmem:[#allocation3 + $0xc18] sm:$0xff]  ;;  %v693_v9 = vld [vmem:[#allocation3 + $0xd20] sm:$0xff] }
 0x184   :  { %5949 = vmatprep.subr.mxu0 %v610_v10  ;;  %5982 = vmatprep.subr.mxu1 %v643_v12  ;;  %v675_v10 = vld [vmem:[#allocation3 + $0xc90] sm:$0xff] }
 0x185   :  { %5950 = vmatpush3.msra.mxu0 %v594_v13  ;;  %5983 = vmatpush3.msra.mxu1 %v627_v14  ;;  %v659_v12 = vld [vmem:[#allocation3 + $0xc10] sm:$0xff]  ;;  %v692_v13 = vld [vmem:[#allocation3 + $0xd18] sm:$0xff]  ;;  %v674_v14 = vld [vmem:[#allocation3 + $0xc88] sm:$0xff] }
 0x186   :  { %5951 = vmatprep.subr.mxu0 %v609_v15  ;;  %5984 = vmatprep.subr.mxu1 %v642_v16  ;;  %v253_v15 = vld [vmem:[%s8049_s25 + $0x60] sm:$0xff]  ;;  %v707_v16 = vld [vmem:[#allocation3 + $0xd90] sm:$0xff] }
 0x187   :  { %5952 = vmatpush3.msra.mxu0 %v593_v17  ;;  %2143 = vmatprep.mubr.f32.mxu0 %v1320_v18  ;;  %v658_v17 = vld [vmem:[#allocation3 + $0xc08] sm:$0xff]  ;;  %v691_v18 = vld [vmem:[#allocation3 + $0xd10] sm:$0xff] }
 0x188   :  { %5985 = vmatpush3.msra.mxu1 %v626_v20  ;;  %2144 = vmatmul.mubr.f32.vlgmr.msra.gmra.mxu0 %v251_v11  ;;  %v708_v11 = vld [vmem:[#allocation3 + $0xd98] sm:$0xff]  ;;  %v706_v20 = vld [vmem:[#allocation3 + $0xd88] sm:$0xff] }
 0x189   :  { %5986 = vmatprep.subr.mxu1 %v641_v21  ;;  %5991 = vmatprep.subr.mxu0 %v688_v22  ;;  %v657_v21 = vld [vmem:[#allocation3 + $0xc00] sm:$0xff]  ;;  %v1322_v22 = vcombine.high %v253_v15, %v253_v15 }
 0x18a   :  { %5987 = vmatpush3.msra.mxu1 %v625_v23  ;;  %2213 = vmatprep.mubr.f32.mxu1 %v1321_v24  ;;  %v254_v23 = vld [vmem:[%s8049_s25 + $0x68] sm:$0xff] }
 0x18b   :  { %5992 = vmatpush3.msra.mxu0 %v672_v25  ;;  %2214 = vmatmul.mubr.f32.vlgmr.msra.gmra.mxu1 %v252_v19  ;;  %v673_v19 = vld [vmem:[#allocation3 + $0xc80] sm:$0xff]  ;;  %v690_v24 = vld [vmem:[#allocation3 + $0xd08] sm:$0xff] }
 0x18c   :  { %5993 = vmatprep.subr.mxu0 %v687_v26  ;;  %6026 = vmatprep.subr.mxu1 %v720_v27  ;;  %v705_v25 = vld [vmem:[#allocation3 + $0xd80] sm:$0xff]  ;;  %v752_v26 = vld [vmem:[#allocation3 + $0xef8] sm:$0xff] }
 0x18d   :  { %5994 = vmatpush3.msra.mxu0 %v671_v28  ;;  %6027 = vmatpush3.msra.mxu1 %v704_v29  ;;  %v689_v27 = vld [vmem:[#allocation3 + $0xd00] sm:$0xff]  ;;  %v1323_v28 = vcombine.high %v254_v23, %v254_v23  ;;  %v736_v29 = vld [vmem:[#allocation3 + $0xe78] sm:$0xff] }
 0x18e   :  { %5995 = vmatprep.subr.mxu0 %v686_v30  ;;  %6028 = vmatprep.subr.mxu1 %v719_v31  ;;  %v751_v30 = vld [vmem:[#allocation3 + $0xef0] sm:$0xff]  ;;  %v784_v31 = vld [vmem:[#allocation3 + $0xff8] sm:$0xff] }
 0x18f   :  { %5996 = vmatpush3.msra.mxu0 %v670_v32  ;;  %6029 = vmatpush3.msra.mxu1 %v703_v33  ;;  %v735_v32 = vld [vmem:[#allocation3 + $0xe70] sm:$0xff]  ;;  %v768_v33 = vld [vmem:[#allocation3 + $0xf78] sm:$0xff] }
 0x190   :  { %5997 = vmatprep.subr.mxu0 %v685_v34  ;;  %6030 = vmatprep.subr.mxu1 %v718_v35  ;;  %v750_v34 = vld [vmem:[#allocation3 + $0xee8] sm:$0xff]  ;;  %v783_v35 = vld [vmem:[#allocation3 + $0xff0] sm:$0xff] }
 0x191   :  { %5998 = vmatpush3.msra.mxu0 %v669_v36  ;;  %6031 = vmatpush3.msra.mxu1 %v702_v37  ;;  %v734_v36 = vld [vmem:[#allocation3 + $0xe68] sm:$0xff]  ;;  %v767_v37 = vld [vmem:[#allocation3 + $0xf70] sm:$0xff] }
 0x192   :  { %5999 = vmatprep.subr.mxu0 %v684_v38  ;;  %6032 = vmatprep.subr.mxu1 %v717_v39  ;;  %v749_v38 = vld [vmem:[#allocation3 + $0xee0] sm:$0xff]  ;;  %v782_v39 = vld [vmem:[#allocation3 + $0xfe8] sm:$0xff] }
 0x193   :  { %6000 = vmatpush3.msra.mxu0 %v668_v40  ;;  %6033 = vmatpush3.msra.mxu1 %v701_v41  ;;  %v733_v40 = vld [vmem:[#allocation3 + $0xe60] sm:$0xff]  ;;  %v766_v41 = vld [vmem:[#allocation3 + $0xf68] sm:$0xff] }
 0x194   :  { %6001 = vmatprep.subr.mxu0 %v683_v42  ;;  %6034 = vmatprep.subr.mxu1 %v716_v43  ;;  %v748_v42 = vld [vmem:[#allocation3 + $0xed8] sm:$0xff]  ;;  %v781_v43 = vld [vmem:[#allocation3 + $0xfe0] sm:$0xff] }
 0x195   :  { %6002 = vmatpush3.msra.mxu0 %v667_v44  ;;  %6035 = vmatpush3.msra.mxu1 %v700_v45  ;;  %v732_v44 = vld [vmem:[#allocation3 + $0xe58] sm:$0xff]  ;;  %v765_v45 = vld [vmem:[#allocation3 + $0xf60] sm:$0xff] }
 0x196   :  { %6003 = vmatprep.subr.mxu0 %v682_v46  ;;  %6036 = vmatprep.subr.mxu1 %v715_v47  ;;  %v747_v46 = vld [vmem:[#allocation3 + $0xed0] sm:$0xff]  ;;  %v780_v47 = vld [vmem:[#allocation3 + $0xfd8] sm:$0xff] }
 0x197   :  { %6004 = vmatpush3.msra.mxu0 %v666_v48  ;;  %6037 = vmatpush3.msra.mxu1 %v699_v49  ;;  %v731_v48 = vld [vmem:[#allocation3 + $0xe50] sm:$0xff]  ;;  %v764_v49 = vld [vmem:[#allocation3 + $0xf58] sm:$0xff] }
 0x198   :  { %6005 = vmatprep.subr.mxu0 %v681_v50  ;;  %6038 = vmatprep.subr.mxu1 %v714_v51  ;;  %v746_v50 = vld [vmem:[#allocation3 + $0xec8] sm:$0xff]  ;;  %v779_v51 = vld [vmem:[#allocation3 + $0xfd0] sm:$0xff] }
 0x199   :  { %6006 = vmatpush3.msra.mxu0 %v665_v52  ;;  %6039 = vmatpush3.msra.mxu1 %v698_v53  ;;  %v730_v52 = vld [vmem:[#allocation3 + $0xe48] sm:$0xff]  ;;  %v763_v53 = vld [vmem:[#allocation3 + $0xf50] sm:$0xff] }
 0x19a   :  { %6007 = vmatprep.subr.mxu0 %v680_v54  ;;  %6040 = vmatprep.subr.mxu1 %v713_v55  ;;  %v745_v54 = vld [vmem:[#allocation3 + $0xec0] sm:$0xff]  ;;  %v778_v55 = vld [vmem:[#allocation3 + $0xfc8] sm:$0xff] }
 0x19b   :  { %6008 = vmatpush3.msra.mxu0 %v664_v56  ;;  %6041 = vmatpush3.msra.mxu1 %v697_v57  ;;  %v729_v56 = vld [vmem:[#allocation3 + $0xe40] sm:$0xff]  ;;  %v762_v57 = vld [vmem:[#allocation3 + $0xf48] sm:$0xff] }
 0x19c   :  { %6009 = vmatprep.subr.mxu0 %v679_v58  ;;  %6042 = vmatprep.subr.mxu1 %v712_v59  ;;  %v744_v58 = vld [vmem:[#allocation3 + $0xeb8] sm:$0xff]  ;;  %v777_v59 = vld [vmem:[#allocation3 + $0xfc0] sm:$0xff] }
 0x19d   :  { %6010 = vmatpush3.msra.mxu0 %v663_v60  ;;  %6043 = vmatpush3.msra.mxu1 %v696_v61  ;;  %v728_v60 = vld [vmem:[#allocation3 + $0xe38] sm:$0xff]  ;;  %v761_v61 = vld [vmem:[#allocation3 + $0xf40] sm:$0xff] }
 0x19e   :  { %6011 = vmatprep.subr.mxu0 %v678_v62  ;;  %6044 = vmatprep.subr.mxu1 %v711_v63  ;;  %v743_v62 = vld [vmem:[#allocation3 + $0xeb0] sm:$0xff]  ;;  %v776_v63 = vld [vmem:[#allocation3 + $0xfb8] sm:$0xff] }
 0x19f   :  { %6012 = vmatpush3.msra.mxu0 %v662_v0  ;;  %6045 = vmatpush3.msra.mxu1 %v695_v1  ;;  %v727_v0 = vld [vmem:[#allocation3 + $0xe30] sm:$0xff]  ;;  %v760_v1 = vld [vmem:[#allocation3 + $0xf38] sm:$0xff] }
 0x1a0   :  { %6013 = vmatprep.subr.mxu0 %v677_v2  ;;  %6046 = vmatprep.subr.mxu1 %v710_v3  ;;  %v742_v2 = vld [vmem:[#allocation3 + $0xea8] sm:$0xff]  ;;  %v775_v3 = vld [vmem:[#allocation3 + $0xfb0] sm:$0xff] }
 0x1a1   :  { %6014 = vmatpush3.msra.mxu0 %v661_v4  ;;  %6047 = vmatpush3.msra.mxu1 %v694_v5  ;;  %v726_v4 = vld [vmem:[#allocation3 + $0xe28] sm:$0xff]  ;;  %v759_v5 = vld [vmem:[#allocation3 + $0xf30] sm:$0xff] }
 0x1a2   :  { %6015 = vmatprep.subr.mxu0 %v676_v6  ;;  %6048 = vmatprep.subr.mxu1 %v709_v7  ;;  %v741_v6 = vld [vmem:[#allocation3 + $0xea0] sm:$0xff]  ;;  %v774_v7 = vld [vmem:[#allocation3 + $0xfa8] sm:$0xff] }
 0x1a3   :  { %6016 = vmatpush3.msra.mxu0 %v660_v8  ;;  %6049 = vmatpush3.msra.mxu1 %v693_v9  ;;  %v725_v8 = vld [vmem:[#allocation3 + $0xe20] sm:$0xff]  ;;  %v758_v9 = vld [vmem:[#allocation3 + $0xf28] sm:$0xff] }
 0x1a4   :  { %6017 = vmatprep.subr.mxu0 %v675_v10  ;;  %6050 = vmatprep.subr.mxu1 %v708_v11  ;;  %v740_v10 = vld [vmem:[#allocation3 + $0xe98] sm:$0xff]  ;;  %v773_v11 = vld [vmem:[#allocation3 + $0xfa0] sm:$0xff] }
 0x1a5   :  { %6018 = vmatpush3.msra.mxu0 %v659_v12  ;;  %6051 = vmatpush3.msra.mxu1 %v692_v13  ;;  %v724_v12 = vld [vmem:[#allocation3 + $0xe18] sm:$0xff]  ;;  %v757_v13 = vld [vmem:[#allocation3 + $0xf20] sm:$0xff] }
 0x1a6   :  { %6019 = vmatprep.subr.mxu0 %v674_v14  ;;  %6052 = vmatprep.subr.mxu1 %v707_v16  ;;  %v739_v14 = vld [vmem:[#allocation3 + $0xe90] sm:$0xff] }
 0x1a7   :  { %6020 = vmatpush3.msra.mxu0 %v658_v17  ;;  %6053 = vmatpush3.msra.mxu1 %v691_v18  ;;  %v723_v16 = vld [vmem:[#allocation3 + $0xe10] sm:$0xff]  ;;  %v756_v17 = vld [vmem:[#allocation3 + $0xf18] sm:$0xff]  ;;  %v738_v18 = vld [vmem:[#allocation3 + $0xe88] sm:$0xff] }
 0x1a8   :  { %6021 = vmatprep.subr.mxu0 %v673_v19  ;;  %6054 = vmatprep.subr.mxu1 %v706_v20  ;;  %v255_v19 = vld [vmem:[%s8049_s25 + $0x70] sm:$0xff] }
 0x1a9   :  { %6022 = vmatpush3.msra.mxu0 %v657_v21  ;;  %2283 = vmatprep.mubr.f32.mxu0 %v1322_v22  ;;  %v771_v20 = vld [vmem:[#allocation3 + $0xf90] sm:$0xff]  ;;  %v722_v21 = vld [vmem:[#allocation3 + $0xe08] sm:$0xff] }
 0x1aa   :  { %6055 = vmatpush3.msra.mxu1 %v690_v24  ;;  %2284 = vmatmul.mubr.f32.vlgmr.msra.gmra.mxu0 %v253_v15  ;;  %v772_v15 = vld [vmem:[#allocation3 + $0xf98] sm:$0xff]  ;;  %v755_v22 = vld [vmem:[#allocation3 + $0xf10] sm:$0xff]  ;;  %v770_v24 = vld [vmem:[#allocation3 + $0xf88] sm:$0xff] }
 0x1ab   :  { %6056 = vmatprep.subr.mxu1 %v705_v25  ;;  %6061 = vmatprep.subr.mxu0 %v752_v26  ;;  %v721_v25 = vld [vmem:[#allocation3 + $0xe00] sm:$0xff]  ;;  %v1324_v26 = vcombine.high %v255_v19, %v255_v19 }
 0x1ac   :  { %6057 = vmatpush3.msra.mxu1 %v689_v27  ;;  %2353 = vmatprep.mubr.f32.mxu1 %v1323_v28  ;;  %v256_v27 = vld [vmem:[%s8049_s25 + $0x78] sm:$0xff]  ;;  %v754_v28 = vld [vmem:[#allocation3 + $0xf08] sm:$0xff] }
 0x1ad   :  { %6062 = vmatpush3.msra.mxu0 %v736_v29  ;;  %2354 = vmatmul.mubr.f32.vlgmr.msra.gmra.mxu1 %v254_v23  ;;  %v737_v23 = vld [vmem:[#allocation3 + $0xe80] sm:$0xff] }
 0x1ae   :  { %6063 = vmatprep.subr.mxu0 %v751_v30  ;;  %6096 = vmatprep.subr.mxu1 %v784_v31  ;;  %v769_v29 = vld [vmem:[#allocation3 + $0xf80] sm:$0xff]  ;;  %v816_v30 = vld [vmem:[#allocation3 + $0x10f8] sm:$0xff] }
 0x1af   :  { %6064 = vmatpush3.msra.mxu0 %v735_v32  ;;  %6097 = vmatpush3.msra.mxu1 %v768_v33  ;;  %v753_v31 = vld [vmem:[#allocation3 + $0xf00] sm:$0xff]  ;;  %v1325_v32 = vcombine.high %v256_v27, %v256_v27  ;;  %v800_v33 = vld [vmem:[#allocation3 + $0x1078] sm:$0xff] }
 0x1b0   :  { %6065 = vmatprep.subr.mxu0 %v750_v34  ;;  %6098 = vmatprep.subr.mxu1 %v783_v35  ;;  %v815_v34 = vld [vmem:[#allocation3 + $0x10f0] sm:$0xff]  ;;  %v848_v35 = vld [vmem:[#allocation3 + $0x11f8] sm:$0xff] }
 0x1b1   :  { %6066 = vmatpush3.msra.mxu0 %v734_v36  ;;  %6099 = vmatpush3.msra.mxu1 %v767_v37  ;;  %v799_v36 = vld [vmem:[#allocation3 + $0x1070] sm:$0xff]  ;;  %v832_v37 = vld [vmem:[#allocation3 + $0x1178] sm:$0xff] }
 0x1b2   :  { %6067 = vmatprep.subr.mxu0 %v749_v38  ;;  %6100 = vmatprep.subr.mxu1 %v782_v39  ;;  %v814_v38 = vld [vmem:[#allocation3 + $0x10e8] sm:$0xff]  ;;  %v847_v39 = vld [vmem:[#allocation3 + $0x11f0] sm:$0xff] }
 0x1b3   :  { %6068 = vmatpush3.msra.mxu0 %v733_v40  ;;  %6101 = vmatpush3.msra.mxu1 %v766_v41  ;;  %v798_v40 = vld [vmem:[#allocation3 + $0x1068] sm:$0xff]  ;;  %v831_v41 = vld [vmem:[#allocation3 + $0x1170] sm:$0xff] }
 0x1b4   :  { %6069 = vmatprep.subr.mxu0 %v748_v42  ;;  %6102 = vmatprep.subr.mxu1 %v781_v43  ;;  %v813_v42 = vld [vmem:[#allocation3 + $0x10e0] sm:$0xff]  ;;  %v846_v43 = vld [vmem:[#allocation3 + $0x11e8] sm:$0xff] }
 0x1b5   :  { %6070 = vmatpush3.msra.mxu0 %v732_v44  ;;  %6103 = vmatpush3.msra.mxu1 %v765_v45  ;;  %v797_v44 = vld [vmem:[#allocation3 + $0x1060] sm:$0xff]  ;;  %v830_v45 = vld [vmem:[#allocation3 + $0x1168] sm:$0xff] }
 0x1b6   :  { %6071 = vmatprep.subr.mxu0 %v747_v46  ;;  %6104 = vmatprep.subr.mxu1 %v780_v47  ;;  %v812_v46 = vld [vmem:[#allocation3 + $0x10d8] sm:$0xff]  ;;  %v845_v47 = vld [vmem:[#allocation3 + $0x11e0] sm:$0xff] }
 0x1b7   :  { %6072 = vmatpush3.msra.mxu0 %v731_v48  ;;  %6105 = vmatpush3.msra.mxu1 %v764_v49  ;;  %v796_v48 = vld [vmem:[#allocation3 + $0x1058] sm:$0xff]  ;;  %v829_v49 = vld [vmem:[#allocation3 + $0x1160] sm:$0xff] }
 0x1b8   :  { %6073 = vmatprep.subr.mxu0 %v746_v50  ;;  %6106 = vmatprep.subr.mxu1 %v779_v51  ;;  %v811_v50 = vld [vmem:[#allocation3 + $0x10d0] sm:$0xff]  ;;  %v844_v51 = vld [vmem:[#allocation3 + $0x11d8] sm:$0xff] }
 0x1b9   :  { %6074 = vmatpush3.msra.mxu0 %v730_v52  ;;  %6107 = vmatpush3.msra.mxu1 %v763_v53  ;;  %v795_v52 = vld [vmem:[#allocation3 + $0x1050] sm:$0xff]  ;;  %v828_v53 = vld [vmem:[#allocation3 + $0x1158] sm:$0xff] }
 0x1ba   :  { %6075 = vmatprep.subr.mxu0 %v745_v54  ;;  %6108 = vmatprep.subr.mxu1 %v778_v55  ;;  %v810_v54 = vld [vmem:[#allocation3 + $0x10c8] sm:$0xff]  ;;  %v843_v55 = vld [vmem:[#allocation3 + $0x11d0] sm:$0xff] }
 0x1bb   :  { %6076 = vmatpush3.msra.mxu0 %v729_v56  ;;  %6109 = vmatpush3.msra.mxu1 %v762_v57  ;;  %v794_v56 = vld [vmem:[#allocation3 + $0x1048] sm:$0xff]  ;;  %v827_v57 = vld [vmem:[#allocation3 + $0x1150] sm:$0xff] }
 0x1bc   :  { %6077 = vmatprep.subr.mxu0 %v744_v58  ;;  %6110 = vmatprep.subr.mxu1 %v777_v59  ;;  %v809_v58 = vld [vmem:[#allocation3 + $0x10c0] sm:$0xff]  ;;  %v842_v59 = vld [vmem:[#allocation3 + $0x11c8] sm:$0xff] }
 0x1bd   :  { %6078 = vmatpush3.msra.mxu0 %v728_v60  ;;  %6111 = vmatpush3.msra.mxu1 %v761_v61  ;;  %v793_v60 = vld [vmem:[#allocation3 + $0x1040] sm:$0xff]  ;;  %v826_v61 = vld [vmem:[#allocation3 + $0x1148] sm:$0xff] }
 0x1be   :  { %6079 = vmatprep.subr.mxu0 %v743_v62  ;;  %6112 = vmatprep.subr.mxu1 %v776_v63  ;;  %v808_v62 = vld [vmem:[#allocation3 + $0x10b8] sm:$0xff]  ;;  %v841_v63 = vld [vmem:[#allocation3 + $0x11c0] sm:$0xff] }
 0x1bf   :  { %6080 = vmatpush3.msra.mxu0 %v727_v0  ;;  %6113 = vmatpush3.msra.mxu1 %v760_v1  ;;  %v792_v0 = vld [vmem:[#allocation3 + $0x1038] sm:$0xff]  ;;  %v825_v1 = vld [vmem:[#allocation3 + $0x1140] sm:$0xff] }
 0x1c0   :  { %6081 = vmatprep.subr.mxu0 %v742_v2  ;;  %6114 = vmatprep.subr.mxu1 %v775_v3  ;;  %v807_v2 = vld [vmem:[#allocation3 + $0x10b0] sm:$0xff]  ;;  %v840_v3 = vld [vmem:[#allocation3 + $0x11b8] sm:$0xff] }
 0x1c1   :  { %6082 = vmatpush3.msra.mxu0 %v726_v4  ;;  %6115 = vmatpush3.msra.mxu1 %v759_v5  ;;  %v791_v4 = vld [vmem:[#allocation3 + $0x1030] sm:$0xff]  ;;  %v824_v5 = vld [vmem:[#allocation3 + $0x1138] sm:$0xff] }
 0x1c2   :  { %6083 = vmatprep.subr.mxu0 %v741_v6  ;;  %6116 = vmatprep.subr.mxu1 %v774_v7  ;;  %v806_v6 = vld [vmem:[#allocation3 + $0x10a8] sm:$0xff]  ;;  %v839_v7 = vld [vmem:[#allocation3 + $0x11b0] sm:$0xff] }
 0x1c3   :  { %6084 = vmatpush3.msra.mxu0 %v725_v8  ;;  %6117 = vmatpush3.msra.mxu1 %v758_v9  ;;  %v790_v8 = vld [vmem:[#allocation3 + $0x1028] sm:$0xff]  ;;  %v823_v9 = vld [vmem:[#allocation3 + $0x1130] sm:$0xff] }
 0x1c4   :  { %6085 = vmatprep.subr.mxu0 %v740_v10  ;;  %6118 = vmatprep.subr.mxu1 %v773_v11  ;;  %v805_v10 = vld [vmem:[#allocation3 + $0x10a0] sm:$0xff]  ;;  %v838_v11 = vld [vmem:[#allocation3 + $0x11a8] sm:$0xff] }
 0x1c5   :  { %6086 = vmatpush3.msra.mxu0 %v724_v12  ;;  %6119 = vmatpush3.msra.mxu1 %v757_v13  ;;  %v789_v12 = vld [vmem:[#allocation3 + $0x1020] sm:$0xff]  ;;  %v822_v13 = vld [vmem:[#allocation3 + $0x1128] sm:$0xff] }
 0x1c6   :  { %6087 = vmatprep.subr.mxu0 %v739_v14  ;;  %6120 = vmatprep.subr.mxu1 %v772_v15  ;;  %v804_v14 = vld [vmem:[#allocation3 + $0x1098] sm:$0xff]  ;;  %v837_v15 = vld [vmem:[#allocation3 + $0x11a0] sm:$0xff] }
 0x1c7   :  { %6088 = vmatpush3.msra.mxu0 %v723_v16  ;;  %6121 = vmatpush3.msra.mxu1 %v756_v17  ;;  %v788_v16 = vld [vmem:[#allocation3 + $0x1018] sm:$0xff]  ;;  %v821_v17 = vld [vmem:[#allocation3 + $0x1120] sm:$0xff] }
 0x1c8   :  { %6089 = vmatprep.subr.mxu0 %v738_v18  ;;  %6122 = vmatprep.subr.mxu1 %v771_v20  ;;  %v803_v18 = vld [vmem:[#allocation3 + $0x1090] sm:$0xff] }
 0x1c9   :  { %6090 = vmatpush3.msra.mxu0 %v722_v21  ;;  %6123 = vmatpush3.msra.mxu1 %v755_v22  ;;  %v787_v20 = vld [vmem:[#allocation3 + $0x1010] sm:$0xff]  ;;  %v820_v21 = vld [vmem:[#allocation3 + $0x1118] sm:$0xff]  ;;  %v802_v22 = vld [vmem:[#allocation3 + $0x1088] sm:$0xff] }
 0x1ca   :  { %6091 = vmatprep.subr.mxu0 %v737_v23  ;;  %6124 = vmatprep.subr.mxu1 %v770_v24  ;;  %v257_v23 = vld [vmem:[%s8049_s25 + $0x80] sm:$0xff]  ;;  %v835_v24 = vld [vmem:[#allocation3 + $0x1190] sm:$0xff] }
 0x1cb   :  { %6092 = vmatpush3.msra.mxu0 %v721_v25  ;;  %2423 = vmatprep.mubr.f32.mxu0 %v1324_v26  ;;  %v786_v25 = vld [vmem:[#allocation3 + $0x1008] sm:$0xff]  ;;  %v819_v26 = vld [vmem:[#allocation3 + $0x1110] sm:$0xff] }
 0x1cc   :  { %6125 = vmatpush3.msra.mxu1 %v754_v28  ;;  %2424 = vmatmul.mubr.f32.vlgmr.msra.gmra.mxu0 %v255_v19  ;;  %v836_v19 = vld [vmem:[#allocation3 + $0x1198] sm:$0xff]  ;;  %v834_v28 = vld [vmem:[#allocation3 + $0x1188] sm:$0xff] }
 0x1cd   :  { %6126 = vmatprep.subr.mxu1 %v769_v29  ;;  %6131 = vmatprep.subr.mxu0 %v816_v30  ;;  %v785_v29 = vld [vmem:[#allocation3 + $0x1000] sm:$0xff]  ;;  %v1326_v30 = vcombine.high %v257_v23, %v257_v23 }
 0x1ce   :  { %6127 = vmatpush3.msra.mxu1 %v753_v31  ;;  %2493 = vmatprep.mubr.f32.mxu1 %v1325_v32  ;;  %v258_v31 = vld [vmem:[%s8049_s25 + $0x88] sm:$0xff] }
 0x1cf   :  { %6132 = vmatpush3.msra.mxu0 %v800_v33  ;;  %2494 = vmatmul.mubr.f32.vlgmr.msra.gmra.mxu1 %v256_v27  ;;  %v801_v27 = vld [vmem:[#allocation3 + $0x1080] sm:$0xff]  ;;  %v818_v32 = vld [vmem:[#allocation3 + $0x1108] sm:$0xff] }
 0x1d0   :  { %6133 = vmatprep.subr.mxu0 %v815_v34  ;;  %6166 = vmatprep.subr.mxu1 %v848_v35  ;;  %v833_v33 = vld [vmem:[#allocation3 + $0x1180] sm:$0xff]  ;;  %v880_v34 = vld [vmem:[#allocation3 + $0x12f8] sm:$0xff] }
 0x1d1   :  { %6134 = vmatpush3.msra.mxu0 %v799_v36  ;;  %6167 = vmatpush3.msra.mxu1 %v832_v37  ;;  %v817_v35 = vld [vmem:[#allocation3 + $0x1100] sm:$0xff]  ;;  %v1327_v36 = vcombine.high %v258_v31, %v258_v31  ;;  %v864_v37 = vld [vmem:[#allocation3 + $0x1278] sm:$0xff] }
 0x1d2   :  { %6135 = vmatprep.subr.mxu0 %v814_v38  ;;  %6168 = vmatprep.subr.mxu1 %v847_v39  ;;  %v879_v38 = vld [vmem:[#allocation3 + $0x12f0] sm:$0xff]  ;;  %v912_v39 = vld [vmem:[#allocation3 + $0x13f8] sm:$0xff] }
 0x1d3   :  { %6136 = vmatpush3.msra.mxu0 %v798_v40  ;;  %6169 = vmatpush3.msra.mxu1 %v831_v41  ;;  %v863_v40 = vld [vmem:[#allocation3 + $0x1270] sm:$0xff]  ;;  %v896_v41 = vld [vmem:[#allocation3 + $0x1378] sm:$0xff] }
 0x1d4   :  { %6137 = vmatprep.subr.mxu0 %v813_v42  ;;  %6170 = vmatprep.subr.mxu1 %v846_v43  ;;  %v878_v42 = vld [vmem:[#allocation3 + $0x12e8] sm:$0xff]  ;;  %v911_v43 = vld [vmem:[#allocation3 + $0x13f0] sm:$0xff] }
 0x1d5   :  { %6138 = vmatpush3.msra.mxu0 %v797_v44  ;;  %6171 = vmatpush3.msra.mxu1 %v830_v45  ;;  %v862_v44 = vld [vmem:[#allocation3 + $0x1268] sm:$0xff]  ;;  %v895_v45 = vld [vmem:[#allocation3 + $0x1370] sm:$0xff] }
 0x1d6   :  { %6139 = vmatprep.subr.mxu0 %v812_v46  ;;  %6172 = vmatprep.subr.mxu1 %v845_v47  ;;  %v877_v46 = vld [vmem:[#allocation3 + $0x12e0] sm:$0xff]  ;;  %v910_v47 = vld [vmem:[#allocation3 + $0x13e8] sm:$0xff] }
 0x1d7   :  { %6140 = vmatpush3.msra.mxu0 %v796_v48  ;;  %6173 = vmatpush3.msra.mxu1 %v829_v49  ;;  %v861_v48 = vld [vmem:[#allocation3 + $0x1260] sm:$0xff]  ;;  %v894_v49 = vld [vmem:[#allocation3 + $0x1368] sm:$0xff] }
 0x1d8   :  { %6141 = vmatprep.subr.mxu0 %v811_v50  ;;  %6174 = vmatprep.subr.mxu1 %v844_v51  ;;  %v876_v50 = vld [vmem:[#allocation3 + $0x12d8] sm:$0xff]  ;;  %v909_v51 = vld [vmem:[#allocation3 + $0x13e0] sm:$0xff] }
 0x1d9   :  { %6142 = vmatpush3.msra.mxu0 %v795_v52  ;;  %6175 = vmatpush3.msra.mxu1 %v828_v53  ;;  %v860_v52 = vld [vmem:[#allocation3 + $0x1258] sm:$0xff]  ;;  %v893_v53 = vld [vmem:[#allocation3 + $0x1360] sm:$0xff] }
 0x1da   :  { %6143 = vmatprep.subr.mxu0 %v810_v54  ;;  %6176 = vmatprep.subr.mxu1 %v843_v55  ;;  %v875_v54 = vld [vmem:[#allocation3 + $0x12d0] sm:$0xff]  ;;  %v908_v55 = vld [vmem:[#allocation3 + $0x13d8] sm:$0xff] }
 0x1db   :  { %6144 = vmatpush3.msra.mxu0 %v794_v56  ;;  %6177 = vmatpush3.msra.mxu1 %v827_v57  ;;  %v859_v56 = vld [vmem:[#allocation3 + $0x1250] sm:$0xff]  ;;  %v892_v57 = vld [vmem:[#allocation3 + $0x1358] sm:$0xff] }
 0x1dc   :  { %6145 = vmatprep.subr.mxu0 %v809_v58  ;;  %6178 = vmatprep.subr.mxu1 %v842_v59  ;;  %v874_v58 = vld [vmem:[#allocation3 + $0x12c8] sm:$0xff]  ;;  %v907_v59 = vld [vmem:[#allocation3 + $0x13d0] sm:$0xff] }
 0x1dd   :  { %6146 = vmatpush3.msra.mxu0 %v793_v60  ;;  %6179 = vmatpush3.msra.mxu1 %v826_v61  ;;  %v858_v60 = vld [vmem:[#allocation3 + $0x1248] sm:$0xff]  ;;  %v891_v61 = vld [vmem:[#allocation3 + $0x1350] sm:$0xff] }
 0x1de   :  { %6147 = vmatprep.subr.mxu0 %v808_v62  ;;  %6180 = vmatprep.subr.mxu1 %v841_v63  ;;  %v873_v62 = vld [vmem:[#allocation3 + $0x12c0] sm:$0xff]  ;;  %v906_v63 = vld [vmem:[#allocation3 + $0x13c8] sm:$0xff] }
 0x1df   :  { %6148 = vmatpush3.msra.mxu0 %v792_v0  ;;  %6181 = vmatpush3.msra.mxu1 %v825_v1  ;;  %v857_v0 = vld [vmem:[#allocation3 + $0x1240] sm:$0xff]  ;;  %v890_v1 = vld [vmem:[#allocation3 + $0x1348] sm:$0xff] }
 0x1e0   :  { %6149 = vmatprep.subr.mxu0 %v807_v2  ;;  %6182 = vmatprep.subr.mxu1 %v840_v3  ;;  %v872_v2 = vld [vmem:[#allocation3 + $0x12b8] sm:$0xff]  ;;  %v905_v3 = vld [vmem:[#allocation3 + $0x13c0] sm:$0xff] }
 0x1e1   :  { %6150 = vmatpush3.msra.mxu0 %v791_v4  ;;  %6183 = vmatpush3.msra.mxu1 %v824_v5  ;;  %v856_v4 = vld [vmem:[#allocation3 + $0x1238] sm:$0xff]  ;;  %v889_v5 = vld [vmem:[#allocation3 + $0x1340] sm:$0xff] }
 0x1e2   :  { %6151 = vmatprep.subr.mxu0 %v806_v6  ;;  %6184 = vmatprep.subr.mxu1 %v839_v7  ;;  %v871_v6 = vld [vmem:[#allocation3 + $0x12b0] sm:$0xff]  ;;  %v904_v7 = vld [vmem:[#allocation3 + $0x13b8] sm:$0xff] }
 0x1e3   :  { %6152 = vmatpush3.msra.mxu0 %v790_v8  ;;  %6185 = vmatpush3.msra.mxu1 %v823_v9  ;;  %v855_v8 = vld [vmem:[#allocation3 + $0x1230] sm:$0xff]  ;;  %v888_v9 = vld [vmem:[#allocation3 + $0x1338] sm:$0xff] }
 0x1e4   :  { %6153 = vmatprep.subr.mxu0 %v805_v10  ;;  %6186 = vmatprep.subr.mxu1 %v838_v11  ;;  %v870_v10 = vld [vmem:[#allocation3 + $0x12a8] sm:$0xff]  ;;  %v903_v11 = vld [vmem:[#allocation3 + $0x13b0] sm:$0xff] }
 0x1e5   :  { %6154 = vmatpush3.msra.mxu0 %v789_v12  ;;  %6187 = vmatpush3.msra.mxu1 %v822_v13  ;;  %v854_v12 = vld [vmem:[#allocation3 + $0x1228] sm:$0xff]  ;;  %v887_v13 = vld [vmem:[#allocation3 + $0x1330] sm:$0xff] }
 0x1e6   :  { %6155 = vmatprep.subr.mxu0 %v804_v14  ;;  %6188 = vmatprep.subr.mxu1 %v837_v15  ;;  %v869_v14 = vld [vmem:[#allocation3 + $0x12a0] sm:$0xff]  ;;  %v902_v15 = vld [vmem:[#allocation3 + $0x13a8] sm:$0xff] }
 0x1e7   :  { %6156 = vmatpush3.msra.mxu0 %v788_v16  ;;  %6189 = vmatpush3.msra.mxu1 %v821_v17  ;;  %v853_v16 = vld [vmem:[#allocation3 + $0x1220] sm:$0xff]  ;;  %v886_v17 = vld [vmem:[#allocation3 + $0x1328] sm:$0xff] }
 0x1e8   :  { %6157 = vmatprep.subr.mxu0 %v803_v18  ;;  %6190 = vmatprep.subr.mxu1 %v836_v19  ;;  %v868_v18 = vld [vmem:[#allocation3 + $0x1298] sm:$0xff]  ;;  %v901_v19 = vld [vmem:[#allocation3 + $0x13a0] sm:$0xff] }
 0x1e9   :  { %6158 = vmatpush3.msra.mxu0 %v787_v20  ;;  %6191 = vmatpush3.msra.mxu1 %v820_v21  ;;  %v852_v20 = vld [vmem:[#allocation3 + $0x1218] sm:$0xff]  ;;  %v885_v21 = vld [vmem:[#allocation3 + $0x1320] sm:$0xff] }
 0x1ea   :  { %6159 = vmatprep.subr.mxu0 %v802_v22  ;;  %6192 = vmatprep.subr.mxu1 %v835_v24  ;;  %v867_v22 = vld [vmem:[#allocation3 + $0x1290] sm:$0xff] }
 0x1eb   :  { %6160 = vmatpush3.msra.mxu0 %v786_v25  ;;  %6193 = vmatpush3.msra.mxu1 %v819_v26  ;;  %v851_v24 = vld [vmem:[#allocation3 + $0x1210] sm:$0xff]  ;;  %v884_v25 = vld [vmem:[#allocation3 + $0x1318] sm:$0xff]  ;;  %v866_v26 = vld [vmem:[#allocation3 + $0x1288] sm:$0xff] }
 0x1ec   :  { %6161 = vmatprep.subr.mxu0 %v801_v27  ;;  %6194 = vmatprep.subr.mxu1 %v834_v28  ;;  %v259_v27 = vld [vmem:[%s8049_s25 + $0x90] sm:$0xff] }
 0x1ed   :  { %6162 = vmatpush3.msra.mxu0 %v785_v29  ;;  %2563 = vmatprep.mubr.f32.mxu0 %v1326_v30  ;;  %v899_v28 = vld [vmem:[#allocation3 + $0x1390] sm:$0xff]  ;;  %v850_v29 = vld [vmem:[#allocation3 + $0x1208] sm:$0xff] }
 0x1ee   :  { %6195 = vmatpush3.msra.mxu1 %v818_v32  ;;  %2564 = vmatmul.mubr.f32.vlgmr.msra.gmra.mxu0 %v257_v23  ;;  %v900_v23 = vld [vmem:[#allocation3 + $0x1398] sm:$0xff]  ;;  %v883_v30 = vld [vmem:[#allocation3 + $0x1310] sm:$0xff]  ;;  %v898_v32 = vld [vmem:[#allocation3 + $0x1388] sm:$0xff] }
 0x1ef   :  { %6196 = vmatprep.subr.mxu1 %v833_v33  ;;  %6201 = vmatprep.subr.mxu0 %v880_v34  ;;  %v849_v33 = vld [vmem:[#allocation3 + $0x1200] sm:$0xff]  ;;  %v1328_v34 = vcombine.high %v259_v27, %v259_v27 }
 0x1f0   :  { %6197 = vmatpush3.msra.mxu1 %v817_v35  ;;  %2633 = vmatprep.mubr.f32.mxu1 %v1327_v36  ;;  %v260_v35 = vld [vmem:[%s8049_s25 + $0x98] sm:$0xff]  ;;  %v882_v36 = vld [vmem:[#allocation3 + $0x1308] sm:$0xff] }
 0x1f1   :  { %6202 = vmatpush3.msra.mxu0 %v864_v37  ;;  %2634 = vmatmul.mubr.f32.vlgmr.msra.gmra.mxu1 %v258_v31  ;;  %v865_v31 = vld [vmem:[#allocation3 + $0x1280] sm:$0xff] }
 0x1f2   :  { %6203 = vmatprep.subr.mxu0 %v879_v38  ;;  %6236 = vmatprep.subr.mxu1 %v912_v39  ;;  %v897_v37 = vld [vmem:[#allocation3 + $0x1380] sm:$0xff]  ;;  %v944_v38 = vld [vmem:[#allocation3 + $0x14f8] sm:$0xff] }
 0x1f3   :  { %6204 = vmatpush3.msra.mxu0 %v863_v40  ;;  %6237 = vmatpush3.msra.mxu1 %v896_v41  ;;  %v881_v39 = vld [vmem:[#allocation3 + $0x1300] sm:$0xff]  ;;  %v1329_v40 = vcombine.high %v260_v35, %v260_v35  ;;  %v928_v41 = vld [vmem:[#allocation3 + $0x1478] sm:$0xff] }
 0x1f4   :  { %6205 = vmatprep.subr.mxu0 %v878_v42  ;;  %6238 = vmatprep.subr.mxu1 %v911_v43  ;;  %v943_v42 = vld [vmem:[#allocation3 + $0x14f0] sm:$0xff]  ;;  %v976_v43 = vld [vmem:[#allocation3 + $0x15f8] sm:$0xff] }
 0x1f5   :  { %6206 = vmatpush3.msra.mxu0 %v862_v44  ;;  %6239 = vmatpush3.msra.mxu1 %v895_v45  ;;  %v927_v44 = vld [vmem:[#allocation3 + $0x1470] sm:$0xff]  ;;  %v960_v45 = vld [vmem:[#allocation3 + $0x1578] sm:$0xff] }
 0x1f6   :  { %6207 = vmatprep.subr.mxu0 %v877_v46  ;;  %6240 = vmatprep.subr.mxu1 %v910_v47  ;;  %v942_v46 = vld [vmem:[#allocation3 + $0x14e8] sm:$0xff]  ;;  %v975_v47 = vld [vmem:[#allocation3 + $0x15f0] sm:$0xff] }
 0x1f7   :  { %6208 = vmatpush3.msra.mxu0 %v861_v48  ;;  %6241 = vmatpush3.msra.mxu1 %v894_v49  ;;  %v926_v48 = vld [vmem:[#allocation3 + $0x1468] sm:$0xff]  ;;  %v959_v49 = vld [vmem:[#allocation3 + $0x1570] sm:$0xff] }
 0x1f8   :  { %6209 = vmatprep.subr.mxu0 %v876_v50  ;;  %6242 = vmatprep.subr.mxu1 %v909_v51  ;;  %v941_v50 = vld [vmem:[#allocation3 + $0x14e0] sm:$0xff]  ;;  %v974_v51 = vld [vmem:[#allocation3 + $0x15e8] sm:$0xff] }
 0x1f9   :  { %6210 = vmatpush3.msra.mxu0 %v860_v52  ;;  %6243 = vmatpush3.msra.mxu1 %v893_v53  ;;  %v925_v52 = vld [vmem:[#allocation3 + $0x1460] sm:$0xff]  ;;  %v958_v53 = vld [vmem:[#allocation3 + $0x1568] sm:$0xff] }
 0x1fa   :  { %6211 = vmatprep.subr.mxu0 %v875_v54  ;;  %6244 = vmatprep.subr.mxu1 %v908_v55  ;;  %v940_v54 = vld [vmem:[#allocation3 + $0x14d8] sm:$0xff]  ;;  %v973_v55 = vld [vmem:[#allocation3 + $0x15e0] sm:$0xff] }
 0x1fb   :  { %6212 = vmatpush3.msra.mxu0 %v859_v56  ;;  %6245 = vmatpush3.msra.mxu1 %v892_v57  ;;  %v924_v56 = vld [vmem:[#allocation3 + $0x1458] sm:$0xff]  ;;  %v957_v57 = vld [vmem:[#allocation3 + $0x1560] sm:$0xff] }
 0x1fc   :  { %6213 = vmatprep.subr.mxu0 %v874_v58  ;;  %6246 = vmatprep.subr.mxu1 %v907_v59  ;;  %v939_v58 = vld [vmem:[#allocation3 + $0x14d0] sm:$0xff]  ;;  %v972_v59 = vld [vmem:[#allocation3 + $0x15d8] sm:$0xff] }
 0x1fd   :  { %6214 = vmatpush3.msra.mxu0 %v858_v60  ;;  %6247 = vmatpush3.msra.mxu1 %v891_v61  ;;  %v923_v60 = vld [vmem:[#allocation3 + $0x1450] sm:$0xff]  ;;  %v956_v61 = vld [vmem:[#allocation3 + $0x1558] sm:$0xff] }
 0x1fe   :  { %6215 = vmatprep.subr.mxu0 %v873_v62  ;;  %6248 = vmatprep.subr.mxu1 %v906_v63  ;;  %v938_v62 = vld [vmem:[#allocation3 + $0x14c8] sm:$0xff]  ;;  %v971_v63 = vld [vmem:[#allocation3 + $0x15d0] sm:$0xff] }
 0x1ff   :  { %6216 = vmatpush3.msra.mxu0 %v857_v0  ;;  %6249 = vmatpush3.msra.mxu1 %v890_v1  ;;  %v922_v0 = vld [vmem:[#allocation3 + $0x1448] sm:$0xff]  ;;  %v955_v1 = vld [vmem:[#allocation3 + $0x1550] sm:$0xff] }
 0x200   :  { %6217 = vmatprep.subr.mxu0 %v872_v2  ;;  %6250 = vmatprep.subr.mxu1 %v905_v3  ;;  %v937_v2 = vld [vmem:[#allocation3 + $0x14c0] sm:$0xff]  ;;  %v970_v3 = vld [vmem:[#allocation3 + $0x15c8] sm:$0xff] }
 0x201   :  { %6218 = vmatpush3.msra.mxu0 %v856_v4  ;;  %6251 = vmatpush3.msra.mxu1 %v889_v5  ;;  %v921_v4 = vld [vmem:[#allocation3 + $0x1440] sm:$0xff]  ;;  %v954_v5 = vld [vmem:[#allocation3 + $0x1548] sm:$0xff] }
 0x202   :  { %6219 = vmatprep.subr.mxu0 %v871_v6  ;;  %6252 = vmatprep.subr.mxu1 %v904_v7  ;;  %v936_v6 = vld [vmem:[#allocation3 + $0x14b8] sm:$0xff]  ;;  %v969_v7 = vld [vmem:[#allocation3 + $0x15c0] sm:$0xff] }
 0x203   :  { %6220 = vmatpush3.msra.mxu0 %v855_v8  ;;  %6253 = vmatpush3.msra.mxu1 %v888_v9  ;;  %v920_v8 = vld [vmem:[#allocation3 + $0x1438] sm:$0xff]  ;;  %v953_v9 = vld [vmem:[#allocation3 + $0x1540] sm:$0xff] }
 0x204   :  { %6221 = vmatprep.subr.mxu0 %v870_v10  ;;  %6254 = vmatprep.subr.mxu1 %v903_v11  ;;  %v935_v10 = vld [vmem:[#allocation3 + $0x14b0] sm:$0xff]  ;;  %v968_v11 = vld [vmem:[#allocation3 + $0x15b8] sm:$0xff] }
 0x205   :  { %6222 = vmatpush3.msra.mxu0 %v854_v12  ;;  %6255 = vmatpush3.msra.mxu1 %v887_v13  ;;  %v919_v12 = vld [vmem:[#allocation3 + $0x1430] sm:$0xff]  ;;  %v952_v13 = vld [vmem:[#allocation3 + $0x1538] sm:$0xff] }
 0x206   :  { %6223 = vmatprep.subr.mxu0 %v869_v14  ;;  %6256 = vmatprep.subr.mxu1 %v902_v15  ;;  %v934_v14 = vld [vmem:[#allocation3 + $0x14a8] sm:$0xff]  ;;  %v967_v15 = vld [vmem:[#allocation3 + $0x15b0] sm:$0xff] }
 0x207   :  { %6224 = vmatpush3.msra.mxu0 %v853_v16  ;;  %6257 = vmatpush3.msra.mxu1 %v886_v17  ;;  %v918_v16 = vld [vmem:[#allocation3 + $0x1428] sm:$0xff]  ;;  %v951_v17 = vld [vmem:[#allocation3 + $0x1530] sm:$0xff] }
 0x208   :  { %6225 = vmatprep.subr.mxu0 %v868_v18  ;;  %6258 = vmatprep.subr.mxu1 %v901_v19  ;;  %v933_v18 = vld [vmem:[#allocation3 + $0x14a0] sm:$0xff]  ;;  %v966_v19 = vld [vmem:[#allocation3 + $0x15a8] sm:$0xff] }
 0x209   :  { %6226 = vmatpush3.msra.mxu0 %v852_v20  ;;  %6259 = vmatpush3.msra.mxu1 %v885_v21  ;;  %v917_v20 = vld [vmem:[#allocation3 + $0x1420] sm:$0xff]  ;;  %v950_v21 = vld [vmem:[#allocation3 + $0x1528] sm:$0xff] }
 0x20a   :  { %6227 = vmatprep.subr.mxu0 %v867_v22  ;;  %6260 = vmatprep.subr.mxu1 %v900_v23  ;;  %v932_v22 = vld [vmem:[#allocation3 + $0x1498] sm:$0xff]  ;;  %v965_v23 = vld [vmem:[#allocation3 + $0x15a0] sm:$0xff] }
 0x20b   :  { %6228 = vmatpush3.msra.mxu0 %v851_v24  ;;  %6261 = vmatpush3.msra.mxu1 %v884_v25  ;;  %v916_v24 = vld [vmem:[#allocation3 + $0x1418] sm:$0xff]  ;;  %v949_v25 = vld [vmem:[#allocation3 + $0x1520] sm:$0xff] }
 0x20c   :  { %6229 = vmatprep.subr.mxu0 %v866_v26  ;;  %6262 = vmatprep.subr.mxu1 %v899_v28  ;;  %v931_v26 = vld [vmem:[#allocation3 + $0x1490] sm:$0xff] }
 0x20d   :  { %6230 = vmatpush3.msra.mxu0 %v850_v29  ;;  %6263 = vmatpush3.msra.mxu1 %v883_v30  ;;  %v915_v28 = vld [vmem:[#allocation3 + $0x1410] sm:$0xff]  ;;  %v948_v29 = vld [vmem:[#allocation3 + $0x1518] sm:$0xff]  ;;  %v930_v30 = vld [vmem:[#allocation3 + $0x1488] sm:$0xff] }
 0x20e   :  { %6231 = vmatprep.subr.mxu0 %v865_v31  ;;  %6264 = vmatprep.subr.mxu1 %v898_v32  ;;  %v261_v31 = vld [vmem:[%s8049_s25 + $0xa0] sm:$0xff]  ;;  %v963_v32 = vld [vmem:[#allocation3 + $0x1590] sm:$0xff] }
 0x20f   :  { %6232 = vmatpush3.msra.mxu0 %v849_v33  ;;  %2703 = vmatprep.mubr.f32.mxu0 %v1328_v34  ;;  %v914_v33 = vld [vmem:[#allocation3 + $0x1408] sm:$0xff]  ;;  %v947_v34 = vld [vmem:[#allocation3 + $0x1510] sm:$0xff] }
 0x210   :  { %6265 = vmatpush3.msra.mxu1 %v882_v36  ;;  %2704 = vmatmul.mubr.f32.vlgmr.msra.gmra.mxu0 %v259_v27  ;;  %v964_v27 = vld [vmem:[#allocation3 + $0x1598] sm:$0xff]  ;;  %v962_v36 = vld [vmem:[#allocation3 + $0x1588] sm:$0xff] }
 0x211   :  { %6266 = vmatprep.subr.mxu1 %v897_v37  ;;  %6271 = vmatprep.subr.mxu0 %v944_v38  ;;  %v913_v37 = vld [vmem:[#allocation3 + $0x1400] sm:$0xff]  ;;  %v1330_v38 = vcombine.high %v261_v31, %v261_v31 }
 0x212   :  { %6267 = vmatpush3.msra.mxu1 %v881_v39  ;;  %2773 = vmatprep.mubr.f32.mxu1 %v1329_v40  ;;  %v262_v39 = vld [vmem:[%s8049_s25 + $0xa8] sm:$0xff] }
 0x213   :  { %6272 = vmatpush3.msra.mxu0 %v928_v41  ;;  %2774 = vmatmul.mubr.f32.vlgmr.msra.gmra.mxu1 %v260_v35  ;;  %v929_v35 = vld [vmem:[#allocation3 + $0x1480] sm:$0xff]  ;;  %v946_v40 = vld [vmem:[#allocation3 + $0x1508] sm:$0xff] }
 0x214   :  { %6273 = vmatprep.subr.mxu0 %v943_v42  ;;  %6306 = vmatprep.subr.mxu1 %v976_v43  ;;  %v961_v41 = vld [vmem:[#allocation3 + $0x1580] sm:$0xff]  ;;  %v1008_v42 = vld [vmem:[#allocation3 + $0x16f8] sm:$0xff] }
 0x215   :  { %6274 = vmatpush3.msra.mxu0 %v927_v44  ;;  %6307 = vmatpush3.msra.mxu1 %v960_v45  ;;  %v945_v43 = vld [vmem:[#allocation3 + $0x1500] sm:$0xff]  ;;  %v1331_v44 = vcombine.high %v262_v39, %v262_v39  ;;  %v992_v45 = vld [vmem:[#allocation3 + $0x1678] sm:$0xff] }
 0x216   :  { %6275 = vmatprep.subr.mxu0 %v942_v46  ;;  %6308 = vmatprep.subr.mxu1 %v975_v47  ;;  %v1007_v46 = vld [vmem:[#allocation3 + $0x16f0] sm:$0xff]  ;;  %v1040_v47 = vld [vmem:[#allocation3 + $0x17f8] sm:$0xff] }
 0x217   :  { %6276 = vmatpush3.msra.mxu0 %v926_v48  ;;  %6309 = vmatpush3.msra.mxu1 %v959_v49  ;;  %v991_v48 = vld [vmem:[#allocation3 + $0x1670] sm:$0xff]  ;;  %v1024_v49 = vld [vmem:[#allocation3 + $0x1778] sm:$0xff] }
 0x218   :  { %6277 = vmatprep.subr.mxu0 %v941_v50  ;;  %6310 = vmatprep.subr.mxu1 %v974_v51  ;;  %v1006_v50 = vld [vmem:[#allocation3 + $0x16e8] sm:$0xff]  ;;  %v1039_v51 = vld [vmem:[#allocation3 + $0x17f0] sm:$0xff] }
 0x219   :  { %6278 = vmatpush3.msra.mxu0 %v925_v52  ;;  %6311 = vmatpush3.msra.mxu1 %v958_v53  ;;  %v990_v52 = vld [vmem:[#allocation3 + $0x1668] sm:$0xff]  ;;  %v1023_v53 = vld [vmem:[#allocation3 + $0x1770] sm:$0xff] }
 0x21a   :  { %6279 = vmatprep.subr.mxu0 %v940_v54  ;;  %6312 = vmatprep.subr.mxu1 %v973_v55  ;;  %v1005_v54 = vld [vmem:[#allocation3 + $0x16e0] sm:$0xff]  ;;  %v1038_v55 = vld [vmem:[#allocation3 + $0x17e8] sm:$0xff] }
 0x21b   :  { %6280 = vmatpush3.msra.mxu0 %v924_v56  ;;  %6313 = vmatpush3.msra.mxu1 %v957_v57  ;;  %v989_v56 = vld [vmem:[#allocation3 + $0x1660] sm:$0xff]  ;;  %v1022_v57 = vld [vmem:[#allocation3 + $0x1768] sm:$0xff] }
 0x21c   :  { %6281 = vmatprep.subr.mxu0 %v939_v58  ;;  %6314 = vmatprep.subr.mxu1 %v972_v59  ;;  %v1004_v58 = vld [vmem:[#allocation3 + $0x16d8] sm:$0xff]  ;;  %v1037_v59 = vld [vmem:[#allocation3 + $0x17e0] sm:$0xff] }
 0x21d   :  { %6282 = vmatpush3.msra.mxu0 %v923_v60  ;;  %6315 = vmatpush3.msra.mxu1 %v956_v61  ;;  %v988_v60 = vld [vmem:[#allocation3 + $0x1658] sm:$0xff]  ;;  %v1021_v61 = vld [vmem:[#allocation3 + $0x1760] sm:$0xff] }
 0x21e   :  { %6283 = vmatprep.subr.mxu0 %v938_v62  ;;  %6316 = vmatprep.subr.mxu1 %v971_v63  ;;  %v1003_v62 = vld [vmem:[#allocation3 + $0x16d0] sm:$0xff]  ;;  %v1036_v63 = vld [vmem:[#allocation3 + $0x17d8] sm:$0xff] }
 0x21f   :  { %6284 = vmatpush3.msra.mxu0 %v922_v0  ;;  %6317 = vmatpush3.msra.mxu1 %v955_v1  ;;  %v987_v0 = vld [vmem:[#allocation3 + $0x1650] sm:$0xff]  ;;  %v1020_v1 = vld [vmem:[#allocation3 + $0x1758] sm:$0xff] }
 0x220   :  { %6285 = vmatprep.subr.mxu0 %v937_v2  ;;  %6318 = vmatprep.subr.mxu1 %v970_v3  ;;  %v1002_v2 = vld [vmem:[#allocation3 + $0x16c8] sm:$0xff]  ;;  %v1035_v3 = vld [vmem:[#allocation3 + $0x17d0] sm:$0xff] }
 0x221   :  { %6286 = vmatpush3.msra.mxu0 %v921_v4  ;;  %6319 = vmatpush3.msra.mxu1 %v954_v5  ;;  %v986_v4 = vld [vmem:[#allocation3 + $0x1648] sm:$0xff]  ;;  %v1019_v5 = vld [vmem:[#allocation3 + $0x1750] sm:$0xff] }
 0x222   :  { %6287 = vmatprep.subr.mxu0 %v936_v6  ;;  %6320 = vmatprep.subr.mxu1 %v969_v7  ;;  %v1001_v6 = vld [vmem:[#allocation3 + $0x16c0] sm:$0xff]  ;;  %v1034_v7 = vld [vmem:[#allocation3 + $0x17c8] sm:$0xff] }
 0x223   :  { %6288 = vmatpush3.msra.mxu0 %v920_v8  ;;  %6321 = vmatpush3.msra.mxu1 %v953_v9  ;;  %v985_v8 = vld [vmem:[#allocation3 + $0x1640] sm:$0xff]  ;;  %v1018_v9 = vld [vmem:[#allocation3 + $0x1748] sm:$0xff] }
 0x224   :  { %6289 = vmatprep.subr.mxu0 %v935_v10  ;;  %6322 = vmatprep.subr.mxu1 %v968_v11  ;;  %v1000_v10 = vld [vmem:[#allocation3 + $0x16b8] sm:$0xff]  ;;  %v1033_v11 = vld [vmem:[#allocation3 + $0x17c0] sm:$0xff] }
 0x225   :  { %6290 = vmatpush3.msra.mxu0 %v919_v12  ;;  %6323 = vmatpush3.msra.mxu1 %v952_v13  ;;  %v984_v12 = vld [vmem:[#allocation3 + $0x1638] sm:$0xff]  ;;  %v1017_v13 = vld [vmem:[#allocation3 + $0x1740] sm:$0xff] }
 0x226   :  { %6291 = vmatprep.subr.mxu0 %v934_v14  ;;  %6324 = vmatprep.subr.mxu1 %v967_v15  ;;  %v999_v14 = vld [vmem:[#allocation3 + $0x16b0] sm:$0xff]  ;;  %v1032_v15 = vld [vmem:[#allocation3 + $0x17b8] sm:$0xff] }
 0x227   :  { %6292 = vmatpush3.msra.mxu0 %v918_v16  ;;  %6325 = vmatpush3.msra.mxu1 %v951_v17  ;;  %v983_v16 = vld [vmem:[#allocation3 + $0x1630] sm:$0xff]  ;;  %v1016_v17 = vld [vmem:[#allocation3 + $0x1738] sm:$0xff] }
 0x228   :  { %6293 = vmatprep.subr.mxu0 %v933_v18  ;;  %6326 = vmatprep.subr.mxu1 %v966_v19  ;;  %v998_v18 = vld [vmem:[#allocation3 + $0x16a8] sm:$0xff]  ;;  %v1031_v19 = vld [vmem:[#allocation3 + $0x17b0] sm:$0xff] }
 0x229   :  { %6294 = vmatpush3.msra.mxu0 %v917_v20  ;;  %6327 = vmatpush3.msra.mxu1 %v950_v21  ;;  %v982_v20 = vld [vmem:[#allocation3 + $0x1628] sm:$0xff]  ;;  %v1015_v21 = vld [vmem:[#allocation3 + $0x1730] sm:$0xff] }
 0x22a   :  { %6295 = vmatprep.subr.mxu0 %v932_v22  ;;  %6328 = vmatprep.subr.mxu1 %v965_v23  ;;  %v997_v22 = vld [vmem:[#allocation3 + $0x16a0] sm:$0xff]  ;;  %v1030_v23 = vld [vmem:[#allocation3 + $0x17a8] sm:$0xff] }
 0x22b   :  { %6296 = vmatpush3.msra.mxu0 %v916_v24  ;;  %6329 = vmatpush3.msra.mxu1 %v949_v25  ;;  %v981_v24 = vld [vmem:[#allocation3 + $0x1620] sm:$0xff]  ;;  %v1014_v25 = vld [vmem:[#allocation3 + $0x1728] sm:$0xff] }
 0x22c   :  { %6297 = vmatprep.subr.mxu0 %v931_v26  ;;  %6330 = vmatprep.subr.mxu1 %v964_v27  ;;  %v996_v26 = vld [vmem:[#allocation3 + $0x1698] sm:$0xff]  ;;  %v1029_v27 = vld [vmem:[#allocation3 + $0x17a0] sm:$0xff] }
 0x22d   :  { %6298 = vmatpush3.msra.mxu0 %v915_v28  ;;  %6331 = vmatpush3.msra.mxu1 %v948_v29  ;;  %v980_v28 = vld [vmem:[#allocation3 + $0x1618] sm:$0xff]  ;;  %v1013_v29 = vld [vmem:[#allocation3 + $0x1720] sm:$0xff] }
 0x22e   :  { %6299 = vmatprep.subr.mxu0 %v930_v30  ;;  %6332 = vmatprep.subr.mxu1 %v963_v32  ;;  %v995_v30 = vld [vmem:[#allocation3 + $0x1690] sm:$0xff] }
 0x22f   :  { %6300 = vmatpush3.msra.mxu0 %v914_v33  ;;  %6333 = vmatpush3.msra.mxu1 %v947_v34  ;;  %v979_v32 = vld [vmem:[#allocation3 + $0x1610] sm:$0xff]  ;;  %v1012_v33 = vld [vmem:[#allocation3 + $0x1718] sm:$0xff]  ;;  %v994_v34 = vld [vmem:[#allocation3 + $0x1688] sm:$0xff] }
 0x230   :  { %6301 = vmatprep.subr.mxu0 %v929_v35  ;;  %6334 = vmatprep.subr.mxu1 %v962_v36  ;;  %v263_v35 = vld [vmem:[%s8049_s25 + $0xb0] sm:$0xff] }
 0x231   :  { %6302 = vmatpush3.msra.mxu0 %v913_v37  ;;  %2843 = vmatprep.mubr.f32.mxu0 %v1330_v38  ;;  %v1027_v36 = vld [vmem:[#allocation3 + $0x1790] sm:$0xff]  ;;  %v978_v37 = vld [vmem:[#allocation3 + $0x1608] sm:$0xff] }
 0x232   :  { %6335 = vmatpush3.msra.mxu1 %v946_v40  ;;  %2844 = vmatmul.mubr.f32.vlgmr.msra.gmra.mxu0 %v261_v31  ;;  %v1028_v31 = vld [vmem:[#allocation3 + $0x1798] sm:$0xff]  ;;  %v1011_v38 = vld [vmem:[#allocation3 + $0x1710] sm:$0xff]  ;;  %v1026_v40 = vld [vmem:[#allocation3 + $0x1788] sm:$0xff] }
 0x233   :  { %6336 = vmatprep.subr.mxu1 %v961_v41  ;;  %6341 = vmatprep.subr.mxu0 %v1008_v42  ;;  %v977_v41 = vld [vmem:[#allocation3 + $0x1600] sm:$0xff]  ;;  %v1332_v42 = vcombine.high %v263_v35, %v263_v35 }
 0x234   :  { %6337 = vmatpush3.msra.mxu1 %v945_v43  ;;  %2913 = vmatprep.mubr.f32.mxu1 %v1331_v44  ;;  %v264_v43 = vld [vmem:[%s8049_s25 + $0xb8] sm:$0xff]  ;;  %v1010_v44 = vld [vmem:[#allocation3 + $0x1708] sm:$0xff] }
 0x235   :  { %6342 = vmatpush3.msra.mxu0 %v992_v45  ;;  %2914 = vmatmul.mubr.f32.vlgmr.msra.gmra.mxu1 %v262_v39  ;;  %v993_v39 = vld [vmem:[#allocation3 + $0x1680] sm:$0xff] }
 0x236   :  { %6343 = vmatprep.subr.mxu0 %v1007_v46  ;;  %6376 = vmatprep.subr.mxu1 %v1040_v47  ;;  %v1025_v45 = vld [vmem:[#allocation3 + $0x1780] sm:$0xff]  ;;  %v1072_v46 = vld [vmem:[#allocation3 + $0x18f8] sm:$0xff] }
 0x237   :  { %6344 = vmatpush3.msra.mxu0 %v991_v48  ;;  %6377 = vmatpush3.msra.mxu1 %v1024_v49  ;;  %v1009_v47 = vld [vmem:[#allocation3 + $0x1700] sm:$0xff]  ;;  %v1333_v48 = vcombine.high %v264_v43, %v264_v43  ;;  %v1056_v49 = vld [vmem:[#allocation3 + $0x1878] sm:$0xff] }
 0x238   :  { %6345 = vmatprep.subr.mxu0 %v1006_v50  ;;  %6378 = vmatprep.subr.mxu1 %v1039_v51  ;;  %v1071_v50 = vld [vmem:[#allocation3 + $0x18f0] sm:$0xff]  ;;  %v1104_v51 = vld [vmem:[#allocation3 + $0x19f8] sm:$0xff] }
 0x239   :  { %6346 = vmatpush3.msra.mxu0 %v990_v52  ;;  %6379 = vmatpush3.msra.mxu1 %v1023_v53  ;;  %v1055_v52 = vld [vmem:[#allocation3 + $0x1870] sm:$0xff]  ;;  %v1088_v53 = vld [vmem:[#allocation3 + $0x1978] sm:$0xff] }
 0x23a   :  { %6347 = vmatprep.subr.mxu0 %v1005_v54  ;;  %6380 = vmatprep.subr.mxu1 %v1038_v55  ;;  %v1070_v54 = vld [vmem:[#allocation3 + $0x18e8] sm:$0xff]  ;;  %v1103_v55 = vld [vmem:[#allocation3 + $0x19f0] sm:$0xff] }
 0x23b   :  { %6348 = vmatpush3.msra.mxu0 %v989_v56  ;;  %6381 = vmatpush3.msra.mxu1 %v1022_v57  ;;  %v1054_v56 = vld [vmem:[#allocation3 + $0x1868] sm:$0xff]  ;;  %v1087_v57 = vld [vmem:[#allocation3 + $0x1970] sm:$0xff] }
 0x23c   :  { %6349 = vmatprep.subr.mxu0 %v1004_v58  ;;  %6382 = vmatprep.subr.mxu1 %v1037_v59  ;;  %v1069_v58 = vld [vmem:[#allocation3 + $0x18e0] sm:$0xff]  ;;  %v1102_v59 = vld [vmem:[#allocation3 + $0x19e8] sm:$0xff] }
 0x23d   :  { %6350 = vmatpush3.msra.mxu0 %v988_v60  ;;  %6383 = vmatpush3.msra.mxu1 %v1021_v61  ;;  %v1053_v60 = vld [vmem:[#allocation3 + $0x1860] sm:$0xff]  ;;  %v1086_v61 = vld [vmem:[#allocation3 + $0x1968] sm:$0xff] }
 0x23e   :  { %6351 = vmatprep.subr.mxu0 %v1003_v62  ;;  %6384 = vmatprep.subr.mxu1 %v1036_v63  ;;  %v1068_v62 = vld [vmem:[#allocation3 + $0x18d8] sm:$0xff]  ;;  %v1101_v63 = vld [vmem:[#allocation3 + $0x19e0] sm:$0xff] }
 0x23f   :  { %6352 = vmatpush3.msra.mxu0 %v987_v0  ;;  %6385 = vmatpush3.msra.mxu1 %v1020_v1  ;;  %v1052_v0 = vld [vmem:[#allocation3 + $0x1858] sm:$0xff]  ;;  %v1085_v1 = vld [vmem:[#allocation3 + $0x1960] sm:$0xff] }
 0x240   :  { %6353 = vmatprep.subr.mxu0 %v1002_v2  ;;  %6386 = vmatprep.subr.mxu1 %v1035_v3  ;;  %v1067_v2 = vld [vmem:[#allocation3 + $0x18d0] sm:$0xff]  ;;  %v1100_v3 = vld [vmem:[#allocation3 + $0x19d8] sm:$0xff] }
 0x241   :  { %6354 = vmatpush3.msra.mxu0 %v986_v4  ;;  %6387 = vmatpush3.msra.mxu1 %v1019_v5  ;;  %v1051_v4 = vld [vmem:[#allocation3 + $0x1850] sm:$0xff]  ;;  %v1084_v5 = vld [vmem:[#allocation3 + $0x1958] sm:$0xff] }
 0x242   :  { %6355 = vmatprep.subr.mxu0 %v1001_v6  ;;  %6388 = vmatprep.subr.mxu1 %v1034_v7  ;;  %v1066_v6 = vld [vmem:[#allocation3 + $0x18c8] sm:$0xff]  ;;  %v1099_v7 = vld [vmem:[#allocation3 + $0x19d0] sm:$0xff] }
 0x243   :  { %6356 = vmatpush3.msra.mxu0 %v985_v8  ;;  %6389 = vmatpush3.msra.mxu1 %v1018_v9  ;;  %v1050_v8 = vld [vmem:[#allocation3 + $0x1848] sm:$0xff]  ;;  %v1083_v9 = vld [vmem:[#allocation3 + $0x1950] sm:$0xff] }
 0x244   :  { %6357 = vmatprep.subr.mxu0 %v1000_v10  ;;  %6390 = vmatprep.subr.mxu1 %v1033_v11  ;;  %v1065_v10 = vld [vmem:[#allocation3 + $0x18c0] sm:$0xff]  ;;  %v1098_v11 = vld [vmem:[#allocation3 + $0x19c8] sm:$0xff] }
 0x245   :  { %6358 = vmatpush3.msra.mxu0 %v984_v12  ;;  %6391 = vmatpush3.msra.mxu1 %v1017_v13  ;;  %v1049_v12 = vld [vmem:[#allocation3 + $0x1840] sm:$0xff]  ;;  %v1082_v13 = vld [vmem:[#allocation3 + $0x1948] sm:$0xff] }
 0x246   :  { %6359 = vmatprep.subr.mxu0 %v999_v14  ;;  %6392 = vmatprep.subr.mxu1 %v1032_v15  ;;  %v1064_v14 = vld [vmem:[#allocation3 + $0x18b8] sm:$0xff]  ;;  %v1097_v15 = vld [vmem:[#allocation3 + $0x19c0] sm:$0xff] }
 0x247   :  { %6360 = vmatpush3.msra.mxu0 %v983_v16  ;;  %6393 = vmatpush3.msra.mxu1 %v1016_v17  ;;  %v1048_v16 = vld [vmem:[#allocation3 + $0x1838] sm:$0xff]  ;;  %v1081_v17 = vld [vmem:[#allocation3 + $0x1940] sm:$0xff] }
 0x248   :  { %6361 = vmatprep.subr.mxu0 %v998_v18  ;;  %6394 = vmatprep.subr.mxu1 %v1031_v19  ;;  %v1063_v18 = vld [vmem:[#allocation3 + $0x18b0] sm:$0xff]  ;;  %v1096_v19 = vld [vmem:[#allocation3 + $0x19b8] sm:$0xff] }
 0x249   :  { %6362 = vmatpush3.msra.mxu0 %v982_v20  ;;  %6395 = vmatpush3.msra.mxu1 %v1015_v21  ;;  %v1047_v20 = vld [vmem:[#allocation3 + $0x1830] sm:$0xff]  ;;  %v1080_v21 = vld [vmem:[#allocation3 + $0x1938] sm:$0xff] }
 0x24a   :  { %6363 = vmatprep.subr.mxu0 %v997_v22  ;;  %6396 = vmatprep.subr.mxu1 %v1030_v23  ;;  %v1062_v22 = vld [vmem:[#allocation3 + $0x18a8] sm:$0xff]  ;;  %v1095_v23 = vld [vmem:[#allocation3 + $0x19b0] sm:$0xff] }
 0x24b   :  { %6364 = vmatpush3.msra.mxu0 %v981_v24  ;;  %6397 = vmatpush3.msra.mxu1 %v1014_v25  ;;  %v1046_v24 = vld [vmem:[#allocation3 + $0x1828] sm:$0xff]  ;;  %v1079_v25 = vld [vmem:[#allocation3 + $0x1930] sm:$0xff] }
 0x24c   :  { %6365 = vmatprep.subr.mxu0 %v996_v26  ;;  %6398 = vmatprep.subr.mxu1 %v1029_v27  ;;  %v1061_v26 = vld [vmem:[#allocation3 + $0x18a0] sm:$0xff]  ;;  %v1094_v27 = vld [vmem:[#allocation3 + $0x19a8] sm:$0xff] }
 0x24d   :  { %6366 = vmatpush3.msra.mxu0 %v980_v28  ;;  %6399 = vmatpush3.msra.mxu1 %v1013_v29  ;;  %v1045_v28 = vld [vmem:[#allocation3 + $0x1820] sm:$0xff]  ;;  %v1078_v29 = vld [vmem:[#allocation3 + $0x1928] sm:$0xff] }
 0x24e   :  { %6367 = vmatprep.subr.mxu0 %v995_v30  ;;  %6400 = vmatprep.subr.mxu1 %v1028_v31  ;;  %v1060_v30 = vld [vmem:[#allocation3 + $0x1898] sm:$0xff]  ;;  %v1093_v31 = vld [vmem:[#allocation3 + $0x19a0] sm:$0xff] }
 0x24f   :  { %6368 = vmatpush3.msra.mxu0 %v979_v32  ;;  %6401 = vmatpush3.msra.mxu1 %v1012_v33  ;;  %v1044_v32 = vld [vmem:[#allocation3 + $0x1818] sm:$0xff]  ;;  %v1077_v33 = vld [vmem:[#allocation3 + $0x1920] sm:$0xff] }
 0x250   :  { %6369 = vmatprep.subr.mxu0 %v994_v34  ;;  %6402 = vmatprep.subr.mxu1 %v1027_v36  ;;  %v1059_v34 = vld [vmem:[#allocation3 + $0x1890] sm:$0xff] }
 0x251   :  { %6370 = vmatpush3.msra.mxu0 %v978_v37  ;;  %6403 = vmatpush3.msra.mxu1 %v1011_v38  ;;  %v1043_v36 = vld [vmem:[#allocation3 + $0x1810] sm:$0xff]  ;;  %v1076_v37 = vld [vmem:[#allocation3 + $0x1918] sm:$0xff]  ;;  %v1058_v38 = vld [vmem:[#allocation3 + $0x1888] sm:$0xff] }
 0x252   :  { %6371 = vmatprep.subr.mxu0 %v993_v39  ;;  %6404 = vmatprep.subr.mxu1 %v1026_v40  ;;  %v265_v39 = vld [vmem:[%s8049_s25 + $0xc0] sm:$0xff]  ;;  %v1091_v40 = vld [vmem:[#allocation3 + $0x1990] sm:$0xff] }
 0x253   :  { %6372 = vmatpush3.msra.mxu0 %v977_v41  ;;  %2983 = vmatprep.mubr.f32.mxu0 %v1332_v42  ;;  %v1042_v41 = vld [vmem:[#allocation3 + $0x1808] sm:$0xff]  ;;  %v1075_v42 = vld [vmem:[#allocation3 + $0x1910] sm:$0xff] }
 0x254   :  { %6405 = vmatpush3.msra.mxu1 %v1010_v44  ;;  %2984 = vmatmul.mubr.f32.vlgmr.msra.gmra.mxu0 %v263_v35  ;;  %v1092_v35 = vld [vmem:[#allocation3 + $0x1998] sm:$0xff]  ;;  %v1090_v44 = vld [vmem:[#allocation3 + $0x1988] sm:$0xff] }
 0x255   :  { %6406 = vmatprep.subr.mxu1 %v1025_v45  ;;  %6411 = vmatprep.subr.mxu0 %v1072_v46  ;;  %v1041_v45 = vld [vmem:[#allocation3 + $0x1800] sm:$0xff]  ;;  %v1334_v46 = vcombine.high %v265_v39, %v265_v39 }
 0x256   :  { %6407 = vmatpush3.msra.mxu1 %v1009_v47  ;;  %3053 = vmatprep.mubr.f32.mxu1 %v1333_v48  ;;  %v266_v47 = vld [vmem:[%s8049_s25 + $0xc8] sm:$0xff] }
 0x257   :  { %6412 = vmatpush3.msra.mxu0 %v1056_v49  ;;  %3054 = vmatmul.mubr.f32.vlgmr.msra.gmra.mxu1 %v264_v43  ;;  %v1057_v43 = vld [vmem:[#allocation3 + $0x1880] sm:$0xff]  ;;  %v1074_v48 = vld [vmem:[#allocation3 + $0x1908] sm:$0xff] }
 0x258   :  { %6413 = vmatprep.subr.mxu0 %v1071_v50  ;;  %6446 = vmatprep.subr.mxu1 %v1104_v51  ;;  %v1089_v49 = vld [vmem:[#allocation3 + $0x1980] sm:$0xff]  ;;  %v1136_v50 = vld [vmem:[#allocation3 + $0x1af8] sm:$0xff] }
 0x259   :  { %6414 = vmatpush3.msra.mxu0 %v1055_v52  ;;  %6447 = vmatpush3.msra.mxu1 %v1088_v53  ;;  %v1073_v51 = vld [vmem:[#allocation3 + $0x1900] sm:$0xff]  ;;  %v1335_v52 = vcombine.high %v266_v47, %v266_v47  ;;  %v1120_v53 = vld [vmem:[#allocation3 + $0x1a78] sm:$0xff] }
 0x25a   :  { %6415 = vmatprep.subr.mxu0 %v1070_v54  ;;  %6448 = vmatprep.subr.mxu1 %v1103_v55  ;;  %v1135_v54 = vld [vmem:[#allocation3 + $0x1af0] sm:$0xff]  ;;  %v1168_v55 = vld [vmem:[#allocation3 + $0x1bf8] sm:$0xff] }
 0x25b   :  { %6416 = vmatpush3.msra.mxu0 %v1054_v56  ;;  %6449 = vmatpush3.msra.mxu1 %v1087_v57  ;;  %v1119_v56 = vld [vmem:[#allocation3 + $0x1a70] sm:$0xff]  ;;  %v1152_v57 = vld [vmem:[#allocation3 + $0x1b78] sm:$0xff] }
 0x25c   :  { %6417 = vmatprep.subr.mxu0 %v1069_v58  ;;  %6450 = vmatprep.subr.mxu1 %v1102_v59  ;;  %v1134_v58 = vld [vmem:[#allocation3 + $0x1ae8] sm:$0xff]  ;;  %v1167_v59 = vld [vmem:[#allocation3 + $0x1bf0] sm:$0xff] }
 0x25d   :  { %6418 = vmatpush3.msra.mxu0 %v1053_v60  ;;  %6451 = vmatpush3.msra.mxu1 %v1086_v61  ;;  %v1118_v60 = vld [vmem:[#allocation3 + $0x1a68] sm:$0xff]  ;;  %v1151_v61 = vld [vmem:[#allocation3 + $0x1b70] sm:$0xff] }
 0x25e   :  { %6419 = vmatprep.subr.mxu0 %v1068_v62  ;;  %6452 = vmatprep.subr.mxu1 %v1101_v63  ;;  %v1133_v62 = vld [vmem:[#allocation3 + $0x1ae0] sm:$0xff]  ;;  %v1166_v63 = vld [vmem:[#allocation3 + $0x1be8] sm:$0xff] }
 0x25f   :  { %6420 = vmatpush3.msra.mxu0 %v1052_v0  ;;  %6453 = vmatpush3.msra.mxu1 %v1085_v1  ;;  %v1117_v0 = vld [vmem:[#allocation3 + $0x1a60] sm:$0xff]  ;;  %v1150_v1 = vld [vmem:[#allocation3 + $0x1b68] sm:$0xff] }
 0x260   :  { %6421 = vmatprep.subr.mxu0 %v1067_v2  ;;  %6454 = vmatprep.subr.mxu1 %v1100_v3  ;;  %v1132_v2 = vld [vmem:[#allocation3 + $0x1ad8] sm:$0xff]  ;;  %v1165_v3 = vld [vmem:[#allocation3 + $0x1be0] sm:$0xff] }
 0x261   :  { %6422 = vmatpush3.msra.mxu0 %v1051_v4  ;;  %6455 = vmatpush3.msra.mxu1 %v1084_v5  ;;  %v1116_v4 = vld [vmem:[#allocation3 + $0x1a58] sm:$0xff]  ;;  %v1149_v5 = vld [vmem:[#allocation3 + $0x1b60] sm:$0xff] }
 0x262   :  { %6423 = vmatprep.subr.mxu0 %v1066_v6  ;;  %6456 = vmatprep.subr.mxu1 %v1099_v7  ;;  %v1131_v6 = vld [vmem:[#allocation3 + $0x1ad0] sm:$0xff]  ;;  %v1164_v7 = vld [vmem:[#allocation3 + $0x1bd8] sm:$0xff] }
 0x263   :  { %6424 = vmatpush3.msra.mxu0 %v1050_v8  ;;  %6457 = vmatpush3.msra.mxu1 %v1083_v9  ;;  %v1115_v8 = vld [vmem:[#allocation3 + $0x1a50] sm:$0xff]  ;;  %v1148_v9 = vld [vmem:[#allocation3 + $0x1b58] sm:$0xff] }
 0x264   :  { %6425 = vmatprep.subr.mxu0 %v1065_v10  ;;  %6458 = vmatprep.subr.mxu1 %v1098_v11  ;;  %v1130_v10 = vld [vmem:[#allocation3 + $0x1ac8] sm:$0xff]  ;;  %v1163_v11 = vld [vmem:[#allocation3 + $0x1bd0] sm:$0xff] }
 0x265   :  { %6426 = vmatpush3.msra.mxu0 %v1049_v12  ;;  %6459 = vmatpush3.msra.mxu1 %v1082_v13  ;;  %v1114_v12 = vld [vmem:[#allocation3 + $0x1a48] sm:$0xff]  ;;  %v1147_v13 = vld [vmem:[#allocation3 + $0x1b50] sm:$0xff] }
 0x266   :  { %6427 = vmatprep.subr.mxu0 %v1064_v14  ;;  %6460 = vmatprep.subr.mxu1 %v1097_v15  ;;  %v1129_v14 = vld [vmem:[#allocation3 + $0x1ac0] sm:$0xff]  ;;  %v1162_v15 = vld [vmem:[#allocation3 + $0x1bc8] sm:$0xff] }
 0x267   :  { %6428 = vmatpush3.msra.mxu0 %v1048_v16  ;;  %6461 = vmatpush3.msra.mxu1 %v1081_v17  ;;  %v1113_v16 = vld [vmem:[#allocation3 + $0x1a40] sm:$0xff]  ;;  %v1146_v17 = vld [vmem:[#allocation3 + $0x1b48] sm:$0xff] }
 0x268   :  { %6429 = vmatprep.subr.mxu0 %v1063_v18  ;;  %6462 = vmatprep.subr.mxu1 %v1096_v19  ;;  %v1128_v18 = vld [vmem:[#allocation3 + $0x1ab8] sm:$0xff]  ;;  %v1161_v19 = vld [vmem:[#allocation3 + $0x1bc0] sm:$0xff] }
 0x269   :  { %6430 = vmatpush3.msra.mxu0 %v1047_v20  ;;  %6463 = vmatpush3.msra.mxu1 %v1080_v21  ;;  %v1112_v20 = vld [vmem:[#allocation3 + $0x1a38] sm:$0xff]  ;;  %v1145_v21 = vld [vmem:[#allocation3 + $0x1b40] sm:$0xff] }
 0x26a   :  { %6431 = vmatprep.subr.mxu0 %v1062_v22  ;;  %6464 = vmatprep.subr.mxu1 %v1095_v23  ;;  %v1127_v22 = vld [vmem:[#allocation3 + $0x1ab0] sm:$0xff]  ;;  %v1160_v23 = vld [vmem:[#allocation3 + $0x1bb8] sm:$0xff] }
 0x26b   :  { %6432 = vmatpush3.msra.mxu0 %v1046_v24  ;;  %6465 = vmatpush3.msra.mxu1 %v1079_v25  ;;  %v1111_v24 = vld [vmem:[#allocation3 + $0x1a30] sm:$0xff]  ;;  %v1144_v25 = vld [vmem:[#allocation3 + $0x1b38] sm:$0xff] }
 0x26c   :  { %6433 = vmatprep.subr.mxu0 %v1061_v26  ;;  %6466 = vmatprep.subr.mxu1 %v1094_v27  ;;  %v1126_v26 = vld [vmem:[#allocation3 + $0x1aa8] sm:$0xff]  ;;  %v1159_v27 = vld [vmem:[#allocation3 + $0x1bb0] sm:$0xff] }
 0x26d   :  { %6434 = vmatpush3.msra.mxu0 %v1045_v28  ;;  %6467 = vmatpush3.msra.mxu1 %v1078_v29  ;;  %v1110_v28 = vld [vmem:[#allocation3 + $0x1a28] sm:$0xff]  ;;  %v1143_v29 = vld [vmem:[#allocation3 + $0x1b30] sm:$0xff] }
 0x26e   :  { %6435 = vmatprep.subr.mxu0 %v1060_v30  ;;  %6468 = vmatprep.subr.mxu1 %v1093_v31  ;;  %v1125_v30 = vld [vmem:[#allocation3 + $0x1aa0] sm:$0xff]  ;;  %v1158_v31 = vld [vmem:[#allocation3 + $0x1ba8] sm:$0xff] }
 0x26f   :  { %6436 = vmatpush3.msra.mxu0 %v1044_v32  ;;  %6469 = vmatpush3.msra.mxu1 %v1077_v33  ;;  %v1109_v32 = vld [vmem:[#allocation3 + $0x1a20] sm:$0xff]  ;;  %v1142_v33 = vld [vmem:[#allocation3 + $0x1b28] sm:$0xff] }
 0x270   :  { %6437 = vmatprep.subr.mxu0 %v1059_v34  ;;  %6470 = vmatprep.subr.mxu1 %v1092_v35  ;;  %v1124_v34 = vld [vmem:[#allocation3 + $0x1a98] sm:$0xff]  ;;  %v1157_v35 = vld [vmem:[#allocation3 + $0x1ba0] sm:$0xff] }
 0x271   :  { %6438 = vmatpush3.msra.mxu0 %v1043_v36  ;;  %6471 = vmatpush3.msra.mxu1 %v1076_v37  ;;  %v1108_v36 = vld [vmem:[#allocation3 + $0x1a18] sm:$0xff]  ;;  %v1141_v37 = vld [vmem:[#allocation3 + $0x1b20] sm:$0xff] }
 0x272   :  { %6439 = vmatprep.subr.mxu0 %v1058_v38  ;;  %6472 = vmatprep.subr.mxu1 %v1091_v40  ;;  %v1123_v38 = vld [vmem:[#allocation3 + $0x1a90] sm:$0xff] }
 0x273   :  { %6440 = vmatpush3.msra.mxu0 %v1042_v41  ;;  %6473 = vmatpush3.msra.mxu1 %v1075_v42  ;;  %v1107_v40 = vld [vmem:[#allocation3 + $0x1a10] sm:$0xff]  ;;  %v1140_v41 = vld [vmem:[#allocation3 + $0x1b18] sm:$0xff]  ;;  %v1122_v42 = vld [vmem:[#allocation3 + $0x1a88] sm:$0xff] }
 0x274   :  { %6441 = vmatprep.subr.mxu0 %v1057_v43  ;;  %6474 = vmatprep.subr.mxu1 %v1090_v44  ;;  %v267_v43 = vld [vmem:[%s8049_s25 + $0xd0] sm:$0xff] }
 0x275   :  { %6442 = vmatpush3.msra.mxu0 %v1041_v45  ;;  %3123 = vmatprep.mubr.f32.mxu0 %v1334_v46  ;;  %v1155_v44 = vld [vmem:[#allocation3 + $0x1b90] sm:$0xff]  ;;  %v1106_v45 = vld [vmem:[#allocation3 + $0x1a08] sm:$0xff] }
 0x276   :  { %6475 = vmatpush3.msra.mxu1 %v1074_v48  ;;  %3124 = vmatmul.mubr.f32.vlgmr.msra.gmra.mxu0 %v265_v39  ;;  %v1156_v39 = vld [vmem:[#allocation3 + $0x1b98] sm:$0xff]  ;;  %v1139_v46 = vld [vmem:[#allocation3 + $0x1b10] sm:$0xff]  ;;  %v1154_v48 = vld [vmem:[#allocation3 + $0x1b88] sm:$0xff] }
 0x277   :  { %6476 = vmatprep.subr.mxu1 %v1089_v49  ;;  %6481 = vmatprep.subr.mxu0 %v1136_v50  ;;  %v1105_v49 = vld [vmem:[#allocation3 + $0x1a00] sm:$0xff]  ;;  %v1336_v50 = vcombine.high %v267_v43, %v267_v43 }
 0x278   :  { %6477 = vmatpush3.msra.mxu1 %v1073_v51  ;;  %3193 = vmatprep.mubr.f32.mxu1 %v1335_v52  ;;  %v268_v51 = vld [vmem:[%s8049_s25 + $0xd8] sm:$0xff]  ;;  %v1138_v52 = vld [vmem:[#allocation3 + $0x1b08] sm:$0xff] }
 0x279   :  { %6482 = vmatpush3.msra.mxu0 %v1120_v53  ;;  %3194 = vmatmul.mubr.f32.vlgmr.msra.gmra.mxu1 %v266_v47  ;;  %v1121_v47 = vld [vmem:[#allocation3 + $0x1a80] sm:$0xff] }
 0x27a   :  { %6483 = vmatprep.subr.mxu0 %v1135_v54  ;;  %6516 = vmatprep.subr.mxu1 %v1168_v55  ;;  %v1153_v53 = vld [vmem:[#allocation3 + $0x1b80] sm:$0xff]  ;;  %v1200_v54 = vld [vmem:[#allocation3 + $0x1cf8] sm:$0xff] }
 0x27b   :  { %6484 = vmatpush3.msra.mxu0 %v1119_v56  ;;  %6517 = vmatpush3.msra.mxu1 %v1152_v57  ;;  %v1137_v55 = vld [vmem:[#allocation3 + $0x1b00] sm:$0xff]  ;;  %v1337_v56 = vcombine.high %v268_v51, %v268_v51  ;;  %v1184_v57 = vld [vmem:[#allocation3 + $0x1c78] sm:$0xff] }
 0x27c   :  { %6485 = vmatprep.subr.mxu0 %v1134_v58  ;;  %6518 = vmatprep.subr.mxu1 %v1167_v59  ;;  %v1199_v58 = vld [vmem:[#allocation3 + $0x1cf0] sm:$0xff]  ;;  %v1232_v59 = vld [vmem:[#allocation3 + $0x1df8] sm:$0xff] }
 0x27d   :  { %6486 = vmatpush3.msra.mxu0 %v1118_v60  ;;  %6519 = vmatpush3.msra.mxu1 %v1151_v61  ;;  %v1183_v60 = vld [vmem:[#allocation3 + $0x1c70] sm:$0xff]  ;;  %v1216_v61 = vld [vmem:[#allocation3 + $0x1d78] sm:$0xff] }
 0x27e   :  { %6487 = vmatprep.subr.mxu0 %v1133_v62  ;;  %6520 = vmatprep.subr.mxu1 %v1166_v63  ;;  %v1198_v62 = vld [vmem:[#allocation3 + $0x1ce8] sm:$0xff]  ;;  %v1231_v63 = vld [vmem:[#allocation3 + $0x1df0] sm:$0xff] }
 0x27f   :  { %6488 = vmatpush3.msra.mxu0 %v1117_v0  ;;  %6521 = vmatpush3.msra.mxu1 %v1150_v1  ;;  %v1182_v0 = vld [vmem:[#allocation3 + $0x1c68] sm:$0xff]  ;;  %v1215_v1 = vld [vmem:[#allocation3 + $0x1d70] sm:$0xff] }
 0x280   :  { %6489 = vmatprep.subr.mxu0 %v1132_v2  ;;  %6522 = vmatprep.subr.mxu1 %v1165_v3  ;;  %v1197_v2 = vld [vmem:[#allocation3 + $0x1ce0] sm:$0xff]  ;;  %v1230_v3 = vld [vmem:[#allocation3 + $0x1de8] sm:$0xff] }
 0x281   :  { %6490 = vmatpush3.msra.mxu0 %v1116_v4  ;;  %6523 = vmatpush3.msra.mxu1 %v1149_v5  ;;  %v1181_v4 = vld [vmem:[#allocation3 + $0x1c60] sm:$0xff]  ;;  %v1214_v5 = vld [vmem:[#allocation3 + $0x1d68] sm:$0xff] }
 0x282   :  { %6491 = vmatprep.subr.mxu0 %v1131_v6  ;;  %6524 = vmatprep.subr.mxu1 %v1164_v7  ;;  %v1196_v6 = vld [vmem:[#allocation3 + $0x1cd8] sm:$0xff]  ;;  %v1229_v7 = vld [vmem:[#allocation3 + $0x1de0] sm:$0xff] }
 0x283   :  { %6492 = vmatpush3.msra.mxu0 %v1115_v8  ;;  %6525 = vmatpush3.msra.mxu1 %v1148_v9  ;;  %v1180_v8 = vld [vmem:[#allocation3 + $0x1c58] sm:$0xff]  ;;  %v1213_v9 = vld [vmem:[#allocation3 + $0x1d60] sm:$0xff] }
 0x284   :  { %6493 = vmatprep.subr.mxu0 %v1130_v10  ;;  %6526 = vmatprep.subr.mxu1 %v1163_v11  ;;  %v1195_v10 = vld [vmem:[#allocation3 + $0x1cd0] sm:$0xff]  ;;  %v1228_v11 = vld [vmem:[#allocation3 + $0x1dd8] sm:$0xff] }
 0x285   :  { %6494 = vmatpush3.msra.mxu0 %v1114_v12  ;;  %6527 = vmatpush3.msra.mxu1 %v1147_v13  ;;  %v1179_v12 = vld [vmem:[#allocation3 + $0x1c50] sm:$0xff]  ;;  %v1212_v13 = vld [vmem:[#allocation3 + $0x1d58] sm:$0xff] }
 0x286   :  { %6495 = vmatprep.subr.mxu0 %v1129_v14  ;;  %6528 = vmatprep.subr.mxu1 %v1162_v15  ;;  %v1194_v14 = vld [vmem:[#allocation3 + $0x1cc8] sm:$0xff]  ;;  %v1227_v15 = vld [vmem:[#allocation3 + $0x1dd0] sm:$0xff] }
 0x287   :  { %6496 = vmatpush3.msra.mxu0 %v1113_v16  ;;  %6529 = vmatpush3.msra.mxu1 %v1146_v17  ;;  %v1178_v16 = vld [vmem:[#allocation3 + $0x1c48] sm:$0xff]  ;;  %v1211_v17 = vld [vmem:[#allocation3 + $0x1d50] sm:$0xff] }
 0x288   :  { %6497 = vmatprep.subr.mxu0 %v1128_v18  ;;  %6530 = vmatprep.subr.mxu1 %v1161_v19  ;;  %v1193_v18 = vld [vmem:[#allocation3 + $0x1cc0] sm:$0xff]  ;;  %v1226_v19 = vld [vmem:[#allocation3 + $0x1dc8] sm:$0xff] }
 0x289   :  { %6498 = vmatpush3.msra.mxu0 %v1112_v20  ;;  %6531 = vmatpush3.msra.mxu1 %v1145_v21  ;;  %v1177_v20 = vld [vmem:[#allocation3 + $0x1c40] sm:$0xff]  ;;  %v1210_v21 = vld [vmem:[#allocation3 + $0x1d48] sm:$0xff] }
 0x28a   :  { %6499 = vmatprep.subr.mxu0 %v1127_v22  ;;  %6532 = vmatprep.subr.mxu1 %v1160_v23  ;;  %v1192_v22 = vld [vmem:[#allocation3 + $0x1cb8] sm:$0xff]  ;;  %v1225_v23 = vld [vmem:[#allocation3 + $0x1dc0] sm:$0xff] }
 0x28b   :  { %6500 = vmatpush3.msra.mxu0 %v1111_v24  ;;  %6533 = vmatpush3.msra.mxu1 %v1144_v25  ;;  %v1176_v24 = vld [vmem:[#allocation3 + $0x1c38] sm:$0xff]  ;;  %v1209_v25 = vld [vmem:[#allocation3 + $0x1d40] sm:$0xff] }
 0x28c   :  { %6501 = vmatprep.subr.mxu0 %v1126_v26  ;;  %6534 = vmatprep.subr.mxu1 %v1159_v27  ;;  %v1191_v26 = vld [vmem:[#allocation3 + $0x1cb0] sm:$0xff]  ;;  %v1224_v27 = vld [vmem:[#allocation3 + $0x1db8] sm:$0xff] }
 0x28d   :  { %6502 = vmatpush3.msra.mxu0 %v1110_v28  ;;  %6535 = vmatpush3.msra.mxu1 %v1143_v29  ;;  %v1175_v28 = vld [vmem:[#allocation3 + $0x1c30] sm:$0xff]  ;;  %v1208_v29 = vld [vmem:[#allocation3 + $0x1d38] sm:$0xff] }
 0x28e   :  { %6503 = vmatprep.subr.mxu0 %v1125_v30  ;;  %6536 = vmatprep.subr.mxu1 %v1158_v31  ;;  %v1190_v30 = vld [vmem:[#allocation3 + $0x1ca8] sm:$0xff]  ;;  %v1223_v31 = vld [vmem:[#allocation3 + $0x1db0] sm:$0xff] }
 0x28f   :  { %6504 = vmatpush3.msra.mxu0 %v1109_v32  ;;  %6537 = vmatpush3.msra.mxu1 %v1142_v33  ;;  %v1174_v32 = vld [vmem:[#allocation3 + $0x1c28] sm:$0xff]  ;;  %v1207_v33 = vld [vmem:[#allocation3 + $0x1d30] sm:$0xff] }
 0x290   :  { %6505 = vmatprep.subr.mxu0 %v1124_v34  ;;  %6538 = vmatprep.subr.mxu1 %v1157_v35  ;;  %v1189_v34 = vld [vmem:[#allocation3 + $0x1ca0] sm:$0xff]  ;;  %v1222_v35 = vld [vmem:[#allocation3 + $0x1da8] sm:$0xff] }
 0x291   :  { %6506 = vmatpush3.msra.mxu0 %v1108_v36  ;;  %6539 = vmatpush3.msra.mxu1 %v1141_v37  ;;  %v1173_v36 = vld [vmem:[#allocation3 + $0x1c20] sm:$0xff]  ;;  %v1206_v37 = vld [vmem:[#allocation3 + $0x1d28] sm:$0xff] }
 0x292   :  { %6507 = vmatprep.subr.mxu0 %v1123_v38  ;;  %6540 = vmatprep.subr.mxu1 %v1156_v39  ;;  %v1188_v38 = vld [vmem:[#allocation3 + $0x1c98] sm:$0xff]  ;;  %v1221_v39 = vld [vmem:[#allocation3 + $0x1da0] sm:$0xff] }
 0x293   :  { %6508 = vmatpush3.msra.mxu0 %v1107_v40  ;;  %6541 = vmatpush3.msra.mxu1 %v1140_v41  ;;  %v1172_v40 = vld [vmem:[#allocation3 + $0x1c18] sm:$0xff]  ;;  %v1205_v41 = vld [vmem:[#allocation3 + $0x1d20] sm:$0xff] }
 0x294   :  { %6509 = vmatprep.subr.mxu0 %v1122_v42  ;;  %6542 = vmatprep.subr.mxu1 %v1155_v44  ;;  %v1187_v42 = vld [vmem:[#allocation3 + $0x1c90] sm:$0xff] }
 0x295   :  { %6510 = vmatpush3.msra.mxu0 %v1106_v45  ;;  %6543 = vmatpush3.msra.mxu1 %v1139_v46  ;;  %v1171_v44 = vld [vmem:[#allocation3 + $0x1c10] sm:$0xff]  ;;  %v1204_v45 = vld [vmem:[#allocation3 + $0x1d18] sm:$0xff]  ;;  %v1186_v46 = vld [vmem:[#allocation3 + $0x1c88] sm:$0xff] }
 0x296   :  { %6511 = vmatprep.subr.mxu0 %v1121_v47  ;;  %6544 = vmatprep.subr.mxu1 %v1154_v48  ;;  %v269_v47 = vld [vmem:[%s8049_s25 + $0xe0] sm:$0xff]  ;;  %v1219_v48 = vld [vmem:[#allocation3 + $0x1d90] sm:$0xff] }
 0x297   :  { %6512 = vmatpush3.msra.mxu0 %v1105_v49  ;;  %3263 = vmatprep.mubr.f32.mxu0 %v1336_v50  ;;  %v1170_v49 = vld [vmem:[#allocation3 + $0x1c08] sm:$0xff]  ;;  %v1203_v50 = vld [vmem:[#allocation3 + $0x1d10] sm:$0xff] }
 0x298   :  { %6545 = vmatpush3.msra.mxu1 %v1138_v52  ;;  %3264 = vmatmul.mubr.f32.vlgmr.msra.gmra.mxu0 %v267_v43  ;;  %v1220_v43 = vld [vmem:[#allocation3 + $0x1d98] sm:$0xff]  ;;  %v1218_v52 = vld [vmem:[#allocation3 + $0x1d88] sm:$0xff] }
 0x299   :  { %6546 = vmatprep.subr.mxu1 %v1153_v53  ;;  %6551 = vmatprep.subr.mxu0 %v1200_v54  ;;  %v1169_v53 = vld [vmem:[#allocation3 + $0x1c00] sm:$0xff]  ;;  %v1338_v54 = vcombine.high %v269_v47, %v269_v47 }
 0x29a   :  { %6547 = vmatpush3.msra.mxu1 %v1137_v55  ;;  %3333 = vmatprep.mubr.f32.mxu1 %v1337_v56  ;;  %v270_v55 = vld [vmem:[%s8049_s25 + $0xe8] sm:$0xff] }
 0x29b   :  { %6552 = vmatpush3.msra.mxu0 %v1184_v57  ;;  %3334 = vmatmul.mubr.f32.vlgmr.msra.gmra.mxu1 %v268_v51  ;;  %v1185_v51 = vld [vmem:[#allocation3 + $0x1c80] sm:$0xff]  ;;  %v1202_v56 = vld [vmem:[#allocation3 + $0x1d08] sm:$0xff] }
 0x29c   :  { %6553 = vmatprep.subr.mxu0 %v1199_v58  ;;  %6586 = vmatprep.subr.mxu1 %v1232_v59  ;;  %v1217_v57 = vld [vmem:[#allocation3 + $0x1d80] sm:$0xff]  ;;  %v1264_v58 = vld [vmem:[#allocation3 + $0x1ef8] sm:$0xff] }
 0x29d   :  { %6554 = vmatpush3.msra.mxu0 %v1183_v60  ;;  %6587 = vmatpush3.msra.mxu1 %v1216_v61  ;;  %v1201_v59 = vld [vmem:[#allocation3 + $0x1d00] sm:$0xff]  ;;  %v1339_v60 = vcombine.high %v270_v55, %v270_v55  ;;  %v1248_v61 = vld [vmem:[#allocation3 + $0x1e78] sm:$0xff] }
 0x29e   :  { %6555 = vmatprep.subr.mxu0 %v1198_v62  ;;  %6588 = vmatprep.subr.mxu1 %v1231_v63  ;;  %v1263_v62 = vld [vmem:[#allocation3 + $0x1ef0] sm:$0xff] }
 0x29f   :  { %6556 = vmatpush3.msra.mxu0 %v1182_v0  ;;  %6589 = vmatpush3.msra.mxu1 %v1215_v1  ;;  %v1247_v63 = vld [vmem:[#allocation3 + $0x1e70] sm:$0xff]  ;;  %v1262_v0 = vld [vmem:[#allocation3 + $0x1ee8] sm:$0xff] }
 0x2a0   :  { %6557 = vmatprep.subr.mxu0 %v1197_v2  ;;  %6590 = vmatprep.subr.mxu1 %v1230_v3  ;;  %v1270_v1 = vld [vmem:[#allocation3 + $0x1f28] sm:$0xf]  ;;  %v1261_v3 = vld [vmem:[#allocation3 + $0x1ee0] sm:$0xff] }
 0x2a1   :  { %6558 = vmatpush3.msra.mxu0 %v1181_v4  ;;  %6591 = vmatpush3.msra.mxu1 %v1214_v5  ;;  %v1246_v2 = vld [vmem:[#allocation3 + $0x1e68] sm:$0xff]  ;;  %v7478_v4 = vmov 0.0   ;;  %v1269_v5 = vld [vmem:[#allocation3 + $0x1f20] sm:$0xff] }
 0x2a2   :  { %6559 = vmatprep.subr.mxu0 %v1196_v6  ;;  %6592 = vmatprep.subr.mxu1 %v1229_v7  ;;  %v7725_v6 = vld [vmem:[%s8049_s25 + $0xf0] sm:$0xff]  ;;  %v1245_v7 = vld [vmem:[#allocation3 + $0x1e60] sm:$0xff] }
 0x2a3   :  { %6560 = vmatpush3.msra.mxu0 %v1180_v8  ;;  %6593 = vmatpush3.msra.mxu1 %v1213_v9  ;;  %v1260_v8 = vld [vmem:[#allocation3 + $0x1ed8] sm:$0xff] }
 0x2a4   :  { %6561 = vmatprep.subr.mxu0 %v1195_v10  ;;  %6594 = vmatprep.subr.mxu1 %v1228_v11  ;;  %v1268_v9 = vld [vmem:[#allocation3 + $0x1f18] sm:$0xff]  ;;  %v1340_v11 = vcombine.high %v7725_v6, %v7725_v6 }
 0x2a5   :  { %6562 = vmatpush3.msra.mxu0 %v1179_v12  ;;  %6595 = vmatpush3.msra.mxu1 %v1212_v13  ;;  %v1244_v10 = vld [vmem:[#allocation3 + $0x1e58] sm:$0xff]  ;;  %v1259_v12 = vld [vmem:[#allocation3 + $0x1ed0] sm:$0xff] }
 0x2a6   :  { %6563 = vmatprep.subr.mxu0 %v1194_v14  ;;  %6596 = vmatprep.subr.mxu1 %v1227_v15  ;;  %v1243_v13 = vld [vmem:[#allocation3 + $0x1e50] sm:$0xff]  ;;  %v1258_v15 = vld [vmem:[#allocation3 + $0x1ec8] sm:$0xff] }
 0x2a7   :  { %6564 = vmatpush3.msra.mxu0 %v1178_v16  ;;  %6597 = vmatpush3.msra.mxu1 %v1211_v17  ;;  %v1267_v14 = vld [vmem:[#allocation3 + $0x1f10] sm:$0xff]  ;;  %v1242_v16 = vld [vmem:[#allocation3 + $0x1e48] sm:$0xff] }
 0x2a8   :  { %6565 = vmatprep.subr.mxu0 %v1193_v18  ;;  %6598 = vmatprep.subr.mxu1 %v1226_v19  ;;  %v1266_v17 = vld [vmem:[#allocation3 + $0x1f08] sm:$0xff]  ;;  %v1257_v18 = vld [vmem:[#allocation3 + $0x1ec0] sm:$0xff] }
 0x2a9   :  { %6566 = vmatpush3.msra.mxu0 %v1177_v20  ;;  %6599 = vmatpush3.msra.mxu1 %v1210_v21  ;;  %v1241_v19 = vld [vmem:[#allocation3 + $0x1e40] sm:$0xff]  ;;  %v1256_v21 = vld [vmem:[#allocation3 + $0x1eb8] sm:$0xff] }
 0x2aa   :  { %6567 = vmatprep.subr.mxu0 %v1192_v22  ;;  %6600 = vmatprep.subr.mxu1 %v1225_v23  ;;  %v1265_v20 = vld [vmem:[#allocation3 + $0x1f00] sm:$0xff]  ;;  %v1240_v22 = vld [vmem:[#allocation3 + $0x1e38] sm:$0xff]  ;;  %v272_v23 = vld [vmem:[%s8049_s25 + $0xf8] sm:$0xf]  ;;  %s7480_s25 = smov 64  }
 0x2ab   :  { %6568 = vmatpush3.msra.mxu0 %v1176_v24  ;;  %6601 = vmatpush3.msra.mxu1 %v1209_v25  ;;  %v1255_v24 = vld [vmem:[#allocation3 + $0x1eb0] sm:$0xff] }
 0x2ac   :  { %6569 = vmatprep.subr.mxu0 %v1191_v26  ;;  %6602 = vmatprep.subr.mxu1 %v1224_v27  ;;  %v1239_v25 = vld [vmem:[#allocation3 + $0x1e30] sm:$0xff]  ;;  %v1254_v26 = vld [vmem:[#allocation3 + $0x1ea8] sm:$0xff] }
 0x2ad   :  { %6570 = vmatpush3.msra.mxu0 %v1175_v28  ;;  %6603 = vmatpush3.msra.mxu1 %v1208_v29  ;;  %v1238_v27 = vld [vmem:[#allocation3 + $0x1e28] sm:$0xff]  ;;  %v1253_v28 = vld [vmem:[#allocation3 + $0x1ea0] sm:$0xff] }
 0x2ae   :  { %6571 = vmatprep.subr.mxu0 %v1190_v30  ;;  %6604 = vmatprep.subr.mxu1 %v1223_v31  ;;  %v1237_v29 = vld [vmem:[#allocation3 + $0x1e20] sm:$0xff]  ;;  %v1252_v30 = vld [vmem:[#allocation3 + $0x1e98] sm:$0xff] }
 0x2af   :  { %6572 = vmatpush3.msra.mxu0 %v1174_v32  ;;  %6605 = vmatpush3.msra.mxu1 %v1207_v33  ;;  %v1236_v31 = vld [vmem:[#allocation3 + $0x1e18] sm:$0xff]  ;;  %v1251_v32 = vld [vmem:[#allocation3 + $0x1e90] sm:$0xff] }
 0x2b0   :  { %6573 = vmatprep.subr.mxu0 %v1189_v34  ;;  %6606 = vmatprep.subr.mxu1 %v1222_v35  ;;  %v1235_v33 = vld [vmem:[#allocation3 + $0x1e10] sm:$0xff]  ;;  %v1250_v34 = vld [vmem:[#allocation3 + $0x1e88] sm:$0xff] }
 0x2b1   :  { %6574 = vmatpush3.msra.mxu0 %v1173_v36  ;;  %6607 = vmatpush3.msra.mxu1 %v1206_v37  ;;  %v1234_v35 = vld [vmem:[#allocation3 + $0x1e08] sm:$0xff]  ;;  %v1249_v36 = vld [vmem:[#allocation3 + $0x1e80] sm:$0xff] }
 0x2b2   :  { %6575 = vmatprep.subr.mxu0 %v1188_v38  ;;  %6608 = vmatprep.subr.mxu1 %v1221_v39  ;;  %v1233_v37 = vld [vmem:[#allocation3 + $0x1e00] sm:$0xff]  ;;  %v5638_v38 = vpop.f32.mrf.mxu1 }
 0x2b3   :  { %6576 = vmatpush3.msra.mxu0 %v1172_v40  ;;  %6609 = vmatpush3.msra.mxu1 %v1205_v41  ;;  %v5603_v41 = vpop.f32.mrf.mxu0 }
 0x2b4   :  { %6577 = vmatprep.subr.mxu0 %v1187_v42  ;;  %6610 = vmatprep.subr.mxu1 %v1220_v43  ;;  %v5639_v39 = vpop.f32.mrf.mxu1 }
 0x2b5   :  { %6578 = vmatpush3.msra.mxu0 %v1171_v44  ;;  %6611 = vmatpush3.msra.mxu1 %v1204_v45  ;;  %v5604_v44 = vpop.f32.mrf.mxu0 }
 0x2b6   :  { %6579 = vmatprep.subr.mxu0 %v1186_v46  ;;  %6612 = vmatprep.subr.mxu1 %v1219_v48  ;;  %v5708_v40 = vpop.f32.mrf.mxu1  ;;  %v5605_v46 = vadd.f32 %v5604_v44, %v5603_v41  ;;  %v5531_v48 = vld [vmem:[#allocation6] ss:$0 sm:$0xff] }
 0x2b7   :  { %6580 = vmatpush3.msra.mxu0 %v1170_v49  ;;  %6613 = vmatpush3.msra.mxu1 %v1203_v50  ;;  %v5673_v45 = vpop.f32.mrf.mxu0 }
 0x2b8   :  { %6581 = vmatprep.subr.mxu0 %v1185_v51  ;;  %6614 = vmatprep.subr.mxu1 %v1218_v52  ;;  %v5709_v42 = vpop.f32.mrf.mxu1  ;;  %v1446_v51 = vadd.f32 %v5605_v46, %v5531_v48  ;;  %v5640_v52 = vadd.f32 %v5639_v39, %v5638_v38 }
 0x2b9   :  { %6582 = vmatpush3.msra.mxu0 %v1169_v53  ;;  %3403 = vmatprep.mubr.f32.mxu0 %v1338_v54  ;;  %v5674_v50 = vpop.f32.mrf.mxu0 }
 0x2ba   :  { %6615 = vmatpush3.msra.mxu1 %v1202_v56  ;;  %3404 = vmatmul.mubr.f32.vlgmr.msra.gmra.mxu0 %v269_v47  ;;  %v5778_v43 = vpop.f32.mrf.mxu1  ;;  %v5675_v54 = vadd.f32 %v5674_v50, %v5673_v45  ;;  %v1516_v56 = vadd.f32 %v5640_v52, %v1446_v51 }
 0x2bb   :  { %6616 = vmatprep.subr.mxu1 %v1217_v57  ;;  %6621 = vmatprep.subr.mxu0 %v1264_v58  ;;  %v5743_v53 = vpop.f32.mrf.mxu0 }
 0x2bc   :  { %6617 = vmatpush3.msra.mxu1 %v1201_v59  ;;  %3473 = vmatprep.mubr.f32.mxu1 %v1339_v60  ;;  %v5779_v47 = vpop.f32.mrf.mxu1  ;;  %v1586_v59 = vadd.f32 %v5675_v54, %v1516_v56  ;;  %v5710_v60 = vadd.f32 %v5709_v42, %v5708_v40 }
 0x2bd   :  { %6622 = vmatpush3.msra.mxu0 %v1248_v61  ;;  %3474 = vmatmul.mubr.f32.vlgmr.msra.gmra.mxu1 %v270_v55  ;;  %v5744_v58 = vpop.f32.mrf.mxu0 }
 0x2be   :  { %6623 = vmatprep.subr.mxu0 %v1263_v62  ;;  %6753 = vmatprep.subr.mxu1 %v7478_v4  ;;  %v5848_v49 = vpop.f32.mrf.mxu1  ;;  %v5745_v62 = vadd.f32 %v5744_v58, %v5743_v53 }
 0x2bf   :  { %6624 = vmatpush3.msra.mxu0 %v1247_v63  ;;  %6754 = vmatpush3.msk.msra.mxu1 %vm1375_vm0, %v1270_v1  ;;  %v5813_v61 = vpop.f32.mrf.mxu0 }
 0x2c0   :  { %6625 = vmatprep.subr.mxu0 %v1262_v0  ;;  %6755 = vmatprep.subr.mxu1 %v7478_v4  ;;  %v5849_v55 = vpop.f32.mrf.mxu1  ;;  %v1656_v0 = vadd.f32 %v5710_v60, %v1586_v59 }
 0x2c1   :  { %6626 = vmatpush3.msra.mxu0 %v1246_v2  ;;  %6756 = vmatpush3.msra.mxu1 %v1269_v5  ;;  %v5814_v2 = vpop.f32.mrf.mxu0  ;;  %v5780_v5 = vadd.f32 %v5779_v47, %v5778_v43 }
 0x2c2   :  { %6627 = vmatprep.subr.mxu0 %v1261_v3  ;;  %6757 = vmatprep.subr.mxu1 %v7478_v4  ;;  %v5918_v57 = vpop.f32.mrf.mxu1  ;;  %v1726_v3 = vadd.f32 %v5745_v62, %v1656_v0 }
 0x2c3   :  { %6628 = vmatpush3.msra.mxu0 %v1245_v7  ;;  %6758 = vmatpush3.msra.mxu1 %v1268_v9  ;;  %v5815_v7 = vadd.f32 %v5814_v2, %v5813_v61 }
 0x2c4   :  { %6629 = vmatprep.subr.mxu0 %v1260_v8  ;;  %6759 = vmatprep.subr.mxu1 %v7478_v4  ;;  %v5919_v63 = vpop.f32.mrf.mxu1  ;;  %v1796_v9 = vadd.f32 %v5780_v5, %v1726_v3 }
 0x2c5   :  { %6630 = vmatpush3.msra.mxu0 %v1244_v10  ;;  %3543 = vmatprep.mubr.f32.mxu0 %v1340_v11 }
 0x2c6   :  { %6631 = vmatprep.subr.mxu0 %v1259_v12  ;;  %6760 = vmatpush3.msra.mxu1 %v1267_v14  ;;  %v5988_v1 = vpop.f32.mrf.mxu1  ;;  %v1866_v12 = vadd.f32 %v5815_v7, %v1796_v9 }
 0x2c7   :  { %6632 = vmatpush3.msra.mxu0 %v1243_v13  ;;  %6761 = vmatprep.subr.mxu1 %v7478_v4  ;;  %v5850_v13 = vadd.f32 %v5849_v55, %v5848_v49 }
 0x2c8   :  { %6633 = vmatprep.subr.mxu0 %v1258_v15  ;;  %6762 = vmatpush3.msra.mxu1 %v1266_v17  ;;  %v5989_v8 = vpop.f32.mrf.mxu1 }
 0x2c9   :  { %6634 = vmatpush3.msra.mxu0 %v1242_v16  ;;  %6763 = vmatprep.subr.mxu1 %v7478_v4  ;;  %v1936_v17 = vadd.f32 %v5850_v13, %v1866_v12 }
 0x2ca   :  { %6635 = vmatprep.subr.mxu0 %v1257_v18  ;;  %6764 = vmatpush3.msra.mxu1 %v1265_v20  ;;  %v6058_v10 = vpop.f32.mrf.mxu1 }
 0x2cb   :  { %6636 = vmatpush3.msra.mxu0 %v1241_v19  ;;  %6765 = vmatprep.mubr.msk.f32.mxu1 %vm7479_vm2, %v7478_v4 }
 0x2cc   :  { %6637 = vmatprep.subr.mxu0 %v1256_v21  ;;  %6766 = vmatmul.mubr.msk.f32.vlgmr.msra.gmra.mxu1 %vm1372_vm1, %v272_v23  ;;  %v6059_v16 = vpop.f32.mrf.mxu1  ;;  %v5920_v21 = vadd.f32 %v5919_v63, %v5918_v57 }
 0x2cd   :  { %6638 = vmatpush3.msra.mxu0 %v1240_v22  ;;  %6768 = vmatprep.subr.mxu1 %v7478_v4 }
 0x2ce   :  { %6639 = vmatprep.subr.mxu0 %v1255_v24  ;;  %6776 = vmatprep.mubr.msk.f32.mxu1 %vm7479_vm2, %v7478_v4  ;;  %v6128_v18 = vpop.f32.mrf.mxu1 }
 0x2cf   :  { %6640 = vmatpush3.msra.mxu0 %v1239_v25 }
 0x2d0   :  { %6641 = vmatprep.subr.mxu0 %v1254_v26  ;;  %v6129_v24 = vpop.f32.mrf.mxu1 }
 0x2d1   :  { %6642 = vmatpush3.msra.mxu0 %v1238_v27  ;;  %v6130_v45 = vadd.f32 %v6129_v24, %v6128_v18 }
 0x2d2   :  { %6643 = vmatprep.subr.mxu0 %v1253_v28  ;;  %v6198_v26 = vpop.f32.mrf.mxu1 }
 0x2d3   :  { %6644 = vmatpush3.msra.mxu0 %v1237_v29  ;;  %v5990_v29 = vadd.f32 %v5989_v8, %v5988_v1 }
 0x2d4   :  { %6645 = vmatprep.subr.mxu0 %v1252_v30 }
 0x2d5   :  { %6646 = vmatpush3.msra.mxu0 %v1236_v31 }
 0x2d6   :  { %6647 = vmatprep.subr.mxu0 %v1251_v32  ;;  %v6199_v32 = vpop.f32.mrf.mxu1 }
 0x2d7   :  { %6648 = vmatpush3.msra.mxu0 %v1235_v33  ;;  %v6200_v53 = vadd.f32 %v6199_v32, %v6198_v26 }
 0x2d8   :  { %6649 = vmatprep.subr.mxu0 %v1250_v34  ;;  %v6268_v34 = vpop.f32.mrf.mxu1 }
 0x2d9   :  { %6650 = vmatpush3.msra.mxu0 %v1234_v35 }
 0x2da   :  { %6651 = vmatprep.subr.mxu0 %v1249_v36  ;;  %v6269_v40 = vpop.f32.mrf.mxu1 }
 0x2db   :  { %6652 = vmatpush3.msra.mxu0 %v1233_v37  ;;  %v6060_v37 = vadd.f32 %v6059_v16, %v6058_v10  ;;  %v6270_v61 = vadd.f32 %v6269_v40, %v6268_v34 }
 0x2dc   :  { %3544 = vmatmul.mubr.f32.vlgmr.msra.gmra.mxu0 %v7725_v6  ;;  %6801 = vmatprep.subr.mxu0 %v7478_v4  ;;  %v5883_v6 = vpop.f32.mrf.mxu0 }
 0x2dd   :  { %6809 = vmatprep.mubr.msk.f32.mxu0 %vm7479_vm2, %v7478_v4 }
 0x2de   :  { %v5884_v11 = vpop.f32.mrf.mxu0 }
 0x2df   :  { %v5885_v15 = vadd.f32 %v5884_v11, %v5883_v6 }
 0x2e0   :  { %v5953_v14 = vpop.f32.mrf.mxu0 }
 0x2e1   :  { %v2006_v20 = vadd.f32 %v5885_v15, %v1936_v17 }
 0x2e2   :  { %v5954_v19 = vpop.f32.mrf.mxu0 }
 0x2e3   :  { %v5955_v23 = vadd.f32 %v5954_v19, %v5953_v14  ;;  %v2076_v25 = vadd.f32 %v5920_v21, %v2006_v20 }
 0x2e4   :  { %v6023_v22 = vpop.f32.mrf.mxu0 }
 0x2e5   :  { %v2146_v28 = vadd.f32 %v5955_v23, %v2076_v25 }
 0x2e6   :  { %v6024_v27 = vpop.f32.mrf.mxu0 }
 0x2e7   :  { %v6025_v31 = vadd.f32 %v6024_v27, %v6023_v22  ;;  %v2216_v33 = vadd.f32 %v5990_v29, %v2146_v28 }
 0x2e8   :  { %v6093_v30 = vpop.f32.mrf.mxu0 }
 0x2e9   :  { %v2286_v36 = vadd.f32 %v6025_v31, %v2216_v33 }
 0x2ea   :  { %v6094_v35 = vpop.f32.mrf.mxu0 }
 0x2eb   :  { %v6095_v39 = vadd.f32 %v6094_v35, %v6093_v30  ;;  %v2356_v41 = vadd.f32 %v6060_v37, %v2286_v36 }
 0x2ec   :  { %v6163_v38 = vpop.f32.mrf.mxu0 }
 0x2ed   :  { %v2426_v44 = vadd.f32 %v6095_v39, %v2356_v41 }
 0x2ee   :  { %v6164_v43 = vpop.f32.mrf.mxu0 }
 0x2ef   :  { %v6165_v47 = vadd.f32 %v6164_v43, %v6163_v38  ;;  %v2496_v49 = vadd.f32 %v6130_v45, %v2426_v44 }
 0x2f0   :  { %v6233_v46 = vpop.f32.mrf.mxu0 }
 0x2f1   :  { %v2566_v52 = vadd.f32 %v6165_v47, %v2496_v49  ;;  %v3653_v47 = vld [vmem:[#allocation11 + $0x10] sm:$0xff]  ;;  %v3651_v49 = vld [vmem:[#allocation11] sm:$0xff] }
 0x2f2   :  { %v6234_v51 = vpop.f32.mrf.mxu0 }
 0x2f3   :  { %v6235_v55 = vadd.f32 %v6234_v51, %v6233_v46  ;;  %v2636_v57 = vadd.f32 %v6200_v53, %v2566_v52  ;;  %v3654_v46 = vld [vmem:[#allocation11 + $0x18] sm:$0xff] }
 0x2f4   :  { %v6303_v54 = vpop.f32.mrf.mxu0  ;;  %6769 = vmatpush3.msra.mxu1 %v3654_v46 }
 0x2f5   :  { %v6338_v42 = vpop.f32.mrf.mxu1  ;;  %v2706_v60 = vadd.f32 %v6235_v55, %v2636_v57  ;;  %6770 = vmatprep.subr.mxu1 %v7478_v4 }
 0x2f6   :  { %v6304_v59 = vpop.f32.mrf.mxu0  ;;  %6771 = vmatpush3.msra.mxu1 %v3653_v47 }
 0x2f7   :  { %v6339_v48 = vpop.f32.mrf.mxu1  ;;  %v6305_v63 = vadd.f32 %v6304_v59, %v6303_v54  ;;  %v2776_v1 = vadd.f32 %v6270_v61, %v2706_v60  ;;  %6772 = vmatprep.subr.mxu1 %v7478_v4  ;;  %v5534_v54 = vld [vmem:[#allocation8] ss:$0 sm:$0xff]  ;;  %v3745_v61 = vld [vmem:[#allocation14 + $0x10] sm:$0xff] }
 0x2f8   :  { %v6340_v6 = vadd.f32 %v6339_v48, %v6338_v42  ;;  %v3652_v48 = vld [vmem:[#allocation11 + $0x8] sm:$0xff]  ;;  %v3746_v60 = vld [vmem:[#allocation14 + $0x18] sm:$0xff] }
 0x2f9   :  { %v2846_v5 = vadd.f32 %v6305_v63, %v2776_v1  ;;  %6773 = vmatpush3.msra.mxu1 %v3652_v48  ;;  %v3743_v63 = vld [vmem:[#allocation14] sm:$0xff]  ;;  %v7763_v1 = vld [vmem:[#allocation15 + $0x10] sm:$0xff] }
 0x2fa   :  { %6774 = vmatprep.subr.mxu1 %v7478_v4 }
 0x2fb   :  { %v2916_v10 = vadd.f32 %v6340_v6, %v2846_v5  ;;  %6775 = vmatpush3.msra.mxu1 %v3651_v49  ;;  %v5536_v5 = vld [vmem:[#allocation12] ss:$0 sm:$0xff] }
 0x2fc   :  { %6779 = vmatprep.subr.mxu1 %v7478_v4 }
 0x314   :  { %v6373_v62 = vpop.f32.mrf.mxu0 }
 0x316   :  { %v6374_v3 = vpop.f32.mrf.mxu0 }
 0x317   :  { %v6408_v50 = vpop.f32.mrf.mxu1  ;;  %v6375_v8 = vadd.f32 %v6374_v3, %v6373_v62  ;;  %v3744_v62 = vld [vmem:[#allocation14 + $0x8] sm:$0xff]  ;;  %v7770_v3 = vld [vmem:[#allocation15] sm:$0xff] }
 0x319   :  { %v6409_v56 = vpop.f32.mrf.mxu1  ;;  %v2986_v13 = vadd.f32 %v6375_v8, %v2916_v10 }
 0x31a   :  { %v6410_v14 = vadd.f32 %v6409_v56, %v6408_v50  ;;  %v5535_v56 = vld [vmem:[#allocation9] ss:$0 sm:$0xff] }
 0x31c   :  { %v3056_v18 = vadd.f32 %v6410_v14, %v2986_v13  ;;  %v5538_v13 = vld [vmem:[#allocation17] ss:$0 sm:$0xff] }
 0x336   :  { %v6443_v7 = vpop.f32.mrf.mxu0 }
 0x338   :  { %v6444_v12 = vpop.f32.mrf.mxu0 }
 0x339   :  { %v6478_v58 = vpop.f32.mrf.mxu1  ;;  %v6445_v16 = vadd.f32 %v6444_v12, %v6443_v7 }
 0x33b   :  { %v6479_v0 = vpop.f32.mrf.mxu1  ;;  %v3126_v21 = vadd.f32 %v6445_v16, %v3056_v18 }
 0x33c   :  { %v6480_v22 = vadd.f32 %v6479_v0, %v6478_v58  ;;  %v7759_v0 = vld [vmem:[#allocation15 + $0x18] sm:$0xff] }
 0x33d   :  { %6802 = vmatpush3.msra.mxu0 %v7759_v0 }
 0x33e   :  { %v3196_v26 = vadd.f32 %v6480_v22, %v3126_v21  ;;  %6803 = vmatprep.subr.mxu0 %v7478_v4 }
 0x33f   :  { %6804 = vmatpush3.msra.mxu0 %v7763_v1 }
 0x340   :  { %6805 = vmatprep.subr.mxu0 %v7478_v4 }
 0x358   :  { %v6513_v15 = vpop.f32.mrf.mxu0 }
 0x35a   :  { %v6514_v20 = vpop.f32.mrf.mxu0 }
 0x35b   :  { %v6548_v2 = vpop.f32.mrf.mxu1  ;;  %v6515_v25 = vadd.f32 %v6514_v20, %v6513_v15 }
 0x35d   :  { %v6549_v9 = vpop.f32.mrf.mxu1  ;;  %v3266_v28 = vadd.f32 %v6515_v25, %v3196_v26 }
 0x35e   :  { %v6550_v29 = vadd.f32 %v6549_v9, %v6548_v2  ;;  %v7766_v2 = vld [vmem:[#allocation15 + $0x8] sm:$0xff] }
 0x35f   :  { %6806 = vmatpush3.msra.mxu0 %v7766_v2 }
 0x360   :  { %v3336_v31 = vadd.f32 %v6550_v29, %v3266_v28  ;;  %6807 = vmatprep.subr.mxu0 %v7478_v4 }
 0x361   :  { %6808 = vmatpush3.msra.mxu0 %v7770_v3 }
 0x362   :  { %6823 = vmatprep.subr.mxu0 %v7478_v4 }
 0x37a   :  { %v6583_v24 = vpop.f32.mrf.mxu0 }
 0x37c   :  { %v6584_v27 = vpop.f32.mrf.mxu0 }
 0x37d   :  { %v6618_v11 = vpop.f32.mrf.mxu1  ;;  %v6585_v30 = vadd.f32 %v6584_v27, %v6583_v24 }
 0x37f   :  { %v6619_v17 = vpop.f32.mrf.mxu1  ;;  %v3406_v32 = vadd.f32 %v6585_v30, %v3336_v31 }
 0x380   :  { %v6620_v33 = vadd.f32 %v6619_v17, %v6618_v11 }
 0x382   :  { %v3476_v36 = vadd.f32 %v6620_v33, %v3406_v32 }
 0x38c   :  { %v3615_v19 = vpop.f32.mrf.mxu1 }
 0x38e   :  { %v6767_v23 = vpop.f32.mrf.mxu1 }
 0x39c   :  { %v6653_v34 = vpop.f32.mrf.mxu0 }
 0x39e   :  { %v6654_v35 = vpop.f32.mrf.mxu0 }
 0x39f   :  { %v6655_v37 = vadd.f32 %v6654_v35, %v6653_v34 }
 0x3a1   :  { %v3546_v38 = vadd.f32 %v6655_v37, %v3476_v36 }
 0x3a3   :  { %v3616_v39 = vadd.f32 %v3615_v19, %v3546_v38 }
 0x3a5   :  { %v3622_v40 = vsel %vm3621_vm3, %v3616_v39, 0.0 }
 0x3a6   :  { %3623 = vadd.xlane.f32.xlu0 %v3622_v40 }
 0x42f   :  { %v3624_v41 = vpop.xlane.xlu0 %3623 }
 0x430   :  { %v3626_v42 = vmul.f32 0.03125, %v3624_v41 }
 0x432   :  { %v3627_v43 = vsub.f32 %v3616_v39, %v3626_v42 }
 0x434   :  { %v3628_v44 = vmul.f32 %v3627_v43, %v3627_v43 }
 0x436   :  { %v3629_v45 = vsel %vm3621_vm3, %v3628_v44, 0.0 }
 0x437   :  { %3630 = vadd.xlane.f32.xlu0 %v3629_v45 }
 0x4c0   :  { %v3631_v50 = vpop.xlane.xlu0 %3630 }
 0x4c1   :  { %v3632_v51 = vmul.f32 0.03125, %v3631_v50 }
 0x4c3   :  { %v3633_v52 = vadd.f32 1e-06, %v3632_v51 }
 0x4c5   :  { %7021 = vrsqrt.f32 %v3633_v52 }
 0x4d2   :  { %v7022_v53 = vpop.eup %7021 }
 0x4d3   :  { %v3635_v55 = vmul.f32 %v7022_v53, %v3627_v43 }
 0x4d5   :  { %v3642_v57 = vmul.f32 %v5534_v54, %v3635_v55 }
 0x4d7   :  { %v3649_v58 = vadd.f32 %v5535_v56, %v3642_v57 }
 0x4d9   :  { %v3650_v59 = vmax.f32 %v3649_v58, 0.0 }
 0x4db   :  { %6777 = vmatmul.mubr.msk.f32.vlgmr.msra.gmra.mxu1 %vm3662_vm4, %v3650_v59 }
 0x4dc   :  { %6787 = vmatprep.mubr.msk.f32.mxu1 %vm7479_vm2, %v7478_v4  ;;  %6780 = vmatpush3.msra.mxu1 %v3746_v60 }
 0x4dd   :  { %6781 = vmatprep.subr.mxu1 %v7478_v4 }
 0x4de   :  { %6782 = vmatpush3.msra.mxu1 %v3745_v61 }
 0x4df   :  { %6783 = vmatprep.subr.mxu1 %v7478_v4 }
 0x4e0   :  { %6784 = vmatpush3.msra.mxu1 %v3744_v62 }
 0x4e1   :  { %6785 = vmatprep.subr.mxu1 %v7478_v4 }
 0x4e2   :  { %6786 = vmatpush3.msra.mxu1 %v3743_v63 }
 0x4e3   :  { %6790 = vmatprep.subr.mxu1 %v7478_v4 }
 0x59b   :  { %v3732_v6 = vpop.f32.mrf.mxu1 }
 0x59c   :  { %v3733_v7 = vadd.f32 %v5536_v5, %v3732_v6 }
 0x59d   :  { %v6778_v8 = vpop.f32.mrf.mxu1 }
 0x59e   :  { %v3736_v9 = vmax.f32 %v3733_v7, 0.0 }
 0x5a0   :  { %3737 = vst.msk [vmem:[#allocation2] sm:$0xf] %vm3621_vm3, %v3736_v9 }
 0x5a7   :  { %v3742_v10 = vld [vmem:[#allocation2] sm:$0xf] }
 0x5a8   :  { %6788 = vmatmul.mubr.msk.f32.vlgmr.msra.gmra.mxu1 %vm3662_vm4, %v3742_v10 }
 0x5a9   :  { %6791 = vmatpush3.msra.mxu1 %v7759_v0  ;;  %6798 = vmatprep.mubr.msk.f32.mxu1 %vm7479_vm2, %v7478_v4 }
 0x5aa   :  { %6792 = vmatprep.subr.mxu1 %v7478_v4 }
 0x5ab   :  { %6793 = vmatpush3.msra.mxu1 %v7763_v1 }
 0x5ac   :  { %6794 = vmatprep.subr.mxu1 %v7478_v4 }
 0x5ad   :  { %6795 = vmatpush3.msra.mxu1 %v7766_v2 }
 0x5ae   :  { %6796 = vmatprep.subr.mxu1 %v7478_v4 }
 0x5af   :  { %6797 = vmatpush3.msra.mxu1 %v7770_v3 }
 0x5b0   :  { %6799 = vmatmul.mubr.f32.vlgmr.msra.gmra.mxu1 %v7478_v4  ;;  %6812 = vmatprep.subr.mxu1 %v7478_v4 }
 0x5b1   :  { %6813 = vmatpush3.msra.mxu1 %v7759_v0  ;;  %6820 = vmatprep.mubr.msk.f32.mxu1 %vm7479_vm2, %v7478_v4 }
 0x5b2   :  { %6814 = vmatprep.subr.mxu1 %v7478_v4 }
 0x5b3   :  { %6815 = vmatpush3.msra.mxu1 %v7763_v1 }
 0x5b4   :  { %6816 = vmatprep.subr.mxu1 %v7478_v4 }
 0x5b5   :  { %6817 = vmatpush3.msra.mxu1 %v7766_v2 }
 0x5b6   :  { %6818 = vmatprep.subr.mxu1 %v7478_v4 }
 0x5b7   :  { %6819 = vmatpush3.msra.mxu1 %v7770_v3 }
 0x5b8   :  { %6834 = vmatprep.subr.mxu1 %v7478_v4 }
 0x668   :  { %v3823_v11 = vpop.f32.mrf.mxu1 }
 0x669   :  { %v7798_v14 = vadd.f32 %v5538_v13, %v3823_v11 }
 0x66a   :  { %v6789_v12 = vpop.f32.mrf.mxu1 }
 0x670   :  { %v3896_v15 = vpop.f32.mrf.mxu1 }
 0x671   :  { %v3900_v16 = vadd.f32 %v3896_v15, %v7798_v14 }
 0x672   :  { %v6800_v17 = vpop.f32.mrf.mxu1 }
 0x673   :  { %7023 = vtanh.f32 %v3900_v16  ;;  %v5540_v19 = vmul.f32 -1.442695, %v3900_v16 }
 0x675   :  { %7025 = vpow2.f32 %v5540_v19 }
 0x680   :  { %v7024_v18 = vpop.eup %7023 }
 0x681   :  { %3910 = vrot.lane.b32.xlu1 %v7024_v18, %s7480_s25 }
 0x682   :  { %v7026_v20 = vpop.eup %7025 }
 0x683   :  { %v3904_v21 = vadd.f32 1.0, %v7026_v20 }
 0x685   :  { %7027 = vrcp.f32 %v3904_v21 }
 0x692   :  { %v7028_v22 = vpop.eup %7027 }
 0x693   :  { %v3908_v25 = vmul.f32 0.0, %v7028_v22 }
 0x6f3   :  { %v3911_v23 = vpop.permute.xlu1 %3910 }
 0x6f4   :  { %v3913_v24 = vmul.f32 %v7028_v22, %v3911_v23 }
 0x6f6   :  { %3915 = vrot.lane.b32.xlu1 %v3913_v24, %s7481_s5 }
 0x768   :  { %v3916_v26 = vpop.permute.xlu1 %3915 }
 0x769   :  { %v3918_v27 = vadd.f32 %v3916_v26, %v3908_v25  ;;  %v4274_v26 = vld [vmem:[#allocation14 + $0x38] sm:$0xff] }
 0x76b   :  { %7029 = vtanh.f32 %v3918_v27  ;;  %v4015_v43 = vrot.slane %v3918_v27, 7  ;;  %v7840_v27 = vld [vmem:[#allocation15 + $0x38] sm:$0xff] }
 0x778   :  { %v7030_v28 = vpop.eup %7029 }
 0x779   :  { %3921 = vrot.lane.b32.xlu0 %v7030_v28, %s7480_s25  ;;  %v4273_v28 = vld [vmem:[#allocation14 + $0x30] sm:$0xff] }
 0x7eb   :  { %v3922_v29 = vpop.permute.xlu0 %3921 }
 0x7ec   :  { %v3924_v30 = vmul.f32 %v7028_v22, %v3922_v29  ;;  %v7843_v29 = vld [vmem:[#allocation15 + $0x30] sm:$0xff] }
 0x7ee   :  { %3926 = vrot.lane.b32.xlu1 %v3924_v30, %s7481_s5  ;;  %v4272_v30 = vld [vmem:[#allocation14 + $0x28] sm:$0xff] }
 0x860   :  { %v3927_v31 = vpop.permute.xlu1 %3926 }
 0x861   :  { %3930 = vst.msk [vmem:[#allocation2] sm:$0x1] %vm3929_vm5, %v3927_v31  ;;  %6810 = vmatmul.mubr.msk.f32.vlgmr.msra.gmra.mxu0 %vm3662_vm4, %v3927_v31  ;;  %v7847_v31 = vld [vmem:[#allocation15 + $0x28] sm:$0xff] }
 0x862   :  { %6824 = vmatpush3.msra.mxu0 %v7759_v0  ;;  %6831 = vmatprep.mubr.msk.f32.mxu0 %vm7479_vm2, %v7478_v4 }
 0x863   :  { %6825 = vmatprep.subr.mxu0 %v7478_v4 }
 0x864   :  { %6826 = vmatpush3.msra.mxu0 %v7763_v1 }
 0x865   :  { %6827 = vmatprep.subr.mxu0 %v7478_v4 }
 0x866   :  { %6828 = vmatpush3.msra.mxu0 %v7766_v2 }
 0x867   :  { %6829 = vmatprep.subr.mxu0 %v7478_v4 }
 0x868   :  { %6830 = vmatpush3.msra.mxu0 %v7770_v3 }
 0x869   :  { %6845 = vmatprep.subr.mxu0 %v7478_v4 }
 0x921   :  { %v3999_v32 = vpop.f32.mrf.mxu0 }
 0x922   :  { %v4004_v33 = vrot.slane %v3999_v32, 7  ;;  %v4271_v32 = vld [vmem:[#allocation14 + $0x20] sm:$0xff] }
 0x923   :  { %v6811_v34 = vpop.f32.mrf.mxu0 }
 0x924   :  { %v4006_v35 = vadd.f32 %v4004_v33, %v7798_v14  ;;  %v7852_v33 = vld [vmem:[#allocation15 + $0x20] sm:$0xff] }
 0x926   :  { %7031 = vtanh.f32 %v4006_v35  ;;  %v5542_v37 = vmul.f32 -1.442695, %v4006_v35 }
 0x928   :  { %7033 = vpow2.f32 %v5542_v37 }
 0x933   :  { %v7032_v36 = vpop.eup %7031 }
 0x934   :  { %4019 = vrot.lane.b32.xlu1 %v7032_v36, %s7480_s25 }
 0x935   :  { %v7034_v38 = vpop.eup %7033 }
 0x936   :  { %v4010_v39 = vadd.f32 1.0, %v7034_v38 }
 0x938   :  { %7035 = vrcp.f32 %v4010_v39 }
 0x945   :  { %v7036_v40 = vpop.eup %7035 }
 0x946   :  { %v4017_v44 = vmul.f32 %v7036_v40, %v4015_v43 }
 0x9a6   :  { %v4020_v41 = vpop.permute.xlu1 %4019 }
 0x9a7   :  { %v4022_v42 = vmul.f32 %v7036_v40, %v4020_v41  ;;  %v5547_v41 = vld [vmem:[#allocation17 + $0x1] ss:$0 sm:$0xff] }
 0x9a9   :  { %4024 = vrot.lane.b32.xlu1 %v4022_v42, %s7481_s5 }
 0xa1b   :  { %v4025_v45 = vpop.permute.xlu1 %4024 }
 0xa1c   :  { %v4027_v46 = vadd.f32 %v4025_v45, %v4017_v44 }
 0xa1e   :  { %7037 = vtanh.f32 %v4027_v46  ;;  %v4127_v63 = vrot.slane %v4027_v46, 7 }
 0xa2b   :  { %v7038_v47 = vpop.eup %7037 }
 0xa2c   :  { %4030 = vrot.lane.b32.xlu1 %v7038_v47, %s7480_s25 }
 0xa9e   :  { %v4031_v48 = vpop.permute.xlu1 %4030 }
 0xa9f   :  { %v4033_v49 = vmul.f32 %v7036_v40, %v4031_v48 }
 0xaa1   :  { %v4040_v50 = vrot.slane %v4033_v49, 1 }
 0xaa3   :  { %4041 = vrot.lane.b32.xlu1 %v4040_v50, %s7481_s5 }
 0xb15   :  { %v4042_v51 = vpop.permute.xlu1 %4041 }
 0xb16   :  { %6821 = vmatmul.mubr.msk.f32.vlgmr.msra.gmra.mxu1 %vm3662_vm4, %v4042_v51 }
 0xb17   :  { %6842 = vmatprep.mubr.msk.f32.mxu1 %vm7479_vm2, %v7478_v4  ;;  %6835 = vmatpush3.msra.mxu1 %v4274_v26 }
 0xb18   :  { %6836 = vmatprep.subr.mxu1 %v7478_v4 }
 0xb19   :  { %6837 = vmatpush3.msra.mxu1 %v4273_v28 }
 0xb1a   :  { %6838 = vmatprep.subr.mxu1 %v7478_v4 }
 0xb1b   :  { %6839 = vmatpush3.msra.mxu1 %v4272_v30 }
 0xb1c   :  { %6840 = vmatprep.subr.mxu1 %v7478_v4 }
 0xb1d   :  { %6841 = vmatpush3.msra.mxu1 %v4271_v32 }
 0xb1e   :  { %6856 = vmatprep.subr.mxu1 %v7478_v4 }
 0xbd6   :  { %v4111_v52 = vpop.f32.mrf.mxu1 }
 0xbd7   :  { %v4116_v53 = vrot.slane %v4111_v52, 6 }
 0xbd8   :  { %v6822_v54 = vpop.f32.mrf.mxu1 }
 0xbd9   :  { %v4118_v55 = vadd.f32 %v4116_v53, %v7798_v14 }
 0xbdb   :  { %7039 = vtanh.f32 %v4118_v55  ;;  %v5544_v57 = vmul.f32 -1.442695, %v4118_v55 }
 0xbdd   :  { %7041 = vpow2.f32 %v5544_v57 }
 0xbe8   :  { %v7040_v56 = vpop.eup %7039 }
 0xbe9   :  { %4131 = vrot.lane.b32.xlu1 %v7040_v56, %s7480_s25 }
 0xbea   :  { %v7042_v58 = vpop.eup %7041 }
 0xbeb   :  { %v4122_v59 = vadd.f32 1.0, %v7042_v58 }
 0xbed   :  { %7043 = vrcp.f32 %v4122_v59 }
 0xbfa   :  { %v7044_v60 = vpop.eup %7043 }
 0xbfb   :  { %v4129_v0 = vmul.f32 %v7044_v60, %v4127_v63 }
 0xc5b   :  { %v4132_v61 = vpop.permute.xlu1 %4131 }
 0xc5c   :  { %v4134_v62 = vmul.f32 %v7044_v60, %v4132_v61 }
 0xc5e   :  { %4136 = vrot.lane.b32.xlu0 %v4134_v62, %s7481_s5 }
 0xcd0   :  { %v4137_v1 = vpop.permute.xlu0 %4136 }
 0xcd1   :  { %v4139_v2 = vadd.f32 %v4137_v1, %v4129_v0 }
 0xcd3   :  { %7045 = vtanh.f32 %v4139_v2  ;;  %v4239_v21 = vrot.slane %v4139_v2, 7 }
 0xce0   :  { %v7046_v3 = vpop.eup %7045 }
 0xce1   :  { %4142 = vrot.lane.b32.xlu1 %v7046_v3, %s7480_s25 }
 0xd53   :  { %v4143_v5 = vpop.permute.xlu1 %4142 }
 0xd54   :  { %v4145_v6 = vmul.f32 %v7044_v60, %v4143_v5 }
 0xd56   :  { %v4152_v7 = vrot.slane %v4145_v6, 2 }
 0xd58   :  { %4153 = vrot.lane.b32.xlu0 %v4152_v7, %s7481_s5 }
 0xdca   :  { %v4154_v8 = vpop.permute.xlu0 %4153 }
 0xdcb   :  { %6832 = vmatmul.mubr.msk.f32.vlgmr.msra.gmra.mxu0 %vm3662_vm4, %v4154_v8 }
 0xdcc   :  { %6853 = vmatprep.mubr.msk.f32.mxu0 %vm7479_vm2, %v7478_v4  ;;  %6846 = vmatpush3.msra.mxu0 %v7840_v27 }
 0xdcd   :  { %6847 = vmatprep.subr.mxu0 %v7478_v4 }
 0xdce   :  { %6848 = vmatpush3.msra.mxu0 %v7843_v29 }
 0xdcf   :  { %6849 = vmatprep.subr.mxu0 %v7478_v4 }
 0xdd0   :  { %6850 = vmatpush3.msra.mxu0 %v7847_v31 }
 0xdd1   :  { %6851 = vmatprep.subr.mxu0 %v7478_v4 }
 0xdd2   :  { %6852 = vmatpush3.msra.mxu0 %v7852_v33 }
 0xdd3   :  { %6854 = vmatmul.mubr.f32.vlgmr.msra.gmra.mxu0 %v7478_v4  ;;  %6867 = vmatprep.subr.mxu0 %v7478_v4 }
 0xdd4   :  { %6875 = vmatprep.mubr.msk.f32.mxu0 %vm7479_vm2, %v7478_v4  ;;  %6868 = vmatpush3.msra.mxu0 %v7840_v27 }
 0xdd5   :  { %6869 = vmatprep.subr.mxu0 %v7478_v4 }
 0xdd6   :  { %6870 = vmatpush3.msra.mxu0 %v7843_v29 }
 0xdd7   :  { %6871 = vmatprep.subr.mxu0 %v7478_v4 }
 0xdd8   :  { %6872 = vmatpush3.msra.mxu0 %v7847_v31 }
 0xdd9   :  { %6873 = vmatprep.subr.mxu0 %v7478_v4 }
 0xdda   :  { %6874 = vmatpush3.msra.mxu0 %v7852_v33 }
 0xddb   :  { %6889 = vmatprep.subr.mxu0 %v7478_v4 }
 0xe8b   :  { %v4223_v9 = vpop.f32.mrf.mxu0 }
 0xe8c   :  { %v4228_v10 = vrot.slane %v4223_v9, 5 }
 0xe8d   :  { %v6833_v11 = vpop.f32.mrf.mxu0 }
 0xe8e   :  { %v4230_v12 = vadd.f32 %v4228_v10, %v7798_v14 }
 0xe90   :  { %7047 = vtanh.f32 %v4230_v12  ;;  %v5546_v15 = vmul.f32 -1.442695, %v4230_v12 }
 0xe92   :  { %7049 = vpow2.f32 %v5546_v15 }
 0xe93   :  { %v4422_v39 = vpop.f32.mrf.mxu0 }
 0xe95   :  { %v6855_v40 = vpop.f32.mrf.mxu0 }
 0xe9d   :  { %v7048_v13 = vpop.eup %7047 }
 0xe9e   :  { %4243 = vrot.lane.b32.xlu1 %v7048_v13, %s7480_s25 }
 0xe9f   :  { %v7050_v16 = vpop.eup %7049 }
 0xea0   :  { %v4234_v17 = vadd.f32 1.0, %v7050_v16 }
 0xea2   :  { %7051 = vrcp.f32 %v4234_v17 }
 0xeaf   :  { %v7052_v18 = vpop.eup %7051 }
 0xeb0   :  { %v4241_v22 = vmul.f32 %v7052_v18, %v4239_v21 }
 0xf10   :  { %v4244_v19 = vpop.permute.xlu1 %4243 }
 0xf11   :  { %v4246_v20 = vmul.f32 %v7052_v18, %v4244_v19 }
 0xf13   :  { %4248 = vrot.lane.b32.xlu0 %v4246_v20, %s7481_s5 }
 0xf17   :  { %4035 = vrot.lane.b32.xlu0 %v4033_v49, %s7481_s5 }
 0xf85   :  { %v4249_v23 = vpop.permute.xlu0 %4248 }
 0xf86   :  { %v4251_v14 = vadd.f32 %v4249_v23, %v4241_v22 }
 0xf88   :  { %7053 = vtanh.f32 %v4251_v14 }
 0xf89   :  { %v4036_v24 = vpop.permute.xlu0 %4035 }
 0xf8a   :  { %4039 = vst.msk [vmem:[#allocation2] sm:$0x2] %vm4038_vm6, %v4036_v24 }
 0xf95   :  { %v7054_v25 = vpop.eup %7053 }
 0xf96   :  { %4254 = vrot.lane.b32.xlu1 %v7054_v25, %s7480_s25 }
 0xf9a   :  { %4147 = vrot.lane.b32.xlu1 %v4145_v6, %s7481_s5 }
0x1008   :  { %v4255_v34 = vpop.permute.xlu1 %4254 }
0x1009   :  { %v4257_v35 = vmul.f32 %v7052_v18, %v4255_v34 }
0x100b   :  { %4259 = vrot.lane.b32.xlu0 %v4257_v35, %s7481_s5 }
0x100c   :  { %v4148_v36 = vpop.permute.xlu1 %4147 }
0x100d   :  { %4151 = vst.msk [vmem:[#allocation2] sm:$0x4] %vm4150_vm7, %v4148_v36 }
0x107d   :  { %v4260_v37 = vpop.permute.xlu0 %4259 }
0x107e   :  { %4263 = vst.msk [vmem:[#allocation2] sm:$0x8] %vm4262_vm8, %v4260_v37 }
0x1085   :  { %v4269_v38 = vld [vmem:[#allocation2] sm:$0xf] }
0x1086   :  { %6843 = vmatmul.mubr.msk.f32.vlgmr.msra.gmra.mxu1 %vm3662_vm4, %v4269_v38 }
0x1087   :  { %6857 = vmatpush3.msra.mxu1 %v7840_v27  ;;  %6864 = vmatprep.mubr.msk.f32.mxu1 %vm7479_vm2, %v7478_v4 }
0x1088   :  { %6858 = vmatprep.subr.mxu1 %v7478_v4 }
0x1089   :  { %6859 = vmatpush3.msra.mxu1 %v7843_v29 }
0x108a   :  { %6860 = vmatprep.subr.mxu1 %v7478_v4 }
0x108b   :  { %6861 = vmatpush3.msra.mxu1 %v7847_v31 }
0x108c   :  { %6862 = vmatprep.subr.mxu1 %v7478_v4 }
0x108d   :  { %6863 = vmatpush3.msra.mxu1 %v7852_v33 }
0x108e   :  { %6878 = vmatprep.subr.mxu1 %v7478_v4 }
0x1146   :  { %v4352_v42 = vpop.f32.mrf.mxu1 }
0x1147   :  { %v7885_v43 = vadd.f32 %v5547_v41, %v4352_v42 }
0x1148   :  { %v6844_v44 = vpop.f32.mrf.mxu1 }
0x1149   :  { %v4426_v45 = vadd.f32 %v4422_v39, %v7885_v43 }
0x114b   :  { %7055 = vtanh.f32 %v4426_v45  ;;  %v5549_v47 = vmul.f32 -1.442695, %v4426_v45 }
0x114d   :  { %7057 = vpow2.f32 %v5549_v47 }
0x1158   :  { %v7056_v46 = vpop.eup %7055 }
0x1159   :  { %4436 = vrot.lane.b32.xlu1 %v7056_v46, %s7480_s25 }
0x115a   :  { %v7058_v48 = vpop.eup %7057 }
0x115b   :  { %v4430_v49 = vadd.f32 1.0, %v7058_v48 }
0x115d   :  { %7059 = vrcp.f32 %v4430_v49 }
0x116a   :  { %v7060_v50 = vpop.eup %7059 }
0x116b   :  { %v4434_v53 = vmul.f32 0.0, %v7060_v50 }
0x11cb   :  { %v4437_v51 = vpop.permute.xlu1 %4436 }
0x11cc   :  { %v4439_v52 = vmul.f32 %v7060_v50, %v4437_v51 }
0x11ce   :  { %4441 = vrot.lane.b32.xlu0 %v4439_v52, %s7481_s5 }
0x1240   :  { %v4442_v54 = vpop.permute.xlu0 %4441 }
0x1241   :  { %v4444_v55 = vadd.f32 %v4442_v54, %v4434_v53  ;;  %v4796_v54 = vld [vmem:[#allocation14 + $0x58] sm:$0xff] }
0x1243   :  { %7061 = vtanh.f32 %v4444_v55  ;;  %v4540_v8 = vrot.slane %v4444_v55, 7  ;;  %v7927_v55 = vld [vmem:[#allocation15 + $0x58] sm:$0xff] }
0x1250   :  { %v7062_v56 = vpop.eup %7061 }
0x1251   :  { %4447 = vrot.lane.b32.xlu1 %v7062_v56, %s7480_s25  ;;  %v4795_v56 = vld [vmem:[#allocation14 + $0x50] sm:$0xff] }
0x12c3   :  { %v4448_v57 = vpop.permute.xlu1 %4447 }
0x12c4   :  { %v4450_v58 = vmul.f32 %v7060_v50, %v4448_v57  ;;  %v7930_v57 = vld [vmem:[#allocation15 + $0x50] sm:$0xff] }
0x12c6   :  { %4452 = vrot.lane.b32.xlu0 %v4450_v58, %s7481_s5  ;;  %v4794_v58 = vld [vmem:[#allocation14 + $0x48] sm:$0xff] }
0x1338   :  { %v4453_v59 = vpop.permute.xlu0 %4452 }
0x1339   :  { %4455 = vst.msk [vmem:[#allocation2] sm:$0x1] %vm3929_vm5, %v4453_v59  ;;  %6865 = vmatmul.mubr.msk.f32.vlgmr.msra.gmra.mxu1 %vm3662_vm4, %v4453_v59  ;;  %v7934_v59 = vld [vmem:[#allocation15 + $0x48] sm:$0xff] }
0x133a   :  { %6879 = vmatpush3.msra.mxu1 %v7840_v27  ;;  %6886 = vmatprep.mubr.msk.f32.mxu1 %vm7479_vm2, %v7478_v4 }
0x133b   :  { %6880 = vmatprep.subr.mxu1 %v7478_v4 }
0x133c   :  { %6881 = vmatpush3.msra.mxu1 %v7843_v29 }
0x133d   :  { %6882 = vmatprep.subr.mxu1 %v7478_v4 }
0x133e   :  { %6883 = vmatpush3.msra.mxu1 %v7847_v31 }
0x133f   :  { %6884 = vmatprep.subr.mxu1 %v7478_v4 }
0x1340   :  { %6885 = vmatpush3.msra.mxu1 %v7852_v33 }
0x1341   :  { %6900 = vmatprep.subr.mxu1 %v7478_v4 }
0x13f9   :  { %v4524_v60 = vpop.f32.mrf.mxu1 }
0x13fa   :  { %v4529_v61 = vrot.slane %v4524_v60, 7  ;;  %v4793_v60 = vld [vmem:[#allocation14 + $0x40] sm:$0xff] }
0x13fb   :  { %v6866_v62 = vpop.f32.mrf.mxu1 }
0x13fc   :  { %v4531_v63 = vadd.f32 %v4529_v61, %v7885_v43  ;;  %v7939_v61 = vld [vmem:[#allocation15 + $0x40] sm:$0xff] }
0x13fe   :  { %7063 = vtanh.f32 %v4531_v63  ;;  %v5551_v1 = vmul.f32 -1.442695, %v4531_v63 }
0x1400   :  { %7065 = vpow2.f32 %v5551_v1 }
0x140b   :  { %v7064_v0 = vpop.eup %7063 }
0x140c   :  { %4544 = vrot.lane.b32.xlu1 %v7064_v0, %s7480_s25 }
0x140d   :  { %v7066_v2 = vpop.eup %7065 }
0x140e   :  { %v4535_v3 = vadd.f32 1.0, %v7066_v2 }
0x1410   :  { %7067 = vrcp.f32 %v4535_v3 }
0x141d   :  { %v7068_v5 = vpop.eup %7067 }
0x141e   :  { %v4542_v9 = vmul.f32 %v7068_v5, %v4540_v8 }
0x147e   :  { %v4545_v6 = vpop.permute.xlu1 %4544 }
0x147f   :  { %v4547_v7 = vmul.f32 %v7068_v5, %v4545_v6  ;;  %v5556_v6 = vld [vmem:[#allocation17 + $0x2] ss:$0 sm:$0xff] }
0x1481   :  { %4549 = vrot.lane.b32.xlu0 %v4547_v7, %s7481_s5 }
0x14f3   :  { %v4550_v10 = vpop.permute.xlu0 %4549 }
0x14f4   :  { %v4552_v11 = vadd.f32 %v4550_v10, %v4542_v9 }
0x14f6   :  { %7069 = vtanh.f32 %v4552_v11  ;;  %v4651_v28 = vrot.slane %v4552_v11, 7 }
0x1503   :  { %v7070_v12 = vpop.eup %7069 }
0x1504   :  { %4555 = vrot.lane.b32.xlu1 %v7070_v12, %s7480_s25 }
0x1576   :  { %v4556_v13 = vpop.permute.xlu1 %4555 }
0x1577   :  { %v4558_v15 = vmul.f32 %v7068_v5, %v4556_v13 }
0x1579   :  { %v4564_v16 = vrot.slane %v4558_v15, 1 }
0x157b   :  { %4565 = vrot.lane.b32.xlu0 %v4564_v16, %s7481_s5 }
0x15ed   :  { %v4566_v17 = vpop.permute.xlu0 %4565 }
0x15ee   :  { %6876 = vmatmul.mubr.msk.f32.vlgmr.msra.gmra.mxu0 %vm3662_vm4, %v4566_v17 }
0x15ef   :  { %6897 = vmatprep.mubr.msk.f32.mxu0 %vm7479_vm2, %v7478_v4  ;;  %6890 = vmatpush3.msra.mxu0 %v4796_v54 }
0x15f0   :  { %6891 = vmatprep.subr.mxu0 %v7478_v4 }
0x15f1   :  { %6892 = vmatpush3.msra.mxu0 %v4795_v56 }
0x15f2   :  { %6893 = vmatprep.subr.mxu0 %v7478_v4 }
0x15f3   :  { %6894 = vmatpush3.msra.mxu0 %v4794_v58 }
0x15f4   :  { %6895 = vmatprep.subr.mxu0 %v7478_v4 }
0x15f5   :  { %6896 = vmatpush3.msra.mxu0 %v4793_v60 }
0x15f6   :  { %6911 = vmatprep.subr.mxu0 %v7478_v4 }
0x16ae   :  { %v4635_v18 = vpop.f32.mrf.mxu0 }
0x16af   :  { %v4640_v19 = vrot.slane %v4635_v18, 6 }
0x16b0   :  { %v6877_v20 = vpop.f32.mrf.mxu0 }
0x16b1   :  { %v4642_v21 = vadd.f32 %v4640_v19, %v7885_v43 }
0x16b3   :  { %7071 = vtanh.f32 %v4642_v21  ;;  %v5553_v23 = vmul.f32 -1.442695, %v4642_v21 }
0x16b5   :  { %7073 = vpow2.f32 %v5553_v23 }
0x16c0   :  { %v7072_v22 = vpop.eup %7071 }
0x16c1   :  { %4655 = vrot.lane.b32.xlu1 %v7072_v22, %s7480_s25 }
0x16c2   :  { %v7074_v14 = vpop.eup %7073 }
0x16c3   :  { %v4646_v24 = vadd.f32 1.0, %v7074_v14 }
0x16c5   :  { %7075 = vrcp.f32 %v4646_v24 }
0x16d2   :  { %v7076_v25 = vpop.eup %7075 }
0x16d3   :  { %v4653_v29 = vmul.f32 %v7076_v25, %v4651_v28 }
0x1733   :  { %v4656_v26 = vpop.permute.xlu1 %4655 }
0x1734   :  { %v4658_v27 = vmul.f32 %v7076_v25, %v4656_v26 }
0x1736   :  { %4660 = vrot.lane.b32.xlu0 %v4658_v27, %s7481_s5 }
0x17a8   :  { %v4661_v30 = vpop.permute.xlu0 %4660 }
0x17a9   :  { %v4663_v31 = vadd.f32 %v4661_v30, %v4653_v29 }
0x17ab   :  { %7077 = vtanh.f32 %v4663_v31  ;;  %v4762_v49 = vrot.slane %v4663_v31, 7 }
0x17b8   :  { %v7078_v32 = vpop.eup %7077 }
0x17b9   :  { %4666 = vrot.lane.b32.xlu1 %v7078_v32, %s7480_s25 }
0x182b   :  { %v4667_v33 = vpop.permute.xlu1 %4666 }
0x182c   :  { %v4669_v34 = vmul.f32 %v7076_v25, %v4667_v33 }
0x182e   :  { %v4675_v35 = vrot.slane %v4669_v34, 2 }
0x1830   :  { %4676 = vrot.lane.b32.xlu0 %v4675_v35, %s7481_s5 }
0x18a2   :  { %v4677_v36 = vpop.permute.xlu0 %4676 }
0x18a3   :  { %6887 = vmatmul.mubr.msk.f32.vlgmr.msra.gmra.mxu1 %vm3662_vm4, %v4677_v36 }
0x18a4   :  { %6908 = vmatprep.mubr.msk.f32.mxu1 %vm7479_vm2, %v7478_v4  ;;  %6901 = vmatpush3.msra.mxu1 %v7927_v55 }
0x18a5   :  { %6902 = vmatprep.subr.mxu1 %v7478_v4 }
0x18a6   :  { %6903 = vmatpush3.msra.mxu1 %v7930_v57 }
0x18a7   :  { %6904 = vmatprep.subr.mxu1 %v7478_v4 }
0x18a8   :  { %6905 = vmatpush3.msra.mxu1 %v7934_v59 }
0x18a9   :  { %6906 = vmatprep.subr.mxu1 %v7478_v4 }
0x18aa   :  { %6907 = vmatpush3.msra.mxu1 %v7939_v61 }
0x18ab   :  { %6909 = vmatmul.mubr.f32.vlgmr.msra.gmra.mxu1 %v7478_v4  ;;  %6922 = vmatprep.subr.mxu1 %v7478_v4 }
0x18ac   :  { %6930 = vmatprep.mubr.msk.f32.mxu1 %vm7479_vm2, %v7478_v4  ;;  %6923 = vmatpush3.msra.mxu1 %v7927_v55 }
0x18ad   :  { %6924 = vmatprep.subr.mxu1 %v7478_v4 }
0x18ae   :  { %6925 = vmatpush3.msra.mxu1 %v7930_v57 }
0x18af   :  { %6926 = vmatprep.subr.mxu1 %v7478_v4 }
0x18b0   :  { %6927 = vmatpush3.msra.mxu1 %v7934_v59 }
0x18b1   :  { %6928 = vmatprep.subr.mxu1 %v7478_v4 }
0x18b2   :  { %6929 = vmatpush3.msra.mxu1 %v7939_v61 }
0x18b3   :  { %6944 = vmatprep.subr.mxu1 %v7478_v4 }
0x1963   :  { %v4746_v37 = vpop.f32.mrf.mxu1 }
0x1964   :  { %v4751_v38 = vrot.slane %v4746_v37, 5 }
0x1965   :  { %v6888_v39 = vpop.f32.mrf.mxu1 }
0x1966   :  { %v4753_v40 = vadd.f32 %v4751_v38, %v7885_v43 }
0x1968   :  { %7079 = vtanh.f32 %v4753_v40  ;;  %v5555_v42 = vmul.f32 -1.442695, %v4753_v40 }
0x196a   :  { %7081 = vpow2.f32 %v5555_v42 }
0x196b   :  { %v4944_v3 = vpop.f32.mrf.mxu1 }
0x196d   :  { %v6910_v5 = vpop.f32.mrf.mxu1 }
0x1975   :  { %v7080_v41 = vpop.eup %7079 }
0x1976   :  { %4766 = vrot.lane.b32.xlu1 %v7080_v41, %s7480_s25 }
0x1977   :  { %v7082_v44 = vpop.eup %7081 }
0x1978   :  { %v4757_v45 = vadd.f32 1.0, %v7082_v44 }
0x197a   :  { %7083 = vrcp.f32 %v4757_v45 }
0x1987   :  { %v7084_v46 = vpop.eup %7083 }
0x1988   :  { %v4764_v50 = vmul.f32 %v7084_v46, %v4762_v49 }
0x19e8   :  { %v4767_v47 = vpop.permute.xlu1 %4766 }
0x19e9   :  { %v4769_v48 = vmul.f32 %v7084_v46, %v4767_v47 }
0x19eb   :  { %4771 = vrot.lane.b32.xlu0 %v4769_v48, %s7481_s5 }
0x19ef   :  { %4560 = vrot.lane.b32.xlu0 %v4558_v15, %s7481_s5 }
0x1a5d   :  { %v4772_v51 = vpop.permute.xlu0 %4771 }
0x1a5e   :  { %v4774_v43 = vadd.f32 %v4772_v51, %v4764_v50 }
0x1a60   :  { %7085 = vtanh.f32 %v4774_v43 }
0x1a61   :  { %v4561_v52 = vpop.permute.xlu0 %4560 }
0x1a62   :  { %4563 = vst.msk [vmem:[#allocation2] sm:$0x2] %vm4038_vm6, %v4561_v52 }
0x1a6d   :  { %v7086_v53 = vpop.eup %7085 }
0x1a6e   :  { %4777 = vrot.lane.b32.xlu1 %v7086_v53, %s7480_s25 }
0x1a72   :  { %4671 = vrot.lane.b32.xlu1 %v4669_v34, %s7481_s5 }
0x1ae0   :  { %v4778_v62 = vpop.permute.xlu1 %4777 }
0x1ae1   :  { %v4780_v63 = vmul.f32 %v7084_v46, %v4778_v62 }
0x1ae3   :  { %4782 = vrot.lane.b32.xlu0 %v4780_v63, %s7481_s5 }
0x1ae4   :  { %v4672_v0 = vpop.permute.xlu1 %4671 }
0x1ae5   :  { %4674 = vst.msk [vmem:[#allocation2] sm:$0x4] %vm4150_vm7, %v4672_v0 }
0x1b55   :  { %v4783_v1 = vpop.permute.xlu0 %4782 }
0x1b56   :  { %4785 = vst.msk [vmem:[#allocation2] sm:$0x8] %vm4262_vm8, %v4783_v1 }
0x1b5d   :  { %v4791_v2 = vld [vmem:[#allocation2] sm:$0xf] }
0x1b5e   :  { %6898 = vmatmul.mubr.msk.f32.vlgmr.msra.gmra.mxu0 %vm3662_vm4, %v4791_v2 }
0x1b5f   :  { %6912 = vmatpush3.msra.mxu0 %v7927_v55  ;;  %6919 = vmatprep.mubr.msk.f32.mxu0 %vm7479_vm2, %v7478_v4 }
0x1b60   :  { %6913 = vmatprep.subr.mxu0 %v7478_v4 }
0x1b61   :  { %6914 = vmatpush3.msra.mxu0 %v7930_v57 }
0x1b62   :  { %6915 = vmatprep.subr.mxu0 %v7478_v4 }
0x1b63   :  { %6916 = vmatpush3.msra.mxu0 %v7934_v59 }
0x1b64   :  { %6917 = vmatprep.subr.mxu0 %v7478_v4 }
0x1b65   :  { %6918 = vmatpush3.msra.mxu0 %v7939_v61 }
0x1b66   :  { %6933 = vmatprep.subr.mxu0 %v7478_v4 }
0x1c1e   :  { %v4874_v7 = vpop.f32.mrf.mxu0 }
0x1c1f   :  { %v7972_v8 = vadd.f32 %v5556_v6, %v4874_v7 }
0x1c20   :  { %v6899_v9 = vpop.f32.mrf.mxu0 }
0x1c21   :  { %v4948_v10 = vadd.f32 %v4944_v3, %v7972_v8 }
0x1c23   :  { %7087 = vtanh.f32 %v4948_v10  ;;  %v5558_v12 = vmul.f32 -1.442695, %v4948_v10 }
0x1c25   :  { %7089 = vpow2.f32 %v5558_v12 }
0x1c30   :  { %v7088_v11 = vpop.eup %7087 }
0x1c31   :  { %4958 = vrot.lane.b32.xlu1 %v7088_v11, %s7480_s25 }
0x1c32   :  { %v7090_v13 = vpop.eup %7089 }
0x1c33   :  { %v4952_v15 = vadd.f32 1.0, %v7090_v13 }
0x1c35   :  { %7091 = vrcp.f32 %v4952_v15 }
0x1c42   :  { %v7092_v16 = vpop.eup %7091 }
0x1c43   :  { %v4956_v19 = vmul.f32 0.0, %v7092_v16 }
0x1ca3   :  { %v4959_v17 = vpop.permute.xlu1 %4958 }
0x1ca4   :  { %v4961_v18 = vmul.f32 %v7092_v16, %v4959_v17 }
0x1ca6   :  { %4963 = vrot.lane.b32.xlu0 %v4961_v18, %s7481_s5 }
0x1d18   :  { %v4964_v20 = vpop.permute.xlu0 %4963 }
0x1d19   :  { %v4966_v21 = vadd.f32 %v4964_v20, %v4956_v19  ;;  %v5312_v20 = vld [vmem:[#allocation18 + $0x18] sm:$0xff] }
0x1d1b   :  { %7093 = vtanh.f32 %v4966_v21  ;;  %v5062_v36 = vrot.slane %v4966_v21, 7  ;;  %v5311_v21 = vld [vmem:[#allocation18 + $0x10] sm:$0xff] }
0x1d28   :  { %v7094_v22 = vpop.eup %7093 }
0x1d29   :  { %4969 = vrot.lane.b32.xlu1 %v7094_v22, %s7480_s25  ;;  %v5310_v22 = vld [vmem:[#allocation18 + $0x8] sm:$0xff] }
0x1d9b   :  { %v4970_v23 = vpop.permute.xlu1 %4969 }
0x1d9c   :  { %v4972_v14 = vmul.f32 %v7092_v16, %v4970_v23  ;;  %v5309_v23 = vld [vmem:[#allocation18] sm:$0xff] }
0x1d9e   :  { %4974 = vrot.lane.b32.xlu0 %v4972_v14, %s7481_s5 }
0x1e10   :  { %v4975_v24 = vpop.permute.xlu0 %4974 }
0x1e11   :  { %4977 = vst.msk [vmem:[#allocation2] sm:$0x1] %vm3929_vm5, %v4975_v24  ;;  %6920 = vmatmul.mubr.msk.f32.vlgmr.msra.gmra.mxu0 %vm3662_vm4, %v4975_v24 }
0x1e12   :  { %6934 = vmatpush3.msra.mxu0 %v7927_v55  ;;  %6941 = vmatprep.mubr.msk.f32.mxu0 %vm7479_vm2, %v7478_v4 }
0x1e13   :  { %6935 = vmatprep.subr.mxu0 %v7478_v4 }
0x1e14   :  { %6936 = vmatpush3.msra.mxu0 %v7930_v57 }
0x1e15   :  { %6937 = vmatprep.subr.mxu0 %v7478_v4 }
0x1e16   :  { %6938 = vmatpush3.msra.mxu0 %v7934_v59 }
0x1e17   :  { %6939 = vmatprep.subr.mxu0 %v7478_v4 }
0x1e18   :  { %6940 = vmatpush3.msra.mxu0 %v7939_v61 }
0x1e19   :  { %6955 = vmatprep.subr.mxu0 %v7478_v4 }
0x1ed1   :  { %v5046_v25 = vpop.f32.mrf.mxu0 }
0x1ed2   :  { %v5051_v26 = vrot.slane %v5046_v25, 7 }
0x1ed3   :  { %v6921_v27 = vpop.f32.mrf.mxu0 }
0x1ed4   :  { %v5053_v28 = vadd.f32 %v5051_v26, %v7972_v8 }
0x1ed6   :  { %7095 = vtanh.f32 %v5053_v28  ;;  %v5560_v30 = vmul.f32 -1.442695, %v5053_v28  ;;  %v5565_v28 = vld [vmem:[#allocation20] ss:$0 sm:$0xff] }
0x1ed8   :  { %7097 = vpow2.f32 %v5560_v30 }
0x1ee3   :  { %v7096_v29 = vpop.eup %7095 }
0x1ee4   :  { %5066 = vrot.lane.b32.xlu1 %v7096_v29, %s7480_s25 }
0x1ee5   :  { %v7098_v31 = vpop.eup %7097 }
0x1ee6   :  { %v5057_v32 = vadd.f32 1.0, %v7098_v31 }
0x1ee8   :  { %7099 = vrcp.f32 %v5057_v32 }
0x1ef5   :  { %v7100_v33 = vpop.eup %7099 }
0x1ef6   :  { %v5064_v37 = vmul.f32 %v7100_v33, %v5062_v36 }
0x1f56   :  { %v5067_v34 = vpop.permute.xlu1 %5066 }
0x1f57   :  { %v5069_v35 = vmul.f32 %v7100_v33, %v5067_v34 }
0x1f59   :  { %5071 = vrot.lane.b32.xlu0 %v5069_v35, %s7481_s5 }
0x1fcb   :  { %v5072_v38 = vpop.permute.xlu0 %5071 }
0x1fcc   :  { %v5074_v39 = vadd.f32 %v5072_v38, %v5064_v37 }
0x1fce   :  { %7101 = vtanh.f32 %v5074_v39  ;;  %v5173_v56 = vrot.slane %v5074_v39, 7  ;;  %v5426_v39 = vld [vmem:[#allocation24 + $0x18] sm:$0xff] }
0x1fdb   :  { %v7102_v40 = vpop.eup %7101 }
0x1fdc   :  { %5077 = vrot.lane.b32.xlu1 %v7102_v40, %s7480_s25  ;;  %v5425_v40 = vld [vmem:[#allocation24 + $0x10] sm:$0xff] }
0x204e   :  { %v5078_v41 = vpop.permute.xlu1 %5077 }
0x204f   :  { %v5080_v42 = vmul.f32 %v7100_v33, %v5078_v41  ;;  %v5424_v41 = vld [vmem:[#allocation24 + $0x8] sm:$0xff] }
0x2051   :  { %v5086_v44 = vrot.slane %v5080_v42, 1 }
0x2053   :  { %5087 = vrot.lane.b32.xlu0 %v5086_v44, %s7481_s5 }
0x20c5   :  { %v5088_v45 = vpop.permute.xlu0 %5087 }
0x20c6   :  { %6931 = vmatmul.mubr.msk.f32.vlgmr.msra.gmra.mxu1 %vm3662_vm4, %v5088_v45 }
0x20c7   :  { %6952 = vmatprep.mubr.msk.f32.mxu1 %vm7479_vm2, %v7478_v4  ;;  %6945 = vmatpush3.msra.mxu1 %v5312_v20 }
0x20c8   :  { %6946 = vmatprep.subr.mxu1 %v7478_v4 }
0x20c9   :  { %6947 = vmatpush3.msra.mxu1 %v5311_v21 }
0x20ca   :  { %6948 = vmatprep.subr.mxu1 %v7478_v4 }
0x20cb   :  { %6949 = vmatpush3.msra.mxu1 %v5310_v22 }
0x20cc   :  { %6950 = vmatprep.subr.mxu1 %v7478_v4 }
0x20cd   :  { %6951 = vmatpush3.msra.mxu1 %v5309_v23 }
0x2186   :  { %v5157_v46 = vpop.f32.mrf.mxu1 }
0x2187   :  { %v5162_v47 = vrot.slane %v5157_v46, 6 }
0x2188   :  { %v6932_v48 = vpop.f32.mrf.mxu1 }
0x2189   :  { %v5164_v49 = vadd.f32 %v5162_v47, %v7972_v8  ;;  %v5567_v48 = vld [vmem:[#allocation21] ss:$0 sm:$0xff] }
0x218b   :  { %7103 = vtanh.f32 %v5164_v49  ;;  %v5562_v51 = vmul.f32 -1.442695, %v5164_v49 }
0x218d   :  { %7105 = vpow2.f32 %v5562_v51 }
0x2198   :  { %v7104_v50 = vpop.eup %7103 }
0x2199   :  { %5177 = vrot.lane.b32.xlu1 %v7104_v50, %s7480_s25  ;;  %v5568_v50 = vld [vmem:[#allocation23] ss:$0 sm:$0xff] }
0x219a   :  { %v7106_v43 = vpop.eup %7105 }
0x219b   :  { %v5168_v52 = vadd.f32 1.0, %v7106_v43 }
0x219d   :  { %7107 = vrcp.f32 %v5168_v52  ;;  %v5569_v52 = vld [vmem:[#allocation26] ss:$0 sm:$0xff] }
0x21aa   :  { %v7108_v53 = vpop.eup %7107 }
0x21ab   :  { %v5175_v57 = vmul.f32 %v7108_v53, %v5173_v56 }
0x220b   :  { %v5178_v54 = vpop.permute.xlu1 %5177 }
0x220c   :  { %v5180_v55 = vmul.f32 %v7108_v53, %v5178_v54 }
0x220e   :  { %5182 = vrot.lane.b32.xlu0 %v5180_v55, %s7481_s5 }
0x2280   :  { %v5183_v58 = vpop.permute.xlu0 %5182 }
0x2281   :  { %v5185_v59 = vadd.f32 %v5183_v58, %v5175_v57 }
0x2283   :  { %7109 = vtanh.f32 %v5185_v59  ;;  %v5284_v15 = vrot.slane %v5185_v59, 7 }
0x2290   :  { %v7110_v60 = vpop.eup %7109 }
0x2291   :  { %5188 = vrot.lane.b32.xlu1 %v7110_v60, %s7480_s25 }
0x2303   :  { %v5189_v61 = vpop.permute.xlu1 %5188 }
0x2304   :  { %v5191_v62 = vmul.f32 %v7108_v53, %v5189_v61 }
0x2306   :  { %v5197_v63 = vrot.slane %v5191_v62, 2 }
0x2308   :  { %5198 = vrot.lane.b32.xlu0 %v5197_v63, %s7481_s5 }
0x237a   :  { %v5199_v0 = vpop.permute.xlu0 %5198 }
0x237b   :  { %6942 = vmatmul.mubr.msk.f32.vlgmr.msra.gmra.mxu0 %vm3662_vm4, %v5199_v0 }
0x237c   :  { %6963 = vmatprep.mubr.msk.f32.mxu0 %vm7479_vm2, %v7478_v4  ;;  %6956 = vmatpush3.msra.mxu0 %v5426_v39 }
0x237d   :  { %6957 = vmatprep.subr.mxu0 %v7478_v4 }
0x237e   :  { %6958 = vmatpush3.msra.mxu0 %v5425_v40 }
0x237f   :  { %6959 = vmatprep.subr.mxu0 %v7478_v4 }
0x2380   :  { %6960 = vmatpush3.msra.mxu0 %v5424_v41 }
0x2381   :  { %6961 = vmatprep.subr.mxu0 %v7478_v4 }
0x243b   :  { %v5268_v1 = vpop.f32.mrf.mxu0 }
0x243c   :  { %v5273_v2 = vrot.slane %v5268_v1, 5 }
0x243d   :  { %v6943_v3 = vpop.f32.mrf.mxu0 }
0x243e   :  { %v5275_v5 = vadd.f32 %v5273_v2, %v7972_v8 }
0x2440   :  { %7111 = vtanh.f32 %v5275_v5  ;;  %v5564_v7 = vmul.f32 -1.442695, %v5275_v5 }
0x2442   :  { %7113 = vpow2.f32 %v5564_v7 }
0x244d   :  { %v7112_v6 = vpop.eup %7111 }
0x244e   :  { %5288 = vrot.lane.b32.xlu1 %v7112_v6, %s7480_s25 }
0x244f   :  { %v7114_v9 = vpop.eup %7113 }
0x2450   :  { %v5279_v10 = vadd.f32 1.0, %v7114_v9 }
0x2452   :  { %7115 = vrcp.f32 %v5279_v10 }
0x245f   :  { %v7116_v11 = vpop.eup %7115 }
0x2460   :  { %v5286_v16 = vmul.f32 %v7116_v11, %v5284_v15 }
0x24c0   :  { %v5289_v12 = vpop.permute.xlu1 %5288 }
0x24c1   :  { %v5291_v13 = vmul.f32 %v7116_v11, %v5289_v12 }
0x24c3   :  { %5293 = vrot.lane.b32.xlu0 %v5291_v13, %s7481_s5 }
0x24c7   :  { %5082 = vrot.lane.b32.xlu0 %v5080_v42, %s7481_s5  ;;  %v5423_v42 = vld [vmem:[#allocation24] sm:$0xff] }
0x24c8   :  { %6962 = vmatpush3.msra.mxu0 %v5423_v42 }
0x2535   :  { %v5294_v17 = vpop.permute.xlu0 %5293 }
0x2536   :  { %v5296_v8 = vadd.f32 %v5294_v17, %v5286_v16 }
0x2538   :  { %7117 = vtanh.f32 %v5296_v8 }
0x2539   :  { %v5083_v18 = vpop.permute.xlu0 %5082 }
0x253a   :  { %5085 = vst.msk [vmem:[#allocation2] sm:$0x2] %vm4038_vm6, %v5083_v18 }
0x2545   :  { %v7118_v19 = vpop.eup %7117 }
0x2546   :  { %5299 = vrot.lane.b32.xlu1 %v7118_v19, %s7480_s25 }
0x254a   :  { %5193 = vrot.lane.b32.xlu1 %v5191_v62, %s7481_s5 }
0x25b8   :  { %v5300_v14 = vpop.permute.xlu1 %5299 }
0x25b9   :  { %v5302_v24 = vmul.f32 %v7116_v11, %v5300_v14 }
0x25bb   :  { %5304 = vrot.lane.b32.xlu0 %v5302_v24, %s7481_s5 }
0x25bc   :  { %v5194_v25 = vpop.permute.xlu1 %5193 }
0x25bd   :  { %5196 = vst.msk [vmem:[#allocation2] sm:$0x4] %vm4150_vm7, %v5194_v25 }
0x262d   :  { %v5305_v26 = vpop.permute.xlu0 %5304 }
0x262e   :  { %5307 = vst.msk [vmem:[#allocation2] sm:$0x8] %vm4262_vm8, %v5305_v26 }
0x2635   :  { %v5308_v27 = vld [vmem:[#allocation2] sm:$0xf] }
0x2636   :  { %6953 = vmatmul.mubr.msk.f32.vlgmr.msra.gmra.mxu1 %vm3662_vm4, %v5308_v27 }
0x26f6   :  { %v5389_v29 = vpop.f32.mrf.mxu1 }
0x26f7   :  { %v5390_v30 = vadd.f32 %v5565_v28, %v5389_v29 }
0x26f8   :  { %v6954_v31 = vpop.f32.mrf.mxu1 }
0x26f9   :  { %v5393_v32 = vmax.f32 %v5390_v30, 0.0 }
0x26fb   :  { %v5396_v33 = vsel %vm3621_vm3, %v5393_v32, 0.0 }
0x26fc   :  { %5397 = vadd.xlane.f32.xlu1 %v5396_v33 }
0x2785   :  { %v5398_v34 = vpop.xlane.xlu1 %5397 }
0x2786   :  { %v5399_v35 = vmul.f32 0.03125, %v5398_v34 }
0x2788   :  { %v5400_v36 = vsub.f32 %v5393_v32, %v5399_v35 }
0x278a   :  { %v5401_v37 = vmul.f32 %v5400_v36, %v5400_v36 }
0x278c   :  { %v5402_v38 = vsel %vm3621_vm3, %v5401_v37, 0.0 }
0x278d   :  { %5403 = vadd.xlane.f32.xlu0 %v5402_v38 }
0x2816   :  { %v5404_v44 = vpop.xlane.xlu0 %5403 }
0x2817   :  { %v5405_v45 = vmul.f32 0.03125, %v5404_v44 }
0x2819   :  { %v5406_v46 = vadd.f32 1e-06, %v5405_v45 }
0x281b   :  { %7119 = vrsqrt.f32 %v5406_v46 }
0x2828   :  { %v7120_v47 = vpop.eup %7119 }
0x2829   :  { %v5408_v49 = vmul.f32 %v7120_v47, %v5400_v36 }
0x282b   :  { %v5415_v51 = vmul.f32 %v5567_v48, %v5408_v49 }
0x282d   :  { %v5422_v43 = vadd.f32 %v5568_v50, %v5415_v51 }
0x282f   :  { %6964 = vmatmul.mubr.msk.f32.vlgmr.msra.gmra.mxu0 %vm3662_vm4, %v5422_v43 }
0x28ef   :  { %v5503_v53 = vpop.f32.mrf.mxu0 }
0x28f0   :  { %v5504_v54 = vadd.f32 %v5569_v52, %v5503_v53 }
0x28f1   :  { %v6965_v4 = vpop.f32.mrf.mxu0 }
0x28f2   :  { %5508 = vst.msk [vmem:[#allocation27] sm:$0xf] %vm5507_vm9, %v5504_v54 }
0x28f3   :  { %7432 = shalt.err (!%p7429_p9)
}
0x28f4   :  { %5518 = dma.vmem_to_hbm [thread:$0]  %s5516_s12, 64, %s8046_s16, [#allocation5]  }
0x28f5   :  { %7457 = dma.done.wait [#allocation5], 64  }
0x28f6   :  { %7458 = vsyncadd [#allocation5], 4294967232 }
0x28f7   :  { %5522 = vsyncpa [#allocation4], 1 }
0x28f8   :  { %5523 = vsyncpa [#allocation7], 1 }
0x28f9   :  { %5524 = vsyncpa [#allocation10], 1 }
0x28fa   :  { %5525 = vsyncpa [#allocation13], 1 }
0x28fb   :  { %5526 = vsyncpa [#allocation16], 1 }
0x28fc   :  { %5527 = vsyncpa [#allocation19], 1 }
0x28fd   :  { %5528 = vsyncpa [#allocation22], 1 }
0x28fe   :  { %5529 = vsyncpa [#allocation25], 1 }
0x28ff   :  { %5530 = vsyncpa [#allocation5], 1 }

</bundles_post_ra>
